<compile_context>
chip_gen: v7x
topology: tpu7x:2x2x1
jax: 0.10.0
libtpu: 0.0.40
codegen_flags: <defaults>
</compile_context>

<pallas_src>
import functools

import numpy as np
import jax
import jax.numpy as jnp
from jax.experimental import pallas as pl
from jax.experimental.pallas import tpu as pltpu

MAX_TM = 512  # max row tile (M dimension); per-step overhead ~0.35us favors large tiles


# ----------------------------- Pallas kernels ------------------------------

def _mm_bn_kernel(a_ref, w_ref, y_ref, sum_ref, sq_ref):
    """y = a @ w (bf16 operands, f32 accumulate) + fused per-channel sum / sum-of-squares.

    The (1, Np) stat outputs are revisited accumulators across the M grid axis, so this
    kernel's grid axis must stay "arbitrary" (sequential)."""
    acc = jnp.dot(a_ref[...], w_ref[...], preferred_element_type=jnp.float32)
    y_ref[...] = acc

    @pl.when(pl.program_id(0) == 0)
    def _():
        sum_ref[...] = jnp.zeros_like(sum_ref)
        sq_ref[...] = jnp.zeros_like(sq_ref)

    sum_ref[...] += jnp.sum(acc, axis=0, keepdims=True)
    sq_ref[...] += jnp.sum(acc * acc, axis=0, keepdims=True)


def _mm_bias_act_kernel(a_ref, w_ref, b_ref, o_ref, *, act, n_real):
    """o = act(a @ w + b); softmax is masked to the first n_real (un-padded) channels."""
    acc = jnp.dot(a_ref[...], w_ref[...], preferred_element_type=jnp.float32)
    acc = acc + b_ref[...]
    if act == "leaky":
        acc = jnp.where(acc >= 0, acc, 0.01 * acc)
    elif act == "tanh":
        acc = jnp.tanh(acc)
    elif act == "softmax":  # softmax over channels (== torch dim=1 in NCHW)
        lane = jax.lax.broadcasted_iota(jnp.int32, acc.shape, 1)
        acc = jnp.where(lane < n_real, acc, -jnp.inf)   # exclude lane-padding channels
        m = jnp.max(acc, axis=-1, keepdims=True)
        e = jnp.exp(acc - m)
        acc = e * pl.reciprocal(jnp.sum(e, axis=-1, keepdims=True), approx=True)
    # act == "none": fall through
    o_ref[...] = acc


def _scale_shift_leaky_kernel(x_ref, scale_ref, shift_ref, o_ref):
    """o = leaky_relu(x * scale + shift) with per-channel scale/shift (f32 epilogue)."""
    y = x_ref[...] * scale_ref[...] + shift_ref[...]
    o_ref[...] = jnp.where(y >= 0, y, 0.01 * y)


# ----------------------------- Pallas wrappers ------------------------------

def _round_up(x, m):
    return ((x + m - 1) // m) * m


def _row_tiling(m):
    """Pick (row_tile, padded_rows): one big tile for small M, 512-row tiles otherwise."""
    if m <= MAX_TM:
        tm = max(8, _round_up(m, 8))
        return tm, tm
    return MAX_TM, _round_up(m, MAX_TM)


def _pad2(a, rows, cols):
    r, c = a.shape
    if rows == r and cols == c:
        return a
    return jnp.pad(a, ((0, rows - r), (0, cols - c)))


def gemm_bn_stats(a, w):
    """a:(M,K) @ w:(K,N) with fused per-channel sum / sum-of-squares.

    Returns (y_pad:(Mp,Np) f32, sums:(1,Np), sqs:(1,Np), tm).  N is padded to a
    multiple of 128 lanes; padded rows of `a` are zero so they never affect the stats
    (no bias is added on this path)."""
    M, K = a.shape
    _, N = w.shape
    tm, Mp = _row_tiling(M)
    Np = _round_up(N, 128)
    a_p = _pad2(a, Mp, K).astype(jnp.bfloat16)
    w_p = _pad2(w, K, Np).astype(jnp.bfloat16)

    y, s, sq = pl.pallas_call(
        _mm_bn_kernel,
        out_shape=(
            jax.ShapeDtypeStruct((Mp, Np), jnp.float32),
            jax.ShapeDtypeStruct((1, Np), jnp.float32),
            jax.ShapeDtypeStruct((1, Np), jnp.float32),
        ),
        grid=(Mp // tm,),
        in_specs=[
            pl.BlockSpec((tm, K), lambda i: (i, 0)),
            pl.BlockSpec((K, Np), lambda i: (0, 0)),
        ],
        out_specs=(
            pl.BlockSpec((tm, Np), lambda i: (i, 0)),
            pl.BlockSpec((1, Np), lambda i: (0, 0)),
            pl.BlockSpec((1, Np), lambda i: (0, 0)),
        ),
        # Stats accumulate across row tiles -> this axis must stay sequential.
        compiler_params=pltpu.CompilerParams(dimension_semantics=("arbitrary",)),
    )(a_p, w_p)
    return y, s, sq, tm


def scale_shift_leaky(y_pad, scale, shift, tm):
    """Elementwise BN-apply + LeakyReLU on the row/lane-padded activation."""
    Mp, Np = y_pad.shape
    return pl.pallas_call(
        _scale_shift_leaky_kernel,
        out_shape=jax.ShapeDtypeStruct((Mp, Np), jnp.float32),
        grid=(Mp // tm,),
        in_specs=[
            pl.BlockSpec((tm, Np), lambda i: (i, 0)),
            pl.BlockSpec((1, Np), lambda i: (0, 0)),
            pl.BlockSpec((1, Np), lambda i: (0, 0)),
        ],
        out_specs=pl.BlockSpec((tm, Np), lambda i: (i, 0)),
        # Independent row tiles -> parallel (lets v7x split across its 2 TensorCores).
        compiler_params=pltpu.CompilerParams(dimension_semantics=("parallel",)),
    )(y_pad, scale.reshape(1, Np), shift.reshape(1, Np))


def matmul_bias_act(a, w, b, act):
    """a:(M,K) @ w:(K,N) + b with fused activation (1x1-conv heads).  Lane-padded N."""
    M, K = a.shape
    _, N = w.shape
    tm, Mp = _row_tiling(M)
    Np = _round_up(N, 128)
    a_p = _pad2(a, Mp, K).astype(jnp.bfloat16)
    w_p = _pad2(w, K, Np).astype(jnp.bfloat16)
    b_p = jnp.pad(b, (0, Np - N)).reshape(1, Np)

    out = pl.pallas_call(
        functools.partial(_mm_bias_act_kernel, act=act, n_real=N),
        out_shape=jax.ShapeDtypeStruct((Mp, Np), jnp.float32),
        grid=(Mp // tm,),
        in_specs=[
            pl.BlockSpec((tm, K), lambda i: (i, 0)),
            pl.BlockSpec((K, Np), lambda i: (0, 0)),
            pl.BlockSpec((1, Np), lambda i: (0, 0)),
        ],
        out_specs=pl.BlockSpec((tm, Np), lambda i: (i, 0)),
        compiler_params=pltpu.CompilerParams(dimension_semantics=("parallel",)),
    )(a_p, w_p, b_p)
    return out[:M, :N]


# ----------------------------- JAX glue: im2col / phase weights ------------------------------

def _im2col(xp, K, stride):
    """xp: padded NHWC (bf16). Returns (N, Ho, Wo, K*K*C) patches, feature order (kh, kw, c)."""
    N, Hp, Wp, C = xp.shape
    Ho = (Hp - K) // stride + 1
    Wo = (Wp - K) // stride + 1
    cols = []
    for kh in range(K):
        for kw in range(K):
            cols.append(
                xp[:, kh:kh + stride * (Ho - 1) + 1:stride,
                      kw:kw + stride * (Wo - 1) + 1:stride, :]
            )
    p = jnp.stack(cols, axis=3)                      # (N, Ho, Wo, K*K, C)
    return p.reshape(N, Ho, Wo, K * K * C), Ho, Wo


def _deconv_phase_weight(w5):
    """Stride-phase decomposition of a 5x5/s2/p2/op1 transposed conv.

    w5: (5,5,Cin,Cout) weights of the equivalent 'conv on zero-dilated input'.
    Returns a (9*Cin, 4*Cout) matrix: one 3x3 sub-conv (on the UNDILATED input, pad=1)
    per output-pixel parity, phases ordered [(0,0),(0,1),(1,0),(1,1)] along columns.
    Mathematically identical to dilate+pad+conv, with no multiply-by-zero work."""
    Cin, Cout = w5.shape[2], w5.shape[3]
    even = ((0, 0), (1, 2), (2, 4))   # (3x3 position, 5x5 tap) for output parity 0
    odd = ((1, 1), (2, 3))            # for output parity 1
    cols = []
    for ph in (0, 1):
        for pw in (0, 1):
            w3 = jnp.zeros((3, 3, Cin, Cout), w5.dtype)
            for dr, kh in (even if ph == 0 else odd):
                for dc, kw in (even if pw == 0 else odd):
                    w3 = w3.at[dr, dc].set(w5[kh, kw])
            cols.append(w3.reshape(9 * Cin, Cout))
    return jnp.concatenate(cols, axis=1)


# ----------------------------- Layers ------------------------------

_EPS = 1e-5


def conv_bn_leaky_multi(x, plist, K=5, stride=2, pad=2):
    """One or more Conv2d(k=5,s=2,p=2)->BN->LeakyReLU heads sharing the same input,
    merged into a single lane-dense Pallas GEMM with fused BN statistics."""
    N, H, W, Cin = x.shape
    xp = jnp.pad(x.astype(jnp.bfloat16), ((0, 0), (pad, pad), (pad, pad), (0, 0)))
    cols, Ho, Wo = _im2col(xp, K, stride)
    M = N * Ho * Wo
    a = cols.reshape(M, K * K * Cin)

    widths = [p["w"].shape[3] for p in plist]
    w_all = jnp.concatenate([p["w"].reshape(K * K * Cin, -1) for p in plist], axis=1)
    # NOTE: conv bias intentionally skipped (exact no-op under train-mode BatchNorm).
    y, s, sq, tm = gemm_bn_stats(a, w_all)
    Np = y.shape[1]

    scales, shifts = [], []
    off = 0
    for p, C in zip(plist, widths):
        mean = s[0, off:off + C] / float(M)
        var = sq[0, off:off + C] / float(M) - mean * mean      # biased batch variance
        sc = p["gamma"] / jnp.sqrt(var + _EPS)
        scales.append(sc)
        shifts.append(p["beta"] - mean * sc)
        off += C
    Nt = sum(widths)
    scale = jnp.pad(jnp.concatenate(scales), (0, Np - Nt), constant_values=1.0)
    shift = jnp.pad(jnp.concatenate(shifts), (0, Np - Nt))

    out = scale_shift_leaky(y, scale, shift, tm)

    results, off = [], 0
    for C in widths:
        results.append(out[:M, off:off + C].reshape(N, Ho, Wo, C))
        off += C
    return results


def deconv_bn_leaky_multi(x, plist):
    """One or more ConvTranspose2d(k=5,s=2,p=2,op=1)->BN->LeakyReLU heads sharing the
    same input, via stride-phase decomposition into a single fused Pallas GEMM."""
    N, H, W, Cin = x.shape
    xp = jnp.pad(x.astype(jnp.bfloat16), ((0, 0), (1, 1), (1, 1), (0, 0)))
    cols, _, _ = _im2col(xp, 3, 1)                   # (N, H, W, 9*Cin)
    M = N * H * W
    a = cols.reshape(M, 9 * Cin)

    widths = [4 * p["w"].shape[3] for p in plist]    # 4 phase blocks per head
    w_all = jnp.concatenate([_deconv_phase_weight(p["w"]) for p in plist], axis=1)
    y, s, sq, tm = gemm_bn_stats(a, w_all)
    Np = y.shape[1]

    scales, shifts = [], []
    off = 0
    for p, wdt in zip(plist, widths):
        C = wdt // 4
        # Each output channel appears once per phase block; BN stats combine all 4.
        s_h = s[0, off:off + wdt].reshape(4, C).sum(0)
        sq_h = sq[0, off:off + wdt].reshape(4, C).sum(0)
        cnt = 4.0 * M                                # = N * (2H) * (2W) output elements
        mean = s_h / cnt
        var = sq_h / cnt - mean * mean
        sc = p["gamma"] / jnp.sqrt(var + _EPS)
        sh = p["beta"] - mean * sc
        scales.append(jnp.tile(sc, 4))               # replicate per phase block
        shifts.append(jnp.tile(sh, 4))
        off += wdt
    Nt = sum(widths)
    scale = jnp.pad(jnp.concatenate(scales), (0, Np - Nt), constant_values=1.0)
    shift = jnp.pad(jnp.concatenate(shifts), (0, Np - Nt))

    out = scale_shift_leaky(y, scale, shift, tm)

    results, off = [], 0
    for wdt in widths:
        C = wdt // 4
        yh = out[:M, off:off + wdt].reshape(N, H, W, 2, 2, C)     # (.., ph, pw, C)
        yh = yh.transpose(0, 1, 3, 2, 4, 5).reshape(N, 2 * H, 2 * W, C)
        results.append(yh)
        off += wdt
    return results


def conv1x1(x, p, act):
    N, H, W, C = x.shape
    w = p["w"].reshape(C, -1)
    y = matmul_bias_act(x.reshape(N * H * W, C), w, p["b"], act)
    return y.reshape(N, H, W, -1)


# ----------------------------- Parameter construction ------------------------------

def _conv_w(key, K, cin, cout):
    kw, kb = jax.random.split(key)
    w = jax.random.normal(kw, (K, K, cin, cout), jnp.float32) / np.sqrt(K * K * cin)
    b = jax.random.normal(kb, (cout,), jnp.float32) * 0.01
    # b is kept for the 1x1 heads; on conv+BN layers it is a mathematical no-op and unused.
    return {"w": w, "b": b}


def _bn_params(c):
    return {"gamma": jnp.ones((c,), jnp.float32), "beta": jnp.zeros((c,), jnp.float32)}


def make_encoder_params(key, in_ch, channels, K=5):
    layers, c_prev = [], in_ch
    for c in channels:
        key, sub = jax.random.split(key)
        p = _conv_w(sub, K, c_prev, c)
        p.update(_bn_params(c))
        layers.append(p)
        c_prev = c
    return layers


def make_decoder_params(key, in_ch, channels, out_ch, K=5):
    layers, c_prev = [], in_ch
    for c in list(channels)[::-1]:
        key, sub = jax.random.split(key)
        p = _conv_w(sub, K, c_prev, c)
        p.update(_bn_params(c))
        layers.append(p)
        c_prev = c
    key, sub = jax.random.split(key)
    return {"layers": layers, "final": _conv_w(sub, 1, c_prev, out_ch)}


def init_local_feddis(key, in_channels=3, channels=(8, 16, 32),
                      channels_app=(4, 8, 16), out_ch=2, K=5):
    keys = jax.random.split(key, 7)
    return {
        "enc_content": make_encoder_params(keys[0], in_channels, channels, K),
        "enc_style": make_encoder_params(keys[1], in_channels, channels_app, K),
        "dec_content": make_decoder_params(keys[2], channels[-1], channels, in_channels, K),
        "dec_style": make_decoder_params(keys[3], channels_app[-1], channels_app, in_channels, K),
        "dec_content_seg": make_decoder_params(keys[4], channels[-1], channels, out_ch, K),
        "merger": _conv_w(keys[5], 1, in_channels * 2, in_channels),
        "projector": _conv_w(keys[6], 1, channels[-1], channels_app[-1]),
    }


# ----------------------------- Full forward ------------------------------

def local_feddis_forward(params, x_nchw):
    # Layout: NCHW in / out (PyTorch convention); NHWC internally for all Pallas compute.
    x = jnp.transpose(x_nchw, (0, 2, 3, 1))

    # Encoders: first layers of content/style encoders consume the same x -> one merged GEMM.
    z_s, z_a = conv_bn_leaky_multi(x, [params["enc_content"][0], params["enc_style"][0]])
    for p in params["enc_content"][1:]:
        z_s = conv_bn_leaky_multi(z_s, [p])[0]
    for p in params["enc_style"][1:]:
        z_a = conv_bn_leaky_multi(z_a, [p])[0]

    # dec_content and dec_content_seg both start from z_s -> merged first deconv layer.
    dc, dcs = params["dec_content"], params["dec_content_seg"]
    h_c, h_g = deconv_bn_leaky_multi(z_s, [dc["layers"][0], dcs["layers"][0]])
    for p in dc["layers"][1:]:
        h_c = deconv_bn_leaky_multi(h_c, [p])[0]
    x_s = conv1x1(h_c, dc["final"], "leaky")                    # content reconstruction
    for p in dcs["layers"][1:]:
        h_g = deconv_bn_leaky_multi(h_g, [p])[0]
    seg = conv1x1(h_g, dcs["final"], "softmax")                 # segmentation head

    # Style decoder.
    h_a = z_a
    for p in params["dec_style"]["layers"]:
        h_a = deconv_bn_leaky_multi(h_a, [p])[0]
    x_a = conv1x1(h_a, params["dec_style"]["final"], "leaky")   # style reconstruction

    x_m = conv1x1(jnp.concatenate([x_s, x_a], axis=-1), params["merger"], "tanh")
    z_s_proj = conv1x1(z_s, params["projector"], "none")

    to_nchw = lambda t: jnp.transpose(t, (0, 3, 1, 2))
    return (to_nchw(seg), to_nchw(x_m), to_nchw(z_s), to_nchw(z_a),
            None, to_nchw(z_s_proj), x_nchw)


# ----------------------------- Main ------------------------------

if __name__ == "__main__":
    key = jax.random.PRNGKey(0)
    pkey, xkey = jax.random.split(key)

    # Small, module-consistent configuration: batch=2, in_channels=3, 16x16 spatial,
    # channels=[8,16,32], channels_app=[4,8,16], out_ch=2 (default topology, scaled down).
    params = init_local_feddis(pkey, in_channels=3, channels=(8, 16, 32),
                               channels_app=(4, 8, 16), out_ch=2, K=5)
    x = jax.random.normal(xkey, (2, 3, 16, 16), jnp.float32)

    outs = jax.jit(local_feddis_forward)(params, x)
    jax.block_until_ready([o for o in outs if o is not None])

    seg, x_merged, z_s, z_a, _none, z_s_proj, x_in = outs
    assert seg.shape == (2, 2, 16, 16)
    assert x_merged.shape == (2, 3, 16, 16)
    assert z_s.shape == (2, 32, 2, 2)
    assert z_a.shape == (2, 16, 2, 2)
    assert z_s_proj.shape == (2, 16, 2, 2)
    assert x_in.shape == (2, 3, 16, 16)
    assert bool(jnp.all(jnp.isfinite(seg))) and bool(jnp.all(jnp.isfinite(x_merged)))
    print("KERNEL_OK")
</pallas_src>

<mosaic_0001>
module attributes {stable_mosaic.version = 11 : i64} {
  func.func @_scale_shift_leaky_kernel(%arg0: i32, %arg1: memref<128x128xf32, #tpu.memory_space<vmem>>, %arg2: memref<1x128xf32, #tpu.memory_space<vmem>>, %arg3: memref<1x128xf32, #tpu.memory_space<vmem>>, %arg4: memref<128x128xf32, #tpu.memory_space<vmem>>) attributes {dimension_semantics = [#tpu.dimension_semantics<parallel>], iteration_bounds = array<i64: 1>, scalar_prefetch = 0 : i64, scratch_operands = 0 : i64, tpu.core_type = #tpu.core_type<tc>, window_params = [{transform_indices = @transform_0, window_bounds = array<i64: 128, 128>}, {pipeline_mode = #tpu.pipeline_mode<synchronous>, transform_indices = @transform_1, window_bounds = array<i64: 1, 128>}, {pipeline_mode = #tpu.pipeline_mode<synchronous>, transform_indices = @transform_2, window_bounds = array<i64: 1, 128>}, {transform_indices = @transform_3, window_bounds = array<i64: 128, 128>}]} {
    %c0 = arith.constant 0 : index
    %c0_0 = arith.constant 0 : index
    %0 = vector.load %arg1[%c0, %c0_0] : memref<128x128xf32, #tpu.memory_space<vmem>>, vector<128x128xf32>
    %c0_1 = arith.constant 0 : index
    %c0_2 = arith.constant 0 : index
    %1 = vector.load %arg2[%c0_1, %c0_2] : memref<1x128xf32, #tpu.memory_space<vmem>>, vector<1x128xf32>
    %2 = vector.broadcast %1 : vector<1x128xf32> to vector<128x128xf32>
    %3 = arith.mulf %0, %2 : vector<128x128xf32>
    %c0_3 = arith.constant 0 : index
    %c0_4 = arith.constant 0 : index
    %4 = vector.load %arg3[%c0_3, %c0_4] : memref<1x128xf32, #tpu.memory_space<vmem>>, vector<1x128xf32>
    %5 = vector.broadcast %4 : vector<1x128xf32> to vector<128x128xf32>
    %6 = arith.addf %3, %5 : vector<128x128xf32>
    %cst = arith.constant 0.000000e+00 : f32
    %7 = vector.broadcast %cst : f32 to vector<128x128xf32>
    %8 = arith.cmpf oge, %6, %7 : vector<128x128xf32>
    %cst_5 = arith.constant 0.00999999977 : f32
    %9 = vector.broadcast %cst_5 : f32 to vector<128x128xf32>
    %10 = arith.mulf %9, %6 : vector<128x128xf32>
    %11 = arith.select %8, %6, %10 : vector<128x128xi1>, vector<128x128xf32>
    %c0_6 = arith.constant 0 : index
    %c0_7 = arith.constant 0 : index
    %12 = vector.load %arg4[%c0_6, %c0_7] : memref<128x128xf32, #tpu.memory_space<vmem>>, vector<128x128xf32>
    tpu.vector_store %arg4[%c0_6, %c0_7], %11 {strides = array<i32>} : memref<128x128xf32, #tpu.memory_space<vmem>>, vector<128x128xf32>,
    return
  }
  func.func @transform_0(%arg0: i32) -> (i32, i32) {
    %c0_i32 = arith.constant 0 : i32
    %c0_i32_0 = arith.constant 0 : i32
    return %arg0, %c0_i32 : i32, i32
  }
  func.func @transform_1(%arg0: i32) -> (i32, i32) {
    %c0_i32 = arith.constant 0 : i32
    %c0_i32_0 = arith.constant 0 : i32
    %c0_i32_1 = arith.constant 0 : i32
    return %c0_i32, %c0_i32_0 : i32, i32
  }
  func.func @transform_2(%arg0: i32) -> (i32, i32) {
    %c0_i32 = arith.constant 0 : i32
    %c0_i32_0 = arith.constant 0 : i32
    %c0_i32_1 = arith.constant 0 : i32
    return %c0_i32, %c0_i32_0 : i32, i32
  }
  func.func @transform_3(%arg0: i32) -> (i32, i32) {
    %c0_i32 = arith.constant 0 : i32
    %c0_i32_0 = arith.constant 0 : i32
    return %arg0, %c0_i32 : i32, i32
  }
}

module attributes {stable_mosaic.version = 11 : i64} {
  func.func @_mm_bn_kernel(%arg0: i32, %arg1: memref<128x75xbf16, #tpu.memory_space<vmem>>, %arg2: memref<75x128xbf16, #tpu.memory_space<vmem>>, %arg3: memref<128x128xf32, #tpu.memory_space<vmem>>, %arg4: memref<1x128xf32, #tpu.memory_space<vmem>>, %arg5: memref<1x128xf32, #tpu.memory_space<vmem>>) attributes {dimension_semantics = [#tpu.dimension_semantics<arbitrary>], iteration_bounds = array<i64: 1>, scalar_prefetch = 0 : i64, scratch_operands = 0 : i64, tpu.core_type = #tpu.core_type<tc>, window_params = [{transform_indices = @transform_0, window_bounds = array<i64: 128, 75>}, {pipeline_mode = #tpu.pipeline_mode<synchronous>, transform_indices = @transform_1, window_bounds = array<i64: 75, 128>}, {transform_indices = @transform_2, window_bounds = array<i64: 128, 128>}, {pipeline_mode = #tpu.pipeline_mode<synchronous>, transform_indices = @transform_3, window_bounds = array<i64: 1, 128>}, {pipeline_mode = #tpu.pipeline_mode<synchronous>, transform_indices = @transform_4, window_bounds = array<i64: 1, 128>}]} {
    %c0 = arith.constant 0 : index
    %c0_0 = arith.constant 0 : index
    %0 = vector.load %arg1[%c0, %c0_0] : memref<128x75xbf16, #tpu.memory_space<vmem>>, vector<128x75xbf16>
    %c0_1 = arith.constant 0 : index
    %c0_2 = arith.constant 0 : index
    %1 = vector.load %arg2[%c0_1, %c0_2] : memref<75x128xbf16, #tpu.memory_space<vmem>>, vector<75x128xbf16>
    %cst = arith.constant dense<0.000000e+00> : vector<128x128xf32>
    %2 = tpu.matmul %0, %1, %cst {dimension_numbers = #tpu.dot_dimension_numbers<[1], [0], [0], [1], [0, 0, 1, 1], [], []>} : vector<128x75xbf16>, vector<75x128xbf16>, vector<128x128xf32> -> vector<128x128xf32>
    %c0_3 = arith.constant 0 : index
    %c0_4 = arith.constant 0 : index
    %3 = vector.load %arg3[%c0_3, %c0_4] : memref<128x128xf32, #tpu.memory_space<vmem>>, vector<128x128xf32>
    tpu.vector_store %arg3[%c0_3, %c0_4], %2 {strides = array<i32>} : memref<128x128xf32, #tpu.memory_space<vmem>>, vector<128x128xf32>,
    %c0_i32 = arith.constant 0 : i32
    %4 = arith.cmpi eq, %arg0, %c0_i32 : i32
    %5 = arith.extui %4 : i1 to i32
    %c0_i32_5 = arith.constant 0 : i32
    %6 = arith.cmpi ne, %5, %c0_i32_5 : i32
    scf.if %6 {
      %cst_16 = arith.constant 0.000000e+00 : f32
      %18 = vector.broadcast %cst_16 : f32 to vector<1x128xf32>
      %c0_17 = arith.constant 0 : index
      %c0_18 = arith.constant 0 : index
      %19 = vector.load %arg4[%c0_17, %c0_18] : memref<1x128xf32, #tpu.memory_space<vmem>>, vector<1x128xf32>
      tpu.vector_store %arg4[%c0_17, %c0_18], %18 {strides = array<i32>} : memref<1x128xf32, #tpu.memory_space<vmem>>, vector<1x128xf32>,
      %cst_19 = arith.constant 0.000000e+00 : f32
      %20 = vector.broadcast %cst_19 : f32 to vector<1x128xf32>
      %c0_20 = arith.constant 0 : index
      %c0_21 = arith.constant 0 : index
      %21 = vector.load %arg5[%c0_20, %c0_21] : memref<1x128xf32, #tpu.memory_space<vmem>>, vector<1x128xf32>
      tpu.vector_store %arg5[%c0_20, %c0_21], %20 {strides = array<i32>} : memref<1x128xf32, #tpu.memory_space<vmem>>, vector<1x128xf32>,
    } else {
    }
    %c0_6 = arith.constant 0 : index
    %c0_7 = arith.constant 0 : index
    %7 = vector.load %arg4[%c0_6, %c0_7] : memref<1x128xf32, #tpu.memory_space<vmem>>, vector<1x128xf32>
    %cst_8 = arith.constant dense<0.000000e+00> : vector<128xf32>
    %8 = vector.multi_reduction <add>, %2, %cst_8 [0] : vector<128x128xf32> to vector<128xf32>
    %9 = vector.shape_cast %8 : vector<128xf32> to vector<1x128xf32>
    %10 = arith.addf %7, %9 : vector<1x128xf32>
    %c0_9 = arith.constant 0 : index
    %c0_10 = arith.constant 0 : index
    %11 = vector.load %arg4[%c0_9, %c0_10] : memref<1x128xf32, #tpu.memory_space<vmem>>, vector<1x128xf32>
    tpu.vector_store %arg4[%c0_9, %c0_10], %10 {strides = array<i32>} : memref<1x128xf32, #tpu.memory_space<vmem>>, vector<1x128xf32>,
    %c0_11 = arith.constant 0 : index
    %c0_12 = arith.constant 0 : index
    %12 = vector.load %arg5[%c0_11, %c0_12] : memref<1x128xf32, #tpu.memory_space<vmem>>, vector<1x128xf32>
    %13 = arith.mulf %2, %2 : vector<128x128xf32>
    %cst_13 = arith.constant dense<0.000000e+00> : vector<128xf32>
    %14 = vector.multi_reduction <add>, %13, %cst_13 [0] : vector<128x128xf32> to vector<128xf32>
    %15 = vector.shape_cast %14 : vector<128xf32> to vector<1x128xf32>
    %16 = arith.addf %12, %15 : vector<1x128xf32>
    %c0_14 = arith.constant 0 : index
    %c0_15 = arith.constant 0 : index
    %17 = vector.load %arg5[%c0_14, %c0_15] : memref<1x128xf32, #tpu.memory_space<vmem>>, vector<1x128xf32>
    tpu.vector_store %arg5[%c0_14, %c0_15], %16 {strides = array<i32>} : memref<1x128xf32, #tpu.memory_space<vmem>>, vector<1x128xf32>,
    return
  }
  func.func @transform_0(%arg0: i32) -> (i32, i32) {
    %c0_i32 = arith.constant 0 : i32
    %c0_i32_0 = arith.constant 0 : i32
    return %arg0, %c0_i32 : i32, i32
  }
  func.func @transform_1(%arg0: i32) -> (i32, i32) {
    %c0_i32 = arith.constant 0 : i32
    %c0_i32_0 = arith.constant 0 : i32
    %c0_i32_1 = arith.constant 0 : i32
    return %c0_i32, %c0_i32_0 : i32, i32
  }
  func.func @transform_2(%arg0: i32) -> (i32, i32) {
    %c0_i32 = arith.constant 0 : i32
    %c0_i32_0 = arith.constant 0 : i32
    return %arg0, %c0_i32 : i32, i32
  }
  func.func @transform_3(%arg0: i32) -> (i32, i32) {
    %c0_i32 = arith.constant 0 : i32
    %c0_i32_0 = arith.constant 0 : i32
    %c0_i32_1 = arith.constant 0 : i32
    return %c0_i32, %c0_i32_0 : i32, i32
  }
  func.func @transform_4(%arg0: i32) -> (i32, i32) {
    %c0_i32 = arith.constant 0 : i32
    %c0_i32_0 = arith.constant 0 : i32
    %c0_i32_1 = arith.constant 0 : i32
    return %c0_i32, %c0_i32_0 : i32, i32
  }
}

module attributes {stable_mosaic.version = 11 : i64} {
  func.func @_mm_bn_kernel(%arg0: i32, %arg1: memref<32x200xbf16, #tpu.memory_space<vmem>>, %arg2: memref<200x128xbf16, #tpu.memory_space<vmem>>, %arg3: memref<32x128xf32, #tpu.memory_space<vmem>>, %arg4: memref<1x128xf32, #tpu.memory_space<vmem>>, %arg5: memref<1x128xf32, #tpu.memory_space<vmem>>) attributes {dimension_semantics = [#tpu.dimension_semantics<arbitrary>], iteration_bounds = array<i64: 1>, scalar_prefetch = 0 : i64, scratch_operands = 0 : i64, tpu.core_type = #tpu.core_type<tc>, window_params = [{transform_indices = @transform_0, window_bounds = array<i64: 32, 200>}, {pipeline_mode = #tpu.pipeline_mode<synchronous>, transform_indices = @transform_1, window_bounds = array<i64: 200, 128>}, {transform_indices = @transform_2, window_bounds = array<i64: 32, 128>}, {pipeline_mode = #tpu.pipeline_mode<synchronous>, transform_indices = @transform_3, window_bounds = array<i64: 1, 128>}, {pipeline_mode = #tpu.pipeline_mode<synchronous>, transform_indices = @transform_4, window_bounds = array<i64: 1, 128>}]} {
    %c0 = arith.constant 0 : index
    %c0_0 = arith.constant 0 : index
    %0 = vector.load %arg1[%c0, %c0_0] : memref<32x200xbf16, #tpu.memory_space<vmem>>, vector<32x200xbf16>
    %c0_1 = arith.constant 0 : index
    %c0_2 = arith.constant 0 : index
    %1 = vector.load %arg2[%c0_1, %c0_2] : memref<200x128xbf16, #tpu.memory_space<vmem>>, vector<200x128xbf16>
    %cst = arith.constant dense<0.000000e+00> : vector<32x128xf32>
    %2 = tpu.matmul %0, %1, %cst {dimension_numbers = #tpu.dot_dimension_numbers<[1], [0], [0], [1], [0, 0, 1, 1], [], []>} : vector<32x200xbf16>, vector<200x128xbf16>, vector<32x128xf32> -> vector<32x128xf32>
    %c0_3 = arith.constant 0 : index
    %c0_4 = arith.constant 0 : index
    %3 = vector.load %arg3[%c0_3, %c0_4] : memref<32x128xf32, #tpu.memory_space<vmem>>, vector<32x128xf32>
    tpu.vector_store %arg3[%c0_3, %c0_4], %2 {strides = array<i32>} : memref<32x128xf32, #tpu.memory_space<vmem>>, vector<32x128xf32>,
    %c0_i32 = arith.constant 0 : i32
    %4 = arith.cmpi eq, %arg0, %c0_i32 : i32
    %5 = arith.extui %4 : i1 to i32
    %c0_i32_5 = arith.constant 0 : i32
    %6 = arith.cmpi ne, %5, %c0_i32_5 : i32
    scf.if %6 {
      %cst_16 = arith.constant 0.000000e+00 : f32
      %18 = vector.broadcast %cst_16 : f32 to vector<1x128xf32>
      %c0_17 = arith.constant 0 : index
      %c0_18 = arith.constant 0 : index
      %19 = vector.load %arg4[%c0_17, %c0_18] : memref<1x128xf32, #tpu.memory_space<vmem>>, vector<1x128xf32>
      tpu.vector_store %arg4[%c0_17, %c0_18], %18 {strides = array<i32>} : memref<1x128xf32, #tpu.memory_space<vmem>>, vector<1x128xf32>,
      %cst_19 = arith.constant 0.000000e+00 : f32
      %20 = vector.broadcast %cst_19 : f32 to vector<1x128xf32>
      %c0_20 = arith.constant 0 : index
      %c0_21 = arith.constant 0 : index
      %21 = vector.load %arg5[%c0_20, %c0_21] : memref<1x128xf32, #tpu.memory_space<vmem>>, vector<1x128xf32>
      tpu.vector_store %arg5[%c0_20, %c0_21], %20 {strides = array<i32>} : memref<1x128xf32, #tpu.memory_space<vmem>>, vector<1x128xf32>,
    } else {
    }
    %c0_6 = arith.constant 0 : index
    %c0_7 = arith.constant 0 : index
    %7 = vector.load %arg4[%c0_6, %c0_7] : memref<1x128xf32, #tpu.memory_space<vmem>>, vector<1x128xf32>
    %cst_8 = arith.constant dense<0.000000e+00> : vector<128xf32>
    %8 = vector.multi_reduction <add>, %2, %cst_8 [0] : vector<32x128xf32> to vector<128xf32>
    %9 = vector.shape_cast %8 : vector<128xf32> to vector<1x128xf32>
    %10 = arith.addf %7, %9 : vector<1x128xf32>
    %c0_9 = arith.constant 0 : index
    %c0_10 = arith.constant 0 : index
    %11 = vector.load %arg4[%c0_9, %c0_10] : memref<1x128xf32, #tpu.memory_space<vmem>>, vector<1x128xf32>
    tpu.vector_store %arg4[%c0_9, %c0_10], %10 {strides = array<i32>} : memref<1x128xf32, #tpu.memory_space<vmem>>, vector<1x128xf32>,
    %c0_11 = arith.constant 0 : index
    %c0_12 = arith.constant 0 : index
    %12 = vector.load %arg5[%c0_11, %c0_12] : memref<1x128xf32, #tpu.memory_space<vmem>>, vector<1x128xf32>
    %13 = arith.mulf %2, %2 : vector<32x128xf32>
    %cst_13 = arith.constant dense<0.000000e+00> : vector<128xf32>
    %14 = vector.multi_reduction <add>, %13, %cst_13 [0] : vector<32x128xf32> to vector<128xf32>
    %15 = vector.shape_cast %14 : vector<128xf32> to vector<1x128xf32>
    %16 = arith.addf %12, %15 : vector<1x128xf32>
    %c0_14 = arith.constant 0 : index
    %c0_15 = arith.constant 0 : index
    %17 = vector.load %arg5[%c0_14, %c0_15] : memref<1x128xf32, #tpu.memory_space<vmem>>, vector<1x128xf32>
    tpu.vector_store %arg5[%c0_14, %c0_15], %16 {strides = array<i32>} : memref<1x128xf32, #tpu.memory_space<vmem>>, vector<1x128xf32>,
    return
  }
  func.func @transform_0(%arg0: i32) -> (i32, i32) {
    %c0_i32 = arith.constant 0 : i32
    %c0_i32_0 = arith.constant 0 : i32
    return %arg0, %c0_i32 : i32, i32
  }
  func.func @transform_1(%arg0: i32) -> (i32, i32) {
    %c0_i32 = arith.constant 0 : i32
    %c0_i32_0 = arith.constant 0 : i32
    %c0_i32_1 = arith.constant 0 : i32
    return %c0_i32, %c0_i32_0 : i32, i32
  }
  func.func @transform_2(%arg0: i32) -> (i32, i32) {
    %c0_i32 = arith.constant 0 : i32
    %c0_i32_0 = arith.constant 0 : i32
    return %arg0, %c0_i32 : i32, i32
  }
  func.func @transform_3(%arg0: i32) -> (i32, i32) {
    %c0_i32 = arith.constant 0 : i32
    %c0_i32_0 = arith.constant 0 : i32
    %c0_i32_1 = arith.constant 0 : i32
    return %c0_i32, %c0_i32_0 : i32, i32
  }
  func.func @transform_4(%arg0: i32) -> (i32, i32) {
    %c0_i32 = arith.constant 0 : i32
    %c0_i32_0 = arith.constant 0 : i32
    %c0_i32_1 = arith.constant 0 : i32
    return %c0_i32, %c0_i32_0 : i32, i32
  }
}

module attributes {stable_mosaic.version = 11 : i64} {
  func.func @_scale_shift_leaky_kernel(%arg0: i32, %arg1: memref<32x128xf32, #tpu.memory_space<vmem>>, %arg2: memref<1x128xf32, #tpu.memory_space<vmem>>, %arg3: memref<1x128xf32, #tpu.memory_space<vmem>>, %arg4: memref<32x128xf32, #tpu.memory_space<vmem>>) attributes {dimension_semantics = [#tpu.dimension_semantics<parallel>], iteration_bounds = array<i64: 1>, scalar_prefetch = 0 : i64, scratch_operands = 0 : i64, tpu.core_type = #tpu.core_type<tc>, window_params = [{transform_indices = @transform_0, window_bounds = array<i64: 32, 128>}, {pipeline_mode = #tpu.pipeline_mode<synchronous>, transform_indices = @transform_1, window_bounds = array<i64: 1, 128>}, {pipeline_mode = #tpu.pipeline_mode<synchronous>, transform_indices = @transform_2, window_bounds = array<i64: 1, 128>}, {transform_indices = @transform_3, window_bounds = array<i64: 32, 128>}]} {
    %c0 = arith.constant 0 : index
    %c0_0 = arith.constant 0 : index
    %0 = vector.load %arg1[%c0, %c0_0] : memref<32x128xf32, #tpu.memory_space<vmem>>, vector<32x128xf32>
    %c0_1 = arith.constant 0 : index
    %c0_2 = arith.constant 0 : index
    %1 = vector.load %arg2[%c0_1, %c0_2] : memref<1x128xf32, #tpu.memory_space<vmem>>, vector<1x128xf32>
    %2 = vector.broadcast %1 : vector<1x128xf32> to vector<32x128xf32>
    %3 = arith.mulf %0, %2 : vector<32x128xf32>
    %c0_3 = arith.constant 0 : index
    %c0_4 = arith.constant 0 : index
    %4 = vector.load %arg3[%c0_3, %c0_4] : memref<1x128xf32, #tpu.memory_space<vmem>>, vector<1x128xf32>
    %5 = vector.broadcast %4 : vector<1x128xf32> to vector<32x128xf32>
    %6 = arith.addf %3, %5 : vector<32x128xf32>
    %cst = arith.constant 0.000000e+00 : f32
    %7 = vector.broadcast %cst : f32 to vector<32x128xf32>
    %8 = arith.cmpf oge, %6, %7 : vector<32x128xf32>
    %cst_5 = arith.constant 0.00999999977 : f32
    %9 = vector.broadcast %cst_5 : f32 to vector<32x128xf32>
    %10 = arith.mulf %9, %6 : vector<32x128xf32>
    %11 = arith.select %8, %6, %10 : vector<32x128xi1>, vector<32x128xf32>
    %c0_6 = arith.constant 0 : index
    %c0_7 = arith.constant 0 : index
    %12 = vector.load %arg4[%c0_6, %c0_7] : memref<32x128xf32, #tpu.memory_space<vmem>>, vector<32x128xf32>
    tpu.vector_store %arg4[%c0_6, %c0_7], %11 {strides = array<i32>} : memref<32x128xf32, #tpu.memory_space<vmem>>, vector<32x128xf32>,
    return
  }
  func.func @transform_0(%arg0: i32) -> (i32, i32) {
    %c0_i32 = arith.constant 0 : i32
    %c0_i32_0 = arith.constant 0 : i32
    return %arg0, %c0_i32 : i32, i32
  }
  func.func @transform_1(%arg0: i32) -> (i32, i32) {
    %c0_i32 = arith.constant 0 : i32
    %c0_i32_0 = arith.constant 0 : i32
    %c0_i32_1 = arith.constant 0 : i32
    return %c0_i32, %c0_i32_0 : i32, i32
  }
  func.func @transform_2(%arg0: i32) -> (i32, i32) {
    %c0_i32 = arith.constant 0 : i32
    %c0_i32_0 = arith.constant 0 : i32
    %c0_i32_1 = arith.constant 0 : i32
    return %c0_i32, %c0_i32_0 : i32, i32
  }
  func.func @transform_3(%arg0: i32) -> (i32, i32) {
    %c0_i32 = arith.constant 0 : i32
    %c0_i32_0 = arith.constant 0 : i32
    return %arg0, %c0_i32 : i32, i32
  }
}

module attributes {stable_mosaic.version = 11 : i64} {
  func.func @_mm_bn_kernel(%arg0: i32, %arg1: memref<8x400xbf16, #tpu.memory_space<vmem>>, %arg2: memref<400x128xbf16, #tpu.memory_space<vmem>>, %arg3: memref<8x128xf32, #tpu.memory_space<vmem>>, %arg4: memref<1x128xf32, #tpu.memory_space<vmem>>, %arg5: memref<1x128xf32, #tpu.memory_space<vmem>>) attributes {dimension_semantics = [#tpu.dimension_semantics<arbitrary>], iteration_bounds = array<i64: 1>, scalar_prefetch = 0 : i64, scratch_operands = 0 : i64, tpu.core_type = #tpu.core_type<tc>, window_params = [{transform_indices = @transform_0, window_bounds = array<i64: 8, 400>}, {pipeline_mode = #tpu.pipeline_mode<synchronous>, transform_indices = @transform_1, window_bounds = array<i64: 400, 128>}, {transform_indices = @transform_2, window_bounds = array<i64: 8, 128>}, {pipeline_mode = #tpu.pipeline_mode<synchronous>, transform_indices = @transform_3, window_bounds = array<i64: 1, 128>}, {pipeline_mode = #tpu.pipeline_mode<synchronous>, transform_indices = @transform_4, window_bounds = array<i64: 1, 128>}]} {
    %c0 = arith.constant 0 : index
    %c0_0 = arith.constant 0 : index
    %0 = vector.load %arg1[%c0, %c0_0] : memref<8x400xbf16, #tpu.memory_space<vmem>>, vector<8x400xbf16>
    %c0_1 = arith.constant 0 : index
    %c0_2 = arith.constant 0 : index
    %1 = vector.load %arg2[%c0_1, %c0_2] : memref<400x128xbf16, #tpu.memory_space<vmem>>, vector<400x128xbf16>
    %cst = arith.constant dense<0.000000e+00> : vector<8x128xf32>
    %2 = tpu.matmul %0, %1, %cst {dimension_numbers = #tpu.dot_dimension_numbers<[1], [0], [0], [1], [0, 0, 1, 1], [], []>} : vector<8x400xbf16>, vector<400x128xbf16>, vector<8x128xf32> -> vector<8x128xf32>
    %c0_3 = arith.constant 0 : index
    %c0_4 = arith.constant 0 : index
    %3 = vector.load %arg3[%c0_3, %c0_4] : memref<8x128xf32, #tpu.memory_space<vmem>>, vector<8x128xf32>
    tpu.vector_store %arg3[%c0_3, %c0_4], %2 {strides = array<i32>} : memref<8x128xf32, #tpu.memory_space<vmem>>, vector<8x128xf32>,
    %c0_i32 = arith.constant 0 : i32
    %4 = arith.cmpi eq, %arg0, %c0_i32 : i32
    %5 = arith.extui %4 : i1 to i32
    %c0_i32_5 = arith.constant 0 : i32
    %6 = arith.cmpi ne, %5, %c0_i32_5 : i32
    scf.if %6 {
      %cst_16 = arith.constant 0.000000e+00 : f32
      %18 = vector.broadcast %cst_16 : f32 to vector<1x128xf32>
      %c0_17 = arith.constant 0 : index
      %c0_18 = arith.constant 0 : index
      %19 = vector.load %arg4[%c0_17, %c0_18] : memref<1x128xf32, #tpu.memory_space<vmem>>, vector<1x128xf32>
      tpu.vector_store %arg4[%c0_17, %c0_18], %18 {strides = array<i32>} : memref<1x128xf32, #tpu.memory_space<vmem>>, vector<1x128xf32>,
      %cst_19 = arith.constant 0.000000e+00 : f32
      %20 = vector.broadcast %cst_19 : f32 to vector<1x128xf32>
      %c0_20 = arith.constant 0 : index
      %c0_21 = arith.constant 0 : index
      %21 = vector.load %arg5[%c0_20, %c0_21] : memref<1x128xf32, #tpu.memory_space<vmem>>, vector<1x128xf32>
      tpu.vector_store %arg5[%c0_20, %c0_21], %20 {strides = array<i32>} : memref<1x128xf32, #tpu.memory_space<vmem>>, vector<1x128xf32>,
    } else {
    }
    %c0_6 = arith.constant 0 : index
    %c0_7 = arith.constant 0 : index
    %7 = vector.load %arg4[%c0_6, %c0_7] : memref<1x128xf32, #tpu.memory_space<vmem>>, vector<1x128xf32>
    %cst_8 = arith.constant dense<0.000000e+00> : vector<128xf32>
    %8 = vector.multi_reduction <add>, %2, %cst_8 [0] : vector<8x128xf32> to vector<128xf32>
    %9 = vector.shape_cast %8 : vector<128xf32> to vector<1x128xf32>
    %10 = arith.addf %7, %9 : vector<1x128xf32>
    %c0_9 = arith.constant 0 : index
    %c0_10 = arith.constant 0 : index
    %11 = vector.load %arg4[%c0_9, %c0_10] : memref<1x128xf32, #tpu.memory_space<vmem>>, vector<1x128xf32>
    tpu.vector_store %arg4[%c0_9, %c0_10], %10 {strides = array<i32>} : memref<1x128xf32, #tpu.memory_space<vmem>>, vector<1x128xf32>,
    %c0_11 = arith.constant 0 : index
    %c0_12 = arith.constant 0 : index
    %12 = vector.load %arg5[%c0_11, %c0_12] : memref<1x128xf32, #tpu.memory_space<vmem>>, vector<1x128xf32>
    %13 = arith.mulf %2, %2 : vector<8x128xf32>
    %cst_13 = arith.constant dense<0.000000e+00> : vector<128xf32>
    %14 = vector.multi_reduction <add>, %13, %cst_13 [0] : vector<8x128xf32> to vector<128xf32>
    %15 = vector.shape_cast %14 : vector<128xf32> to vector<1x128xf32>
    %16 = arith.addf %12, %15 : vector<1x128xf32>
    %c0_14 = arith.constant 0 : index
    %c0_15 = arith.constant 0 : index
    %17 = vector.load %arg5[%c0_14, %c0_15] : memref<1x128xf32, #tpu.memory_space<vmem>>, vector<1x128xf32>
    tpu.vector_store %arg5[%c0_14, %c0_15], %16 {strides = array<i32>} : memref<1x128xf32, #tpu.memory_space<vmem>>, vector<1x128xf32>,
    return
  }
  func.func @transform_0(%arg0: i32) -> (i32, i32) {
    %c0_i32 = arith.constant 0 : i32
    %c0_i32_0 = arith.constant 0 : i32
    return %arg0, %c0_i32 : i32, i32
  }
  func.func @transform_1(%arg0: i32) -> (i32, i32) {
    %c0_i32 = arith.constant 0 : i32
    %c0_i32_0 = arith.constant 0 : i32
    %c0_i32_1 = arith.constant 0 : i32
    return %c0_i32, %c0_i32_0 : i32, i32
  }
  func.func @transform_2(%arg0: i32) -> (i32, i32) {
    %c0_i32 = arith.constant 0 : i32
    %c0_i32_0 = arith.constant 0 : i32
    return %arg0, %c0_i32 : i32, i32
  }
  func.func @transform_3(%arg0: i32) -> (i32, i32) {
    %c0_i32 = arith.constant 0 : i32
    %c0_i32_0 = arith.constant 0 : i32
    %c0_i32_1 = arith.constant 0 : i32
    return %c0_i32, %c0_i32_0 : i32, i32
  }
  func.func @transform_4(%arg0: i32) -> (i32, i32) {
    %c0_i32 = arith.constant 0 : i32
    %c0_i32_0 = arith.constant 0 : i32
    %c0_i32_1 = arith.constant 0 : i32
    return %c0_i32, %c0_i32_0 : i32, i32
  }
}

module attributes {stable_mosaic.version = 11 : i64} {
  func.func @_scale_shift_leaky_kernel(%arg0: i32, %arg1: memref<8x128xf32, #tpu.memory_space<vmem>>, %arg2: memref<1x128xf32, #tpu.memory_space<vmem>>, %arg3: memref<1x128xf32, #tpu.memory_space<vmem>>, %arg4: memref<8x128xf32, #tpu.memory_space<vmem>>) attributes {dimension_semantics = [#tpu.dimension_semantics<parallel>], iteration_bounds = array<i64: 1>, scalar_prefetch = 0 : i64, scratch_operands = 0 : i64, tpu.core_type = #tpu.core_type<tc>, window_params = [{transform_indices = @transform_0, window_bounds = array<i64: 8, 128>}, {pipeline_mode = #tpu.pipeline_mode<synchronous>, transform_indices = @transform_1, window_bounds = array<i64: 1, 128>}, {pipeline_mode = #tpu.pipeline_mode<synchronous>, transform_indices = @transform_2, window_bounds = array<i64: 1, 128>}, {transform_indices = @transform_3, window_bounds = array<i64: 8, 128>}]} {
    %c0 = arith.constant 0 : index
    %c0_0 = arith.constant 0 : index
    %0 = vector.load %arg1[%c0, %c0_0] : memref<8x128xf32, #tpu.memory_space<vmem>>, vector<8x128xf32>
    %c0_1 = arith.constant 0 : index
    %c0_2 = arith.constant 0 : index
    %1 = vector.load %arg2[%c0_1, %c0_2] : memref<1x128xf32, #tpu.memory_space<vmem>>, vector<1x128xf32>
    %2 = vector.broadcast %1 : vector<1x128xf32> to vector<8x128xf32>
    %3 = arith.mulf %0, %2 : vector<8x128xf32>
    %c0_3 = arith.constant 0 : index
    %c0_4 = arith.constant 0 : index
    %4 = vector.load %arg3[%c0_3, %c0_4] : memref<1x128xf32, #tpu.memory_space<vmem>>, vector<1x128xf32>
    %5 = vector.broadcast %4 : vector<1x128xf32> to vector<8x128xf32>
    %6 = arith.addf %3, %5 : vector<8x128xf32>
    %cst = arith.constant 0.000000e+00 : f32
    %7 = vector.broadcast %cst : f32 to vector<8x128xf32>
    %8 = arith.cmpf oge, %6, %7 : vector<8x128xf32>
    %cst_5 = arith.constant 0.00999999977 : f32
    %9 = vector.broadcast %cst_5 : f32 to vector<8x128xf32>
    %10 = arith.mulf %9, %6 : vector<8x128xf32>
    %11 = arith.select %8, %6, %10 : vector<8x128xi1>, vector<8x128xf32>
    %c0_6 = arith.constant 0 : index
    %c0_7 = arith.constant 0 : index
    %12 = vector.load %arg4[%c0_6, %c0_7] : memref<8x128xf32, #tpu.memory_space<vmem>>, vector<8x128xf32>
    tpu.vector_store %arg4[%c0_6, %c0_7], %11 {strides = array<i32>} : memref<8x128xf32, #tpu.memory_space<vmem>>, vector<8x128xf32>,
    return
  }
  func.func @transform_0(%arg0: i32) -> (i32, i32) {
    %c0_i32 = arith.constant 0 : i32
    %c0_i32_0 = arith.constant 0 : i32
    return %arg0, %c0_i32 : i32, i32
  }
  func.func @transform_1(%arg0: i32) -> (i32, i32) {
    %c0_i32 = arith.constant 0 : i32
    %c0_i32_0 = arith.constant 0 : i32
    %c0_i32_1 = arith.constant 0 : i32
    return %c0_i32, %c0_i32_0 : i32, i32
  }
  func.func @transform_2(%arg0: i32) -> (i32, i32) {
    %c0_i32 = arith.constant 0 : i32
    %c0_i32_0 = arith.constant 0 : i32
    %c0_i32_1 = arith.constant 0 : i32
    return %c0_i32, %c0_i32_0 : i32, i32
  }
  func.func @transform_3(%arg0: i32) -> (i32, i32) {
    %c0_i32 = arith.constant 0 : i32
    %c0_i32_0 = arith.constant 0 : i32
    return %arg0, %c0_i32 : i32, i32
  }
}

module attributes {stable_mosaic.version = 11 : i64} {
  func.func @_mm_bn_kernel(%arg0: i32, %arg1: memref<8x288xbf16, #tpu.memory_space<vmem>>, %arg2: memref<288x256xbf16, #tpu.memory_space<vmem>>, %arg3: memref<8x256xf32, #tpu.memory_space<vmem>>, %arg4: memref<1x256xf32, #tpu.memory_space<vmem>>, %arg5: memref<1x256xf32, #tpu.memory_space<vmem>>) attributes {dimension_semantics = [#tpu.dimension_semantics<arbitrary>], iteration_bounds = array<i64: 1>, scalar_prefetch = 0 : i64, scratch_operands = 0 : i64, tpu.core_type = #tpu.core_type<tc>, window_params = [{transform_indices = @transform_0, window_bounds = array<i64: 8, 288>}, {pipeline_mode = #tpu.pipeline_mode<synchronous>, transform_indices = @transform_1, window_bounds = array<i64: 288, 256>}, {transform_indices = @transform_2, window_bounds = array<i64: 8, 256>}, {pipeline_mode = #tpu.pipeline_mode<synchronous>, transform_indices = @transform_3, window_bounds = array<i64: 1, 256>}, {pipeline_mode = #tpu.pipeline_mode<synchronous>, transform_indices = @transform_4, window_bounds = array<i64: 1, 256>}]} {
    %c0 = arith.constant 0 : index
    %c0_0 = arith.constant 0 : index
    %0 = vector.load %arg1[%c0, %c0_0] : memref<8x288xbf16, #tpu.memory_space<vmem>>, vector<8x288xbf16>
    %c0_1 = arith.constant 0 : index
    %c0_2 = arith.constant 0 : index
    %1 = vector.load %arg2[%c0_1, %c0_2] : memref<288x256xbf16, #tpu.memory_space<vmem>>, vector<288x256xbf16>
    %cst = arith.constant dense<0.000000e+00> : vector<8x256xf32>
    %2 = tpu.matmul %0, %1, %cst {dimension_numbers = #tpu.dot_dimension_numbers<[1], [0], [0], [1], [0, 0, 1, 1], [], []>} : vector<8x288xbf16>, vector<288x256xbf16>, vector<8x256xf32> -> vector<8x256xf32>
    %c0_3 = arith.constant 0 : index
    %c0_4 = arith.constant 0 : index
    %3 = vector.load %arg3[%c0_3, %c0_4] : memref<8x256xf32, #tpu.memory_space<vmem>>, vector<8x256xf32>
    tpu.vector_store %arg3[%c0_3, %c0_4], %2 {strides = array<i32>} : memref<8x256xf32, #tpu.memory_space<vmem>>, vector<8x256xf32>,
    %c0_i32 = arith.constant 0 : i32
    %4 = arith.cmpi eq, %arg0, %c0_i32 : i32
    %5 = arith.extui %4 : i1 to i32
    %c0_i32_5 = arith.constant 0 : i32
    %6 = arith.cmpi ne, %5, %c0_i32_5 : i32
    scf.if %6 {
      %cst_16 = arith.constant 0.000000e+00 : f32
      %18 = vector.broadcast %cst_16 : f32 to vector<1x256xf32>
      %c0_17 = arith.constant 0 : index
      %c0_18 = arith.constant 0 : index
      %19 = vector.load %arg4[%c0_17, %c0_18] : memref<1x256xf32, #tpu.memory_space<vmem>>, vector<1x256xf32>
      tpu.vector_store %arg4[%c0_17, %c0_18], %18 {strides = array<i32>} : memref<1x256xf32, #tpu.memory_space<vmem>>, vector<1x256xf32>,
      %cst_19 = arith.constant 0.000000e+00 : f32
      %20 = vector.broadcast %cst_19 : f32 to vector<1x256xf32>
      %c0_20 = arith.constant 0 : index
      %c0_21 = arith.constant 0 : index
      %21 = vector.load %arg5[%c0_20, %c0_21] : memref<1x256xf32, #tpu.memory_space<vmem>>, vector<1x256xf32>
      tpu.vector_store %arg5[%c0_20, %c0_21], %20 {strides = array<i32>} : memref<1x256xf32, #tpu.memory_space<vmem>>, vector<1x256xf32>,
    } else {
    }
    %c0_6 = arith.constant 0 : index
    %c0_7 = arith.constant 0 : index
    %7 = vector.load %arg4[%c0_6, %c0_7] : memref<1x256xf32, #tpu.memory_space<vmem>>, vector<1x256xf32>
    %cst_8 = arith.constant dense<0.000000e+00> : vector<256xf32>
    %8 = vector.multi_reduction <add>, %2, %cst_8 [0] : vector<8x256xf32> to vector<256xf32>
    %9 = vector.shape_cast %8 : vector<256xf32> to vector<1x256xf32>
    %10 = arith.addf %7, %9 : vector<1x256xf32>
    %c0_9 = arith.constant 0 : index
    %c0_10 = arith.constant 0 : index
    %11 = vector.load %arg4[%c0_9, %c0_10] : memref<1x256xf32, #tpu.memory_space<vmem>>, vector<1x256xf32>
    tpu.vector_store %arg4[%c0_9, %c0_10], %10 {strides = array<i32>} : memref<1x256xf32, #tpu.memory_space<vmem>>, vector<1x256xf32>,
    %c0_11 = arith.constant 0 : index
    %c0_12 = arith.constant 0 : index
    %12 = vector.load %arg5[%c0_11, %c0_12] : memref<1x256xf32, #tpu.memory_space<vmem>>, vector<1x256xf32>
    %13 = arith.mulf %2, %2 : vector<8x256xf32>
    %cst_13 = arith.constant dense<0.000000e+00> : vector<256xf32>
    %14 = vector.multi_reduction <add>, %13, %cst_13 [0] : vector<8x256xf32> to vector<256xf32>
    %15 = vector.shape_cast %14 : vector<256xf32> to vector<1x256xf32>
    %16 = arith.addf %12, %15 : vector<1x256xf32>
    %c0_14 = arith.constant 0 : index
    %c0_15 = arith.constant 0 : index
    %17 = vector.load %arg5[%c0_14, %c0_15] : memref<1x256xf32, #tpu.memory_space<vmem>>, vector<1x256xf32>
    tpu.vector_store %arg5[%c0_14, %c0_15], %16 {strides = array<i32>} : memref<1x256xf32, #tpu.memory_space<vmem>>, vector<1x256xf32>,
    return
  }
  func.func @transform_0(%arg0: i32) -> (i32, i32) {
    %c0_i32 = arith.constant 0 : i32
    %c0_i32_0 = arith.constant 0 : i32
    return %arg0, %c0_i32 : i32, i32
  }
  func.func @transform_1(%arg0: i32) -> (i32, i32) {
    %c0_i32 = arith.constant 0 : i32
    %c0_i32_0 = arith.constant 0 : i32
    %c0_i32_1 = arith.constant 0 : i32
    return %c0_i32, %c0_i32_0 : i32, i32
  }
  func.func @transform_2(%arg0: i32) -> (i32, i32) {
    %c0_i32 = arith.constant 0 : i32
    %c0_i32_0 = arith.constant 0 : i32
    return %arg0, %c0_i32 : i32, i32
  }
  func.func @transform_3(%arg0: i32) -> (i32, i32) {
    %c0_i32 = arith.constant 0 : i32
    %c0_i32_0 = arith.constant 0 : i32
    %c0_i32_1 = arith.constant 0 : i32
    return %c0_i32, %c0_i32_0 : i32, i32
  }
  func.func @transform_4(%arg0: i32) -> (i32, i32) {
    %c0_i32 = arith.constant 0 : i32
    %c0_i32_0 = arith.constant 0 : i32
    %c0_i32_1 = arith.constant 0 : i32
    return %c0_i32, %c0_i32_0 : i32, i32
  }
}

module attributes {stable_mosaic.version = 11 : i64} {
  func.func @_scale_shift_leaky_kernel(%arg0: i32, %arg1: memref<8x256xf32, #tpu.memory_space<vmem>>, %arg2: memref<1x256xf32, #tpu.memory_space<vmem>>, %arg3: memref<1x256xf32, #tpu.memory_space<vmem>>, %arg4: memref<8x256xf32, #tpu.memory_space<vmem>>) attributes {dimension_semantics = [#tpu.dimension_semantics<parallel>], iteration_bounds = array<i64: 1>, scalar_prefetch = 0 : i64, scratch_operands = 0 : i64, tpu.core_type = #tpu.core_type<tc>, window_params = [{transform_indices = @transform_0, window_bounds = array<i64: 8, 256>}, {pipeline_mode = #tpu.pipeline_mode<synchronous>, transform_indices = @transform_1, window_bounds = array<i64: 1, 256>}, {pipeline_mode = #tpu.pipeline_mode<synchronous>, transform_indices = @transform_2, window_bounds = array<i64: 1, 256>}, {transform_indices = @transform_3, window_bounds = array<i64: 8, 256>}]} {
    %c0 = arith.constant 0 : index
    %c0_0 = arith.constant 0 : index
    %0 = vector.load %arg1[%c0, %c0_0] : memref<8x256xf32, #tpu.memory_space<vmem>>, vector<8x256xf32>
    %c0_1 = arith.constant 0 : index
    %c0_2 = arith.constant 0 : index
    %1 = vector.load %arg2[%c0_1, %c0_2] : memref<1x256xf32, #tpu.memory_space<vmem>>, vector<1x256xf32>
    %2 = vector.broadcast %1 : vector<1x256xf32> to vector<8x256xf32>
    %3 = arith.mulf %0, %2 : vector<8x256xf32>
    %c0_3 = arith.constant 0 : index
    %c0_4 = arith.constant 0 : index
    %4 = vector.load %arg3[%c0_3, %c0_4] : memref<1x256xf32, #tpu.memory_space<vmem>>, vector<1x256xf32>
    %5 = vector.broadcast %4 : vector<1x256xf32> to vector<8x256xf32>
    %6 = arith.addf %3, %5 : vector<8x256xf32>
    %cst = arith.constant 0.000000e+00 : f32
    %7 = vector.broadcast %cst : f32 to vector<8x256xf32>
    %8 = arith.cmpf oge, %6, %7 : vector<8x256xf32>
    %cst_5 = arith.constant 0.00999999977 : f32
    %9 = vector.broadcast %cst_5 : f32 to vector<8x256xf32>
    %10 = arith.mulf %9, %6 : vector<8x256xf32>
    %11 = arith.select %8, %6, %10 : vector<8x256xi1>, vector<8x256xf32>
    %c0_6 = arith.constant 0 : index
    %c0_7 = arith.constant 0 : index
    %12 = vector.load %arg4[%c0_6, %c0_7] : memref<8x256xf32, #tpu.memory_space<vmem>>, vector<8x256xf32>
    tpu.vector_store %arg4[%c0_6, %c0_7], %11 {strides = array<i32>} : memref<8x256xf32, #tpu.memory_space<vmem>>, vector<8x256xf32>,
    return
  }
  func.func @transform_0(%arg0: i32) -> (i32, i32) {
    %c0_i32 = arith.constant 0 : i32
    %c0_i32_0 = arith.constant 0 : i32
    return %arg0, %c0_i32 : i32, i32
  }
  func.func @transform_1(%arg0: i32) -> (i32, i32) {
    %c0_i32 = arith.constant 0 : i32
    %c0_i32_0 = arith.constant 0 : i32
    %c0_i32_1 = arith.constant 0 : i32
    return %c0_i32, %c0_i32_0 : i32, i32
  }
  func.func @transform_2(%arg0: i32) -> (i32, i32) {
    %c0_i32 = arith.constant 0 : i32
    %c0_i32_0 = arith.constant 0 : i32
    %c0_i32_1 = arith.constant 0 : i32
    return %c0_i32, %c0_i32_0 : i32, i32
  }
  func.func @transform_3(%arg0: i32) -> (i32, i32) {
    %c0_i32 = arith.constant 0 : i32
    %c0_i32_0 = arith.constant 0 : i32
    return %arg0, %c0_i32 : i32, i32
  }
}

module attributes {stable_mosaic.version = 11 : i64} {
  func.func @_mm_bn_kernel(%arg0: i32, %arg1: memref<32x288xbf16, #tpu.memory_space<vmem>>, %arg2: memref<288x128xbf16, #tpu.memory_space<vmem>>, %arg3: memref<32x128xf32, #tpu.memory_space<vmem>>, %arg4: memref<1x128xf32, #tpu.memory_space<vmem>>, %arg5: memref<1x128xf32, #tpu.memory_space<vmem>>) attributes {dimension_semantics = [#tpu.dimension_semantics<arbitrary>], iteration_bounds = array<i64: 1>, scalar_prefetch = 0 : i64, scratch_operands = 0 : i64, tpu.core_type = #tpu.core_type<tc>, window_params = [{transform_indices = @transform_0, window_bounds = array<i64: 32, 288>}, {pipeline_mode = #tpu.pipeline_mode<synchronous>, transform_indices = @transform_1, window_bounds = array<i64: 288, 128>}, {transform_indices = @transform_2, window_bounds = array<i64: 32, 128>}, {pipeline_mode = #tpu.pipeline_mode<synchronous>, transform_indices = @transform_3, window_bounds = array<i64: 1, 128>}, {pipeline_mode = #tpu.pipeline_mode<synchronous>, transform_indices = @transform_4, window_bounds = array<i64: 1, 128>}]} {
    %c0 = arith.constant 0 : index
    %c0_0 = arith.constant 0 : index
    %0 = vector.load %arg1[%c0, %c0_0] : memref<32x288xbf16, #tpu.memory_space<vmem>>, vector<32x288xbf16>
    %c0_1 = arith.constant 0 : index
    %c0_2 = arith.constant 0 : index
    %1 = vector.load %arg2[%c0_1, %c0_2] : memref<288x128xbf16, #tpu.memory_space<vmem>>, vector<288x128xbf16>
    %cst = arith.constant dense<0.000000e+00> : vector<32x128xf32>
    %2 = tpu.matmul %0, %1, %cst {dimension_numbers = #tpu.dot_dimension_numbers<[1], [0], [0], [1], [0, 0, 1, 1], [], []>} : vector<32x288xbf16>, vector<288x128xbf16>, vector<32x128xf32> -> vector<32x128xf32>
    %c0_3 = arith.constant 0 : index
    %c0_4 = arith.constant 0 : index
    %3 = vector.load %arg3[%c0_3, %c0_4] : memref<32x128xf32, #tpu.memory_space<vmem>>, vector<32x128xf32>
    tpu.vector_store %arg3[%c0_3, %c0_4], %2 {strides = array<i32>} : memref<32x128xf32, #tpu.memory_space<vmem>>, vector<32x128xf32>,
    %c0_i32 = arith.constant 0 : i32
    %4 = arith.cmpi eq, %arg0, %c0_i32 : i32
    %5 = arith.extui %4 : i1 to i32
    %c0_i32_5 = arith.constant 0 : i32
    %6 = arith.cmpi ne, %5, %c0_i32_5 : i32
    scf.if %6 {
      %cst_16 = arith.constant 0.000000e+00 : f32
      %18 = vector.broadcast %cst_16 : f32 to vector<1x128xf32>
      %c0_17 = arith.constant 0 : index
      %c0_18 = arith.constant 0 : index
      %19 = vector.load %arg4[%c0_17, %c0_18] : memref<1x128xf32, #tpu.memory_space<vmem>>, vector<1x128xf32>
      tpu.vector_store %arg4[%c0_17, %c0_18], %18 {strides = array<i32>} : memref<1x128xf32, #tpu.memory_space<vmem>>, vector<1x128xf32>,
      %cst_19 = arith.constant 0.000000e+00 : f32
      %20 = vector.broadcast %cst_19 : f32 to vector<1x128xf32>
      %c0_20 = arith.constant 0 : index
      %c0_21 = arith.constant 0 : index
      %21 = vector.load %arg5[%c0_20, %c0_21] : memref<1x128xf32, #tpu.memory_space<vmem>>, vector<1x128xf32>
      tpu.vector_store %arg5[%c0_20, %c0_21], %20 {strides = array<i32>} : memref<1x128xf32, #tpu.memory_space<vmem>>, vector<1x128xf32>,
    } else {
    }
    %c0_6 = arith.constant 0 : index
    %c0_7 = arith.constant 0 : index
    %7 = vector.load %arg4[%c0_6, %c0_7] : memref<1x128xf32, #tpu.memory_space<vmem>>, vector<1x128xf32>
    %cst_8 = arith.constant dense<0.000000e+00> : vector<128xf32>
    %8 = vector.multi_reduction <add>, %2, %cst_8 [0] : vector<32x128xf32> to vector<128xf32>
    %9 = vector.shape_cast %8 : vector<128xf32> to vector<1x128xf32>
    %10 = arith.addf %7, %9 : vector<1x128xf32>
    %c0_9 = arith.constant 0 : index
    %c0_10 = arith.constant 0 : index
    %11 = vector.load %arg4[%c0_9, %c0_10] : memref<1x128xf32, #tpu.memory_space<vmem>>, vector<1x128xf32>
    tpu.vector_store %arg4[%c0_9, %c0_10], %10 {strides = array<i32>} : memref<1x128xf32, #tpu.memory_space<vmem>>, vector<1x128xf32>,
    %c0_11 = arith.constant 0 : index
    %c0_12 = arith.constant 0 : index
    %12 = vector.load %arg5[%c0_11, %c0_12] : memref<1x128xf32, #tpu.memory_space<vmem>>, vector<1x128xf32>
    %13 = arith.mulf %2, %2 : vector<32x128xf32>
    %cst_13 = arith.constant dense<0.000000e+00> : vector<128xf32>
    %14 = vector.multi_reduction <add>, %13, %cst_13 [0] : vector<32x128xf32> to vector<128xf32>
    %15 = vector.shape_cast %14 : vector<128xf32> to vector<1x128xf32>
    %16 = arith.addf %12, %15 : vector<1x128xf32>
    %c0_14 = arith.constant 0 : index
    %c0_15 = arith.constant 0 : index
    %17 = vector.load %arg5[%c0_14, %c0_15] : memref<1x128xf32, #tpu.memory_space<vmem>>, vector<1x128xf32>
    tpu.vector_store %arg5[%c0_14, %c0_15], %16 {strides = array<i32>} : memref<1x128xf32, #tpu.memory_space<vmem>>, vector<1x128xf32>,
    return
  }
  func.func @transform_0(%arg0: i32) -> (i32, i32) {
    %c0_i32 = arith.constant 0 : i32
    %c0_i32_0 = arith.constant 0 : i32
    return %arg0, %c0_i32 : i32, i32
  }
  func.func @transform_1(%arg0: i32) -> (i32, i32) {
    %c0_i32 = arith.constant 0 : i32
    %c0_i32_0 = arith.constant 0 : i32
    %c0_i32_1 = arith.constant 0 : i32
    return %c0_i32, %c0_i32_0 : i32, i32
  }
  func.func @transform_2(%arg0: i32) -> (i32, i32) {
    %c0_i32 = arith.constant 0 : i32
    %c0_i32_0 = arith.constant 0 : i32
    return %arg0, %c0_i32 : i32, i32
  }
  func.func @transform_3(%arg0: i32) -> (i32, i32) {
    %c0_i32 = arith.constant 0 : i32
    %c0_i32_0 = arith.constant 0 : i32
    %c0_i32_1 = arith.constant 0 : i32
    return %c0_i32, %c0_i32_0 : i32, i32
  }
  func.func @transform_4(%arg0: i32) -> (i32, i32) {
    %c0_i32 = arith.constant 0 : i32
    %c0_i32_0 = arith.constant 0 : i32
    %c0_i32_1 = arith.constant 0 : i32
    return %c0_i32, %c0_i32_0 : i32, i32
  }
}

module attributes {stable_mosaic.version = 11 : i64} {
  func.func @_mm_bn_kernel(%arg0: i32, %arg1: memref<128x144xbf16, #tpu.memory_space<vmem>>, %arg2: memref<144x128xbf16, #tpu.memory_space<vmem>>, %arg3: memref<128x128xf32, #tpu.memory_space<vmem>>, %arg4: memref<1x128xf32, #tpu.memory_space<vmem>>, %arg5: memref<1x128xf32, #tpu.memory_space<vmem>>) attributes {dimension_semantics = [#tpu.dimension_semantics<arbitrary>], iteration_bounds = array<i64: 1>, scalar_prefetch = 0 : i64, scratch_operands = 0 : i64, tpu.core_type = #tpu.core_type<tc>, window_params = [{transform_indices = @transform_0, window_bounds = array<i64: 128, 144>}, {pipeline_mode = #tpu.pipeline_mode<synchronous>, transform_indices = @transform_1, window_bounds = array<i64: 144, 128>}, {transform_indices = @transform_2, window_bounds = array<i64: 128, 128>}, {pipeline_mode = #tpu.pipeline_mode<synchronous>, transform_indices = @transform_3, window_bounds = array<i64: 1, 128>}, {pipeline_mode = #tpu.pipeline_mode<synchronous>, transform_indices = @transform_4, window_bounds = array<i64: 1, 128>}]} {
    %c0 = arith.constant 0 : index
    %c0_0 = arith.constant 0 : index
    %0 = vector.load %arg1[%c0, %c0_0] : memref<128x144xbf16, #tpu.memory_space<vmem>>, vector<128x144xbf16>
    %c0_1 = arith.constant 0 : index
    %c0_2 = arith.constant 0 : index
    %1 = vector.load %arg2[%c0_1, %c0_2] : memref<144x128xbf16, #tpu.memory_space<vmem>>, vector<144x128xbf16>
    %cst = arith.constant dense<0.000000e+00> : vector<128x128xf32>
    %2 = tpu.matmul %0, %1, %cst {dimension_numbers = #tpu.dot_dimension_numbers<[1], [0], [0], [1], [0, 0, 1, 1], [], []>} : vector<128x144xbf16>, vector<144x128xbf16>, vector<128x128xf32> -> vector<128x128xf32>
    %c0_3 = arith.constant 0 : index
    %c0_4 = arith.constant 0 : index
    %3 = vector.load %arg3[%c0_3, %c0_4] : memref<128x128xf32, #tpu.memory_space<vmem>>, vector<128x128xf32>
    tpu.vector_store %arg3[%c0_3, %c0_4], %2 {strides = array<i32>} : memref<128x128xf32, #tpu.memory_space<vmem>>, vector<128x128xf32>,
    %c0_i32 = arith.constant 0 : i32
    %4 = arith.cmpi eq, %arg0, %c0_i32 : i32
    %5 = arith.extui %4 : i1 to i32
    %c0_i32_5 = arith.constant 0 : i32
    %6 = arith.cmpi ne, %5, %c0_i32_5 : i32
    scf.if %6 {
      %cst_16 = arith.constant 0.000000e+00 : f32
      %18 = vector.broadcast %cst_16 : f32 to vector<1x128xf32>
      %c0_17 = arith.constant 0 : index
      %c0_18 = arith.constant 0 : index
      %19 = vector.load %arg4[%c0_17, %c0_18] : memref<1x128xf32, #tpu.memory_space<vmem>>, vector<1x128xf32>
      tpu.vector_store %arg4[%c0_17, %c0_18], %18 {strides = array<i32>} : memref<1x128xf32, #tpu.memory_space<vmem>>, vector<1x128xf32>,
      %cst_19 = arith.constant 0.000000e+00 : f32
      %20 = vector.broadcast %cst_19 : f32 to vector<1x128xf32>
      %c0_20 = arith.constant 0 : index
      %c0_21 = arith.constant 0 : index
      %21 = vector.load %arg5[%c0_20, %c0_21] : memref<1x128xf32, #tpu.memory_space<vmem>>, vector<1x128xf32>
      tpu.vector_store %arg5[%c0_20, %c0_21], %20 {strides = array<i32>} : memref<1x128xf32, #tpu.memory_space<vmem>>, vector<1x128xf32>,
    } else {
    }
    %c0_6 = arith.constant 0 : index
    %c0_7 = arith.constant 0 : index
    %7 = vector.load %arg4[%c0_6, %c0_7] : memref<1x128xf32, #tpu.memory_space<vmem>>, vector<1x128xf32>
    %cst_8 = arith.constant dense<0.000000e+00> : vector<128xf32>
    %8 = vector.multi_reduction <add>, %2, %cst_8 [0] : vector<128x128xf32> to vector<128xf32>
    %9 = vector.shape_cast %8 : vector<128xf32> to vector<1x128xf32>
    %10 = arith.addf %7, %9 : vector<1x128xf32>
    %c0_9 = arith.constant 0 : index
    %c0_10 = arith.constant 0 : index
    %11 = vector.load %arg4[%c0_9, %c0_10] : memref<1x128xf32, #tpu.memory_space<vmem>>, vector<1x128xf32>
    tpu.vector_store %arg4[%c0_9, %c0_10], %10 {strides = array<i32>} : memref<1x128xf32, #tpu.memory_space<vmem>>, vector<1x128xf32>,
    %c0_11 = arith.constant 0 : index
    %c0_12 = arith.constant 0 : index
    %12 = vector.load %arg5[%c0_11, %c0_12] : memref<1x128xf32, #tpu.memory_space<vmem>>, vector<1x128xf32>
    %13 = arith.mulf %2, %2 : vector<128x128xf32>
    %cst_13 = arith.constant dense<0.000000e+00> : vector<128xf32>
    %14 = vector.multi_reduction <add>, %13, %cst_13 [0] : vector<128x128xf32> to vector<128xf32>
    %15 = vector.shape_cast %14 : vector<128xf32> to vector<1x128xf32>
    %16 = arith.addf %12, %15 : vector<1x128xf32>
    %c0_14 = arith.constant 0 : index
    %c0_15 = arith.constant 0 : index
    %17 = vector.load %arg5[%c0_14, %c0_15] : memref<1x128xf32, #tpu.memory_space<vmem>>, vector<1x128xf32>
    tpu.vector_store %arg5[%c0_14, %c0_15], %16 {strides = array<i32>} : memref<1x128xf32, #tpu.memory_space<vmem>>, vector<1x128xf32>,
    return
  }
  func.func @transform_0(%arg0: i32) -> (i32, i32) {
    %c0_i32 = arith.constant 0 : i32
    %c0_i32_0 = arith.constant 0 : i32
    return %arg0, %c0_i32 : i32, i32
  }
  func.func @transform_1(%arg0: i32) -> (i32, i32) {
    %c0_i32 = arith.constant 0 : i32
    %c0_i32_0 = arith.constant 0 : i32
    %c0_i32_1 = arith.constant 0 : i32
    return %c0_i32, %c0_i32_0 : i32, i32
  }
  func.func @transform_2(%arg0: i32) -> (i32, i32) {
    %c0_i32 = arith.constant 0 : i32
    %c0_i32_0 = arith.constant 0 : i32
    return %arg0, %c0_i32 : i32, i32
  }
  func.func @transform_3(%arg0: i32) -> (i32, i32) {
    %c0_i32 = arith.constant 0 : i32
    %c0_i32_0 = arith.constant 0 : i32
    %c0_i32_1 = arith.constant 0 : i32
    return %c0_i32, %c0_i32_0 : i32, i32
  }
  func.func @transform_4(%arg0: i32) -> (i32, i32) {
    %c0_i32 = arith.constant 0 : i32
    %c0_i32_0 = arith.constant 0 : i32
    %c0_i32_1 = arith.constant 0 : i32
    return %c0_i32, %c0_i32_0 : i32, i32
  }
}

module attributes {stable_mosaic.version = 11 : i64} {
  func.func @_mm_bias_act_kernel(%arg0: i32, %arg1: memref<512x8xbf16, #tpu.memory_space<vmem>>, %arg2: memref<8x128xbf16, #tpu.memory_space<vmem>>, %arg3: memref<1x128xf32, #tpu.memory_space<vmem>>, %arg4: memref<512x128xf32, #tpu.memory_space<vmem>>) attributes {dimension_semantics = [#tpu.dimension_semantics<parallel>], iteration_bounds = array<i64: 1>, scalar_prefetch = 0 : i64, scratch_operands = 0 : i64, tpu.core_type = #tpu.core_type<tc>, window_params = [{transform_indices = @transform_0, window_bounds = array<i64: 512, 8>}, {pipeline_mode = #tpu.pipeline_mode<synchronous>, transform_indices = @transform_1, window_bounds = array<i64: 8, 128>}, {pipeline_mode = #tpu.pipeline_mode<synchronous>, transform_indices = @transform_2, window_bounds = array<i64: 1, 128>}, {transform_indices = @transform_3, window_bounds = array<i64: 512, 128>}]} {
    %c0 = arith.constant 0 : index
    %c0_0 = arith.constant 0 : index
    %0 = vector.load %arg1[%c0, %c0_0] : memref<512x8xbf16, #tpu.memory_space<vmem>>, vector<512x8xbf16>
    %c0_1 = arith.constant 0 : index
    %c0_2 = arith.constant 0 : index
    %1 = vector.load %arg2[%c0_1, %c0_2] : memref<8x128xbf16, #tpu.memory_space<vmem>>, vector<8x128xbf16>
    %cst = arith.constant dense<0.000000e+00> : vector<512x128xf32>
    %2 = tpu.matmul %0, %1, %cst {dimension_numbers = #tpu.dot_dimension_numbers<[1], [0], [0], [1], [0, 0, 1, 1], [], []>} : vector<512x8xbf16>, vector<8x128xbf16>, vector<512x128xf32> -> vector<512x128xf32>
    %c0_3 = arith.constant 0 : index
    %c0_4 = arith.constant 0 : index
    %3 = vector.load %arg3[%c0_3, %c0_4] : memref<1x128xf32, #tpu.memory_space<vmem>>, vector<1x128xf32>
    %4 = vector.broadcast %3 : vector<1x128xf32> to vector<512x128xf32>
    %5 = arith.addf %2, %4 : vector<512x128xf32>
    %6 = tpu.iota {dimensions = array<i32: 1>} : vector<512x128xi32>
    %c2_i32 = arith.constant 2 : i32
    %7 = vector.broadcast %c2_i32 : i32 to vector<512x128xi32>
    %8 = arith.cmpi slt, %6, %7 : vector<512x128xi32>
    %cst_5 = arith.constant 0xFF800000 : f32
    %9 = vector.broadcast %cst_5 : f32 to vector<512x128xf32>
    %10 = arith.select %8, %5, %9 : vector<512x128xi1>, vector<512x128xf32>
    %cst_6 = arith.constant dense<0xFF800000> : vector<512xf32>
    %11 = vector.multi_reduction <maximumf>, %10, %cst_6 [1] : vector<512x128xf32> to vector<512xf32>
    %12 = vector.shape_cast %11 : vector<512xf32> to vector<512x1xf32>
    %13 = vector.broadcast %12 : vector<512x1xf32> to vector<512x128xf32>
    %14 = arith.subf %10, %13 : vector<512x128xf32>
    %15 = math.exp %14 : vector<512x128xf32>
    %cst_7 = arith.constant dense<0.000000e+00> : vector<512xf32>
    %16 = vector.multi_reduction <add>, %15, %cst_7 [1] : vector<512x128xf32> to vector<512xf32>
    %17 = vector.shape_cast %16 : vector<512xf32> to vector<512x1xf32>
    %18 = tpu.reciprocal %17 {approx = true} : vector<512x1xf32> -> vector<512x1xf32>
    %19 = vector.broadcast %18 : vector<512x1xf32> to vector<512x128xf32>
    %20 = arith.mulf %15, %19 : vector<512x128xf32>
    %c0_8 = arith.constant 0 : index
    %c0_9 = arith.constant 0 : index
    %21 = vector.load %arg4[%c0_8, %c0_9] : memref<512x128xf32, #tpu.memory_space<vmem>>, vector<512x128xf32>
    tpu.vector_store %arg4[%c0_8, %c0_9], %20 {strides = array<i32>} : memref<512x128xf32, #tpu.memory_space<vmem>>, vector<512x128xf32>,
    return
  }
  func.func @transform_0(%arg0: i32) -> (i32, i32) {
    %c0_i32 = arith.constant 0 : i32
    %c0_i32_0 = arith.constant 0 : i32
    return %arg0, %c0_i32 : i32, i32
  }
  func.func @transform_1(%arg0: i32) -> (i32, i32) {
    %c0_i32 = arith.constant 0 : i32
    %c0_i32_0 = arith.constant 0 : i32
    %c0_i32_1 = arith.constant 0 : i32
    return %c0_i32, %c0_i32_0 : i32, i32
  }
  func.func @transform_2(%arg0: i32) -> (i32, i32) {
    %c0_i32 = arith.constant 0 : i32
    %c0_i32_0 = arith.constant 0 : i32
    %c0_i32_1 = arith.constant 0 : i32
    return %c0_i32, %c0_i32_0 : i32, i32
  }
  func.func @transform_3(%arg0: i32) -> (i32, i32) {
    %c0_i32 = arith.constant 0 : i32
    %c0_i32_0 = arith.constant 0 : i32
    return %arg0, %c0_i32 : i32, i32
  }
}

module attributes {stable_mosaic.version = 11 : i64} {
  func.func @_mm_bn_kernel(%arg0: i32, %arg1: memref<32x100xbf16, #tpu.memory_space<vmem>>, %arg2: memref<100x128xbf16, #tpu.memory_space<vmem>>, %arg3: memref<32x128xf32, #tpu.memory_space<vmem>>, %arg4: memref<1x128xf32, #tpu.memory_space<vmem>>, %arg5: memref<1x128xf32, #tpu.memory_space<vmem>>) attributes {dimension_semantics = [#tpu.dimension_semantics<arbitrary>], iteration_bounds = array<i64: 1>, scalar_prefetch = 0 : i64, scratch_operands = 0 : i64, tpu.core_type = #tpu.core_type<tc>, window_params = [{transform_indices = @transform_0, window_bounds = array<i64: 32, 100>}, {pipeline_mode = #tpu.pipeline_mode<synchronous>, transform_indices = @transform_1, window_bounds = array<i64: 100, 128>}, {transform_indices = @transform_2, window_bounds = array<i64: 32, 128>}, {pipeline_mode = #tpu.pipeline_mode<synchronous>, transform_indices = @transform_3, window_bounds = array<i64: 1, 128>}, {pipeline_mode = #tpu.pipeline_mode<synchronous>, transform_indices = @transform_4, window_bounds = array<i64: 1, 128>}]} {
    %c0 = arith.constant 0 : index
    %c0_0 = arith.constant 0 : index
    %0 = vector.load %arg1[%c0, %c0_0] : memref<32x100xbf16, #tpu.memory_space<vmem>>, vector<32x100xbf16>
    %c0_1 = arith.constant 0 : index
    %c0_2 = arith.constant 0 : index
    %1 = vector.load %arg2[%c0_1, %c0_2] : memref<100x128xbf16, #tpu.memory_space<vmem>>, vector<100x128xbf16>
    %cst = arith.constant dense<0.000000e+00> : vector<32x128xf32>
    %2 = tpu.matmul %0, %1, %cst {dimension_numbers = #tpu.dot_dimension_numbers<[1], [0], [0], [1], [0, 0, 1, 1], [], []>} : vector<32x100xbf16>, vector<100x128xbf16>, vector<32x128xf32> -> vector<32x128xf32>
    %c0_3 = arith.constant 0 : index
    %c0_4 = arith.constant 0 : index
    %3 = vector.load %arg3[%c0_3, %c0_4] : memref<32x128xf32, #tpu.memory_space<vmem>>, vector<32x128xf32>
    tpu.vector_store %arg3[%c0_3, %c0_4], %2 {strides = array<i32>} : memref<32x128xf32, #tpu.memory_space<vmem>>, vector<32x128xf32>,
    %c0_i32 = arith.constant 0 : i32
    %4 = arith.cmpi eq, %arg0, %c0_i32 : i32
    %5 = arith.extui %4 : i1 to i32
    %c0_i32_5 = arith.constant 0 : i32
    %6 = arith.cmpi ne, %5, %c0_i32_5 : i32
    scf.if %6 {
      %cst_16 = arith.constant 0.000000e+00 : f32
      %18 = vector.broadcast %cst_16 : f32 to vector<1x128xf32>
      %c0_17 = arith.constant 0 : index
      %c0_18 = arith.constant 0 : index
      %19 = vector.load %arg4[%c0_17, %c0_18] : memref<1x128xf32, #tpu.memory_space<vmem>>, vector<1x128xf32>
      tpu.vector_store %arg4[%c0_17, %c0_18], %18 {strides = array<i32>} : memref<1x128xf32, #tpu.memory_space<vmem>>, vector<1x128xf32>,
      %cst_19 = arith.constant 0.000000e+00 : f32
      %20 = vector.broadcast %cst_19 : f32 to vector<1x128xf32>
      %c0_20 = arith.constant 0 : index
      %c0_21 = arith.constant 0 : index
      %21 = vector.load %arg5[%c0_20, %c0_21] : memref<1x128xf32, #tpu.memory_space<vmem>>, vector<1x128xf32>
      tpu.vector_store %arg5[%c0_20, %c0_21], %20 {strides = array<i32>} : memref<1x128xf32, #tpu.memory_space<vmem>>, vector<1x128xf32>,
    } else {
    }
    %c0_6 = arith.constant 0 : index
    %c0_7 = arith.constant 0 : index
    %7 = vector.load %arg4[%c0_6, %c0_7] : memref<1x128xf32, #tpu.memory_space<vmem>>, vector<1x128xf32>
    %cst_8 = arith.constant dense<0.000000e+00> : vector<128xf32>
    %8 = vector.multi_reduction <add>, %2, %cst_8 [0] : vector<32x128xf32> to vector<128xf32>
    %9 = vector.shape_cast %8 : vector<128xf32> to vector<1x128xf32>
    %10 = arith.addf %7, %9 : vector<1x128xf32>
    %c0_9 = arith.constant 0 : index
    %c0_10 = arith.constant 0 : index
    %11 = vector.load %arg4[%c0_9, %c0_10] : memref<1x128xf32, #tpu.memory_space<vmem>>, vector<1x128xf32>
    tpu.vector_store %arg4[%c0_9, %c0_10], %10 {strides = array<i32>} : memref<1x128xf32, #tpu.memory_space<vmem>>, vector<1x128xf32>,
    %c0_11 = arith.constant 0 : index
    %c0_12 = arith.constant 0 : index
    %12 = vector.load %arg5[%c0_11, %c0_12] : memref<1x128xf32, #tpu.memory_space<vmem>>, vector<1x128xf32>
    %13 = arith.mulf %2, %2 : vector<32x128xf32>
    %cst_13 = arith.constant dense<0.000000e+00> : vector<128xf32>
    %14 = vector.multi_reduction <add>, %13, %cst_13 [0] : vector<32x128xf32> to vector<128xf32>
    %15 = vector.shape_cast %14 : vector<128xf32> to vector<1x128xf32>
    %16 = arith.addf %12, %15 : vector<1x128xf32>
    %c0_14 = arith.constant 0 : index
    %c0_15 = arith.constant 0 : index
    %17 = vector.load %arg5[%c0_14, %c0_15] : memref<1x128xf32, #tpu.memory_space<vmem>>, vector<1x128xf32>
    tpu.vector_store %arg5[%c0_14, %c0_15], %16 {strides = array<i32>} : memref<1x128xf32, #tpu.memory_space<vmem>>, vector<1x128xf32>,
    return
  }
  func.func @transform_0(%arg0: i32) -> (i32, i32) {
    %c0_i32 = arith.constant 0 : i32
    %c0_i32_0 = arith.constant 0 : i32
    return %arg0, %c0_i32 : i32, i32
  }
  func.func @transform_1(%arg0: i32) -> (i32, i32) {
    %c0_i32 = arith.constant 0 : i32
    %c0_i32_0 = arith.constant 0 : i32
    %c0_i32_1 = arith.constant 0 : i32
    return %c0_i32, %c0_i32_0 : i32, i32
  }
  func.func @transform_2(%arg0: i32) -> (i32, i32) {
    %c0_i32 = arith.constant 0 : i32
    %c0_i32_0 = arith.constant 0 : i32
    return %arg0, %c0_i32 : i32, i32
  }
  func.func @transform_3(%arg0: i32) -> (i32, i32) {
    %c0_i32 = arith.constant 0 : i32
    %c0_i32_0 = arith.constant 0 : i32
    %c0_i32_1 = arith.constant 0 : i32
    return %c0_i32, %c0_i32_0 : i32, i32
  }
  func.func @transform_4(%arg0: i32) -> (i32, i32) {
    %c0_i32 = arith.constant 0 : i32
    %c0_i32_0 = arith.constant 0 : i32
    %c0_i32_1 = arith.constant 0 : i32
    return %c0_i32, %c0_i32_0 : i32, i32
  }
}

module attributes {stable_mosaic.version = 11 : i64} {
  func.func @_mm_bn_kernel(%arg0: i32, %arg1: memref<8x200xbf16, #tpu.memory_space<vmem>>, %arg2: memref<200x128xbf16, #tpu.memory_space<vmem>>, %arg3: memref<8x128xf32, #tpu.memory_space<vmem>>, %arg4: memref<1x128xf32, #tpu.memory_space<vmem>>, %arg5: memref<1x128xf32, #tpu.memory_space<vmem>>) attributes {dimension_semantics = [#tpu.dimension_semantics<arbitrary>], iteration_bounds = array<i64: 1>, scalar_prefetch = 0 : i64, scratch_operands = 0 : i64, tpu.core_type = #tpu.core_type<tc>, window_params = [{transform_indices = @transform_0, window_bounds = array<i64: 8, 200>}, {pipeline_mode = #tpu.pipeline_mode<synchronous>, transform_indices = @transform_1, window_bounds = array<i64: 200, 128>}, {transform_indices = @transform_2, window_bounds = array<i64: 8, 128>}, {pipeline_mode = #tpu.pipeline_mode<synchronous>, transform_indices = @transform_3, window_bounds = array<i64: 1, 128>}, {pipeline_mode = #tpu.pipeline_mode<synchronous>, transform_indices = @transform_4, window_bounds = array<i64: 1, 128>}]} {
    %c0 = arith.constant 0 : index
    %c0_0 = arith.constant 0 : index
    %0 = vector.load %arg1[%c0, %c0_0] : memref<8x200xbf16, #tpu.memory_space<vmem>>, vector<8x200xbf16>
    %c0_1 = arith.constant 0 : index
    %c0_2 = arith.constant 0 : index
    %1 = vector.load %arg2[%c0_1, %c0_2] : memref<200x128xbf16, #tpu.memory_space<vmem>>, vector<200x128xbf16>
    %cst = arith.constant dense<0.000000e+00> : vector<8x128xf32>
    %2 = tpu.matmul %0, %1, %cst {dimension_numbers = #tpu.dot_dimension_numbers<[1], [0], [0], [1], [0, 0, 1, 1], [], []>} : vector<8x200xbf16>, vector<200x128xbf16>, vector<8x128xf32> -> vector<8x128xf32>
    %c0_3 = arith.constant 0 : index
    %c0_4 = arith.constant 0 : index
    %3 = vector.load %arg3[%c0_3, %c0_4] : memref<8x128xf32, #tpu.memory_space<vmem>>, vector<8x128xf32>
    tpu.vector_store %arg3[%c0_3, %c0_4], %2 {strides = array<i32>} : memref<8x128xf32, #tpu.memory_space<vmem>>, vector<8x128xf32>,
    %c0_i32 = arith.constant 0 : i32
    %4 = arith.cmpi eq, %arg0, %c0_i32 : i32
    %5 = arith.extui %4 : i1 to i32
    %c0_i32_5 = arith.constant 0 : i32
    %6 = arith.cmpi ne, %5, %c0_i32_5 : i32
    scf.if %6 {
      %cst_16 = arith.constant 0.000000e+00 : f32
      %18 = vector.broadcast %cst_16 : f32 to vector<1x128xf32>
      %c0_17 = arith.constant 0 : index
      %c0_18 = arith.constant 0 : index
      %19 = vector.load %arg4[%c0_17, %c0_18] : memref<1x128xf32, #tpu.memory_space<vmem>>, vector<1x128xf32>
      tpu.vector_store %arg4[%c0_17, %c0_18], %18 {strides = array<i32>} : memref<1x128xf32, #tpu.memory_space<vmem>>, vector<1x128xf32>,
      %cst_19 = arith.constant 0.000000e+00 : f32
      %20 = vector.broadcast %cst_19 : f32 to vector<1x128xf32>
      %c0_20 = arith.constant 0 : index
      %c0_21 = arith.constant 0 : index
      %21 = vector.load %arg5[%c0_20, %c0_21] : memref<1x128xf32, #tpu.memory_space<vmem>>, vector<1x128xf32>
      tpu.vector_store %arg5[%c0_20, %c0_21], %20 {strides = array<i32>} : memref<1x128xf32, #tpu.memory_space<vmem>>, vector<1x128xf32>,
    } else {
    }
    %c0_6 = arith.constant 0 : index
    %c0_7 = arith.constant 0 : index
    %7 = vector.load %arg4[%c0_6, %c0_7] : memref<1x128xf32, #tpu.memory_space<vmem>>, vector<1x128xf32>
    %cst_8 = arith.constant dense<0.000000e+00> : vector<128xf32>
    %8 = vector.multi_reduction <add>, %2, %cst_8 [0] : vector<8x128xf32> to vector<128xf32>
    %9 = vector.shape_cast %8 : vector<128xf32> to vector<1x128xf32>
    %10 = arith.addf %7, %9 : vector<1x128xf32>
    %c0_9 = arith.constant 0 : index
    %c0_10 = arith.constant 0 : index
    %11 = vector.load %arg4[%c0_9, %c0_10] : memref<1x128xf32, #tpu.memory_space<vmem>>, vector<1x128xf32>
    tpu.vector_store %arg4[%c0_9, %c0_10], %10 {strides = array<i32>} : memref<1x128xf32, #tpu.memory_space<vmem>>, vector<1x128xf32>,
    %c0_11 = arith.constant 0 : index
    %c0_12 = arith.constant 0 : index
    %12 = vector.load %arg5[%c0_11, %c0_12] : memref<1x128xf32, #tpu.memory_space<vmem>>, vector<1x128xf32>
    %13 = arith.mulf %2, %2 : vector<8x128xf32>
    %cst_13 = arith.constant dense<0.000000e+00> : vector<128xf32>
    %14 = vector.multi_reduction <add>, %13, %cst_13 [0] : vector<8x128xf32> to vector<128xf32>
    %15 = vector.shape_cast %14 : vector<128xf32> to vector<1x128xf32>
    %16 = arith.addf %12, %15 : vector<1x128xf32>
    %c0_14 = arith.constant 0 : index
    %c0_15 = arith.constant 0 : index
    %17 = vector.load %arg5[%c0_14, %c0_15] : memref<1x128xf32, #tpu.memory_space<vmem>>, vector<1x128xf32>
    tpu.vector_store %arg5[%c0_14, %c0_15], %16 {strides = array<i32>} : memref<1x128xf32, #tpu.memory_space<vmem>>, vector<1x128xf32>,
    return
  }
  func.func @transform_0(%arg0: i32) -> (i32, i32) {
    %c0_i32 = arith.constant 0 : i32
    %c0_i32_0 = arith.constant 0 : i32
    return %arg0, %c0_i32 : i32, i32
  }
  func.func @transform_1(%arg0: i32) -> (i32, i32) {
    %c0_i32 = arith.constant 0 : i32
    %c0_i32_0 = arith.constant 0 : i32
    %c0_i32_1 = arith.constant 0 : i32
    return %c0_i32, %c0_i32_0 : i32, i32
  }
  func.func @transform_2(%arg0: i32) -> (i32, i32) {
    %c0_i32 = arith.constant 0 : i32
    %c0_i32_0 = arith.constant 0 : i32
    return %arg0, %c0_i32 : i32, i32
  }
  func.func @transform_3(%arg0: i32) -> (i32, i32) {
    %c0_i32 = arith.constant 0 : i32
    %c0_i32_0 = arith.constant 0 : i32
    %c0_i32_1 = arith.constant 0 : i32
    return %c0_i32, %c0_i32_0 : i32, i32
  }
  func.func @transform_4(%arg0: i32) -> (i32, i32) {
    %c0_i32 = arith.constant 0 : i32
    %c0_i32_0 = arith.constant 0 : i32
    %c0_i32_1 = arith.constant 0 : i32
    return %c0_i32, %c0_i32_0 : i32, i32
  }
}

module attributes {stable_mosaic.version = 11 : i64} {
  func.func @_mm_bn_kernel(%arg0: i32, %arg1: memref<8x144xbf16, #tpu.memory_space<vmem>>, %arg2: memref<144x128xbf16, #tpu.memory_space<vmem>>, %arg3: memref<8x128xf32, #tpu.memory_space<vmem>>, %arg4: memref<1x128xf32, #tpu.memory_space<vmem>>, %arg5: memref<1x128xf32, #tpu.memory_space<vmem>>) attributes {dimension_semantics = [#tpu.dimension_semantics<arbitrary>], iteration_bounds = array<i64: 1>, scalar_prefetch = 0 : i64, scratch_operands = 0 : i64, tpu.core_type = #tpu.core_type<tc>, window_params = [{transform_indices = @transform_0, window_bounds = array<i64: 8, 144>}, {pipeline_mode = #tpu.pipeline_mode<synchronous>, transform_indices = @transform_1, window_bounds = array<i64: 144, 128>}, {transform_indices = @transform_2, window_bounds = array<i64: 8, 128>}, {pipeline_mode = #tpu.pipeline_mode<synchronous>, transform_indices = @transform_3, window_bounds = array<i64: 1, 128>}, {pipeline_mode = #tpu.pipeline_mode<synchronous>, transform_indices = @transform_4, window_bounds = array<i64: 1, 128>}]} {
    %c0 = arith.constant 0 : index
    %c0_0 = arith.constant 0 : index
    %0 = vector.load %arg1[%c0, %c0_0] : memref<8x144xbf16, #tpu.memory_space<vmem>>, vector<8x144xbf16>
    %c0_1 = arith.constant 0 : index
    %c0_2 = arith.constant 0 : index
    %1 = vector.load %arg2[%c0_1, %c0_2] : memref<144x128xbf16, #tpu.memory_space<vmem>>, vector<144x128xbf16>
    %cst = arith.constant dense<0.000000e+00> : vector<8x128xf32>
    %2 = tpu.matmul %0, %1, %cst {dimension_numbers = #tpu.dot_dimension_numbers<[1], [0], [0], [1], [0, 0, 1, 1], [], []>} : vector<8x144xbf16>, vector<144x128xbf16>, vector<8x128xf32> -> vector<8x128xf32>
    %c0_3 = arith.constant 0 : index
    %c0_4 = arith.constant 0 : index
    %3 = vector.load %arg3[%c0_3, %c0_4] : memref<8x128xf32, #tpu.memory_space<vmem>>, vector<8x128xf32>
    tpu.vector_store %arg3[%c0_3, %c0_4], %2 {strides = array<i32>} : memref<8x128xf32, #tpu.memory_space<vmem>>, vector<8x128xf32>,
    %c0_i32 = arith.constant 0 : i32
    %4 = arith.cmpi eq, %arg0, %c0_i32 : i32
    %5 = arith.extui %4 : i1 to i32
    %c0_i32_5 = arith.constant 0 : i32
    %6 = arith.cmpi ne, %5, %c0_i32_5 : i32
    scf.if %6 {
      %cst_16 = arith.constant 0.000000e+00 : f32
      %18 = vector.broadcast %cst_16 : f32 to vector<1x128xf32>
      %c0_17 = arith.constant 0 : index
      %c0_18 = arith.constant 0 : index
      %19 = vector.load %arg4[%c0_17, %c0_18] : memref<1x128xf32, #tpu.memory_space<vmem>>, vector<1x128xf32>
      tpu.vector_store %arg4[%c0_17, %c0_18], %18 {strides = array<i32>} : memref<1x128xf32, #tpu.memory_space<vmem>>, vector<1x128xf32>,
      %cst_19 = arith.constant 0.000000e+00 : f32
      %20 = vector.broadcast %cst_19 : f32 to vector<1x128xf32>
      %c0_20 = arith.constant 0 : index
      %c0_21 = arith.constant 0 : index
      %21 = vector.load %arg5[%c0_20, %c0_21] : memref<1x128xf32, #tpu.memory_space<vmem>>, vector<1x128xf32>
      tpu.vector_store %arg5[%c0_20, %c0_21], %20 {strides = array<i32>} : memref<1x128xf32, #tpu.memory_space<vmem>>, vector<1x128xf32>,
    } else {
    }
    %c0_6 = arith.constant 0 : index
    %c0_7 = arith.constant 0 : index
    %7 = vector.load %arg4[%c0_6, %c0_7] : memref<1x128xf32, #tpu.memory_space<vmem>>, vector<1x128xf32>
    %cst_8 = arith.constant dense<0.000000e+00> : vector<128xf32>
    %8 = vector.multi_reduction <add>, %2, %cst_8 [0] : vector<8x128xf32> to vector<128xf32>
    %9 = vector.shape_cast %8 : vector<128xf32> to vector<1x128xf32>
    %10 = arith.addf %7, %9 : vector<1x128xf32>
    %c0_9 = arith.constant 0 : index
    %c0_10 = arith.constant 0 : index
    %11 = vector.load %arg4[%c0_9, %c0_10] : memref<1x128xf32, #tpu.memory_space<vmem>>, vector<1x128xf32>
    tpu.vector_store %arg4[%c0_9, %c0_10], %10 {strides = array<i32>} : memref<1x128xf32, #tpu.memory_space<vmem>>, vector<1x128xf32>,
    %c0_11 = arith.constant 0 : index
    %c0_12 = arith.constant 0 : index
    %12 = vector.load %arg5[%c0_11, %c0_12] : memref<1x128xf32, #tpu.memory_space<vmem>>, vector<1x128xf32>
    %13 = arith.mulf %2, %2 : vector<8x128xf32>
    %cst_13 = arith.constant dense<0.000000e+00> : vector<128xf32>
    %14 = vector.multi_reduction <add>, %13, %cst_13 [0] : vector<8x128xf32> to vector<128xf32>
    %15 = vector.shape_cast %14 : vector<128xf32> to vector<1x128xf32>
    %16 = arith.addf %12, %15 : vector<1x128xf32>
    %c0_14 = arith.constant 0 : index
    %c0_15 = arith.constant 0 : index
    %17 = vector.load %arg5[%c0_14, %c0_15] : memref<1x128xf32, #tpu.memory_space<vmem>>, vector<1x128xf32>
    tpu.vector_store %arg5[%c0_14, %c0_15], %16 {strides = array<i32>} : memref<1x128xf32, #tpu.memory_space<vmem>>, vector<1x128xf32>,
    return
  }
  func.func @transform_0(%arg0: i32) -> (i32, i32) {
    %c0_i32 = arith.constant 0 : i32
    %c0_i32_0 = arith.constant 0 : i32
    return %arg0, %c0_i32 : i32, i32
  }
  func.func @transform_1(%arg0: i32) -> (i32, i32) {
    %c0_i32 = arith.constant 0 : i32
    %c0_i32_0 = arith.constant 0 : i32
    %c0_i32_1 = arith.constant 0 : i32
    return %c0_i32, %c0_i32_0 : i32, i32
  }
  func.func @transform_2(%arg0: i32) -> (i32, i32) {
    %c0_i32 = arith.constant 0 : i32
    %c0_i32_0 = arith.constant 0 : i32
    return %arg0, %c0_i32 : i32, i32
  }
  func.func @transform_3(%arg0: i32) -> (i32, i32) {
    %c0_i32 = arith.constant 0 : i32
    %c0_i32_0 = arith.constant 0 : i32
    %c0_i32_1 = arith.constant 0 : i32
    return %c0_i32, %c0_i32_0 : i32, i32
  }
  func.func @transform_4(%arg0: i32) -> (i32, i32) {
    %c0_i32 = arith.constant 0 : i32
    %c0_i32_0 = arith.constant 0 : i32
    %c0_i32_1 = arith.constant 0 : i32
    return %c0_i32, %c0_i32_0 : i32, i32
  }
}

module attributes {stable_mosaic.version = 11 : i64} {
  func.func @_mm_bn_kernel(%arg0: i32, %arg1: memref<32x144xbf16, #tpu.memory_space<vmem>>, %arg2: memref<144x128xbf16, #tpu.memory_space<vmem>>, %arg3: memref<32x128xf32, #tpu.memory_space<vmem>>, %arg4: memref<1x128xf32, #tpu.memory_space<vmem>>, %arg5: memref<1x128xf32, #tpu.memory_space<vmem>>) attributes {dimension_semantics = [#tpu.dimension_semantics<arbitrary>], iteration_bounds = array<i64: 1>, scalar_prefetch = 0 : i64, scratch_operands = 0 : i64, tpu.core_type = #tpu.core_type<tc>, window_params = [{transform_indices = @transform_0, window_bounds = array<i64: 32, 144>}, {pipeline_mode = #tpu.pipeline_mode<synchronous>, transform_indices = @transform_1, window_bounds = array<i64: 144, 128>}, {transform_indices = @transform_2, window_bounds = array<i64: 32, 128>}, {pipeline_mode = #tpu.pipeline_mode<synchronous>, transform_indices = @transform_3, window_bounds = array<i64: 1, 128>}, {pipeline_mode = #tpu.pipeline_mode<synchronous>, transform_indices = @transform_4, window_bounds = array<i64: 1, 128>}]} {
    %c0 = arith.constant 0 : index
    %c0_0 = arith.constant 0 : index
    %0 = vector.load %arg1[%c0, %c0_0] : memref<32x144xbf16, #tpu.memory_space<vmem>>, vector<32x144xbf16>
    %c0_1 = arith.constant 0 : index
    %c0_2 = arith.constant 0 : index
    %1 = vector.load %arg2[%c0_1, %c0_2] : memref<144x128xbf16, #tpu.memory_space<vmem>>, vector<144x128xbf16>
    %cst = arith.constant dense<0.000000e+00> : vector<32x128xf32>
    %2 = tpu.matmul %0, %1, %cst {dimension_numbers = #tpu.dot_dimension_numbers<[1], [0], [0], [1], [0, 0, 1, 1], [], []>} : vector<32x144xbf16>, vector<144x128xbf16>, vector<32x128xf32> -> vector<32x128xf32>
    %c0_3 = arith.constant 0 : index
    %c0_4 = arith.constant 0 : index
    %3 = vector.load %arg3[%c0_3, %c0_4] : memref<32x128xf32, #tpu.memory_space<vmem>>, vector<32x128xf32>
    tpu.vector_store %arg3[%c0_3, %c0_4], %2 {strides = array<i32>} : memref<32x128xf32, #tpu.memory_space<vmem>>, vector<32x128xf32>,
    %c0_i32 = arith.constant 0 : i32
    %4 = arith.cmpi eq, %arg0, %c0_i32 : i32
    %5 = arith.extui %4 : i1 to i32
    %c0_i32_5 = arith.constant 0 : i32
    %6 = arith.cmpi ne, %5, %c0_i32_5 : i32
    scf.if %6 {
      %cst_16 = arith.constant 0.000000e+00 : f32
      %18 = vector.broadcast %cst_16 : f32 to vector<1x128xf32>
      %c0_17 = arith.constant 0 : index
      %c0_18 = arith.constant 0 : index
      %19 = vector.load %arg4[%c0_17, %c0_18] : memref<1x128xf32, #tpu.memory_space<vmem>>, vector<1x128xf32>
      tpu.vector_store %arg4[%c0_17, %c0_18], %18 {strides = array<i32>} : memref<1x128xf32, #tpu.memory_space<vmem>>, vector<1x128xf32>,
      %cst_19 = arith.constant 0.000000e+00 : f32
      %20 = vector.broadcast %cst_19 : f32 to vector<1x128xf32>
      %c0_20 = arith.constant 0 : index
      %c0_21 = arith.constant 0 : index
      %21 = vector.load %arg5[%c0_20, %c0_21] : memref<1x128xf32, #tpu.memory_space<vmem>>, vector<1x128xf32>
      tpu.vector_store %arg5[%c0_20, %c0_21], %20 {strides = array<i32>} : memref<1x128xf32, #tpu.memory_space<vmem>>, vector<1x128xf32>,
    } else {
    }
    %c0_6 = arith.constant 0 : index
    %c0_7 = arith.constant 0 : index
    %7 = vector.load %arg4[%c0_6, %c0_7] : memref<1x128xf32, #tpu.memory_space<vmem>>, vector<1x128xf32>
    %cst_8 = arith.constant dense<0.000000e+00> : vector<128xf32>
    %8 = vector.multi_reduction <add>, %2, %cst_8 [0] : vector<32x128xf32> to vector<128xf32>
    %9 = vector.shape_cast %8 : vector<128xf32> to vector<1x128xf32>
    %10 = arith.addf %7, %9 : vector<1x128xf32>
    %c0_9 = arith.constant 0 : index
    %c0_10 = arith.constant 0 : index
    %11 = vector.load %arg4[%c0_9, %c0_10] : memref<1x128xf32, #tpu.memory_space<vmem>>, vector<1x128xf32>
    tpu.vector_store %arg4[%c0_9, %c0_10], %10 {strides = array<i32>} : memref<1x128xf32, #tpu.memory_space<vmem>>, vector<1x128xf32>,
    %c0_11 = arith.constant 0 : index
    %c0_12 = arith.constant 0 : index
    %12 = vector.load %arg5[%c0_11, %c0_12] : memref<1x128xf32, #tpu.memory_space<vmem>>, vector<1x128xf32>
    %13 = arith.mulf %2, %2 : vector<32x128xf32>
    %cst_13 = arith.constant dense<0.000000e+00> : vector<128xf32>
    %14 = vector.multi_reduction <add>, %13, %cst_13 [0] : vector<32x128xf32> to vector<128xf32>
    %15 = vector.shape_cast %14 : vector<128xf32> to vector<1x128xf32>
    %16 = arith.addf %12, %15 : vector<1x128xf32>
    %c0_14 = arith.constant 0 : index
    %c0_15 = arith.constant 0 : index
    %17 = vector.load %arg5[%c0_14, %c0_15] : memref<1x128xf32, #tpu.memory_space<vmem>>, vector<1x128xf32>
    tpu.vector_store %arg5[%c0_14, %c0_15], %16 {strides = array<i32>} : memref<1x128xf32, #tpu.memory_space<vmem>>, vector<1x128xf32>,
    return
  }
  func.func @transform_0(%arg0: i32) -> (i32, i32) {
    %c0_i32 = arith.constant 0 : i32
    %c0_i32_0 = arith.constant 0 : i32
    return %arg0, %c0_i32 : i32, i32
  }
  func.func @transform_1(%arg0: i32) -> (i32, i32) {
    %c0_i32 = arith.constant 0 : i32
    %c0_i32_0 = arith.constant 0 : i32
    %c0_i32_1 = arith.constant 0 : i32
    return %c0_i32, %c0_i32_0 : i32, i32
  }
  func.func @transform_2(%arg0: i32) -> (i32, i32) {
    %c0_i32 = arith.constant 0 : i32
    %c0_i32_0 = arith.constant 0 : i32
    return %arg0, %c0_i32 : i32, i32
  }
  func.func @transform_3(%arg0: i32) -> (i32, i32) {
    %c0_i32 = arith.constant 0 : i32
    %c0_i32_0 = arith.constant 0 : i32
    %c0_i32_1 = arith.constant 0 : i32
    return %c0_i32, %c0_i32_0 : i32, i32
  }
  func.func @transform_4(%arg0: i32) -> (i32, i32) {
    %c0_i32 = arith.constant 0 : i32
    %c0_i32_0 = arith.constant 0 : i32
    %c0_i32_1 = arith.constant 0 : i32
    return %c0_i32, %c0_i32_0 : i32, i32
  }
}

module attributes {stable_mosaic.version = 11 : i64} {
  func.func @_mm_bn_kernel(%arg0: i32, %arg1: memref<128x72xbf16, #tpu.memory_space<vmem>>, %arg2: memref<72x128xbf16, #tpu.memory_space<vmem>>, %arg3: memref<128x128xf32, #tpu.memory_space<vmem>>, %arg4: memref<1x128xf32, #tpu.memory_space<vmem>>, %arg5: memref<1x128xf32, #tpu.memory_space<vmem>>) attributes {dimension_semantics = [#tpu.dimension_semantics<arbitrary>], iteration_bounds = array<i64: 1>, scalar_prefetch = 0 : i64, scratch_operands = 0 : i64, tpu.core_type = #tpu.core_type<tc>, window_params = [{transform_indices = @transform_0, window_bounds = array<i64: 128, 72>}, {pipeline_mode = #tpu.pipeline_mode<synchronous>, transform_indices = @transform_1, window_bounds = array<i64: 72, 128>}, {transform_indices = @transform_2, window_bounds = array<i64: 128, 128>}, {pipeline_mode = #tpu.pipeline_mode<synchronous>, transform_indices = @transform_3, window_bounds = array<i64: 1, 128>}, {pipeline_mode = #tpu.pipeline_mode<synchronous>, transform_indices = @transform_4, window_bounds = array<i64: 1, 128>}]} {
    %c0 = arith.constant 0 : index
    %c0_0 = arith.constant 0 : index
    %0 = vector.load %arg1[%c0, %c0_0] : memref<128x72xbf16, #tpu.memory_space<vmem>>, vector<128x72xbf16>
    %c0_1 = arith.constant 0 : index
    %c0_2 = arith.constant 0 : index
    %1 = vector.load %arg2[%c0_1, %c0_2] : memref<72x128xbf16, #tpu.memory_space<vmem>>, vector<72x128xbf16>
    %cst = arith.constant dense<0.000000e+00> : vector<128x128xf32>
    %2 = tpu.matmul %0, %1, %cst {dimension_numbers = #tpu.dot_dimension_numbers<[1], [0], [0], [1], [0, 0, 1, 1], [], []>} : vector<128x72xbf16>, vector<72x128xbf16>, vector<128x128xf32> -> vector<128x128xf32>
    %c0_3 = arith.constant 0 : index
    %c0_4 = arith.constant 0 : index
    %3 = vector.load %arg3[%c0_3, %c0_4] : memref<128x128xf32, #tpu.memory_space<vmem>>, vector<128x128xf32>
    tpu.vector_store %arg3[%c0_3, %c0_4], %2 {strides = array<i32>} : memref<128x128xf32, #tpu.memory_space<vmem>>, vector<128x128xf32>,
    %c0_i32 = arith.constant 0 : i32
    %4 = arith.cmpi eq, %arg0, %c0_i32 : i32
    %5 = arith.extui %4 : i1 to i32
    %c0_i32_5 = arith.constant 0 : i32
    %6 = arith.cmpi ne, %5, %c0_i32_5 : i32
    scf.if %6 {
      %cst_16 = arith.constant 0.000000e+00 : f32
      %18 = vector.broadcast %cst_16 : f32 to vector<1x128xf32>
      %c0_17 = arith.constant 0 : index
      %c0_18 = arith.constant 0 : index
      %19 = vector.load %arg4[%c0_17, %c0_18] : memref<1x128xf32, #tpu.memory_space<vmem>>, vector<1x128xf32>
      tpu.vector_store %arg4[%c0_17, %c0_18], %18 {strides = array<i32>} : memref<1x128xf32, #tpu.memory_space<vmem>>, vector<1x128xf32>,
      %cst_19 = arith.constant 0.000000e+00 : f32
      %20 = vector.broadcast %cst_19 : f32 to vector<1x128xf32>
      %c0_20 = arith.constant 0 : index
      %c0_21 = arith.constant 0 : index
      %21 = vector.load %arg5[%c0_20, %c0_21] : memref<1x128xf32, #tpu.memory_space<vmem>>, vector<1x128xf32>
      tpu.vector_store %arg5[%c0_20, %c0_21], %20 {strides = array<i32>} : memref<1x128xf32, #tpu.memory_space<vmem>>, vector<1x128xf32>,
    } else {
    }
    %c0_6 = arith.constant 0 : index
    %c0_7 = arith.constant 0 : index
    %7 = vector.load %arg4[%c0_6, %c0_7] : memref<1x128xf32, #tpu.memory_space<vmem>>, vector<1x128xf32>
    %cst_8 = arith.constant dense<0.000000e+00> : vector<128xf32>
    %8 = vector.multi_reduction <add>, %2, %cst_8 [0] : vector<128x128xf32> to vector<128xf32>
    %9 = vector.shape_cast %8 : vector<128xf32> to vector<1x128xf32>
    %10 = arith.addf %7, %9 : vector<1x128xf32>
    %c0_9 = arith.constant 0 : index
    %c0_10 = arith.constant 0 : index
    %11 = vector.load %arg4[%c0_9, %c0_10] : memref<1x128xf32, #tpu.memory_space<vmem>>, vector<1x128xf32>
    tpu.vector_store %arg4[%c0_9, %c0_10], %10 {strides = array<i32>} : memref<1x128xf32, #tpu.memory_space<vmem>>, vector<1x128xf32>,
    %c0_11 = arith.constant 0 : index
    %c0_12 = arith.constant 0 : index
    %12 = vector.load %arg5[%c0_11, %c0_12] : memref<1x128xf32, #tpu.memory_space<vmem>>, vector<1x128xf32>
    %13 = arith.mulf %2, %2 : vector<128x128xf32>
    %cst_13 = arith.constant dense<0.000000e+00> : vector<128xf32>
    %14 = vector.multi_reduction <add>, %13, %cst_13 [0] : vector<128x128xf32> to vector<128xf32>
    %15 = vector.shape_cast %14 : vector<128xf32> to vector<1x128xf32>
    %16 = arith.addf %12, %15 : vector<1x128xf32>
    %c0_14 = arith.constant 0 : index
    %c0_15 = arith.constant 0 : index
    %17 = vector.load %arg5[%c0_14, %c0_15] : memref<1x128xf32, #tpu.memory_space<vmem>>, vector<1x128xf32>
    tpu.vector_store %arg5[%c0_14, %c0_15], %16 {strides = array<i32>} : memref<1x128xf32, #tpu.memory_space<vmem>>, vector<1x128xf32>,
    return
  }
  func.func @transform_0(%arg0: i32) -> (i32, i32) {
    %c0_i32 = arith.constant 0 : i32
    %c0_i32_0 = arith.constant 0 : i32
    return %arg0, %c0_i32 : i32, i32
  }
  func.func @transform_1(%arg0: i32) -> (i32, i32) {
    %c0_i32 = arith.constant 0 : i32
    %c0_i32_0 = arith.constant 0 : i32
    %c0_i32_1 = arith.constant 0 : i32
    return %c0_i32, %c0_i32_0 : i32, i32
  }
  func.func @transform_2(%arg0: i32) -> (i32, i32) {
    %c0_i32 = arith.constant 0 : i32
    %c0_i32_0 = arith.constant 0 : i32
    return %arg0, %c0_i32 : i32, i32
  }
  func.func @transform_3(%arg0: i32) -> (i32, i32) {
    %c0_i32 = arith.constant 0 : i32
    %c0_i32_0 = arith.constant 0 : i32
    %c0_i32_1 = arith.constant 0 : i32
    return %c0_i32, %c0_i32_0 : i32, i32
  }
  func.func @transform_4(%arg0: i32) -> (i32, i32) {
    %c0_i32 = arith.constant 0 : i32
    %c0_i32_0 = arith.constant 0 : i32
    %c0_i32_1 = arith.constant 0 : i32
    return %c0_i32, %c0_i32_0 : i32, i32
  }
}

module attributes {stable_mosaic.version = 11 : i64} {
  func.func @_mm_bias_act_kernel(%arg0: i32, %arg1: memref<512x4xbf16, #tpu.memory_space<vmem>>, %arg2: memref<4x128xbf16, #tpu.memory_space<vmem>>, %arg3: memref<1x128xf32, #tpu.memory_space<vmem>>, %arg4: memref<512x128xf32, #tpu.memory_space<vmem>>) attributes {dimension_semantics = [#tpu.dimension_semantics<parallel>], iteration_bounds = array<i64: 1>, scalar_prefetch = 0 : i64, scratch_operands = 0 : i64, tpu.core_type = #tpu.core_type<tc>, window_params = [{transform_indices = @transform_0, window_bounds = array<i64: 512, 4>}, {pipeline_mode = #tpu.pipeline_mode<synchronous>, transform_indices = @transform_1, window_bounds = array<i64: 4, 128>}, {pipeline_mode = #tpu.pipeline_mode<synchronous>, transform_indices = @transform_2, window_bounds = array<i64: 1, 128>}, {transform_indices = @transform_3, window_bounds = array<i64: 512, 128>}]} {
    %c0 = arith.constant 0 : index
    %c0_0 = arith.constant 0 : index
    %0 = vector.load %arg1[%c0, %c0_0] : memref<512x4xbf16, #tpu.memory_space<vmem>>, vector<512x4xbf16>
    %c0_1 = arith.constant 0 : index
    %c0_2 = arith.constant 0 : index
    %1 = vector.load %arg2[%c0_1, %c0_2] : memref<4x128xbf16, #tpu.memory_space<vmem>>, vector<4x128xbf16>
    %cst = arith.constant dense<0.000000e+00> : vector<512x128xf32>
    %2 = tpu.matmul %0, %1, %cst {dimension_numbers = #tpu.dot_dimension_numbers<[1], [0], [0], [1], [0, 0, 1, 1], [], []>} : vector<512x4xbf16>, vector<4x128xbf16>, vector<512x128xf32> -> vector<512x128xf32>
    %c0_3 = arith.constant 0 : index
    %c0_4 = arith.constant 0 : index
    %3 = vector.load %arg3[%c0_3, %c0_4] : memref<1x128xf32, #tpu.memory_space<vmem>>, vector<1x128xf32>
    %4 = vector.broadcast %3 : vector<1x128xf32> to vector<512x128xf32>
    %5 = arith.addf %2, %4 : vector<512x128xf32>
    %cst_5 = arith.constant 0.000000e+00 : f32
    %6 = vector.broadcast %cst_5 : f32 to vector<512x128xf32>
    %7 = arith.cmpf oge, %5, %6 : vector<512x128xf32>
    %cst_6 = arith.constant 0.00999999977 : f32
    %8 = vector.broadcast %cst_6 : f32 to vector<512x128xf32>
    %9 = arith.mulf %8, %5 : vector<512x128xf32>
    %10 = arith.select %7, %5, %9 : vector<512x128xi1>, vector<512x128xf32>
    %c0_7 = arith.constant 0 : index
    %c0_8 = arith.constant 0 : index
    %11 = vector.load %arg4[%c0_7, %c0_8] : memref<512x128xf32, #tpu.memory_space<vmem>>, vector<512x128xf32>
    tpu.vector_store %arg4[%c0_7, %c0_8], %10 {strides = array<i32>} : memref<512x128xf32, #tpu.memory_space<vmem>>, vector<512x128xf32>,
    return
  }
  func.func @transform_0(%arg0: i32) -> (i32, i32) {
    %c0_i32 = arith.constant 0 : i32
    %c0_i32_0 = arith.constant 0 : i32
    return %arg0, %c0_i32 : i32, i32
  }
  func.func @transform_1(%arg0: i32) -> (i32, i32) {
    %c0_i32 = arith.constant 0 : i32
    %c0_i32_0 = arith.constant 0 : i32
    %c0_i32_1 = arith.constant 0 : i32
    return %c0_i32, %c0_i32_0 : i32, i32
  }
  func.func @transform_2(%arg0: i32) -> (i32, i32) {
    %c0_i32 = arith.constant 0 : i32
    %c0_i32_0 = arith.constant 0 : i32
    %c0_i32_1 = arith.constant 0 : i32
    return %c0_i32, %c0_i32_0 : i32, i32
  }
  func.func @transform_3(%arg0: i32) -> (i32, i32) {
    %c0_i32 = arith.constant 0 : i32
    %c0_i32_0 = arith.constant 0 : i32
    return %arg0, %c0_i32 : i32, i32
  }
}

module attributes {stable_mosaic.version = 11 : i64} {
  func.func @_mm_bias_act_kernel(%arg0: i32, %arg1: memref<512x8xbf16, #tpu.memory_space<vmem>>, %arg2: memref<8x128xbf16, #tpu.memory_space<vmem>>, %arg3: memref<1x128xf32, #tpu.memory_space<vmem>>, %arg4: memref<512x128xf32, #tpu.memory_space<vmem>>) attributes {dimension_semantics = [#tpu.dimension_semantics<parallel>], iteration_bounds = array<i64: 1>, scalar_prefetch = 0 : i64, scratch_operands = 0 : i64, tpu.core_type = #tpu.core_type<tc>, window_params = [{transform_indices = @transform_0, window_bounds = array<i64: 512, 8>}, {pipeline_mode = #tpu.pipeline_mode<synchronous>, transform_indices = @transform_1, window_bounds = array<i64: 8, 128>}, {pipeline_mode = #tpu.pipeline_mode<synchronous>, transform_indices = @transform_2, window_bounds = array<i64: 1, 128>}, {transform_indices = @transform_3, window_bounds = array<i64: 512, 128>}]} {
    %c0 = arith.constant 0 : index
    %c0_0 = arith.constant 0 : index
    %0 = vector.load %arg1[%c0, %c0_0] : memref<512x8xbf16, #tpu.memory_space<vmem>>, vector<512x8xbf16>
    %c0_1 = arith.constant 0 : index
    %c0_2 = arith.constant 0 : index
    %1 = vector.load %arg2[%c0_1, %c0_2] : memref<8x128xbf16, #tpu.memory_space<vmem>>, vector<8x128xbf16>
    %cst = arith.constant dense<0.000000e+00> : vector<512x128xf32>
    %2 = tpu.matmul %0, %1, %cst {dimension_numbers = #tpu.dot_dimension_numbers<[1], [0], [0], [1], [0, 0, 1, 1], [], []>} : vector<512x8xbf16>, vector<8x128xbf16>, vector<512x128xf32> -> vector<512x128xf32>
    %c0_3 = arith.constant 0 : index
    %c0_4 = arith.constant 0 : index
    %3 = vector.load %arg3[%c0_3, %c0_4] : memref<1x128xf32, #tpu.memory_space<vmem>>, vector<1x128xf32>
    %4 = vector.broadcast %3 : vector<1x128xf32> to vector<512x128xf32>
    %5 = arith.addf %2, %4 : vector<512x128xf32>
    %cst_5 = arith.constant 0.000000e+00 : f32
    %6 = vector.broadcast %cst_5 : f32 to vector<512x128xf32>
    %7 = arith.cmpf oge, %5, %6 : vector<512x128xf32>
    %cst_6 = arith.constant 0.00999999977 : f32
    %8 = vector.broadcast %cst_6 : f32 to vector<512x128xf32>
    %9 = arith.mulf %8, %5 : vector<512x128xf32>
    %10 = arith.select %7, %5, %9 : vector<512x128xi1>, vector<512x128xf32>
    %c0_7 = arith.constant 0 : index
    %c0_8 = arith.constant 0 : index
    %11 = vector.load %arg4[%c0_7, %c0_8] : memref<512x128xf32, #tpu.memory_space<vmem>>, vector<512x128xf32>
    tpu.vector_store %arg4[%c0_7, %c0_8], %10 {strides = array<i32>} : memref<512x128xf32, #tpu.memory_space<vmem>>, vector<512x128xf32>,
    return
  }
  func.func @transform_0(%arg0: i32) -> (i32, i32) {
    %c0_i32 = arith.constant 0 : i32
    %c0_i32_0 = arith.constant 0 : i32
    return %arg0, %c0_i32 : i32, i32
  }
  func.func @transform_1(%arg0: i32) -> (i32, i32) {
    %c0_i32 = arith.constant 0 : i32
    %c0_i32_0 = arith.constant 0 : i32
    %c0_i32_1 = arith.constant 0 : i32
    return %c0_i32, %c0_i32_0 : i32, i32
  }
  func.func @transform_2(%arg0: i32) -> (i32, i32) {
    %c0_i32 = arith.constant 0 : i32
    %c0_i32_0 = arith.constant 0 : i32
    %c0_i32_1 = arith.constant 0 : i32
    return %c0_i32, %c0_i32_0 : i32, i32
  }
  func.func @transform_3(%arg0: i32) -> (i32, i32) {
    %c0_i32 = arith.constant 0 : i32
    %c0_i32_0 = arith.constant 0 : i32
    return %arg0, %c0_i32 : i32, i32
  }
}

module attributes {stable_mosaic.version = 11 : i64} {
  func.func @_mm_bias_act_kernel(%arg0: i32, %arg1: memref<512x6xbf16, #tpu.memory_space<vmem>>, %arg2: memref<6x128xbf16, #tpu.memory_space<vmem>>, %arg3: memref<1x128xf32, #tpu.memory_space<vmem>>, %arg4: memref<512x128xf32, #tpu.memory_space<vmem>>) attributes {dimension_semantics = [#tpu.dimension_semantics<parallel>], iteration_bounds = array<i64: 1>, scalar_prefetch = 0 : i64, scratch_operands = 0 : i64, tpu.core_type = #tpu.core_type<tc>, window_params = [{transform_indices = @transform_0, window_bounds = array<i64: 512, 6>}, {pipeline_mode = #tpu.pipeline_mode<synchronous>, transform_indices = @transform_1, window_bounds = array<i64: 6, 128>}, {pipeline_mode = #tpu.pipeline_mode<synchronous>, transform_indices = @transform_2, window_bounds = array<i64: 1, 128>}, {transform_indices = @transform_3, window_bounds = array<i64: 512, 128>}]} {
    %c0 = arith.constant 0 : index
    %c0_0 = arith.constant 0 : index
    %0 = vector.load %arg1[%c0, %c0_0] : memref<512x6xbf16, #tpu.memory_space<vmem>>, vector<512x6xbf16>
    %c0_1 = arith.constant 0 : index
    %c0_2 = arith.constant 0 : index
    %1 = vector.load %arg2[%c0_1, %c0_2] : memref<6x128xbf16, #tpu.memory_space<vmem>>, vector<6x128xbf16>
    %cst = arith.constant dense<0.000000e+00> : vector<512x128xf32>
    %2 = tpu.matmul %0, %1, %cst {dimension_numbers = #tpu.dot_dimension_numbers<[1], [0], [0], [1], [0, 0, 1, 1], [], []>} : vector<512x6xbf16>, vector<6x128xbf16>, vector<512x128xf32> -> vector<512x128xf32>
    %c0_3 = arith.constant 0 : index
    %c0_4 = arith.constant 0 : index
    %3 = vector.load %arg3[%c0_3, %c0_4] : memref<1x128xf32, #tpu.memory_space<vmem>>, vector<1x128xf32>
    %4 = vector.broadcast %3 : vector<1x128xf32> to vector<512x128xf32>
    %5 = arith.addf %2, %4 : vector<512x128xf32>
    %6 = math.tanh %5 : vector<512x128xf32>
    %c0_5 = arith.constant 0 : index
    %c0_6 = arith.constant 0 : index
    %7 = vector.load %arg4[%c0_5, %c0_6] : memref<512x128xf32, #tpu.memory_space<vmem>>, vector<512x128xf32>
    tpu.vector_store %arg4[%c0_5, %c0_6], %6 {strides = array<i32>} : memref<512x128xf32, #tpu.memory_space<vmem>>, vector<512x128xf32>,
    return
  }
  func.func @transform_0(%arg0: i32) -> (i32, i32) {
    %c0_i32 = arith.constant 0 : i32
    %c0_i32_0 = arith.constant 0 : i32
    return %arg0, %c0_i32 : i32, i32
  }
  func.func @transform_1(%arg0: i32) -> (i32, i32) {
    %c0_i32 = arith.constant 0 : i32
    %c0_i32_0 = arith.constant 0 : i32
    %c0_i32_1 = arith.constant 0 : i32
    return %c0_i32, %c0_i32_0 : i32, i32
  }
  func.func @transform_2(%arg0: i32) -> (i32, i32) {
    %c0_i32 = arith.constant 0 : i32
    %c0_i32_0 = arith.constant 0 : i32
    %c0_i32_1 = arith.constant 0 : i32
    return %c0_i32, %c0_i32_0 : i32, i32
  }
  func.func @transform_3(%arg0: i32) -> (i32, i32) {
    %c0_i32 = arith.constant 0 : i32
    %c0_i32_0 = arith.constant 0 : i32
    return %arg0, %c0_i32 : i32, i32
  }
}

module attributes {stable_mosaic.version = 11 : i64} {
  func.func @_mm_bias_act_kernel(%arg0: i32, %arg1: memref<8x32xbf16, #tpu.memory_space<vmem>>, %arg2: memref<32x128xbf16, #tpu.memory_space<vmem>>, %arg3: memref<1x128xf32, #tpu.memory_space<vmem>>, %arg4: memref<8x128xf32, #tpu.memory_space<vmem>>) attributes {dimension_semantics = [#tpu.dimension_semantics<parallel>], iteration_bounds = array<i64: 1>, scalar_prefetch = 0 : i64, scratch_operands = 0 : i64, tpu.core_type = #tpu.core_type<tc>, window_params = [{transform_indices = @transform_0, window_bounds = array<i64: 8, 32>}, {pipeline_mode = #tpu.pipeline_mode<synchronous>, transform_indices = @transform_1, window_bounds = array<i64: 32, 128>}, {pipeline_mode = #tpu.pipeline_mode<synchronous>, transform_indices = @transform_2, window_bounds = array<i64: 1, 128>}, {transform_indices = @transform_3, window_bounds = array<i64: 8, 128>}]} {
    %c0 = arith.constant 0 : index
    %c0_0 = arith.constant 0 : index
    %0 = vector.load %arg1[%c0, %c0_0] : memref<8x32xbf16, #tpu.memory_space<vmem>>, vector<8x32xbf16>
    %c0_1 = arith.constant 0 : index
    %c0_2 = arith.constant 0 : index
    %1 = vector.load %arg2[%c0_1, %c0_2] : memref<32x128xbf16, #tpu.memory_space<vmem>>, vector<32x128xbf16>
    %cst = arith.constant dense<0.000000e+00> : vector<8x128xf32>
    %2 = tpu.matmul %0, %1, %cst {dimension_numbers = #tpu.dot_dimension_numbers<[1], [0], [0], [1], [0, 0, 1, 1], [], []>} : vector<8x32xbf16>, vector<32x128xbf16>, vector<8x128xf32> -> vector<8x128xf32>
    %c0_3 = arith.constant 0 : index
    %c0_4 = arith.constant 0 : index
    %3 = vector.load %arg3[%c0_3, %c0_4] : memref<1x128xf32, #tpu.memory_space<vmem>>, vector<1x128xf32>
    %4 = vector.broadcast %3 : vector<1x128xf32> to vector<8x128xf32>
    %5 = arith.addf %2, %4 : vector<8x128xf32>
    %c0_5 = arith.constant 0 : index
    %c0_6 = arith.constant 0 : index
    %6 = vector.load %arg4[%c0_5, %c0_6] : memref<8x128xf32, #tpu.memory_space<vmem>>, vector<8x128xf32>
    tpu.vector_store %arg4[%c0_5, %c0_6], %5 {strides = array<i32>} : memref<8x128xf32, #tpu.memory_space<vmem>>, vector<8x128xf32>,
    return
  }
  func.func @transform_0(%arg0: i32) -> (i32, i32) {
    %c0_i32 = arith.constant 0 : i32
    %c0_i32_0 = arith.constant 0 : i32
    return %arg0, %c0_i32 : i32, i32
  }
  func.func @transform_1(%arg0: i32) -> (i32, i32) {
    %c0_i32 = arith.constant 0 : i32
    %c0_i32_0 = arith.constant 0 : i32
    %c0_i32_1 = arith.constant 0 : i32
    return %c0_i32, %c0_i32_0 : i32, i32
  }
  func.func @transform_2(%arg0: i32) -> (i32, i32) {
    %c0_i32 = arith.constant 0 : i32
    %c0_i32_0 = arith.constant 0 : i32
    %c0_i32_1 = arith.constant 0 : i32
    return %c0_i32, %c0_i32_0 : i32, i32
  }
  func.func @transform_3(%arg0: i32) -> (i32, i32) {
    %c0_i32 = arith.constant 0 : i32
    %c0_i32_0 = arith.constant 0 : i32
    return %arg0, %c0_i32 : i32, i32
  }
}

</mosaic_0001>

<bundles_post_ra>
// kernel: local_feddis_forward.32
= control target key start
LH: loop header
LB: loop body
LE: loop exit
PB: predicated region body
PF: predicated region fallthrough
CT: control target
= control target key end

     0   :  { %s305_s0 = inlined_call_operand.vmem [shape: f32[128,128], index: 0, kind: input, shape index: {}]   ;;  %s306_s1 = inlined_call_operand.vmem [shape: f32[1,128], index: 1, kind: input, shape index: {}]   ;;  %s307_s2 = inlined_call_operand.vmem [shape: f32[1,128], index: 2, kind: input, shape index: {}]   ;;  %s308_s3 = inlined_call_operand.vmem [shape: f32[128,128], index: 3, kind: output, shape index: {}]  }
   0x1   :  { %v14_v0 = vld [vmem:[%s305_s0] sm:$0xff]  ;;  %v15_v4 = vld [vmem:[%s305_s0 + $0x8] sm:$0xff]  ;;  %v16_v5 = vld [vmem:[%s305_s0 + $0x10] sm:$0xff] }
   0x2   :  { %v172_v1 = vld [vmem:[%s306_s1] ss:$0 sm:$0xff]  ;;  %v17_v6 = vld [vmem:[%s305_s0 + $0x18] sm:$0xff]  ;;  %v19_v11 = vld [vmem:[%s305_s0 + $0x28] sm:$0xff] }
   0x3   :  { %v177_v2 = vld [vmem:[%s307_s2] ss:$0 sm:$0xff]  ;;  %v37_v3 = vmul.f32 %v172_v1, %v14_v0  ;;  %v38_v7 = vmul.f32 %v172_v1, %v15_v4  ;;  %v39_v8 = vmul.f32 %v172_v1, %v16_v5  ;;  %v40_v9 = vmul.f32 %v172_v1, %v17_v6  ;;  %v20_v12 = vld [vmem:[%s305_s0 + $0x30] sm:$0xff]  ;;  %v21_v17 = vld [vmem:[%s305_s0 + $0x38] sm:$0xff] }
   0x4   :  { %v18_v10 = vld [vmem:[%s305_s0 + $0x20] sm:$0xff]  ;;  %v42_v15 = vmul.f32 %v172_v1, %v19_v11  ;;  %v43_v16 = vmul.f32 %v172_v1, %v20_v12  ;;  %v44_v21 = vmul.f32 %v172_v1, %v21_v17  ;;  %v23_v30 = vld [vmem:[%s305_s0 + $0x48] sm:$0xff]  ;;  %v24_v31 = vld [vmem:[%s305_s0 + $0x50] sm:$0xff] }
   0x5   :  { %v60_v13 = vadd.f32 %v177_v2, %v37_v3  ;;  %v41_v14 = vmul.f32 %v172_v1, %v18_v10  ;;  %v61_v18 = vadd.f32 %v177_v2, %v38_v7  ;;  %v62_v19 = vadd.f32 %v177_v2, %v39_v8  ;;  %v22_v25 = vld [vmem:[%s305_s0 + $0x40] sm:$0xff]  ;;  %v25_v43 = vld [vmem:[%s305_s0 + $0x58] sm:$0xff]  ;;  %v27_v45 = vld [vmem:[%s305_s0 + $0x68] sm:$0xff] }
   0x6   :  { %v63_v20 = vadd.f32 %v177_v2, %v40_v9  ;;  %v65_v24 = vadd.f32 %v177_v2, %v42_v15  ;;  %v66_v37 = vadd.f32 %v177_v2, %v43_v16  ;;  %v67_v38 = vadd.f32 %v177_v2, %v44_v21  ;;  %v26_v44 = vld [vmem:[%s305_s0 + $0x60] sm:$0xff]  ;;  %v28_v56 = vld [vmem:[%s305_s0 + $0x70] sm:$0xff]  ;;  %v29_v4 = vld [vmem:[%s305_s0 + $0x78] sm:$0xff] }
   0x7   :  { %vm76_vm0 = vcmp.ge.f32.partialorder %v60_v13, 0.0  ;;  %v92_v22 = vmul.f32 0.01, %v60_v13  ;;  %v64_v23 = vadd.f32 %v177_v2, %v41_v14  ;;  %vm77_vm1 = vcmp.ge.f32.partialorder %v61_v18, 0.0 }
   0x8   :  { %v93_v26 = vmul.f32 0.01, %v61_v18  ;;  %vm78_vm2 = vcmp.ge.f32.partialorder %v62_v19, 0.0  ;;  %v94_v27 = vmul.f32 0.01, %v62_v19  ;;  %vm79_vm3 = vcmp.ge.f32.partialorder %v63_v20, 0.0 }
   0x9   :  { %v108_v28 = vsel %vm76_vm0, %v60_v13, %v92_v22  ;;  %v95_v29 = vmul.f32 0.01, %v63_v20  ;;  %vm80_vm4 = vcmp.ge.f32.partialorder %v64_v23, 0.0  ;;  %v96_v34 = vmul.f32 0.01, %v64_v23 }
   0xa   :  { %124 = vst [vmem:[%s308_s3] sm:$0xff] %v108_v28  ;;  %v109_v32 = vsel %vm77_vm1, %v61_v18, %v93_v26  ;;  %v110_v33 = vsel %vm78_vm2, %v62_v19, %v94_v27  ;;  %vm81_vm5 = vcmp.ge.f32.partialorder %v65_v24, 0.0  ;;  %v97_v36 = vmul.f32 0.01, %v65_v24 }
   0xb   :  { %125 = vst [vmem:[%s308_s3 + $0x8] sm:$0xff] %v109_v32  ;;  %126 = vst [vmem:[%s308_s3 + $0x10] sm:$0xff] %v110_v33  ;;  %v111_v35 = vsel %vm79_vm3, %v63_v20, %v95_v29  ;;  %v112_v39 = vsel %vm80_vm4, %v64_v23, %v96_v34  ;;  %v45_v40 = vmul.f32 %v172_v1, %v22_v25  ;;  %vm82_vm6 = vcmp.ge.f32.partialorder %v66_v37, 0.0 }
   0xc   :  { %127 = vst [vmem:[%s308_s3 + $0x18] sm:$0xff] %v111_v35  ;;  %v46_v41 = vmul.f32 %v172_v1, %v23_v30  ;;  %v47_v42 = vmul.f32 %v172_v1, %v24_v31  ;;  %128 = vst [vmem:[%s308_s3 + $0x20] sm:$0xff] %v112_v39  ;;  %v113_v46 = vsel %vm81_vm5, %v65_v24, %v97_v36  ;;  %v98_v47 = vmul.f32 0.01, %v66_v37 }
   0xd   :  { %vm83_vm7 = vcmp.ge.f32.partialorder %v67_v38, 0.0  ;;  %129 = vst [vmem:[%s308_s3 + $0x28] sm:$0xff] %v113_v46  ;;  %v99_v48 = vmul.f32 0.01, %v67_v38  ;;  %v68_v49 = vadd.f32 %v177_v2, %v45_v40  ;;  %v48_v53 = vmul.f32 %v172_v1, %v25_v43 }
   0xe   :  { %v69_v50 = vadd.f32 %v177_v2, %v46_v41  ;;  %v70_v51 = vadd.f32 %v177_v2, %v47_v42  ;;  %v114_v52 = vsel %vm82_vm6, %v66_v37, %v98_v47  ;;  %v49_v54 = vmul.f32 %v172_v1, %v26_v44 }
   0xf   :  { %v50_v55 = vmul.f32 %v172_v1, %v27_v45  ;;  %130 = vst [vmem:[%s308_s3 + $0x30] sm:$0xff] %v114_v52  ;;  %v115_v57 = vsel %vm83_vm7, %v67_v38, %v99_v48  ;;  %vm84_vm8 = vcmp.ge.f32.partialorder %v68_v49, 0.0  ;;  %v100_v58 = vmul.f32 0.01, %v68_v49 }
  0x10   :  { %vm85_vm9 = vcmp.ge.f32.partialorder %v69_v50, 0.0  ;;  %131 = vst [vmem:[%s308_s3 + $0x38] sm:$0xff] %v115_v57  ;;  %v101_v59 = vmul.f32 0.01, %v69_v50  ;;  %vm86_vm10 = vcmp.ge.f32.partialorder %v70_v51, 0.0  ;;  %v71_v61 = vadd.f32 %v177_v2, %v48_v53 }
  0x11   :  { %v102_v60 = vmul.f32 0.01, %v70_v51  ;;  %v116_v62 = vsel %vm84_vm8, %v68_v49, %v100_v58  ;;  %v72_v63 = vadd.f32 %v177_v2, %v49_v54  ;;  %v73_v0 = vadd.f32 %v177_v2, %v50_v55 }
  0x12   :  { %v51_v3 = vmul.f32 %v172_v1, %v28_v56  ;;  %132 = vst [vmem:[%s308_s3 + $0x40] sm:$0xff] %v116_v62  ;;  %v117_v5 = vsel %vm85_vm9, %v69_v50, %v101_v59  ;;  %vm87_vm11 = vcmp.ge.f32.partialorder %v71_v61, 0.0  ;;  %v103_v7 = vmul.f32 0.01, %v71_v61 }
  0x13   :  { %v118_v6 = vsel %vm86_vm10, %v70_v51, %v102_v60  ;;  %133 = vst [vmem:[%s308_s3 + $0x48] sm:$0xff] %v117_v5  ;;  %vm88_vm12 = vcmp.ge.f32.partialorder %v72_v63, 0.0  ;;  %v104_v8 = vmul.f32 0.01, %v72_v63  ;;  %vm89_vm13 = vcmp.ge.f32.partialorder %v73_v0, 0.0 }
  0x14   :  { %134 = vst [vmem:[%s308_s3 + $0x50] sm:$0xff] %v118_v6  ;;  %v105_v9 = vmul.f32 0.01, %v73_v0  ;;  %v119_v10 = vsel %vm87_vm11, %v71_v61, %v103_v7  ;;  %v74_v11 = vadd.f32 %v177_v2, %v51_v3  ;;  %v52_v12 = vmul.f32 %v172_v1, %v29_v4 }
  0x15   :  { %135 = vst [vmem:[%s308_s3 + $0x58] sm:$0xff] %v119_v10  ;;  %v120_v13 = vsel %vm88_vm12, %v72_v63, %v104_v8 }
  0x16   :  { %v121_v14 = vsel %vm89_vm13, %v73_v0, %v105_v9  ;;  %136 = vst [vmem:[%s308_s3 + $0x60] sm:$0xff] %v120_v13  ;;  %vm90_vm14 = vcmp.ge.f32.partialorder %v74_v11, 0.0  ;;  %v106_v15 = vmul.f32 0.01, %v74_v11  ;;  %v75_v16 = vadd.f32 %v177_v2, %v52_v12 }
  0x17   :  { %137 = vst [vmem:[%s308_s3 + $0x68] sm:$0xff] %v121_v14 }
  0x18   :  { %v122_v17 = vsel %vm90_vm14, %v74_v11, %v106_v15  ;;  %vm91_vm15 = vcmp.ge.f32.partialorder %v75_v16, 0.0  ;;  %v107_v1 = vmul.f32 0.01, %v75_v16 }
  0x19   :  { %138 = vst [vmem:[%s308_s3 + $0x70] sm:$0xff] %v122_v17 }
  0x1a   :  { %v123_v18 = vsel %vm91_vm15, %v75_v16, %v107_v1 }
  0x1b   :  { %139 = vst [vmem:[%s308_s3 + $0x78] sm:$0xff] %v123_v18 }

// kernel: local_feddis_forward.31
= control target key start
LH: loop header
LB: loop body
LE: loop exit
PB: predicated region body
PF: predicated region fallthrough
CT: control target
= control target key end

     0   :  { %vm135_vm0 = vcmask 1044480   ;;  %vm110_vm1 = vcmask 613376   ;;  %vm136_vm2 = vcmask 1045504   ;;  %v422_v4 = vmov 65535   ;;  %s562_s1 = inlined_call_operand.vmem [shape: bf16[75,128], index: 1, kind: input, shape index: {}]   ;;  %s563_s0 = inlined_call_operand.vmem [shape: bf16[128,75], index: 0, kind: input, shape index: {}]   ;;  %s564_s3 = inlined_call_operand.vmem [shape: f32[1,128], index: 3, kind: output, shape index: {1}]   ;;  %s565_s4 = inlined_call_operand.vmem [shape: f32[1,128], index: 4, kind: output, shape index: {2}]   ;;  %s566_s2 = inlined_call_operand.vmem [shape: f32[128,128], index: 2, kind: output, shape index: {0}]  }
   0x1   :  { %v409_v0 = vld [vmem:[%s562_s1] sm:$0xff]   ;;  %v410_v1 = vld [vmem:[%s562_s1 + $0x8] sm:$0xff]   ;;  %v411_v2 = vld [vmem:[%s562_s1 + $0x10] sm:$0xff]   ;;  %v137_v5 = vsel %vm135_vm0, 4294967295, %v422_v4  ;;  %v423_v17 = vmov 0.0  }
   0x2   :  { %371 = vmatprep.subr.bf16.mxu0 %v409_v0  ;;  %397 = vmatprep.subr.bf16.mxu1 %v409_v0  ;;  %v414_v3 = vld [vmem:[%s563_s0] sm:$0xff]   ;;  %v412_v6 = vld [vmem:[%s562_s1 + $0x18] sm:$0xff]   ;;  %v138_v8 = vsel %vm136_vm2, %v137_v5, 0  ;;  %v415_v11 = vld [vmem:[%s563_s0 + $0x8] sm:$0xff]   ;;  %259 = vst [vmem:[%s564_s3] sm:$0x1] %v423_v17 }
   0x3   :  { %372 = vmatpush3.bf16.msra.mxu0 %v409_v0  ;;  %402 = vmatpush3.bf16.msra.mxu1 %v409_v0  ;;  %v413_v7 = vld [vmem:[%s562_s1 + $0x20] sm:$0x3f]   ;;  %v419_v12 = vld [vmem:[%s563_s0 + $0x28] sm:$0xff]   ;;  %v416_v13 = vld [vmem:[%s563_s0 + $0x10] sm:$0xff]   ;;  %260 = vst [vmem:[%s565_s4] sm:$0x1] %v423_v17 }
   0x4   :  { %373 = vmatprep.subr.bf16.mxu0 %v410_v1  ;;  %398 = vmatprep.subr.bf16.mxu1 %v410_v1  ;;  %v418_v9 = vld [vmem:[%s563_s0 + $0x20] sm:$0xff]   ;;  %v140_v10 = vand.u32 %v413_v7, %v138_v8  ;;  %v420_v14 = vld [vmem:[%s563_s0 + $0x30] sm:$0xff]   ;;  %v417_v15 = vld [vmem:[%s563_s0 + $0x18] sm:$0xff]  }
   0x5   :  { %381 = vmatprep.mubr.msk.bf16.mxu0 %vm110_vm1, %v414_v3  ;;  %389 = vmatprep.mubr.msk.bf16.mxu1 %vm110_vm1, %v418_v9  ;;  %v421_v16 = vld [vmem:[%s563_s0 + $0x38] sm:$0xff]  }
   0x7   :  { %374 = vmatpush3.bf16.msra.mxu0 %v410_v1  ;;  %403 = vmatpush3.bf16.msra.mxu1 %v410_v1 }
   0x8   :  { %375 = vmatprep.subr.bf16.mxu0 %v411_v2  ;;  %399 = vmatprep.subr.bf16.mxu1 %v411_v2 }
   0xb   :  { %376 = vmatpush3.bf16.msra.mxu0 %v411_v2  ;;  %404 = vmatpush3.bf16.msra.mxu1 %v411_v2 }
   0xc   :  { %377 = vmatprep.subr.bf16.mxu0 %v412_v6  ;;  %400 = vmatprep.subr.bf16.mxu1 %v412_v6 }
   0xf   :  { %378 = vmatpush3.bf16.msra.mxu0 %v412_v6  ;;  %405 = vmatpush3.bf16.msra.mxu1 %v412_v6 }
  0x10   :  { %379 = vmatprep.subr.bf16.mxu0 %v140_v10  ;;  %401 = vmatprep.subr.bf16.mxu1 %v140_v10 }
  0x13   :  { %380 = vmatpush3.bf16.msra.mxu0 %v140_v10  ;;  %406 = vmatpush3.bf16.msra.mxu1 %v140_v10 }
  0x16   :  { %382 = vmatmul.mubr.msk.bf16.vlgmr.msra.gmra.mrb[0].mxu0 %vm110_vm1, %v415_v11  ;;  %390 = vmatmul.mubr.msk.bf16.vlgmr.msra.gmra.mrb[0].mxu1 %vm110_vm1, %v419_v12 }
  0x17   :  { %385 = vmatprep.mubr.msk.bf16.mxu0 %vm110_vm1, %v416_v13  ;;  %393 = vmatprep.mubr.msk.bf16.mxu1 %vm110_vm1, %v420_v14 }
  0x1e   :  { %386 = vmatmul.mubr.msk.bf16.gmra.mrb[4].mxu0 %vm110_vm1, %v417_v15  ;;  %394 = vmatmul.mubr.msk.bf16.gmra.mrb[4].mxu1 %vm110_vm1, %v421_v16 }
  0xe9   :  { %v383_v18 = vpop.f32.mrb[0].mxu0  ;;  %v391_v19 = vpop.f32.mrb[0].mxu1 }
  0xea   :  { %241 = vst [vmem:[%s566_s2 + $0x10] sm:$0xff] %v383_v18  ;;  %v176_v20 = vpop.f32.mrb[1].mxu0  ;;  %249 = vst [vmem:[%s566_s2 + $0x50] sm:$0xff] %v391_v19  ;;  %v208_v21 = vpop.f32.mrb[1].mxu1  ;;  %v288_v29 = vmul.f32 %v383_v18, %v383_v18  ;;  %v296_v61 = vmul.f32 %v391_v19, %v391_v19 }
  0xeb   :  { %239 = vst [vmem:[%s566_s2] sm:$0xff] %v176_v20  ;;  %v384_v22 = vpop.f32.mrb[2].mxu0  ;;  %247 = vst [vmem:[%s566_s2 + $0x40] sm:$0xff] %v208_v21  ;;  %v392_v23 = vpop.f32.mrb[2].mxu1  ;;  %v286_v26 = vmul.f32 %v176_v20, %v176_v20  ;;  %v294_v55 = vmul.f32 %v208_v21, %v208_v21 }
  0xec   :  { %242 = vst [vmem:[%s566_s2 + $0x18] sm:$0xff] %v384_v22  ;;  %v179_v24 = vpop.f32.mrb[3].mxu0  ;;  %250 = vst [vmem:[%s566_s2 + $0x58] sm:$0xff] %v392_v23  ;;  %v211_v25 = vpop.f32.mrb[3].mxu1  ;;  %v289_v32 = vmul.f32 %v384_v22, %v384_v22  ;;  %v297_v0 = vmul.f32 %v392_v23, %v392_v23 }
  0xed   :  { %240 = vst [vmem:[%s566_s2 + $0x8] sm:$0xff] %v179_v24  ;;  %v262_v27 = vadd.f32 %v179_v24, %v176_v20  ;;  %v287_v28 = vmul.f32 %v179_v24, %v179_v24  ;;  %248 = vst [vmem:[%s566_s2 + $0x48] sm:$0xff] %v211_v25  ;;  %v295_v60 = vmul.f32 %v211_v25, %v211_v25 }
  0xef   :  { %v263_v30 = vadd.f32 %v383_v18, %v262_v27  ;;  %v302_v31 = vadd.f32 %v287_v28, %v286_v26  ;;  %v285_v28 = vld [vmem:[%s565_s4] sm:$0x1] }
  0xf1   :  { %v303_v33 = vadd.f32 %v302_v31, %v288_v29  ;;  %v387_v34 = vpop.f32.mrb[4].mxu0  ;;  %v264_v35 = vadd.f32 %v384_v22, %v263_v30  ;;  %v395_v36 = vpop.f32.mrb[4].mxu1 }
  0xf2   :  { %245 = vst [vmem:[%s566_s2 + $0x30] sm:$0xff] %v387_v34  ;;  %v192_v37 = vpop.f32.mrb[5].mxu0  ;;  %253 = vst [vmem:[%s566_s2 + $0x70] sm:$0xff] %v395_v36  ;;  %v224_v38 = vpop.f32.mrb[5].mxu1  ;;  %v292_v49 = vmul.f32 %v387_v34, %v387_v34  ;;  %v300_v9 = vmul.f32 %v395_v36, %v395_v36 }
  0xf3   :  { %243 = vst [vmem:[%s566_s2 + $0x20] sm:$0xff] %v192_v37  ;;  %v265_v39 = vadd.f32 %v264_v35, %v192_v37  ;;  %v290_v40 = vmul.f32 %v192_v37, %v192_v37  ;;  %v304_v41 = vadd.f32 %v303_v33, %v289_v32  ;;  %v388_v42 = vpop.f32.mrb[6].mxu0  ;;  %251 = vst [vmem:[%s566_s2 + $0x60] sm:$0xff] %v224_v38  ;;  %v396_v43 = vpop.f32.mrb[6].mxu1 }
  0xf4   :  { %246 = vst [vmem:[%s566_s2 + $0x38] sm:$0xff] %v388_v42  ;;  %v195_v44 = vpop.f32.mrb[7].mxu0  ;;  %254 = vst [vmem:[%s566_s2 + $0x78] sm:$0xff] %v396_v43  ;;  %v227_v45 = vpop.f32.mrb[7].mxu1  ;;  %v293_v52 = vmul.f32 %v388_v42, %v388_v42  ;;  %v298_v3 = vmul.f32 %v224_v38, %v224_v38  ;;  %v301_v12 = vmul.f32 %v396_v43, %v396_v43 }
  0xf5   :  { %v305_v46 = vadd.f32 %v304_v41, %v290_v40  ;;  %244 = vst [vmem:[%s566_s2 + $0x28] sm:$0xff] %v195_v44  ;;  %v266_v47 = vadd.f32 %v265_v39, %v195_v44  ;;  %v291_v48 = vmul.f32 %v195_v44, %v195_v44  ;;  %252 = vst [vmem:[%s566_s2 + $0x68] sm:$0xff] %v227_v45 }
  0xf6   :  { %v299_v8 = vmul.f32 %v227_v45, %v227_v45 }
  0xf7   :  { %v267_v50 = vadd.f32 %v387_v34, %v266_v47  ;;  %v306_v51 = vadd.f32 %v305_v46, %v291_v48 }
  0xf9   :  { %v307_v53 = vadd.f32 %v306_v51, %v292_v49  ;;  %v268_v54 = vadd.f32 %v388_v42, %v267_v50 }
  0xfb   :  { %v269_v56 = vadd.f32 %v268_v54, %v208_v21  ;;  %v308_v57 = vadd.f32 %v307_v53, %v293_v52 }
  0xfd   :  { %v309_v58 = vadd.f32 %v308_v57, %v294_v55  ;;  %v270_v59 = vadd.f32 %v269_v56, %v211_v25  ;;  %v261_v25 = vld [vmem:[%s564_s3] sm:$0x1] }
  0xff   :  { %v271_v62 = vadd.f32 %v391_v19, %v270_v59  ;;  %v310_v63 = vadd.f32 %v309_v58, %v295_v60 }
 0x101   :  { %v311_v1 = vadd.f32 %v310_v63, %v296_v61  ;;  %v272_v2 = vadd.f32 %v392_v23, %v271_v62 }
 0x103   :  { %v273_v4 = vadd.f32 %v272_v2, %v224_v38  ;;  %v312_v5 = vadd.f32 %v311_v1, %v297_v0 }
 0x105   :  { %v313_v6 = vadd.f32 %v312_v5, %v298_v3  ;;  %v274_v7 = vadd.f32 %v273_v4, %v227_v45 }
 0x107   :  { %v275_v10 = vadd.f32 %v395_v36, %v274_v7  ;;  %v314_v11 = vadd.f32 %v313_v6, %v299_v8 }
 0x109   :  { %v276_v13 = vadd.f32 %v396_v43, %v275_v10  ;;  %v315_v14 = vadd.f32 %v314_v11, %v300_v9 }
 0x10b   :  { %v277_v15 = vrot.slane %v276_v13, 4  ;;  %v316_v16 = vadd.f32 %v315_v14, %v301_v12 }
 0x10d   :  { %v278_v17 = vadd.f32 %v277_v15, %v276_v13  ;;  %v317_v18 = vrot.slane %v316_v16, 4 }
 0x10f   :  { %v279_v19 = vrot.slane %v278_v17, 2  ;;  %v318_v20 = vadd.f32 %v317_v18, %v316_v16 }
 0x111   :  { %v280_v21 = vadd.f32 %v279_v19, %v278_v17  ;;  %v319_v22 = vrot.slane %v318_v20, 2 }
 0x113   :  { %v281_v23 = vrot.slane %v280_v21, 1  ;;  %v320_v24 = vadd.f32 %v319_v22, %v318_v20 }
 0x115   :  { %v282_v26 = vadd.f32 %v281_v23, %v280_v21  ;;  %v321_v27 = vrot.slane %v320_v24, 1 }
 0x117   :  { %v283_v29 = vadd.f32 %v282_v26, %v261_v25  ;;  %v322_v30 = vadd.f32 %v321_v27, %v320_v24 }
 0x119   :  { %284 = vst [vmem:[%s564_s3] sm:$0x1] %v283_v29  ;;  %v323_v31 = vadd.f32 %v322_v30, %v285_v28 }
 0x11b   :  { %324 = vst [vmem:[%s565_s4] sm:$0x1] %v323_v31 }

// kernel: local_feddis_forward.33
= control target key start
LH: loop header
LB: loop body
LE: loop exit
PB: predicated region body
PF: predicated region fallthrough
CT: control target
= control target key end

     0   :  { %v313_v0 = vmov 0   ;;  %vm137_vm0 = vcmask 588800   ;;  %vm144_vm1 = vcmask 1043456   ;;  %v314_v19 = vmov 0.0   ;;  %s447_s1 = inlined_call_operand.vmem [shape: bf16[200,128], index: 1, kind: input, shape index: {}]   ;;  %s448_s0 = inlined_call_operand.vmem [shape: bf16[32,200], index: 0, kind: input, shape index: {}]   ;;  %s449_s3 = inlined_call_operand.vmem [shape: f32[1,128], index: 3, kind: output, shape index: {1}]   ;;  %s450_s4 = inlined_call_operand.vmem [shape: f32[1,128], index: 4, kind: output, shape index: {2}]   ;;  %s451_s2 = inlined_call_operand.vmem [shape: f32[32,128], index: 2, kind: output, shape index: {0}]  }
   0x1   :  { %148 = vmatprep.subr.bf16.mxu0 %v313_v0  ;;  %266 = vmatprep.subr.bf16.mxu1 %v313_v0  ;;  %v294_v1 = vld [vmem:[%s447_s1] sm:$0xff]   ;;  %v295_v2 = vld [vmem:[%s447_s1 + $0x8] sm:$0xff]   ;;  %v296_v3 = vld [vmem:[%s447_s1 + $0x10] sm:$0xff]   ;;  %205 = vst [vmem:[%s449_s3] sm:$0x1] %v314_v19 }
   0x2   :  { %149 = vmatpush1.bf16.msra.mxu0 %v294_v1  ;;  %279 = vmatpush1.bf16.msra.mxu1 %v294_v1  ;;  %v297_v4 = vld [vmem:[%s447_s1 + $0x18] sm:$0xff]   ;;  %v309_v5 = vld [vmem:[%s448_s0 + $0x4] ss:$8 sps:$4 sm:$0xff]   ;;  %v300_v9 = vld [vmem:[%s447_s1 + $0x30] sm:$0xff]   ;;  %206 = vst [vmem:[%s450_s4] sm:$0x1] %v314_v19 }
   0x3   :  { %150 = vmatprep.subr.bf16.mxu0 %v313_v0  ;;  %267 = vmatprep.subr.bf16.mxu1 %v313_v0  ;;  %v298_v6 = vld [vmem:[%s447_s1 + $0x20] sm:$0xff]   ;;  %v312_v7 = vld [vmem:[%s448_s0 + $0x14] ss:$8 sps:$4 sm:$0xff]   ;;  %v299_v8 = vld [vmem:[%s447_s1 + $0x28] sm:$0xff]  }
   0x4   :  { %264 = vmatprep.mubr.msk.bf16.mxu0 %vm137_vm0, %v309_v5  ;;  %265 = vmatprep.mubr.msk.bf16.mxu1 %vm137_vm0, %v312_v7  ;;  %v301_v10 = vld [vmem:[%s447_s1 + $0x38] sm:$0xff]   ;;  %v302_v11 = vld [vmem:[%s447_s1 + $0x40] sm:$0xff]   ;;  %v303_v12 = vld [vmem:[%s447_s1 + $0x48] sm:$0xff]  }
   0x5   :  { %v304_v13 = vld [vmem:[%s447_s1 + $0x50] sm:$0xff]   ;;  %v305_v14 = vld [vmem:[%s447_s1 + $0x58] sm:$0xff]   ;;  %v306_v15 = vld [vmem:[%s447_s1 + $0x60] ss:$0 sps:$4 sm:$0xff]  }
   0x6   :  { %151 = vmatpush1.bf16.msra.mxu0 %v295_v2  ;;  %280 = vmatpush1.bf16.msra.mxu1 %v295_v2  ;;  %v146_v16 = vsel %vm144_vm1, %v306_v15, 0  ;;  %v307_v17 = vld [vmem:[%s448_s0] ss:$8 sps:$4 sm:$0xff]   ;;  %v310_v18 = vld [vmem:[%s448_s0 + $0x10] ss:$8 sps:$4 sm:$0xff]  }
   0x7   :  { %152 = vmatprep.subr.bf16.mxu0 %v313_v0  ;;  %268 = vmatprep.subr.bf16.mxu1 %v313_v0 }
   0x8   :  { %v207_v47 = vld [vmem:[%s449_s3] sm:$0x1] }
   0x9   :  { %v219_v50 = vld [vmem:[%s450_s4] sm:$0x1] }
   0xa   :  { %153 = vmatpush1.bf16.msra.mxu0 %v296_v3  ;;  %281 = vmatpush1.bf16.msra.mxu1 %v296_v3 }
   0xb   :  { %154 = vmatprep.subr.bf16.mxu0 %v313_v0  ;;  %269 = vmatprep.subr.bf16.mxu1 %v313_v0 }
   0xe   :  { %155 = vmatpush1.bf16.msra.mxu0 %v297_v4  ;;  %282 = vmatpush1.bf16.msra.mxu1 %v297_v4 }
   0xf   :  { %156 = vmatprep.subr.bf16.mxu0 %v313_v0  ;;  %270 = vmatprep.subr.bf16.mxu1 %v313_v0 }
  0x12   :  { %157 = vmatpush1.bf16.msra.mxu0 %v298_v6  ;;  %283 = vmatpush1.bf16.msra.mxu1 %v298_v6 }
  0x13   :  { %158 = vmatprep.subr.bf16.mxu0 %v313_v0  ;;  %271 = vmatprep.subr.bf16.mxu1 %v313_v0 }
  0x16   :  { %159 = vmatpush1.bf16.msra.mxu0 %v299_v8  ;;  %284 = vmatpush1.bf16.msra.mxu1 %v299_v8 }
  0x17   :  { %160 = vmatprep.subr.bf16.mxu0 %v313_v0  ;;  %272 = vmatprep.subr.bf16.mxu1 %v313_v0 }
  0x1a   :  { %161 = vmatpush1.bf16.msra.mxu0 %v300_v9  ;;  %285 = vmatpush1.bf16.msra.mxu1 %v300_v9 }
  0x1b   :  { %162 = vmatprep.subr.bf16.mxu0 %v313_v0  ;;  %273 = vmatprep.subr.bf16.mxu1 %v313_v0 }
  0x1e   :  { %163 = vmatpush1.bf16.msra.mxu0 %v301_v10  ;;  %286 = vmatpush1.bf16.msra.mxu1 %v301_v10 }
  0x1f   :  { %164 = vmatprep.subr.bf16.mxu0 %v313_v0  ;;  %274 = vmatprep.subr.bf16.mxu1 %v313_v0 }
  0x22   :  { %165 = vmatpush1.bf16.msra.mxu0 %v302_v11  ;;  %287 = vmatpush1.bf16.msra.mxu1 %v302_v11 }
  0x23   :  { %166 = vmatprep.subr.bf16.mxu0 %v313_v0  ;;  %275 = vmatprep.subr.bf16.mxu1 %v313_v0 }
  0x26   :  { %167 = vmatpush1.bf16.msra.mxu0 %v303_v12  ;;  %288 = vmatpush1.bf16.msra.mxu1 %v303_v12 }
  0x27   :  { %168 = vmatprep.subr.bf16.mxu0 %v313_v0  ;;  %276 = vmatprep.subr.bf16.mxu1 %v313_v0 }
  0x2a   :  { %169 = vmatpush1.bf16.msra.mxu0 %v304_v13  ;;  %289 = vmatpush1.bf16.msra.mxu1 %v304_v13 }
  0x2b   :  { %170 = vmatprep.subr.bf16.mxu0 %v313_v0  ;;  %277 = vmatprep.subr.bf16.mxu1 %v313_v0 }
  0x2e   :  { %171 = vmatpush1.bf16.msra.mxu0 %v305_v14  ;;  %290 = vmatpush1.bf16.msra.mxu1 %v305_v14 }
  0x2f   :  { %172 = vmatprep.subr.bf16.mxu0 %v313_v0  ;;  %278 = vmatprep.subr.bf16.mxu1 %v313_v0 }
  0x32   :  { %173 = vmatpush1.bf16.msra.mxu0 %v146_v16  ;;  %291 = vmatpush1.bf16.msra.mxu1 %v146_v16 }
  0x35   :  { %181 = vmatmul.mubr.bf16.vlgmr.msra.gmra.mrb[0].mxu0 %v307_v17  ;;  %189 = vmatmul.mubr.bf16.vlgmr.msra.gmra.mrb[0].mxu1 %v310_v18 }
 0x108   :  { %v182_v20 = vpop.f32.mrb[0].mxu0  ;;  %v190_v21 = vpop.f32.mrb[0].mxu1 }
 0x109   :  { %197 = vst [vmem:[%s451_s2] sm:$0xff] %v182_v20  ;;  %v184_v22 = vpop.f32.mrb[1].mxu0  ;;  %199 = vst [vmem:[%s451_s2 + $0x10] sm:$0xff] %v190_v21  ;;  %v192_v23 = vpop.f32.mrb[1].mxu1  ;;  %v220_v26 = vmul.f32 %v182_v20, %v182_v20  ;;  %v222_v27 = vmul.f32 %v190_v21, %v190_v21 }
 0x10a   :  { %v185_v24 = vpop.f32.mrb[2].mxu0  ;;  %v193_v25 = vpop.f32.mrb[2].mxu1 }
 0x10b   :  { %198 = vst [vmem:[%s451_s2 + $0x8] sm:$0xff] %v185_v24  ;;  %v208_v28 = vadd.f32 %v185_v24, %v182_v20  ;;  %v221_v29 = vmul.f32 %v185_v24, %v185_v24  ;;  %v187_v30 = vpop.f32.mrb[3].mxu0  ;;  %200 = vst [vmem:[%s451_s2 + $0x18] sm:$0xff] %v193_v25  ;;  %v195_v31 = vpop.f32.mrb[3].mxu1  ;;  %v223_v35 = vmul.f32 %v193_v25, %v193_v25 }
 0x10d   :  { %v224_v32 = vadd.f32 %v221_v29, %v220_v26  ;;  %v209_v33 = vadd.f32 %v208_v28, %v190_v21 }
 0x10f   :  { %v210_v34 = vadd.f32 %v209_v33, %v193_v25  ;;  %v225_v36 = vadd.f32 %v224_v32, %v222_v27 }
 0x111   :  { %v211_v37 = vrot.slane %v210_v34, 4  ;;  %v226_v38 = vadd.f32 %v225_v36, %v223_v35 }
 0x113   :  { %v212_v39 = vadd.f32 %v211_v37, %v210_v34  ;;  %v227_v40 = vrot.slane %v226_v38, 4 }
 0x115   :  { %v213_v41 = vrot.slane %v212_v39, 2  ;;  %v228_v42 = vadd.f32 %v227_v40, %v226_v38 }
 0x117   :  { %v214_v43 = vadd.f32 %v213_v41, %v212_v39  ;;  %v229_v44 = vrot.slane %v228_v42, 2 }
 0x119   :  { %v215_v45 = vrot.slane %v214_v43, 1  ;;  %v230_v46 = vadd.f32 %v229_v44, %v228_v42 }
 0x11b   :  { %v216_v48 = vadd.f32 %v215_v45, %v214_v43  ;;  %v231_v49 = vrot.slane %v230_v46, 1 }
 0x11d   :  { %v217_v51 = vadd.f32 %v216_v48, %v207_v47  ;;  %v232_v52 = vadd.f32 %v231_v49, %v230_v46 }
 0x11f   :  { %218 = vst [vmem:[%s449_s3] sm:$0x1] %v217_v51  ;;  %v233_v53 = vadd.f32 %v232_v52, %v219_v50 }
 0x121   :  { %234 = vst [vmem:[%s450_s4] sm:$0x1] %v233_v53 }

// kernel: local_feddis_forward.34
= control target key start
LH: loop header
LB: loop body
LE: loop exit
PB: predicated region body
PF: predicated region fallthrough
CT: control target
= control target key end

     0   :  { %s112_s0 = inlined_call_operand.vmem [shape: f32[32,128], index: 0, kind: input, shape index: {}]   ;;  %s113_s1 = inlined_call_operand.vmem [shape: f32[1,128], index: 1, kind: input, shape index: {}]   ;;  %s114_s2 = inlined_call_operand.vmem [shape: f32[1,128], index: 2, kind: input, shape index: {}]   ;;  %s115_s3 = inlined_call_operand.vmem [shape: f32[32,128], index: 3, kind: output, shape index: {}]  }
   0x1   :  { %v14_v0 = vld [vmem:[%s112_s0] sm:$0xff]  ;;  %v15_v4 = vld [vmem:[%s112_s0 + $0x8] sm:$0xff]  ;;  %v16_v5 = vld [vmem:[%s112_s0 + $0x10] sm:$0xff] }
   0x2   :  { %v60_v1 = vld [vmem:[%s113_s1] ss:$0 sm:$0xff]  ;;  %v17_v6 = vld [vmem:[%s112_s0 + $0x18] sm:$0xff] }
   0x3   :  { %v61_v2 = vld [vmem:[%s114_s2] ss:$0 sm:$0xff]  ;;  %v25_v3 = vmul.f32 %v60_v1, %v14_v0  ;;  %v26_v7 = vmul.f32 %v60_v1, %v15_v4  ;;  %v27_v8 = vmul.f32 %v60_v1, %v16_v5  ;;  %v28_v9 = vmul.f32 %v60_v1, %v17_v6 }
   0x5   :  { %v36_v10 = vadd.f32 %v61_v2, %v25_v3  ;;  %v37_v11 = vadd.f32 %v61_v2, %v26_v7  ;;  %v38_v12 = vadd.f32 %v61_v2, %v27_v8  ;;  %v39_v13 = vadd.f32 %v61_v2, %v28_v9 }
   0x7   :  { %vm40_vm0 = vcmp.ge.f32.partialorder %v36_v10, 0.0  ;;  %v44_v14 = vmul.f32 0.01, %v36_v10  ;;  %vm41_vm1 = vcmp.ge.f32.partialorder %v37_v11, 0.0  ;;  %v45_v15 = vmul.f32 0.01, %v37_v11 }
   0x8   :  { %vm42_vm2 = vcmp.ge.f32.partialorder %v38_v12, 0.0  ;;  %v46_v16 = vmul.f32 0.01, %v38_v12  ;;  %vm43_vm3 = vcmp.ge.f32.partialorder %v39_v13, 0.0  ;;  %v47_v18 = vmul.f32 0.01, %v39_v13 }
   0x9   :  { %v48_v17 = vsel %vm40_vm0, %v36_v10, %v44_v14  ;;  %v49_v19 = vsel %vm41_vm1, %v37_v11, %v45_v15 }
   0xa   :  { %52 = vst [vmem:[%s115_s3] sm:$0xff] %v48_v17  ;;  %v50_v20 = vsel %vm42_vm2, %v38_v12, %v46_v16  ;;  %53 = vst [vmem:[%s115_s3 + $0x8] sm:$0xff] %v49_v19  ;;  %v51_v21 = vsel %vm43_vm3, %v39_v13, %v47_v18 }
   0xb   :  { %54 = vst [vmem:[%s115_s3 + $0x10] sm:$0xff] %v50_v20  ;;  %55 = vst [vmem:[%s115_s3 + $0x18] sm:$0xff] %v51_v21 }

// kernel: local_feddis_forward.35
= control target key start
LH: loop header
LB: loop body
LE: loop exit
PB: predicated region body
PF: predicated region fallthrough
CT: control target
= control target key end

     0   :  { %v435_v0 = vmov 0   ;;  %vm230_vm0 = vcmask 130048   ;;  %v436_v32 = vmov 0.0   ;;  %s573_s1 = inlined_call_operand.vmem [shape: bf16[400,128], index: 1, kind: input, shape index: {}]   ;;  %s574_s0 = inlined_call_operand.vmem [shape: bf16[8,400], index: 0, kind: input, shape index: {}]   ;;  %s575_s3 = inlined_call_operand.vmem [shape: f32[1,128], index: 3, kind: output, shape index: {1}]   ;;  %s576_s4 = inlined_call_operand.vmem [shape: f32[1,128], index: 4, kind: output, shape index: {2}]   ;;  %s577_s2 = inlined_call_operand.vmem [shape: f32[8,128], index: 2, kind: output, shape index: {0}]  }
   0x1   :  { %274 = vmatprep.subr.bf16.mxu1 %v435_v0  ;;  %v406_v1 = vld [vmem:[%s573_s1 + $0x40] sm:$0xff]   ;;  %v409_v4 = vld [vmem:[%s573_s1 + $0x48] sm:$0xff]   ;;  %v412_v7 = vld [vmem:[%s573_s1 + $0x50] sm:$0xff]   ;;  %319 = vst [vmem:[%s575_s3] sm:$0x1] %v436_v32 }
   0x2   :  { %v407_v2 = vld [vmem:[%s573_s1 + $0x80] sm:$0xff]   ;;  %382 = vmatprep.subr.bf16.mxu0 %v406_v1  ;;  %v410_v5 = vld [vmem:[%s573_s1 + $0x88] sm:$0xff]   ;;  %v413_v8 = vld [vmem:[%s573_s1 + $0x90] sm:$0xff]   ;;  %320 = vst [vmem:[%s576_s4] sm:$0x1] %v436_v32 }
   0x3   :  { %v408_v3 = vld [vmem:[%s573_s1] sm:$0xff]   ;;  %275 = vmatpush1.bf16.msra.mxu1 %v407_v2  ;;  %v411_v6 = vld [vmem:[%s573_s1 + $0x8] sm:$0xff]   ;;  %v414_v9 = vld [vmem:[%s573_s1 + $0x10] sm:$0xff]  }
   0x4   :  { %383 = vmatpush3.bf16.msra.mxu0 %v408_v3  ;;  %276 = vmatprep.subr.bf16.mxu1 %v435_v0  ;;  %v415_v10 = vld [vmem:[%s573_s1 + $0x58] sm:$0xff]   ;;  %v418_v13 = vld [vmem:[%s573_s1 + $0x60] sm:$0xff]   ;;  %v421_v16 = vld [vmem:[%s573_s1 + $0x68] sm:$0xff]  }
   0x5   :  { %384 = vmatprep.subr.bf16.mxu0 %v409_v4  ;;  %v416_v11 = vld [vmem:[%s573_s1 + $0x98] sm:$0xff]   ;;  %v419_v14 = vld [vmem:[%s573_s1 + $0xa0] sm:$0xff]   ;;  %v422_v17 = vld [vmem:[%s573_s1 + $0xa8] sm:$0xff]  }
   0x6   :  { %v417_v12 = vld [vmem:[%s573_s1 + $0x18] sm:$0xff]   ;;  %v420_v15 = vld [vmem:[%s573_s1 + $0x20] sm:$0xff]   ;;  %v423_v18 = vld [vmem:[%s573_s1 + $0x28] sm:$0xff]  }
   0x7   :  { %277 = vmatpush1.bf16.msra.mxu1 %v410_v5  ;;  %v424_v19 = vld [vmem:[%s573_s1 + $0x70] sm:$0xff]   ;;  %v15_v22 = vld [vmem:[%s574_s0] sm:$0xff]  ;;  %v427_v23 = vld [vmem:[%s573_s1 + $0x78] sm:$0xff]  }
   0x8   :  { %385 = vmatpush3.bf16.msra.mxu0 %v411_v6  ;;  %278 = vmatprep.subr.bf16.mxu1 %v435_v0  ;;  %v425_v20 = vld [vmem:[%s573_s1 + $0xb0] sm:$0xff]   ;;  %v353_v24 = vcombine.high %v15_v22, %v15_v22  ;;  %v16_v25 = vld [vmem:[%s574_s0 + $0x8] sm:$0xff]  ;;  %v428_v27 = vld [vmem:[%s573_s1 + $0xb8] sm:$0xff]   ;;  %v352_v29 = vcombine.low %v15_v22, %v15_v22 }
   0x9   :  { %386 = vmatprep.subr.bf16.mxu0 %v412_v7  ;;  %v426_v21 = vld [vmem:[%s573_s1 + $0x30] sm:$0xff]   ;;  %v355_v26 = vcombine.high %v16_v25, %v16_v25  ;;  %v429_v28 = vld [vmem:[%s573_s1 + $0x38] sm:$0xff]   ;;  %v432_v30 = vld [vmem:[%s573_s1 + $0xc0] sm:$0xff]   ;;  %v354_v31 = vcombine.low %v16_v25, %v16_v25 }
   0xa   :  { %266 = vmatprep.mubr.bf16.mxu0 %v353_v24  ;;  %v321_v53 = vld [vmem:[%s575_s3] sm:$0x1] }
   0xb   :  { %279 = vmatpush1.bf16.msra.mxu1 %v413_v8  ;;  %381 = vmatprep.mubr.msk.bf16.mxu1 %vm230_vm0, %v355_v26  ;;  %v330_v56 = vld [vmem:[%s576_s4] sm:$0x1] }
   0xc   :  { %387 = vmatpush3.bf16.msra.mxu0 %v414_v9  ;;  %280 = vmatprep.subr.bf16.mxu1 %v435_v0 }
   0xd   :  { %388 = vmatprep.subr.bf16.mxu0 %v415_v10 }
   0xf   :  { %281 = vmatpush1.bf16.msra.mxu1 %v416_v11 }
  0x10   :  { %389 = vmatpush3.bf16.msra.mxu0 %v417_v12  ;;  %282 = vmatprep.subr.bf16.mxu1 %v435_v0 }
  0x11   :  { %390 = vmatprep.subr.bf16.mxu0 %v418_v13 }
  0x13   :  { %283 = vmatpush1.bf16.msra.mxu1 %v419_v14 }
  0x14   :  { %391 = vmatpush3.bf16.msra.mxu0 %v420_v15  ;;  %284 = vmatprep.subr.bf16.mxu1 %v435_v0 }
  0x15   :  { %392 = vmatprep.subr.bf16.mxu0 %v421_v16 }
  0x17   :  { %285 = vmatpush1.bf16.msra.mxu1 %v422_v17 }
  0x18   :  { %393 = vmatpush3.bf16.msra.mxu0 %v423_v18  ;;  %286 = vmatprep.subr.bf16.mxu1 %v435_v0 }
  0x19   :  { %394 = vmatprep.subr.bf16.mxu0 %v424_v19 }
  0x1b   :  { %287 = vmatpush1.bf16.msra.mxu1 %v425_v20 }
  0x1c   :  { %395 = vmatpush3.bf16.msra.mxu0 %v426_v21  ;;  %288 = vmatprep.subr.bf16.mxu1 %v435_v0 }
  0x1d   :  { %396 = vmatprep.subr.bf16.mxu0 %v427_v23 }
  0x1f   :  { %289 = vmatpush1.bf16.msra.mxu1 %v428_v27 }
  0x20   :  { %397 = vmatpush3.bf16.msra.mxu0 %v429_v28  ;;  %290 = vmatprep.subr.bf16.mxu1 %v435_v0 }
  0x23   :  { %267 = vmatmul.mubr.bf16.vlgmr.msra.gmra.mrb[0].mxu0 %v352_v29  ;;  %291 = vmatpush1.bf16.msra.mxu1 %v432_v30 }
  0x26   :  { %307 = vmatmul.mubr.bf16.vlgmr.msra.gmra.mrb[0].mxu1 %v354_v31 }
  0xf6   :  { %v398_v33 = vpop.f32.mrb[0].mxu0 }
  0xf7   :  { %v399_v34 = vpop.f32.mrb[1].mxu0 }
  0xf8   :  { %v400_v35 = vadd.f32 %v399_v34, %v398_v33  ;;  %v401_v36 = vpop.f32.mrb[2].mxu0 }
  0xf9   :  { %v402_v37 = vpop.f32.mrb[3].mxu0  ;;  %v308_v38 = vpop.f32.mrb[0].mxu1 }
  0xfa   :  { %v309_v39 = vadd.f32 %v400_v35, %v308_v38  ;;  %v310_v40 = vpop.f32.mrb[1].mxu1 }
  0xfb   :  { %v311_v41 = vpop.f32.mrb[2].mxu1 }
  0xfc   :  { %314 = vst [vmem:[%s577_s2] sm:$0xff] %v309_v39  ;;  %v322_v42 = vrot.slane %v309_v39, 4  ;;  %v331_v43 = vmul.f32 %v309_v39, %v309_v39  ;;  %v312_v44 = vpop.f32.mrb[3].mxu1 }
  0xfe   :  { %v323_v45 = vadd.f32 %v322_v42, %v309_v39  ;;  %v332_v46 = vrot.slane %v331_v43, 4 }
 0x100   :  { %v324_v47 = vrot.slane %v323_v45, 2  ;;  %v333_v48 = vadd.f32 %v332_v46, %v331_v43 }
 0x102   :  { %v325_v49 = vadd.f32 %v324_v47, %v323_v45  ;;  %v334_v50 = vrot.slane %v333_v48, 2 }
 0x104   :  { %v326_v51 = vrot.slane %v325_v49, 1  ;;  %v335_v52 = vadd.f32 %v334_v50, %v333_v48 }
 0x106   :  { %v327_v54 = vadd.f32 %v326_v51, %v325_v49  ;;  %v336_v55 = vrot.slane %v335_v52, 1 }
 0x108   :  { %v328_v57 = vadd.f32 %v327_v54, %v321_v53  ;;  %v337_v58 = vadd.f32 %v336_v55, %v335_v52 }
 0x10a   :  { %329 = vst [vmem:[%s575_s3] sm:$0x1] %v328_v57  ;;  %v338_v59 = vadd.f32 %v337_v58, %v330_v56 }
 0x10c   :  { %339 = vst [vmem:[%s576_s4] sm:$0x1] %v338_v59 }

// kernel: local_feddis_forward.36
= control target key start
LH: loop header
LB: loop body
LE: loop exit
PB: predicated region body
PF: predicated region fallthrough
CT: control target
= control target key end

     0   :  { %s73_s0 = inlined_call_operand.vmem [shape: f32[8,128], index: 0, kind: input, shape index: {}]   ;;  %s74_s1 = inlined_call_operand.vmem [shape: f32[1,128], index: 1, kind: input, shape index: {}]   ;;  %s75_s2 = inlined_call_operand.vmem [shape: f32[1,128], index: 2, kind: input, shape index: {}]   ;;  %s76_s3 = inlined_call_operand.vmem [shape: f32[8,128], index: 3, kind: output, shape index: {}]  }
   0x1   :  { %v14_v0 = vld [vmem:[%s73_s0] sm:$0xff] }
   0x2   :  { %v39_v1 = vld [vmem:[%s74_s1] ss:$0 sm:$0xff] }
   0x3   :  { %v40_v2 = vld [vmem:[%s75_s2] ss:$0 sm:$0xff]  ;;  %v22_v3 = vmul.f32 %v39_v1, %v14_v0 }
   0x5   :  { %v30_v4 = vadd.f32 %v40_v2, %v22_v3 }
   0x7   :  { %vm31_vm0 = vcmp.ge.f32.partialorder %v30_v4, 0.0  ;;  %v32_v5 = vmul.f32 0.01, %v30_v4 }
   0x9   :  { %v33_v6 = vsel %vm31_vm0, %v30_v4, %v32_v5 }
   0xa   :  { %34 = vst [vmem:[%s76_s3] sm:$0xff] %v33_v6 }

// kernel: squeeze.319
= control target key start
LH: loop header
LB: loop body
LE: loop exit
PB: predicated region body
PF: predicated region fallthrough
CT: control target
= control target key end

     0   :  { %s37_s8 = smov 32   ;;  %vm7_vm0 = vcmask 261120   ;;  %s38_s9 = smov 64   ;;  %s55_s0 = inlined_call_operand.vmem [shape: f32[128], index: 0, kind: input, shape index: {}]   ;;  %s56_s1 = inlined_call_operand.vmem [shape: f32[4,32], index: 1, kind: output, shape index: {}]  }
   0x1   :  { %v4_v0 = vld [vmem:[%s55_s0] sm:$0x1]  ;;  %s36_s0 = smov 96  }
   0x2   :  { %5 = vst [vmem:[#allocation1] sm:$0x1] %v4_v0 }
   0x9   :  { %v9_v1 = vld [vmem:[#allocation1] sm:$0x1]  }
   0xa   :  { %v21_v2 = vld [vmem:[#allocation1] sm:$0x1]   ;;  %10 = vrot.lane.b32.xlu0 %v9_v1, %s36_s0 }
   0xb   :  { %22 = vrot.lane.b32.xlu1 %v21_v2, %s37_s8  ;;  %v6_v3 = vld [vmem:[#allocation1] sm:$0x1]  }
   0xc   :  { %v15_v4 = vld [vmem:[#allocation1] sm:$0x1]   ;;  %8 = vst.msk [vmem:[#allocation0] sm:$0x1] %vm7_vm0, %v6_v3  }
   0xe   :  { %16 = vrot.lane.b32.xlu0 %v15_v4, %s38_s9 }
  0x7c   :  { %v11_v5 = vpop.permute.xlu0 %10  }
  0x7d   :  { %v23_v6 = vpop.permute.xlu1 %22   ;;  %14 = vst.msk [vmem:[#allocation0 + $0x1] sm:$0x1] %vm7_vm0, %v11_v5  }
  0x7e   :  { %26 = vst.msk [vmem:[#allocation0 + $0x3] sm:$0x1] %vm7_vm0, %v23_v6  }
  0x80   :  { %v17_v7 = vpop.permute.xlu0 %16  }
  0x81   :  { %20 = vst.msk [vmem:[#allocation0 + $0x2] sm:$0x1] %vm7_vm0, %v17_v7  }
  0x88   :  { %v30_v8 = vld [vmem:[#allocation0] sm:$0xf] }
  0x89   :  { %32 = vst [vmem:[%s56_s1] sm:$0xf] %v30_v8 }

// kernel: tile.103
= control target key start
LH: loop header
LB: loop body
LE: loop exit
PB: predicated region body
PF: predicated region fallthrough
CT: control target
= control target key end

     0   :  { %s22_s0 = inlined_call_operand.vmem [shape: f32[32], index: 0, kind: input, shape index: {}]   ;;  %s23_s1 = inlined_call_operand.vmem [shape: f32[4,32], index: 1, kind: output, shape index: {}]  }
   0x1   :  { %v4_v0 = vld [vmem:[%s22_s0] ss:$0 sm:$0xff] }
   0x2   :  { %5 = vst [vmem:[%s23_s1] sm:$0xf] %v4_v0 }

// kernel: tile.104
= control target key start
LH: loop header
LB: loop body
LE: loop exit
PB: predicated region body
PF: predicated region fallthrough
CT: control target
= control target key end

     0   :  { %vm7_vm0 = vcmask 261120   ;;  %s37_s8 = smov 32   ;;  %s38_s9 = smov 64   ;;  %vm13_vm1 = vcmask 1048320   ;;  %vm19_vm2 = vcmask 785920   ;;  %vm25_vm3 = vcmask 523520   ;;  %s55_s0 = inlined_call_operand.vmem [shape: f32[4,32], index: 0, kind: input, shape index: {}]   ;;  %s56_s1 = inlined_call_operand.vmem [shape: f32[128], index: 1, kind: output, shape index: {}]  }
   0x1   :  { %v4_v0 = vld [vmem:[%s55_s0] sm:$0xf]  ;;  %s36_s0 = smov 96  }
   0x2   :  { %5 = vst [vmem:[#allocation1] sm:$0xf] %v4_v0 }
   0x9   :  { %v10_v1 = vld [vmem:[#allocation1 + $0x3] sm:$0x1]   ;;  %v22_v2 = vld [vmem:[#allocation1 + $0x1] sm:$0x1]   ;;  %v6_v3 = vld [vmem:[#allocation1] sm:$0x1]  }
   0xa   :  { %11 = vrot.lane.b32.xlu0 %v10_v1, %s36_s0  ;;  %23 = vrot.lane.b32.xlu1 %v22_v2, %s37_s8  ;;  %v16_v4 = vld [vmem:[#allocation1 + $0x2] sm:$0x1]   ;;  %8 = vst.msk [vmem:[#allocation0] sm:$0x1] %vm7_vm0, %v6_v3  }
   0xe   :  { %17 = vrot.lane.b32.xlu0 %v16_v4, %s38_s9 }
  0x7c   :  { %v12_v5 = vpop.permute.xlu0 %11   ;;  %v24_v6 = vpop.permute.xlu1 %23  }
  0x7d   :  { %14 = vst.msk [vmem:[#allocation0] sm:$0x1] %vm13_vm1, %v12_v5  }
  0x80   :  { %v18_v7 = vpop.permute.xlu0 %17  }
  0x81   :  { %20 = vst.msk [vmem:[#allocation0] sm:$0x1] %vm19_vm2, %v18_v7  }
  0x82   :  { %26 = vst.msk [vmem:[#allocation0] sm:$0x1] %vm25_vm3, %v24_v6  }
  0x89   :  { %v30_v8 = vld [vmem:[#allocation0] sm:$0x1] }
  0x8a   :  { %32 = vst [vmem:[%s56_s1] sm:$0x1] %v30_v8 }

// kernel: local_feddis_forward.41
= control target key start
LH: loop header
LB: loop body
LE: loop exit
PB: predicated region body
PF: predicated region fallthrough
CT: control target
= control target key end

     0   :  { %v527_v1 = vmov 0   ;;  %vm243_vm0 = vcmask 261120   ;;  %v335_v41 = vlaneseq  ;;  %v528_v43 = vmov 0.0   ;;  %s705_s1 = inlined_call_operand.vmem [shape: bf16[288,256], index: 1, kind: input, shape index: {}]   ;;  %s706_s0 = inlined_call_operand.vmem [shape: bf16[8,288], index: 0, kind: input, shape index: {}]   ;;  %s707_s3 = inlined_call_operand.vmem [shape: f32[1,256], index: 3, kind: output, shape index: {1}]   ;;  %s708_s4 = inlined_call_operand.vmem [shape: f32[1,256], index: 4, kind: output, shape index: {2}]   ;;  %s709_s2 = inlined_call_operand.vmem [shape: f32[8,256], index: 2, kind: output, shape index: {0}]  }
   0x1   :  { %v470_v0 = vld [vmem:[%s705_s1 + $0x4] ss:$8 sps:$4 sm:$0xff]   ;;  %320 = vmatprep.mubr.bf16.mxu0 %v527_v1  ;;  %v472_v2 = vld [vmem:[%s705_s1] ss:$8 sps:$4 sm:$0xff]   ;;  %v473_v3 = vld [vmem:[%s705_s1 + $0x14] ss:$8 sps:$4 sm:$0xff]  }
   0x2   :  { %247 = vmatprep.subr.bf16.mxu1 %v470_v0  ;;  %v475_v4 = vld [vmem:[%s705_s1 + $0x10] ss:$8 sps:$4 sm:$0xff]   ;;  %v476_v5 = vld [vmem:[%s705_s1 + $0x24] ss:$8 sps:$4 sm:$0xff]   ;;  %v478_v6 = vld [vmem:[%s705_s1 + $0x20] ss:$8 sps:$4 sm:$0xff]  }
   0x3   :  { %248 = vmatpush1.bf16.msra.mxu1 %v472_v2  ;;  %v479_v7 = vld [vmem:[%s705_s1 + $0x34] ss:$8 sps:$4 sm:$0xff]   ;;  %v481_v8 = vld [vmem:[%s705_s1 + $0x30] ss:$8 sps:$4 sm:$0xff]   ;;  %v482_v9 = vld [vmem:[%s705_s1 + $0x44] ss:$8 sps:$4 sm:$0xff]  }
   0x4   :  { %249 = vmatprep.subr.bf16.mxu1 %v473_v3  ;;  %v484_v10 = vld [vmem:[%s705_s1 + $0x40] ss:$8 sps:$4 sm:$0xff]   ;;  %v485_v11 = vld [vmem:[%s705_s1 + $0x54] ss:$8 sps:$4 sm:$0xff]   ;;  %v487_v12 = vld [vmem:[%s705_s1 + $0x50] ss:$8 sps:$4 sm:$0xff]  }
   0x5   :  { %v512_v13 = vld [vmem:[%s705_s1 + $0x104] ss:$8 sps:$4 sm:$0xff]   ;;  %v514_v14 = vld [vmem:[%s705_s1 + $0x100] ss:$8 sps:$4 sm:$0xff]   ;;  %v518_v16 = vld [vmem:[%s705_s1 + $0x114] ss:$8 sps:$4 sm:$0xff]  }
   0x6   :  { %v488_v15 = vld [vmem:[%s705_s1 + $0x64] ss:$8 sps:$4 sm:$0xff]   ;;  %288 = vmatprep.subr.bf16.mxu0 %v512_v13  ;;  %v520_v17 = vld [vmem:[%s705_s1 + $0x110] ss:$8 sps:$4 sm:$0xff]   ;;  %v490_v18 = vld [vmem:[%s705_s1 + $0x60] ss:$8 sps:$4 sm:$0xff]  }
   0x7   :  { %250 = vmatpush1.bf16.msra.mxu1 %v475_v4  ;;  %289 = vmatpush1.bf16.msra.mxu0 %v514_v14  ;;  %v491_v19 = vld [vmem:[%s705_s1 + $0x74] ss:$8 sps:$4 sm:$0xff]   ;;  %v15_v20 = vld [vmem:[%s706_s0] sm:$0xff]  ;;  %v524_v21 = vld [vmem:[%s706_s0 + $0x8] ss:$0 sps:$4 sm:$0xff]   ;;  %vm669_vm1 = vcmp.lt.s32.totalorder %v335_v41, 256 }
   0x8   :  { %251 = vmatprep.subr.bf16.mxu1 %v476_v5  ;;  %290 = vmatprep.subr.bf16.mxu0 %v518_v16  ;;  %v426_v22 = vcombine.high %v15_v20, %v15_v20  ;;  %v493_v23 = vld [vmem:[%s705_s1 + $0x70] ss:$8 sps:$4 sm:$0xff]   ;;  %v494_v24 = vld [vmem:[%s705_s1 + $0x84] ss:$8 sps:$4 sm:$0xff]   ;;  %v496_v25 = vld [vmem:[%s705_s1 + $0x80] ss:$8 sps:$4 sm:$0xff]   ;;  %v425_v40 = vcombine.low %v15_v20, %v15_v20 }
   0x9   :  { %v497_v26 = vld [vmem:[%s705_s1 + $0x94] ss:$8 sps:$4 sm:$0xff]   ;;  %v499_v27 = vld [vmem:[%s705_s1 + $0x90] ss:$8 sps:$4 sm:$0xff]   ;;  %v500_v28 = vld [vmem:[%s705_s1 + $0xa4] ss:$8 sps:$4 sm:$0xff]  }
   0xa   :  { %279 = vmatprep.mubr.bf16.mxu1 %v426_v22  ;;  %v502_v29 = vld [vmem:[%s705_s1 + $0xa0] ss:$8 sps:$4 sm:$0xff]   ;;  %v503_v30 = vld [vmem:[%s705_s1 + $0xb4] ss:$8 sps:$4 sm:$0xff]   ;;  %v505_v31 = vld [vmem:[%s705_s1 + $0xb0] ss:$8 sps:$4 sm:$0xff]  }
   0xb   :  { %252 = vmatpush1.bf16.msra.mxu1 %v478_v6  ;;  %291 = vmatpush1.bf16.msra.mxu0 %v520_v17  ;;  %v506_v32 = vld [vmem:[%s705_s1 + $0xc4] ss:$8 sps:$4 sm:$0xff]   ;;  %v508_v33 = vld [vmem:[%s705_s1 + $0xc0] ss:$8 sps:$4 sm:$0xff]   ;;  %v509_v34 = vld [vmem:[%s705_s1 + $0xd4] ss:$8 sps:$4 sm:$0xff]  }
   0xc   :  { %253 = vmatprep.subr.bf16.mxu1 %v479_v7  ;;  %v511_v35 = vld [vmem:[%s705_s1 + $0xd0] ss:$8 sps:$4 sm:$0xff]   ;;  %v515_v36 = vld [vmem:[%s705_s1 + $0xe4] ss:$8 sps:$4 sm:$0xff]   ;;  %v517_v37 = vld [vmem:[%s705_s1 + $0xe0] ss:$8 sps:$4 sm:$0xff]  }
   0xd   :  { %v521_v38 = vld [vmem:[%s705_s1 + $0xf4] ss:$8 sps:$4 sm:$0xff]   ;;  %v523_v39 = vld [vmem:[%s705_s1 + $0xf0] ss:$8 sps:$4 sm:$0xff]   ;;  %339 = vst.msk [vmem:[%s707_s3] sm:$0x3] %vm669_vm1, %v528_v43 }
   0xe   :  { %464 = vmatmul.mubr.msk.bf16.vlgmr.msra.gmra.mrb[0].mxu0 %vm243_vm0, %v524_v21  ;;  %340 = vst.msk [vmem:[%s708_s4] sm:$0x3] %vm669_vm1, %v528_v43  ;;  %v529_v61 = vmov 1966171168  }
   0xf   :  { %254 = vmatpush1.bf16.msra.mxu1 %v481_v8  ;;  %v358_v62 = vunpack.c.l.s4 %v529_v61  ;;  %v361_v8 = vshrl.u32 %v335_v41, 7 }
  0x10   :  { %255 = vmatprep.subr.bf16.mxu1 %v482_v9 }
  0x11   :  { %v359_v7 = vunpack.c.0.s8 %v358_v62 }
  0x13   :  { %256 = vmatpush1.bf16.msra.mxu1 %v484_v10  ;;  %v362_v17 = vsub.s32 %v359_v7, %v361_v8 }
  0x14   :  { %257 = vmatprep.subr.bf16.mxu1 %v485_v11 }
  0x17   :  { %258 = vmatpush1.bf16.msra.mxu1 %v487_v12 }
  0x18   :  { %259 = vmatprep.subr.bf16.mxu1 %v488_v15 }
  0x1b   :  { %260 = vmatpush1.bf16.msra.mxu1 %v490_v18 }
  0x1c   :  { %261 = vmatprep.subr.bf16.mxu1 %v491_v19 }
  0x1f   :  { %262 = vmatpush1.bf16.msra.mxu1 %v493_v23 }
  0x20   :  { %263 = vmatprep.subr.bf16.mxu1 %v494_v24  ;;  %v341_v24 = vld [vmem:[%s707_s3] sm:$0x3] }
  0x23   :  { %264 = vmatpush1.bf16.msra.mxu1 %v496_v25 }
  0x24   :  { %265 = vmatprep.subr.bf16.mxu1 %v497_v26 }
  0x27   :  { %266 = vmatpush1.bf16.msra.mxu1 %v499_v27  ;;  %v378_v27 = vld [vmem:[%s708_s4] sm:$0x3] }
  0x28   :  { %267 = vmatprep.subr.bf16.mxu1 %v500_v28 }
  0x2b   :  { %268 = vmatpush1.bf16.msra.mxu1 %v502_v29 }
  0x2c   :  { %269 = vmatprep.subr.bf16.mxu1 %v503_v30 }
  0x2f   :  { %270 = vmatpush1.bf16.msra.mxu1 %v505_v31 }
  0x30   :  { %271 = vmatprep.subr.bf16.mxu1 %v506_v32 }
  0x33   :  { %272 = vmatpush1.bf16.msra.mxu1 %v508_v33 }
  0x34   :  { %273 = vmatprep.subr.bf16.mxu1 %v509_v34 }
  0x37   :  { %274 = vmatpush1.bf16.msra.mxu1 %v511_v35 }
  0x38   :  { %275 = vmatprep.subr.bf16.mxu1 %v515_v36 }
  0x3b   :  { %276 = vmatpush1.bf16.msra.mxu1 %v517_v37 }
  0x3c   :  { %277 = vmatprep.subr.bf16.mxu1 %v521_v38 }
  0x3f   :  { %278 = vmatpush1.bf16.msra.mxu1 %v523_v39 }
  0x42   :  { %280 = vmatmul.mubr.bf16.vlgmr.msra.gmra.mrb[0].mxu1 %v425_v40 }
  0xe1   :  { %v322_v44 = vpop.f32.mrb[0].mxu0 }
  0xe2   :  { %v324_v45 = vpop.f32.mrb[1].mxu0 }
  0xe3   :  { %v326_v46 = vpop.f32.mrb[2].mxu0 }
  0xe4   :  { %v327_v47 = vpop.f32.mrb[3].mxu0 }
 0x115   :  { %v281_v48 = vpop.f32.mrb[0].mxu1 }
 0x116   :  { %v323_v49 = vadd.f32 %v322_v44, %v281_v48  ;;  %v283_v50 = vpop.f32.mrb[1].mxu1 }
 0x117   :  { %v325_v51 = vadd.f32 %v324_v45, %v283_v50  ;;  %v285_v52 = vpop.f32.mrb[2].mxu1 }
 0x118   :  { %329 = vst [vmem:[%s709_s2] sm:$0xff] %v323_v49  ;;  %v342_v53 = vrot.slane %v323_v49, 4  ;;  %v379_v54 = vmul.f32 %v323_v49, %v323_v49  ;;  %v286_v55 = vpop.f32.mrb[3].mxu1 }
 0x119   :  { %330 = vst [vmem:[%s709_s2 + $0x8] sm:$0xff] %v325_v51  ;;  %v348_v56 = vrot.slane %v325_v51, 4  ;;  %v380_v57 = vmul.f32 %v325_v51, %v325_v51 }
 0x11a   :  { %v343_v58 = vadd.f32 %v342_v53, %v323_v49  ;;  %v381_v59 = vrot.slane %v379_v54, 4 }
 0x11b   :  { %v349_v60 = vadd.f32 %v348_v56, %v325_v51  ;;  %v387_v63 = vrot.slane %v380_v57, 4 }
 0x11c   :  { %v344_v0 = vrot.slane %v343_v58, 2  ;;  %v382_v1 = vadd.f32 %v381_v59, %v379_v54 }
 0x11d   :  { %v350_v2 = vrot.slane %v349_v60, 2  ;;  %v388_v3 = vadd.f32 %v387_v63, %v380_v57 }
 0x11e   :  { %v345_v4 = vadd.f32 %v344_v0, %v343_v58  ;;  %v383_v5 = vrot.slane %v382_v1, 2 }
 0x11f   :  { %v351_v6 = vadd.f32 %v350_v2, %v349_v60  ;;  %v389_v9 = vrot.slane %v388_v3, 2 }
 0x120   :  { %v346_v10 = vrot.slane %v345_v4, 1  ;;  %v384_v11 = vadd.f32 %v383_v5, %v382_v1 }
 0x121   :  { %v352_v12 = vrot.slane %v351_v6, 1  ;;  %v390_v13 = vadd.f32 %v389_v9, %v388_v3 }
 0x122   :  { %v347_v14 = vadd.f32 %v346_v10, %v345_v4  ;;  %v385_v15 = vrot.slane %v384_v11, 1 }
 0x123   :  { %v353_v16 = vadd.f32 %v352_v12, %v351_v6  ;;  %v391_v18 = vrot.slane %v390_v13, 1 }
 0x124   :  { %v386_v19 = vadd.f32 %v385_v15, %v384_v11 }
 0x125   :  { %v356_v20 = vcombine.low %v347_v14, %v353_v16  ;;  %v392_v21 = vadd.f32 %v391_v18, %v390_v13 }
 0x127   :  { %v363_v22 = vrot.slane %v356_v20, %v362_v17  ;;  %v395_v23 = vcombine.low %v386_v19, %v392_v21 }
 0x129   :  { %v370_v25 = vrot.slane %v363_v22, %v362_v17  ;;  %v402_v26 = vrot.slane %v395_v23, %v362_v17 }
 0x12b   :  { %v372_v28 = vadd.f32 %v370_v25, %v341_v24  ;;  %v409_v29 = vrot.slane %v402_v26, %v362_v17 }
 0x12d   :  { %377 = vst.msk [vmem:[%s707_s3] sm:$0x3] %vm669_vm1, %v372_v28  ;;  %v411_v30 = vadd.f32 %v409_v29, %v378_v27 }
 0x12f   :  { %412 = vst.msk [vmem:[%s708_s4] sm:$0x3] %vm669_vm1, %v411_v30 }

// kernel: local_feddis_forward.42
= control target key start
LH: loop header
LB: loop body
LE: loop exit
PB: predicated region body
PF: predicated region fallthrough
CT: control target
= control target key end

     0   :  { %v18_v0 = vlaneseq  ;;  %s94_s1 = inlined_call_operand.vmem [shape: f32[1,256], index: 1, kind: input, shape index: {}]   ;;  %s95_s2 = inlined_call_operand.vmem [shape: f32[1,256], index: 2, kind: input, shape index: {}]   ;;  %s96_s0 = inlined_call_operand.vmem [shape: f32[8,256], index: 0, kind: input, shape index: {}]   ;;  %s97_s3 = inlined_call_operand.vmem [shape: f32[8,256], index: 3, kind: output, shape index: {}]  }
   0x1   :  { %v16_v2 = vld [vmem:[%s94_s1] sm:$0x3]  ;;  %v15_v7 = vld [vmem:[%s96_s0 + $0x8] sm:$0xff] }
   0x2   :  { %v19_v1 = vshrl.u32 %v18_v0, 7  ;;  %v30_v3 = vld [vmem:[%s95_s2] sm:$0x3] }
   0x3   :  { %v14_v6 = vld [vmem:[%s96_s0] sm:$0xff] }
   0x4   :  { %v20_v4 = vsub.s32 0, %v19_v1  ;;  %v24_v5 = vsub.s32 1, %v19_v1 }
   0x6   :  { %v21_v8 = vrot.slane %v16_v2, %v20_v4  ;;  %v35_v9 = vrot.slane %v30_v3, %v20_v4  ;;  %v25_v10 = vrot.slane %v16_v2, %v24_v5  ;;  %v39_v11 = vrot.slane %v30_v3, %v24_v5 }
   0x8   :  { %v28_v12 = vmul.f32 %v21_v8, %v14_v6  ;;  %v29_v13 = vmul.f32 %v25_v10, %v15_v7 }
   0xa   :  { %v42_v14 = vadd.f32 %v35_v9, %v28_v12  ;;  %v43_v15 = vadd.f32 %v39_v11, %v29_v13 }
   0xc   :  { %vm44_vm0 = vcmp.ge.f32.partialorder %v42_v14, 0.0  ;;  %v46_v16 = vmul.f32 0.01, %v42_v14  ;;  %vm45_vm1 = vcmp.ge.f32.partialorder %v43_v15, 0.0  ;;  %v47_v17 = vmul.f32 0.01, %v43_v15 }
   0xe   :  { %v48_v18 = vsel %vm44_vm0, %v42_v14, %v46_v16  ;;  %v49_v19 = vsel %vm45_vm1, %v43_v15, %v47_v17 }
   0xf   :  { %50 = vst [vmem:[%s97_s3] sm:$0xff] %v48_v18  ;;  %51 = vst [vmem:[%s97_s3 + $0x8] sm:$0xff] %v49_v19 }

// kernel: squeeze.400
= control target key start
LH: loop header
LB: loop body
LE: loop exit
PB: predicated region body
PF: predicated region fallthrough
CT: control target
= control target key end

     0   :  { %s37_s8 = smov 80   ;;  %vm7_vm0 = vcmask 130048   ;;  %s38_s9 = smov 96   ;;  %s55_s0 = inlined_call_operand.vmem [shape: f32[64], index: 0, kind: input, shape index: {}]   ;;  %s56_s1 = inlined_call_operand.vmem [shape: f32[4,16], index: 1, kind: output, shape index: {}]  }
   0x1   :  { %v4_v0 = vld [vmem:[%s55_s0] sm:$0x1]  ;;  %s36_s0 = smov 112  }
   0x2   :  { %5 = vst [vmem:[#allocation1] sm:$0x1] %v4_v0 }
   0x9   :  { %v9_v1 = vld [vmem:[#allocation1] sm:$0x1]  }
   0xa   :  { %v21_v2 = vld [vmem:[#allocation1] sm:$0x1]   ;;  %10 = vrot.lane.b32.xlu0 %v9_v1, %s36_s0 }
   0xb   :  { %22 = vrot.lane.b32.xlu1 %v21_v2, %s37_s8  ;;  %v6_v3 = vld [vmem:[#allocation1] sm:$0x1]  }
   0xc   :  { %v15_v4 = vld [vmem:[#allocation1] sm:$0x1]   ;;  %8 = vst.msk [vmem:[#allocation0] sm:$0x1] %vm7_vm0, %v6_v3  }
   0xe   :  { %16 = vrot.lane.b32.xlu0 %v15_v4, %s38_s9 }
  0x7c   :  { %v11_v5 = vpop.permute.xlu0 %10  }
  0x7d   :  { %v23_v6 = vpop.permute.xlu1 %22   ;;  %14 = vst.msk [vmem:[#allocation0 + $0x1] sm:$0x1] %vm7_vm0, %v11_v5  }
  0x7e   :  { %26 = vst.msk [vmem:[#allocation0 + $0x3] sm:$0x1] %vm7_vm0, %v23_v6  }
  0x80   :  { %v17_v7 = vpop.permute.xlu0 %16  }
  0x81   :  { %20 = vst.msk [vmem:[#allocation0 + $0x2] sm:$0x1] %vm7_vm0, %v17_v7  }
  0x88   :  { %v30_v8 = vld [vmem:[#allocation0] sm:$0xf] }
  0x89   :  { %32 = vst [vmem:[%s56_s1] sm:$0xf] %v30_v8 }

// kernel: tile.133
= control target key start
LH: loop header
LB: loop body
LE: loop exit
PB: predicated region body
PF: predicated region fallthrough
CT: control target
= control target key end

     0   :  { %s22_s0 = inlined_call_operand.vmem [shape: f32[16], index: 0, kind: input, shape index: {}]   ;;  %s23_s1 = inlined_call_operand.vmem [shape: f32[4,16], index: 1, kind: output, shape index: {}]  }
   0x1   :  { %v4_v0 = vld [vmem:[%s22_s0] ss:$0 sm:$0xff] }
   0x2   :  { %5 = vst [vmem:[%s23_s1] sm:$0xf] %v4_v0 }

// kernel: tile.134
= control target key start
LH: loop header
LB: loop body
LE: loop exit
PB: predicated region body
PF: predicated region fallthrough
CT: control target
= control target key end

     0   :  { %vm7_vm0 = vcmask 130048   ;;  %s37_s8 = smov 16   ;;  %s38_s9 = smov 32   ;;  %vm13_vm1 = vcmask 523648   ;;  %vm19_vm2 = vcmask 392448   ;;  %vm25_vm3 = vcmask 261248   ;;  %s55_s0 = inlined_call_operand.vmem [shape: f32[4,16], index: 0, kind: input, shape index: {}]   ;;  %s56_s1 = inlined_call_operand.vmem [shape: f32[64], index: 1, kind: output, shape index: {}]  }
   0x1   :  { %v4_v0 = vld [vmem:[%s55_s0] sm:$0xf]  ;;  %s36_s0 = smov 48  }
   0x2   :  { %5 = vst [vmem:[#allocation1] sm:$0xf] %v4_v0 }
   0x9   :  { %v10_v1 = vld [vmem:[#allocation1 + $0x3] sm:$0x1]   ;;  %v22_v2 = vld [vmem:[#allocation1 + $0x1] sm:$0x1]   ;;  %v6_v3 = vld [vmem:[#allocation1] sm:$0x1]  }
   0xa   :  { %11 = vrot.lane.b32.xlu0 %v10_v1, %s36_s0  ;;  %23 = vrot.lane.b32.xlu1 %v22_v2, %s37_s8  ;;  %v16_v4 = vld [vmem:[#allocation1 + $0x2] sm:$0x1]   ;;  %8 = vst.msk [vmem:[#allocation0] sm:$0x1] %vm7_vm0, %v6_v3  }
   0xe   :  { %17 = vrot.lane.b32.xlu0 %v16_v4, %s38_s9 }
  0x7c   :  { %v12_v5 = vpop.permute.xlu0 %11   ;;  %v24_v6 = vpop.permute.xlu1 %23  }
  0x7d   :  { %14 = vst.msk [vmem:[#allocation0] sm:$0x1] %vm13_vm1, %v12_v5  }
  0x80   :  { %v18_v7 = vpop.permute.xlu0 %17  }
  0x81   :  { %20 = vst.msk [vmem:[#allocation0] sm:$0x1] %vm19_vm2, %v18_v7  }
  0x82   :  { %26 = vst.msk [vmem:[#allocation0] sm:$0x1] %vm25_vm3, %v24_v6  }
  0x89   :  { %v30_v8 = vld [vmem:[#allocation0] sm:$0x1] }
  0x8a   :  { %32 = vst [vmem:[%s56_s1] sm:$0x1] %v30_v8 }

// kernel: local_feddis_forward.48
= control target key start
LH: loop header
LB: loop body
LE: loop exit
PB: predicated region body
PF: predicated region fallthrough
CT: control target
= control target key end

     0   :  { %vm197_vm0 = vcmask 261120   ;;  %v445_v24 = vmov 0.0   ;;  %s573_s1 = inlined_call_operand.vmem [shape: bf16[288,128], index: 1, kind: input, shape index: {}]   ;;  %s574_s0 = inlined_call_operand.vmem [shape: bf16[32,288], index: 0, kind: input, shape index: {}]   ;;  %s575_s3 = inlined_call_operand.vmem [shape: f32[1,128], index: 3, kind: output, shape index: {1}]   ;;  %s576_s4 = inlined_call_operand.vmem [shape: f32[1,128], index: 4, kind: output, shape index: {2}]   ;;  %s577_s2 = inlined_call_operand.vmem [shape: f32[32,128], index: 2, kind: output, shape index: {0}]  }
   0x1   :  { %v419_v0 = vld [vmem:[%s573_s1 + $0x40] sm:$0xff]   ;;  %v421_v2 = vld [vmem:[%s573_s1 + $0x48] sm:$0xff]   ;;  %v423_v4 = vld [vmem:[%s573_s1 + $0x50] sm:$0xff]   ;;  %310 = vst [vmem:[%s575_s3] sm:$0x1] %v445_v24 }
   0x2   :  { %v420_v1 = vld [vmem:[%s573_s1] sm:$0xff]   ;;  %378 = vmatprep.subr.bf16.mxu0 %v419_v0  ;;  %v422_v3 = vld [vmem:[%s573_s1 + $0x8] sm:$0xff]   ;;  %v424_v5 = vld [vmem:[%s573_s1 + $0x10] sm:$0xff]   ;;  %311 = vst [vmem:[%s576_s4] sm:$0x1] %v445_v24 }
   0x3   :  { %379 = vmatpush3.bf16.msra.mxu0 %v420_v1  ;;  %v425_v6 = vld [vmem:[%s573_s1 + $0x58] sm:$0xff]   ;;  %v427_v8 = vld [vmem:[%s573_s1 + $0x60] sm:$0xff]   ;;  %v429_v11 = vld [vmem:[%s573_s1 + $0x68] sm:$0xff]  }
   0x4   :  { %380 = vmatprep.subr.bf16.mxu0 %v421_v2  ;;  %v426_v7 = vld [vmem:[%s573_s1 + $0x18] sm:$0xff]   ;;  %v433_v9 = vld [vmem:[%s573_s1 + $0x80] sm:$0xff]   ;;  %v430_v12 = vld [vmem:[%s573_s1 + $0x28] sm:$0xff]  }
   0x5   :  { %v428_v10 = vld [vmem:[%s573_s1 + $0x20] sm:$0xff]   ;;  %410 = vmatprep.subr.bf16.mxu1 %v433_v9  ;;  %v436_v13 = vld [vmem:[%s573_s1 + $0x88] sm:$0xff]   ;;  %v431_v14 = vld [vmem:[%s573_s1 + $0x70] sm:$0xff]  }
   0x6   :  { %411 = vmatpush3.bf16.msra.mxu1 %v433_v9  ;;  %v439_v15 = vld [vmem:[%s574_s0 + $0x4] ss:$12 sps:$4 sm:$0xff]   ;;  %v440_v16 = vld [vmem:[%s574_s0 + $0x8] ss:$12 sps:$4 sm:$0xff]   ;;  %v441_v17 = vld [vmem:[%s574_s0 + $0x20] ss:$12 sps:$4 sm:$0xff]  }
   0x7   :  { %381 = vmatpush3.bf16.msra.mxu0 %v422_v3  ;;  %412 = vmatprep.subr.bf16.mxu1 %v436_v13  ;;  %v432_v18 = vld [vmem:[%s573_s1 + $0x30] sm:$0xff]   ;;  %v434_v19 = vld [vmem:[%s573_s1 + $0x78] sm:$0xff]   ;;  %v437_v21 = vld [vmem:[%s574_s0] ss:$12 sps:$4 sm:$0xff]  }
   0x8   :  { %382 = vmatprep.subr.bf16.mxu0 %v423_v4  ;;  %236 = vmatprep.mubr.bf16.mxu0 %v439_v15  ;;  %v435_v20 = vld [vmem:[%s573_s1 + $0x38] sm:$0xff]   ;;  %v312_v0 = vld [vmem:[%s575_s3] sm:$0x1] }
   0x9   :  { %414 = vmatprep.mubr.msk.bf16.mxu1 %vm197_vm0, %v440_v16  ;;  %v442_v22 = vld [vmem:[%s574_s0 + $0x1c] ss:$12 sps:$4 sm:$0xff]   ;;  %v444_v23 = vld [vmem:[%s574_s0 + $0x18] ss:$12 sps:$4 sm:$0xff]   ;;  %v324_v3 = vld [vmem:[%s576_s4] sm:$0x1] }
   0xa   :  { %413 = vmatpush3.bf16.msra.mxu1 %v436_v13 }
   0xb   :  { %383 = vmatpush3.bf16.msra.mxu0 %v424_v5 }
   0xc   :  { %384 = vmatprep.subr.bf16.mxu0 %v425_v6 }
   0xd   :  { %415 = vmatmul.mubr.msk.bf16.vlgmr.msra.gmra.mrb[0].mxu1 %vm197_vm0, %v441_v17 }
   0xf   :  { %385 = vmatpush3.bf16.msra.mxu0 %v426_v7 }
  0x10   :  { %386 = vmatprep.subr.bf16.mxu0 %v427_v8 }
  0x13   :  { %387 = vmatpush3.bf16.msra.mxu0 %v428_v10 }
  0x14   :  { %388 = vmatprep.subr.bf16.mxu0 %v429_v11 }
  0x17   :  { %389 = vmatpush3.bf16.msra.mxu0 %v430_v12 }
  0x18   :  { %390 = vmatprep.subr.bf16.mxu0 %v431_v14 }
  0x1b   :  { %391 = vmatpush3.bf16.msra.mxu0 %v432_v18 }
  0x1c   :  { %392 = vmatprep.subr.bf16.mxu0 %v434_v19 }
  0x1f   :  { %393 = vmatpush3.bf16.msra.mxu0 %v435_v20 }
  0x22   :  { %237 = vmatmul.mubr.bf16.vlgmr.msra.gmra.mrb[0].mxu0 %v437_v21 }
  0x23   :  { %244 = vmatprep.mubr.bf16.mxu0 %v442_v22 }
  0x2a   :  { %245 = vmatmul.mubr.bf16.gmra.mrb[4].mxu0 %v444_v23 }
  0xe0   :  { %v416_v25 = vpop.f32.mrb[0].mxu1 }
  0xe1   :  { %v287_v26 = vpop.f32.mrb[1].mxu1 }
  0xe2   :  { %v417_v27 = vpop.f32.mrb[2].mxu1 }
  0xe3   :  { %v290_v28 = vpop.f32.mrb[3].mxu1 }
  0xf5   :  { %v394_v29 = vpop.f32.mrb[0].mxu0 }
  0xf6   :  { %v395_v30 = vpop.f32.mrb[1].mxu0 }
  0xf7   :  { %v396_v31 = vadd.f32 %v395_v30, %v394_v29  ;;  %v397_v32 = vpop.f32.mrb[2].mxu0 }
  0xf8   :  { %v398_v33 = vpop.f32.mrb[3].mxu0 }
  0xf9   :  { %v399_v34 = vadd.f32 %v398_v33, %v397_v32  ;;  %v288_v35 = vadd.f32 %v396_v31, %v287_v26 }
  0xfb   :  { %302 = vst [vmem:[%s577_s2] sm:$0xff] %v288_v35  ;;  %v291_v36 = vadd.f32 %v399_v34, %v290_v28  ;;  %v325_v37 = vmul.f32 %v288_v35, %v288_v35 }
  0xfd   :  { %303 = vst [vmem:[%s577_s2 + $0x8] sm:$0xff] %v291_v36  ;;  %v313_v38 = vadd.f32 %v291_v36, %v288_v35  ;;  %v326_v39 = vmul.f32 %v291_v36, %v291_v36  ;;  %v400_v40 = vpop.f32.mrb[4].mxu0 }
  0xfe   :  { %v401_v41 = vpop.f32.mrb[5].mxu0 }
  0xff   :  { %v329_v42 = vadd.f32 %v326_v39, %v325_v37  ;;  %v402_v43 = vadd.f32 %v401_v41, %v400_v40  ;;  %v403_v44 = vpop.f32.mrb[6].mxu0 }
 0x100   :  { %v404_v45 = vpop.f32.mrb[7].mxu0 }
 0x101   :  { %v296_v46 = vadd.f32 %v416_v25, %v402_v43  ;;  %v405_v47 = vadd.f32 %v404_v45, %v403_v44 }
 0x103   :  { %304 = vst [vmem:[%s577_s2 + $0x10] sm:$0xff] %v296_v46  ;;  %v314_v48 = vadd.f32 %v313_v38, %v296_v46  ;;  %v327_v49 = vmul.f32 %v296_v46, %v296_v46  ;;  %v299_v50 = vadd.f32 %v417_v27, %v405_v47 }
 0x105   :  { %v330_v51 = vadd.f32 %v329_v42, %v327_v49  ;;  %305 = vst [vmem:[%s577_s2 + $0x18] sm:$0xff] %v299_v50  ;;  %v315_v52 = vadd.f32 %v314_v48, %v299_v50  ;;  %v328_v53 = vmul.f32 %v299_v50, %v299_v50 }
 0x107   :  { %v316_v54 = vrot.slane %v315_v52, 4  ;;  %v331_v55 = vadd.f32 %v330_v51, %v328_v53 }
 0x109   :  { %v317_v56 = vadd.f32 %v316_v54, %v315_v52  ;;  %v332_v57 = vrot.slane %v331_v55, 4 }
 0x10b   :  { %v318_v58 = vrot.slane %v317_v56, 2  ;;  %v333_v59 = vadd.f32 %v332_v57, %v331_v55 }
 0x10d   :  { %v319_v60 = vadd.f32 %v318_v58, %v317_v56  ;;  %v334_v61 = vrot.slane %v333_v59, 2 }
 0x10f   :  { %v320_v62 = vrot.slane %v319_v60, 1  ;;  %v335_v63 = vadd.f32 %v334_v61, %v333_v59 }
 0x111   :  { %v321_v1 = vadd.f32 %v320_v62, %v319_v60  ;;  %v336_v2 = vrot.slane %v335_v63, 1 }
 0x113   :  { %v322_v4 = vadd.f32 %v321_v1, %v312_v0  ;;  %v337_v5 = vadd.f32 %v336_v2, %v335_v63 }
 0x115   :  { %323 = vst [vmem:[%s575_s3] sm:$0x1] %v322_v4  ;;  %v338_v6 = vadd.f32 %v337_v5, %v324_v3 }
 0x117   :  { %339 = vst [vmem:[%s576_s4] sm:$0x1] %v338_v6 }

// kernel: squeeze.427
= control target key start
LH: loop header
LB: loop body
LE: loop exit
PB: predicated region body
PF: predicated region fallthrough
CT: control target
= control target key end

     0   :  { %s37_s8 = smov 104   ;;  %vm7_vm0 = vcmask 64512   ;;  %s38_s9 = smov 112   ;;  %s55_s0 = inlined_call_operand.vmem [shape: f32[32], index: 0, kind: input, shape index: {}]   ;;  %s56_s1 = inlined_call_operand.vmem [shape: f32[4,8], index: 1, kind: output, shape index: {}]  }
   0x1   :  { %v4_v0 = vld [vmem:[%s55_s0] sm:$0x1]  ;;  %s36_s0 = smov 120  }
   0x2   :  { %5 = vst [vmem:[#allocation1] sm:$0x1] %v4_v0 }
   0x9   :  { %v9_v1 = vld [vmem:[#allocation1] sm:$0x1]  }
   0xa   :  { %v21_v2 = vld [vmem:[#allocation1] sm:$0x1]   ;;  %10 = vrot.lane.b32.xlu0 %v9_v1, %s36_s0 }
   0xb   :  { %22 = vrot.lane.b32.xlu1 %v21_v2, %s37_s8  ;;  %v6_v3 = vld [vmem:[#allocation1] sm:$0x1]  }
   0xc   :  { %v15_v4 = vld [vmem:[#allocation1] sm:$0x1]   ;;  %8 = vst.msk [vmem:[#allocation0] sm:$0x1] %vm7_vm0, %v6_v3  }
   0xe   :  { %16 = vrot.lane.b32.xlu0 %v15_v4, %s38_s9 }
  0x7c   :  { %v11_v5 = vpop.permute.xlu0 %10  }
  0x7d   :  { %v23_v6 = vpop.permute.xlu1 %22   ;;  %14 = vst.msk [vmem:[#allocation0 + $0x1] sm:$0x1] %vm7_vm0, %v11_v5  }
  0x7e   :  { %26 = vst.msk [vmem:[#allocation0 + $0x3] sm:$0x1] %vm7_vm0, %v23_v6  }
  0x80   :  { %v17_v7 = vpop.permute.xlu0 %16  }
  0x81   :  { %20 = vst.msk [vmem:[#allocation0 + $0x2] sm:$0x1] %vm7_vm0, %v17_v7  }
  0x88   :  { %v30_v8 = vld [vmem:[#allocation0] sm:$0xf] }
  0x89   :  { %32 = vst [vmem:[%s56_s1] sm:$0xf] %v30_v8 }

// kernel: tile.143
= control target key start
LH: loop header
LB: loop body
LE: loop exit
PB: predicated region body
PF: predicated region fallthrough
CT: control target
= control target key end

     0   :  { %s22_s0 = inlined_call_operand.vmem [shape: f32[8], index: 0, kind: input, shape index: {}]   ;;  %s23_s1 = inlined_call_operand.vmem [shape: f32[4,8], index: 1, kind: output, shape index: {}]  }
   0x1   :  { %v4_v0 = vld [vmem:[%s22_s0] ss:$0 sm:$0xff] }
   0x2   :  { %5 = vst [vmem:[%s23_s1] sm:$0xf] %v4_v0 }

// kernel: tile.144
= control target key start
LH: loop header
LB: loop body
LE: loop exit
PB: predicated region body
PF: predicated region fallthrough
CT: control target
= control target key end

     0   :  { %vm7_vm0 = vcmask 64512   ;;  %s37_s8 = smov 8   ;;  %s38_s9 = smov 16   ;;  %vm13_vm1 = vcmask 261312   ;;  %vm19_vm2 = vcmask 195712   ;;  %vm25_vm3 = vcmask 130112   ;;  %s55_s0 = inlined_call_operand.vmem [shape: f32[4,8], index: 0, kind: input, shape index: {}]   ;;  %s56_s1 = inlined_call_operand.vmem [shape: f32[32], index: 1, kind: output, shape index: {}]  }
   0x1   :  { %v4_v0 = vld [vmem:[%s55_s0] sm:$0xf]  ;;  %s36_s0 = smov 24  }
   0x2   :  { %5 = vst [vmem:[#allocation1] sm:$0xf] %v4_v0 }
   0x9   :  { %v10_v1 = vld [vmem:[#allocation1 + $0x3] sm:$0x1]   ;;  %v22_v2 = vld [vmem:[#allocation1 + $0x1] sm:$0x1]   ;;  %v6_v3 = vld [vmem:[#allocation1] sm:$0x1]  }
   0xa   :  { %11 = vrot.lane.b32.xlu0 %v10_v1, %s36_s0  ;;  %23 = vrot.lane.b32.xlu1 %v22_v2, %s37_s8  ;;  %v16_v4 = vld [vmem:[#allocation1 + $0x2] sm:$0x1]   ;;  %8 = vst.msk [vmem:[#allocation0] sm:$0x1] %vm7_vm0, %v6_v3  }
   0xe   :  { %17 = vrot.lane.b32.xlu0 %v16_v4, %s38_s9 }
  0x7c   :  { %v12_v5 = vpop.permute.xlu0 %11   ;;  %v24_v6 = vpop.permute.xlu1 %23  }
  0x7d   :  { %14 = vst.msk [vmem:[#allocation0] sm:$0x1] %vm13_vm1, %v12_v5  }
  0x80   :  { %v18_v7 = vpop.permute.xlu0 %17  }
  0x81   :  { %20 = vst.msk [vmem:[#allocation0] sm:$0x1] %vm19_vm2, %v18_v7  }
  0x82   :  { %26 = vst.msk [vmem:[#allocation0] sm:$0x1] %vm25_vm3, %v24_v6  }
  0x89   :  { %v30_v8 = vld [vmem:[#allocation0] sm:$0x1] }
  0x8a   :  { %32 = vst [vmem:[%s56_s1] sm:$0x1] %v30_v8 }

// kernel: local_feddis_forward.50
= control target key start
LH: loop header
LB: loop body
LE: loop exit
PB: predicated region body
PF: predicated region fallthrough
CT: control target
= control target key end

     0   :  { %v481_v0 = vmov 0   ;;  %vm175_vm0 = vcmask 130048   ;;  %v482_v26 = vmov 0.0   ;;  %s669_s1 = inlined_call_operand.vmem [shape: bf16[144,128], index: 1, kind: input, shape index: {}]   ;;  %s670_s0 = inlined_call_operand.vmem [shape: bf16[128,144], index: 0, kind: input, shape index: {}]   ;;  %s671_s3 = inlined_call_operand.vmem [shape: f32[1,128], index: 3, kind: output, shape index: {1}]   ;;  %s672_s4 = inlined_call_operand.vmem [shape: f32[1,128], index: 4, kind: output, shape index: {2}]   ;;  %s673_s2 = inlined_call_operand.vmem [shape: f32[128,128], index: 2, kind: output, shape index: {0}]  }
   0x1   :  { %200 = vmatprep.subr.bf16.mxu0 %v481_v0  ;;  %v448_v1 = vld [vmem:[%s669_s1] sm:$0xff]   ;;  %428 = vmatprep.subr.bf16.mxu1 %v481_v0  ;;  %v449_v2 = vld [vmem:[%s669_s1 + $0x8] sm:$0xff]   ;;  %v450_v3 = vld [vmem:[%s669_s1 + $0x10] sm:$0xff]   ;;  %317 = vst [vmem:[%s671_s3] sm:$0x1] %v482_v26 }
   0x2   :  { %201 = vmatpush1.bf16.msra.mxu0 %v448_v1  ;;  %437 = vmatpush1.bf16.msra.mxu1 %v448_v1  ;;  %v451_v4 = vld [vmem:[%s669_s1 + $0x18] sm:$0xff]   ;;  %v459_v5 = vld [vmem:[%s670_s0 + $0x4] ss:$8 sps:$4 sm:$0xff]   ;;  %v454_v9 = vld [vmem:[%s669_s1 + $0x30] sm:$0xff]   ;;  %318 = vst [vmem:[%s672_s4] sm:$0x1] %v482_v26 }
   0x3   :  { %202 = vmatprep.subr.bf16.mxu0 %v481_v0  ;;  %429 = vmatprep.subr.bf16.mxu1 %v481_v0  ;;  %v465_v6 = vld [vmem:[%s670_s0 + $0x44] ss:$8 sps:$4 sm:$0xff]   ;;  %v455_v10 = vld [vmem:[%s669_s1 + $0x38] sm:$0xff]   ;;  %v457_v12 = vld [vmem:[%s670_s0] ss:$8 sps:$4 sm:$0xff]  }
   0x4   :  { %420 = vmatprep.mubr.msk.bf16.mxu0 %vm175_vm0, %v459_v5  ;;  %v452_v7 = vld [vmem:[%s669_s1 + $0x20] sm:$0xff]   ;;  %424 = vmatprep.mubr.msk.bf16.mxu1 %vm175_vm0, %v465_v6  ;;  %v453_v8 = vld [vmem:[%s669_s1 + $0x28] sm:$0xff]   ;;  %v460_v14 = vld [vmem:[%s670_s0 + $0x14] ss:$8 sps:$4 sm:$0xff]  }
   0x5   :  { %v456_v11 = vld [vmem:[%s669_s1 + $0x40] sm:$0xff]   ;;  %v469_v15 = vld [vmem:[%s670_s0 + $0x54] ss:$8 sps:$4 sm:$0xff]   ;;  %v462_v16 = vld [vmem:[%s670_s0 + $0x10] ss:$8 sps:$4 sm:$0xff]  }
   0x6   :  { %203 = vmatpush1.bf16.msra.mxu0 %v449_v2  ;;  %438 = vmatpush1.bf16.msra.mxu1 %v449_v2  ;;  %v463_v13 = vld [vmem:[%s670_s0 + $0x40] ss:$8 sps:$4 sm:$0xff]   ;;  %v471_v17 = vld [vmem:[%s670_s0 + $0x50] ss:$8 sps:$4 sm:$0xff]   ;;  %v466_v18 = vld [vmem:[%s670_s0 + $0x24] ss:$8 sps:$4 sm:$0xff]  }
   0x7   :  { %204 = vmatprep.subr.bf16.mxu0 %v481_v0  ;;  %430 = vmatprep.subr.bf16.mxu1 %v481_v0  ;;  %v475_v19 = vld [vmem:[%s670_s0 + $0x64] ss:$8 sps:$4 sm:$0xff]   ;;  %v468_v20 = vld [vmem:[%s670_s0 + $0x20] ss:$8 sps:$4 sm:$0xff]   ;;  %v472_v22 = vld [vmem:[%s670_s0 + $0x34] ss:$8 sps:$4 sm:$0xff]  }
   0x8   :  { %v477_v21 = vld [vmem:[%s670_s0 + $0x60] ss:$8 sps:$4 sm:$0xff]   ;;  %v478_v23 = vld [vmem:[%s670_s0 + $0x74] ss:$8 sps:$4 sm:$0xff]   ;;  %v474_v24 = vld [vmem:[%s670_s0 + $0x30] ss:$8 sps:$4 sm:$0xff]  }
   0x9   :  { %v480_v25 = vld [vmem:[%s670_s0 + $0x70] ss:$8 sps:$4 sm:$0xff]  }
   0xa   :  { %205 = vmatpush1.bf16.msra.mxu0 %v450_v3  ;;  %439 = vmatpush1.bf16.msra.mxu1 %v450_v3 }
   0xb   :  { %206 = vmatprep.subr.bf16.mxu0 %v481_v0  ;;  %431 = vmatprep.subr.bf16.mxu1 %v481_v0 }
   0xe   :  { %207 = vmatpush1.bf16.msra.mxu0 %v451_v4  ;;  %440 = vmatpush1.bf16.msra.mxu1 %v451_v4 }
   0xf   :  { %208 = vmatprep.subr.bf16.mxu0 %v481_v0  ;;  %432 = vmatprep.subr.bf16.mxu1 %v481_v0 }
  0x12   :  { %209 = vmatpush1.bf16.msra.mxu0 %v452_v7  ;;  %441 = vmatpush1.bf16.msra.mxu1 %v452_v7 }
  0x13   :  { %210 = vmatprep.subr.bf16.mxu0 %v481_v0  ;;  %433 = vmatprep.subr.bf16.mxu1 %v481_v0 }
  0x16   :  { %211 = vmatpush1.bf16.msra.mxu0 %v453_v8  ;;  %442 = vmatpush1.bf16.msra.mxu1 %v453_v8 }
  0x17   :  { %212 = vmatprep.subr.bf16.mxu0 %v481_v0  ;;  %434 = vmatprep.subr.bf16.mxu1 %v481_v0 }
  0x1a   :  { %213 = vmatpush1.bf16.msra.mxu0 %v454_v9  ;;  %443 = vmatpush1.bf16.msra.mxu1 %v454_v9 }
  0x1b   :  { %214 = vmatprep.subr.bf16.mxu0 %v481_v0  ;;  %435 = vmatprep.subr.bf16.mxu1 %v481_v0 }
  0x1e   :  { %215 = vmatpush1.bf16.msra.mxu0 %v455_v10  ;;  %444 = vmatpush1.bf16.msra.mxu1 %v455_v10 }
  0x1f   :  { %216 = vmatprep.subr.bf16.mxu0 %v481_v0  ;;  %436 = vmatprep.subr.bf16.mxu1 %v481_v0 }
  0x22   :  { %217 = vmatpush1.bf16.msra.mxu0 %v456_v11  ;;  %445 = vmatpush1.bf16.msra.mxu1 %v456_v11 }
  0x25   :  { %233 = vmatmul.mubr.bf16.vlgmr.msra.gmra.mrb[0].mxu0 %v457_v12  ;;  %265 = vmatmul.mubr.bf16.vlgmr.msra.gmra.mrb[0].mxu1 %v463_v13 }
  0x26   :  { %421 = vmatprep.mubr.msk.bf16.mxu0 %vm175_vm0, %v460_v14  ;;  %425 = vmatprep.mubr.msk.bf16.mxu1 %vm175_vm0, %v469_v15 }
  0x2d   :  { %241 = vmatmul.mubr.bf16.gmra.mrb[4].mxu0 %v462_v16  ;;  %273 = vmatmul.mubr.bf16.gmra.mrb[4].mxu1 %v471_v17 }
  0x2e   :  { %422 = vmatprep.mubr.msk.bf16.mxu0 %vm175_vm0, %v466_v18  ;;  %426 = vmatprep.mubr.msk.bf16.mxu1 %vm175_vm0, %v475_v19 }
  0x35   :  { %249 = vmatmul.mubr.bf16.gmra.mrb[8].mxu0 %v468_v20  ;;  %281 = vmatmul.mubr.bf16.gmra.mrb[8].mxu1 %v477_v21 }
  0x36   :  { %423 = vmatprep.mubr.msk.bf16.mxu0 %vm175_vm0, %v472_v22  ;;  %427 = vmatprep.mubr.msk.bf16.mxu1 %vm175_vm0, %v478_v23 }
  0x3d   :  { %257 = vmatmul.mubr.bf16.gmra.mrb[12].mxu0 %v474_v24  ;;  %289 = vmatmul.mubr.bf16.gmra.mrb[12].mxu1 %v480_v25 }
  0xf8   :  { %v234_v27 = vpop.f32.mrb[0].mxu0  ;;  %v597_v28 = vpop.f32.mrb[0].mxu1 }
  0xf9   :  { %297 = vst [vmem:[%s673_s2] sm:$0xff] %v234_v27  ;;  %v236_v29 = vpop.f32.mrb[1].mxu0  ;;  %305 = vst [vmem:[%s673_s2 + $0x40] sm:$0xff] %v597_v28  ;;  %v268_v30 = vpop.f32.mrb[1].mxu1  ;;  %v344_v33 = vmul.f32 %v234_v27, %v234_v27  ;;  %v352_v16 = vmul.f32 %v597_v28, %v597_v28 }
  0xfa   :  { %v237_v31 = vpop.f32.mrb[2].mxu0  ;;  %v606_v32 = vpop.f32.mrb[2].mxu1 }
  0xfb   :  { %298 = vst [vmem:[%s673_s2 + $0x8] sm:$0xff] %v237_v31  ;;  %v320_v34 = vadd.f32 %v237_v31, %v234_v27  ;;  %v345_v35 = vmul.f32 %v237_v31, %v237_v31  ;;  %v239_v36 = vpop.f32.mrb[3].mxu0  ;;  %306 = vst [vmem:[%s673_s2 + $0x48] sm:$0xff] %v606_v32  ;;  %v271_v37 = vpop.f32.mrb[3].mxu1  ;;  %v353_v19 = vmul.f32 %v606_v32, %v606_v32 }
  0xfd   :  { %v360_v38 = vadd.f32 %v345_v35, %v344_v33 }
 0x100   :  { %v242_v39 = vpop.f32.mrb[4].mxu0  ;;  %v274_v40 = vpop.f32.mrb[4].mxu1 }
 0x101   :  { %299 = vst [vmem:[%s673_s2 + $0x10] sm:$0xff] %v242_v39  ;;  %v321_v41 = vadd.f32 %v320_v34, %v242_v39  ;;  %v346_v42 = vmul.f32 %v242_v39, %v242_v39  ;;  %v244_v43 = vpop.f32.mrb[5].mxu0  ;;  %307 = vst [vmem:[%s673_s2 + $0x50] sm:$0xff] %v274_v40  ;;  %v276_v44 = vpop.f32.mrb[5].mxu1  ;;  %v354_v22 = vmul.f32 %v274_v40, %v274_v40 }
 0x102   :  { %v245_v45 = vpop.f32.mrb[6].mxu0  ;;  %v277_v46 = vpop.f32.mrb[6].mxu1 }
 0x103   :  { %v361_v47 = vadd.f32 %v360_v38, %v346_v42  ;;  %300 = vst [vmem:[%s673_s2 + $0x18] sm:$0xff] %v245_v45  ;;  %v322_v48 = vadd.f32 %v321_v41, %v245_v45  ;;  %v347_v49 = vmul.f32 %v245_v45, %v245_v45  ;;  %v247_v50 = vpop.f32.mrb[7].mxu0  ;;  %308 = vst [vmem:[%s673_s2 + $0x58] sm:$0xff] %v277_v46  ;;  %v279_v51 = vpop.f32.mrb[7].mxu1 }
 0x104   :  { %v355_v25 = vmul.f32 %v277_v46, %v277_v46  ;;  %v319_v50 = vld [vmem:[%s671_s3] sm:$0x1] }
 0x105   :  { %v362_v52 = vadd.f32 %v361_v47, %v347_v49 }
 0x108   :  { %v250_v53 = vpop.f32.mrb[8].mxu0  ;;  %v282_v54 = vpop.f32.mrb[8].mxu1 }
 0x109   :  { %301 = vst [vmem:[%s673_s2 + $0x20] sm:$0xff] %v250_v53  ;;  %v323_v55 = vadd.f32 %v322_v48, %v250_v53  ;;  %v348_v56 = vmul.f32 %v250_v53, %v250_v53  ;;  %v252_v57 = vpop.f32.mrb[9].mxu0  ;;  %309 = vst [vmem:[%s673_s2 + $0x60] sm:$0xff] %v282_v54  ;;  %v284_v58 = vpop.f32.mrb[9].mxu1  ;;  %v356_v30 = vmul.f32 %v282_v54, %v282_v54  ;;  %v343_v53 = vld [vmem:[%s672_s4] sm:$0x1] }
 0x10a   :  { %v253_v59 = vpop.f32.mrb[10].mxu0  ;;  %v285_v60 = vpop.f32.mrb[10].mxu1 }
 0x10b   :  { %v363_v61 = vadd.f32 %v362_v52, %v348_v56  ;;  %302 = vst [vmem:[%s673_s2 + $0x28] sm:$0xff] %v253_v59  ;;  %v324_v62 = vadd.f32 %v323_v55, %v253_v59  ;;  %v349_v63 = vmul.f32 %v253_v59, %v253_v59  ;;  %v255_v0 = vpop.f32.mrb[11].mxu0  ;;  %310 = vst [vmem:[%s673_s2 + $0x68] sm:$0xff] %v285_v60  ;;  %v287_v1 = vpop.f32.mrb[11].mxu1 }
 0x10c   :  { %v357_v35 = vmul.f32 %v285_v60, %v285_v60 }
 0x10d   :  { %v364_v2 = vadd.f32 %v363_v61, %v349_v63 }
 0x110   :  { %v258_v3 = vpop.f32.mrb[12].mxu0  ;;  %v290_v4 = vpop.f32.mrb[12].mxu1 }
 0x111   :  { %303 = vst [vmem:[%s673_s2 + $0x30] sm:$0xff] %v258_v3  ;;  %v325_v5 = vadd.f32 %v324_v62, %v258_v3  ;;  %v350_v6 = vmul.f32 %v258_v3, %v258_v3  ;;  %v260_v7 = vpop.f32.mrb[13].mxu0  ;;  %311 = vst [vmem:[%s673_s2 + $0x70] sm:$0xff] %v290_v4  ;;  %v292_v8 = vpop.f32.mrb[13].mxu1 }
 0x112   :  { %v261_v9 = vpop.f32.mrb[14].mxu0  ;;  %v293_v10 = vpop.f32.mrb[14].mxu1 }
 0x113   :  { %v365_v11 = vadd.f32 %v364_v2, %v350_v6  ;;  %304 = vst [vmem:[%s673_s2 + $0x38] sm:$0xff] %v261_v9  ;;  %v326_v12 = vadd.f32 %v325_v5, %v261_v9  ;;  %v351_v13 = vmul.f32 %v261_v9, %v261_v9  ;;  %v263_v14 = vpop.f32.mrb[15].mxu0  ;;  %312 = vst [vmem:[%s673_s2 + $0x78] sm:$0xff] %v293_v10  ;;  %v295_v15 = vpop.f32.mrb[15].mxu1 }
 0x114   :  { %v359_v41 = vmul.f32 %v293_v10, %v293_v10 }
 0x115   :  { %v327_v17 = vadd.f32 %v326_v12, %v597_v28  ;;  %v366_v18 = vadd.f32 %v365_v11, %v351_v13  ;;  %v358_v28 = vmul.f32 %v290_v4, %v290_v4 }
 0x117   :  { %v328_v20 = vadd.f32 %v327_v17, %v606_v32  ;;  %v367_v21 = vadd.f32 %v366_v18, %v352_v16 }
 0x119   :  { %v368_v23 = vadd.f32 %v367_v21, %v353_v19  ;;  %v329_v24 = vadd.f32 %v328_v20, %v274_v40 }
 0x11b   :  { %v330_v26 = vadd.f32 %v329_v24, %v277_v46  ;;  %v369_v27 = vadd.f32 %v368_v23, %v354_v22 }
 0x11d   :  { %v331_v29 = vadd.f32 %v330_v26, %v282_v54  ;;  %v370_v31 = vadd.f32 %v369_v27, %v355_v25 }
 0x11f   :  { %v371_v33 = vadd.f32 %v370_v31, %v356_v30  ;;  %v332_v34 = vadd.f32 %v331_v29, %v285_v60 }
 0x121   :  { %v372_v36 = vadd.f32 %v371_v33, %v357_v35  ;;  %v333_v37 = vadd.f32 %v332_v34, %v290_v4 }
 0x123   :  { %v373_v38 = vadd.f32 %v372_v36, %v358_v28  ;;  %v334_v39 = vadd.f32 %v333_v37, %v293_v10 }
 0x125   :  { %v335_v32 = vrot.slane %v334_v39, 4  ;;  %v374_v42 = vadd.f32 %v373_v38, %v359_v41 }
 0x127   :  { %v336_v43 = vadd.f32 %v335_v32, %v334_v39  ;;  %v375_v44 = vrot.slane %v374_v42, 4 }
 0x129   :  { %v337_v40 = vrot.slane %v336_v43, 2  ;;  %v376_v45 = vadd.f32 %v375_v44, %v374_v42 }
 0x12b   :  { %v338_v46 = vadd.f32 %v337_v40, %v336_v43  ;;  %v377_v47 = vrot.slane %v376_v45, 2 }
 0x12d   :  { %v339_v48 = vrot.slane %v338_v46, 1  ;;  %v378_v49 = vadd.f32 %v377_v47, %v376_v45 }
 0x12f   :  { %v340_v51 = vadd.f32 %v339_v48, %v338_v46  ;;  %v379_v52 = vrot.slane %v378_v49, 1 }
 0x131   :  { %v341_v54 = vadd.f32 %v340_v51, %v319_v50  ;;  %v380_v55 = vadd.f32 %v379_v52, %v378_v49 }
 0x133   :  { %342 = vst [vmem:[%s671_s3] sm:$0x1] %v341_v54  ;;  %v381_v56 = vadd.f32 %v380_v55, %v343_v53 }
 0x135   :  { %382 = vst [vmem:[%s672_s4] sm:$0x1] %v381_v56 }

// kernel: local_feddis_forward.52
= control target key start
LH: loop header
LB: loop body
LE: loop exit
PB: predicated region body
PF: predicated region fallthrough
CT: control target
= control target key end

     0   :  { %vm344_vm0 = vcmask 1043456   ;;  %vm247_vm1 = vcmask 64512   ;;  %v637_v34 = vlaneseq  ;;  %s2895_s1 = inlined_call_operand.vmem [shape: bf16[8,128], index: 1, kind: input, shape index: {}]   ;;  %s2896_s0 = inlined_call_operand.vmem [shape: bf16[512,8], index: 0, kind: input, shape index: {}]   ;;  %s2897_s2 = inlined_call_operand.vmem [shape: f32[1,128], index: 2, kind: input, shape index: {}]   ;;  %s2898_s3 = inlined_call_operand.vmem [shape: f32[512,128], index: 3, kind: output, shape index: {}]  }
   0x1   :  { %v79_v0 = vld [vmem:[%s2895_s1] sm:$0xf]  ;;  %v1518_v4 = vld [vmem:[%s2896_s0 + $0x8] sm:$0xff]   ;;  %v1520_v6 = vld [vmem:[%s2896_s0 + $0x10] sm:$0xff]  }
   0x2   :  { %1514 = vmatprep.subr.msk.bf16.mxu0 %vm344_vm0, %v79_v0  ;;  %1515 = vmatprep.subr.msk.bf16.mxu1 %vm344_vm0, %v79_v0  ;;  %v346_v1 = vsel %vm344_vm0, %v79_v0, 0  ;;  %v1516_v2 = vld [vmem:[%s2896_s0] sm:$0xff]   ;;  %v1519_v5 = vld [vmem:[%s2896_s0 + $0x88] sm:$0xff]   ;;  %v1522_v7 = vld [vmem:[%s2896_s0 + $0x90] sm:$0xff]   ;;  %v1955_v35 = vand.u32 127, %v637_v34 }
   0x3   :  { %1447 = vmatpush3.bf16.msra.mxu0 %v346_v1  ;;  %1513 = vmatpush3.bf16.msra.mxu1 %v346_v1  ;;  %v1517_v3 = vld [vmem:[%s2896_s0 + $0x80] sm:$0xff]   ;;  %v1521_v8 = vld [vmem:[%s2896_s0 + $0x18] sm:$0xff]   ;;  %v1525_v12 = vld [vmem:[%s2896_s0 + $0x28] sm:$0xff]  }
   0x4   :  { %1448 = vmatprep.mubr.msk.bf16.mxu0 %vm247_vm1, %v1516_v2  ;;  %1480 = vmatprep.mubr.msk.bf16.mxu1 %vm247_vm1, %v1517_v3  ;;  %v1523_v9 = vld [vmem:[%s2896_s0 + $0x98] sm:$0xff]   ;;  %v1524_v10 = vld [vmem:[%s2896_s0 + $0x20] sm:$0xff]   ;;  %v1527_v13 = vld [vmem:[%s2896_s0 + $0xa8] sm:$0xff]   ;;  %vm639_vm2 = vcmp.lt.s32.totalorder %v1955_v35, 2 }
   0x5   :  { %v1526_v11 = vld [vmem:[%s2896_s0 + $0xa0] sm:$0xff]   ;;  %v1528_v14 = vld [vmem:[%s2896_s0 + $0x30] sm:$0xff]   ;;  %v1529_v16 = vld [vmem:[%s2896_s0 + $0x38] sm:$0xff]  }
   0x6   :  { %1449 = vmatmul.mubr.msk.bf16.vlgmr.msra.gmra.mrb[0].mxu0 %vm247_vm1, %v1518_v4  ;;  %1481 = vmatmul.mubr.msk.bf16.vlgmr.msra.gmra.mrb[0].mxu1 %vm247_vm1, %v1519_v5  ;;  %v1530_v15 = vld [vmem:[%s2896_s0 + $0xb0] sm:$0xff]   ;;  %v1531_v17 = vld [vmem:[%s2896_s0 + $0xb8] sm:$0xff]   ;;  %v1532_v18 = vld [vmem:[%s2896_s0 + $0x40] sm:$0xff]  }
   0x7   :  { %1452 = vmatprep.mubr.msk.bf16.mxu0 %vm247_vm1, %v1520_v6  ;;  %1484 = vmatprep.mubr.msk.bf16.mxu1 %vm247_vm1, %v1522_v7  ;;  %v1534_v19 = vld [vmem:[%s2896_s0 + $0xc0] sm:$0xff]   ;;  %v1533_v20 = vld [vmem:[%s2896_s0 + $0x48] sm:$0xff]   ;;  %v1536_v22 = vld [vmem:[%s2896_s0 + $0x50] sm:$0xff]  }
   0x8   :  { %v1535_v21 = vld [vmem:[%s2896_s0 + $0xc8] sm:$0xff]   ;;  %v1538_v23 = vld [vmem:[%s2896_s0 + $0xd0] sm:$0xff]   ;;  %v1537_v24 = vld [vmem:[%s2896_s0 + $0x58] sm:$0xff]  }
   0x9   :  { %v1539_v25 = vld [vmem:[%s2896_s0 + $0xd8] sm:$0xff]   ;;  %v1540_v26 = vld [vmem:[%s2896_s0 + $0x60] sm:$0xff]   ;;  %v1541_v28 = vld [vmem:[%s2896_s0 + $0x68] sm:$0xff]  }
   0xa   :  { %v1542_v27 = vld [vmem:[%s2896_s0 + $0xe0] sm:$0xff]   ;;  %v1543_v29 = vld [vmem:[%s2896_s0 + $0xe8] sm:$0xff]   ;;  %v1544_v30 = vld [vmem:[%s2896_s0 + $0x70] sm:$0xff]  }
   0xb   :  { %v1546_v31 = vld [vmem:[%s2896_s0 + $0xf0] sm:$0xff]   ;;  %v1545_v32 = vld [vmem:[%s2896_s0 + $0x78] sm:$0xff]   ;;  %v1960_v36 = vld [vmem:[%s2897_s2] ss:$0 sm:$0xff] }
   0xc   :  { %v1547_v33 = vld [vmem:[%s2896_s0 + $0xf8] sm:$0xff]  }
   0xe   :  { %1453 = vmatmul.mubr.msk.bf16.gmra.mrb[4].mxu0 %vm247_vm1, %v1521_v8  ;;  %1485 = vmatmul.mubr.msk.bf16.gmra.mrb[4].mxu1 %vm247_vm1, %v1523_v9 }
   0xf   :  { %1456 = vmatprep.mubr.msk.bf16.mxu0 %vm247_vm1, %v1524_v10  ;;  %1488 = vmatprep.mubr.msk.bf16.mxu1 %vm247_vm1, %v1526_v11 }
  0x16   :  { %1457 = vmatmul.mubr.msk.bf16.gmra.mrb[8].mxu0 %vm247_vm1, %v1525_v12  ;;  %1489 = vmatmul.mubr.msk.bf16.gmra.mrb[8].mxu1 %vm247_vm1, %v1527_v13 }
  0x17   :  { %1460 = vmatprep.mubr.msk.bf16.mxu0 %vm247_vm1, %v1528_v14  ;;  %1492 = vmatprep.mubr.msk.bf16.mxu1 %vm247_vm1, %v1530_v15 }
  0x1e   :  { %1461 = vmatmul.mubr.msk.bf16.gmra.mrb[12].mxu0 %vm247_vm1, %v1529_v16  ;;  %1493 = vmatmul.mubr.msk.bf16.gmra.mrb[12].mxu1 %vm247_vm1, %v1531_v17 }
  0x1f   :  { %1464 = vmatprep.mubr.msk.bf16.mxu0 %vm247_vm1, %v1532_v18  ;;  %1496 = vmatprep.mubr.msk.bf16.mxu1 %vm247_vm1, %v1534_v19 }
  0x26   :  { %1465 = vmatmul.mubr.msk.bf16.gmra.mrb[16].mxu0 %vm247_vm1, %v1533_v20  ;;  %1497 = vmatmul.mubr.msk.bf16.gmra.mrb[16].mxu1 %vm247_vm1, %v1535_v21 }
  0x27   :  { %1468 = vmatprep.mubr.msk.bf16.mxu0 %vm247_vm1, %v1536_v22  ;;  %1500 = vmatprep.mubr.msk.bf16.mxu1 %vm247_vm1, %v1538_v23 }
  0x2e   :  { %1469 = vmatmul.mubr.msk.bf16.gmra.mrb[20].mxu0 %vm247_vm1, %v1537_v24  ;;  %1501 = vmatmul.mubr.msk.bf16.gmra.mrb[20].mxu1 %vm247_vm1, %v1539_v25 }
  0x2f   :  { %1472 = vmatprep.mubr.msk.bf16.mxu0 %vm247_vm1, %v1540_v26  ;;  %1504 = vmatprep.mubr.msk.bf16.mxu1 %vm247_vm1, %v1542_v27 }
  0x36   :  { %1473 = vmatmul.mubr.msk.bf16.gmra.mrb[24].mxu0 %vm247_vm1, %v1541_v28  ;;  %1505 = vmatmul.mubr.msk.bf16.gmra.mrb[24].mxu1 %vm247_vm1, %v1543_v29 }
  0x37   :  { %1476 = vmatprep.mubr.msk.bf16.mxu0 %vm247_vm1, %v1544_v30  ;;  %1508 = vmatprep.mubr.msk.bf16.mxu1 %vm247_vm1, %v1546_v31 }
  0x3e   :  { %1477 = vmatmul.mubr.msk.bf16.gmra.mrb[28].mxu0 %vm247_vm1, %v1545_v32  ;;  %1509 = vmatmul.mubr.msk.bf16.gmra.mrb[28].mxu1 %vm247_vm1, %v1547_v33 }
  0xd9   :  { %v1450_v37 = vpop.f32.mrb[0].mxu0  ;;  %v1482_v39 = vpop.f32.mrb[0].mxu1 }
  0xda   :  { %v391_v38 = vadd.f32 %v1450_v37, %v1960_v36  ;;  %v382_v40 = vpop.f32.mrb[1].mxu0  ;;  %v519_v41 = vadd.f32 %v1482_v39, %v1960_v36  ;;  %v510_v42 = vpop.f32.mrb[1].mxu1 }
  0xdb   :  { %v1451_v43 = vpop.f32.mrb[2].mxu0  ;;  %v1483_v45 = vpop.f32.mrb[2].mxu1  ;;  %v383_v48 = vadd.f32 %v1960_v36, %v382_v40  ;;  %v511_v53 = vadd.f32 %v1960_v36, %v510_v42 }
  0xdc   :  { %v394_v44 = vadd.f32 %v1451_v43, %v1960_v36  ;;  %v385_v46 = vpop.f32.mrb[3].mxu0  ;;  %v1968_v47 = vsel %vm639_vm2, %v391_v38, -inf  ;;  %v513_v49 = vpop.f32.mrb[3].mxu1  ;;  %v1973_v50 = vsel %vm639_vm2, %v519_v41, -inf  ;;  %v522_v51 = vadd.f32 %v1483_v45, %v1960_v36 }
  0xdd   :  { %708 = vmax.xlane.f32.xlu1 %v1968_v47  ;;  %772 = vmax.xlane.f32.xlu0 %v1973_v50  ;;  %v1986_v54 = vsel %vm639_vm2, %v383_v48, -inf  ;;  %v514_v60 = vadd.f32 %v1960_v36, %v513_v49  ;;  %v386_v0 = vadd.f32 %v1960_v36, %v385_v46  ;;  %v1998_v1 = vsel %vm639_vm2, %v511_v53, -inf }
  0xde   :  { %v1980_v52 = vsel %vm639_vm2, %v394_v44, -inf  ;;  %v1992_v61 = vsel %vm639_vm2, %v522_v51, -inf }
  0xdf   :  { %v2004_v4 = vsel %vm639_vm2, %v514_v60, -inf  ;;  %v2010_v6 = vsel %vm639_vm2, %v386_v0, -inf }
  0xe1   :  { %710 = vmax.xlane.f32.xlu1 %v1980_v52  ;;  %v1454_v55 = vpop.f32.mrb[4].mxu0  ;;  %704 = vmax.xlane.f32.xlu0 %v1986_v54  ;;  %v1486_v57 = vpop.f32.mrb[4].mxu1 }
  0xe2   :  { %v398_v56 = vpop.f32.mrb[5].mxu0  ;;  %v526_v59 = vpop.f32.mrb[5].mxu1  ;;  %v407_v5 = vadd.f32 %v1454_v55, %v1960_v36  ;;  %v535_v16 = vadd.f32 %v1486_v57, %v1960_v36 }
  0xe3   :  { %v1455_v58 = vpop.f32.mrb[6].mxu0  ;;  %v1487_v63 = vpop.f32.mrb[6].mxu1  ;;  %v399_v21 = vadd.f32 %v1960_v36, %v398_v56  ;;  %v527_v32 = vadd.f32 %v1960_v36, %v526_v59 }
  0xe4   :  { %v401_v62 = vpop.f32.mrb[7].mxu0  ;;  %v529_v2 = vpop.f32.mrb[7].mxu1  ;;  %v410_v3 = vadd.f32 %v1455_v58, %v1960_v36  ;;  %v538_v12 = vadd.f32 %v1487_v63, %v1960_v36  ;;  %v2028_v17 = vsel %vm639_vm2, %v407_v5, -inf  ;;  %v2042_v22 = vsel %vm639_vm2, %v535_v16, -inf }
  0xe5   :  { %774 = vmax.xlane.f32.xlu1 %v1992_v61  ;;  %768 = vmax.xlane.f32.xlu0 %v1998_v1  ;;  %v402_v19 = vadd.f32 %v1960_v36, %v401_v62  ;;  %v530_v28 = vadd.f32 %v1960_v36, %v529_v2  ;;  %v2068_v33 = vsel %vm639_vm2, %v399_v21, -inf  ;;  %v2082_v40 = vsel %vm639_vm2, %v527_v32, -inf }
  0xe6   :  { %v2020_v13 = vsel %vm639_vm2, %v410_v3, -inf  ;;  %v2036_v20 = vsel %vm639_vm2, %v538_v12, -inf }
  0xe7   :  { %v2058_v29 = vsel %vm639_vm2, %v402_v19, -inf  ;;  %v2077_v39 = vsel %vm639_vm2, %v530_v28, -inf }
  0xe9   :  { %770 = vmax.xlane.f32.xlu1 %v2004_v4  ;;  %v1458_v7 = vpop.f32.mrb[8].mxu0  ;;  %706 = vmax.xlane.f32.xlu0 %v2010_v6  ;;  %v1490_v9 = vpop.f32.mrb[8].mxu1 }
  0xea   :  { %v2013_v8 = vpop.f32.mrb[9].mxu0  ;;  %v2015_v11 = vpop.f32.mrb[9].mxu1  ;;  %v423_v37 = vadd.f32 %v1458_v7, %v1960_v36  ;;  %v551_v42 = vadd.f32 %v1490_v9, %v1960_v36 }
  0xeb   :  { %v1459_v10 = vpop.f32.mrb[10].mxu0  ;;  %v1491_v15 = vpop.f32.mrb[10].mxu1  ;;  %v415_v12 = vadd.f32 %v1960_v36, %v2013_v8 }
  0xec   :  { %v2022_v14 = vpop.f32.mrb[11].mxu0  ;;  %v2030_v18 = vpop.f32.mrb[11].mxu1  ;;  %v426_v38 = vadd.f32 %v1459_v10, %v1960_v36  ;;  %v554_v46 = vadd.f32 %v1491_v15, %v1960_v36  ;;  %v2090_v48 = vsel %vm639_vm2, %v423_v37, -inf  ;;  %v2148_v8 = vsel %vm639_vm2, %v551_v42, -inf }
  0xed   :  { %718 = vmax.xlane.f32.xlu1 %v2020_v13  ;;  %716 = vmax.xlane.f32.xlu0 %v2028_v17  ;;  %v418_v19 = vadd.f32 %v1960_v36, %v2022_v14  ;;  %v543_v37 = vadd.f32 %v1960_v36, %v2015_v11 }
  0xee   :  { %v2096_v56 = vsel %vm639_vm2, %v426_v38, -inf  ;;  %v2139_v21 = vsel %vm639_vm2, %v554_v46, -inf }
  0xef   :  { %v2164_v11 = vsel %vm639_vm2, %v418_v19, -inf }
  0xf0   :  { %2926 = vst [vmem:[#allocation3_spill] sm:$0xff] %v2164_v11 }
  0xf1   :  { %782 = vmax.xlane.f32.xlu1 %v2036_v20  ;;  %v2044_v23 = vpop.f32.mrb[12].mxu0  ;;  %780 = vmax.xlane.f32.xlu0 %v2042_v22  ;;  %v2049_v25 = vpop.f32.mrb[12].mxu1 }
  0xf2   :  { %v2047_v24 = vpop.f32.mrb[13].mxu0  ;;  %v2053_v27 = vpop.f32.mrb[13].mxu1  ;;  %v439_v19 = vadd.f32 %v2044_v23, %v1960_v36  ;;  %v2216_v23 = vsel %vm639_vm2, %v543_v37, -inf }
  0xf3   :  { %v2051_v26 = vpop.f32.mrb[14].mxu0  ;;  %v2062_v31 = vpop.f32.mrb[14].mxu1  ;;  %2928 = vst [vmem:[#allocation5_spill] sm:$0xff] %v2216_v23 }
  0xf4   :  { %v2060_v30 = vpop.f32.mrb[15].mxu0  ;;  %v2070_v34 = vpop.f32.mrb[15].mxu1 }
  0xf5   :  { %714 = vmax.xlane.f32.xlu1 %v2058_v29  ;;  %712 = vmax.xlane.f32.xlu0 %v2068_v33 }
  0xf9   :  { %778 = vmax.xlane.f32.xlu1 %v2077_v39  ;;  %v1466_v41 = vpop.f32.mrb[16].mxu0  ;;  %776 = vmax.xlane.f32.xlu0 %v2082_v40  ;;  %v1498_v45 = vpop.f32.mrb[16].mxu1 }
  0xfa   :  { %v455_v43 = vadd.f32 %v1466_v41, %v1960_v36  ;;  %v446_v44 = vpop.f32.mrb[17].mxu0  ;;  %v583_v53 = vadd.f32 %v1498_v45, %v1960_v36  ;;  %v574_v55 = vpop.f32.mrb[17].mxu1 }
  0xfb   :  { %v447_v49 = vadd.f32 %v1960_v36, %v446_v44  ;;  %v1467_v51 = vpop.f32.mrb[18].mxu0  ;;  %v575_v59 = vadd.f32 %v1960_v36, %v574_v55  ;;  %v1499_v60 = vpop.f32.mrb[18].mxu1  ;;  %v2158_v44 = vsel %vm639_vm2, %v415_v12, -inf }
  0xfc   :  { %v458_v57 = vadd.f32 %v1467_v51, %v1960_v36  ;;  %v449_v58 = vpop.f32.mrb[19].mxu0  ;;  %v2102_v62 = vsel %vm639_vm2, %v455_v43, -inf  ;;  %v586_v0 = vadd.f32 %v1499_v60, %v1960_v36  ;;  %v577_v2 = vpop.f32.mrb[19].mxu1  ;;  %v2109_v3 = vsel %vm639_vm2, %v583_v53, -inf  ;;  %2925 = vst [vmem:[#allocation2_spill] sm:$0xff] %v2158_v44 }
  0xfd   :  { %726 = vmax.xlane.f32.xlu1 %v2096_v56  ;;  %v450_v63 = vadd.f32 %v1960_v36, %v449_v58  ;;  %v2113_v5 = vsel %vm639_vm2, %v447_v49, -inf  ;;  %724 = vmax.xlane.f32.xlu0 %v2090_v48  ;;  %v578_v7 = vadd.f32 %v1960_v36, %v577_v2  ;;  %v2123_v10 = vsel %vm639_vm2, %v575_v59, -inf }
  0xfe   :  { %v2119_v9 = vsel %vm639_vm2, %v458_v57, -inf  ;;  %v2129_v15 = vsel %vm639_vm2, %v586_v0, -inf  ;;  %v546_v43 = vadd.f32 %v1960_v36, %v2030_v18 }
  0xff   :  { %v2133_v16 = vsel %vm639_vm2, %v450_v63, -inf  ;;  %v2143_v28 = vsel %vm639_vm2, %v578_v7, -inf }
 0x101   :  { %790 = vmax.xlane.f32.xlu1 %v2139_v21  ;;  %v1470_v32 = vpop.f32.mrb[20].mxu0  ;;  %788 = vmax.xlane.f32.xlu0 %v2148_v8  ;;  %v1502_v41 = vpop.f32.mrb[20].mxu1 }
 0x102   :  { %v471_v14 = vadd.f32 %v1470_v32, %v1960_v36  ;;  %v462_v38 = vpop.f32.mrb[21].mxu0  ;;  %v599_v46 = vadd.f32 %v1502_v41, %v1960_v36  ;;  %v590_v49 = vpop.f32.mrb[21].mxu1  ;;  %v2207_v41 = vsel %vm639_vm2, %v546_v43, -inf }
 0x103   :  { %v463_v42 = vadd.f32 %v1960_v36, %v462_v38  ;;  %v1471_v45 = vpop.f32.mrb[22].mxu0  ;;  %v591_v55 = vadd.f32 %v1960_v36, %v590_v49  ;;  %v1503_v18 = vpop.f32.mrb[22].mxu1  ;;  %v442_v38 = vadd.f32 %v2051_v26, %v1960_v36  ;;  %2927 = vst [vmem:[#allocation4_spill] sm:$0xff] %v2207_v41 }
 0x104   :  { %v474_v51 = vadd.f32 %v1471_v45, %v1960_v36  ;;  %v465_v53 = vpop.f32.mrb[23].mxu0  ;;  %v2170_v57 = vsel %vm639_vm2, %v471_v14, -inf  ;;  %v602_v59 = vadd.f32 %v1503_v18, %v1960_v36  ;;  %v593_v60 = vpop.f32.mrb[23].mxu1  ;;  %v2177_v63 = vsel %vm639_vm2, %v599_v46, -inf }
 0x105   :  { %722 = vmax.xlane.f32.xlu1 %v2164_v11  ;;  %v466_v58 = vadd.f32 %v1960_v36, %v465_v53  ;;  %v2181_v0 = vsel %vm639_vm2, %v463_v42, -inf  ;;  %720 = vmax.xlane.f32.xlu0 %v2158_v44  ;;  %v594_v2 = vadd.f32 %v1960_v36, %v593_v60  ;;  %v2191_v12 = vsel %vm639_vm2, %v591_v55, -inf }
 0x106   :  { %v2187_v7 = vsel %vm639_vm2, %v474_v51, -inf  ;;  %v2197_v32 = vsel %vm639_vm2, %v602_v59, -inf  ;;  %v567_v46 = vadd.f32 %v2049_v25, %v1960_v36  ;;  %v570_v51 = vadd.f32 %v2062_v31, %v1960_v36 }
 0x107   :  { %v2201_v14 = vsel %vm639_vm2, %v466_v58, -inf  ;;  %v2211_v42 = vsel %vm639_vm2, %v594_v2, -inf  ;;  %v2226_v53 = vsel %vm639_vm2, %v439_v19, -inf  ;;  %v2232_v25 = vsel %vm639_vm2, %v442_v38, -inf }
 0x108   :  { %2929 = vst [vmem:[#allocation6_spill] sm:$0xff] %v2226_v53  ;;  %2930 = vst [vmem:[#allocation7_spill] sm:$0xff] %v2232_v25 }
 0x109   :  { %786 = vmax.xlane.f32.xlu1 %v2207_v41  ;;  %v1474_v45 = vpop.f32.mrb[24].mxu0  ;;  %784 = vmax.xlane.f32.xlu0 %v2216_v23  ;;  %v1506_v49 = vpop.f32.mrb[24].mxu1 }
 0x10a   :  { %v487_v26 = vadd.f32 %v1474_v45, %v1960_v36  ;;  %v478_v43 = vpop.f32.mrb[25].mxu0  ;;  %v615_v18 = vadd.f32 %v1506_v49, %v1960_v36  ;;  %v606_v58 = vpop.f32.mrb[25].mxu1 }
 0x10b   :  { %v479_v37 = vadd.f32 %v1960_v36, %v478_v43  ;;  %v1475_v55 = vpop.f32.mrb[26].mxu0  ;;  %v607_v2 = vadd.f32 %v1960_v36, %v606_v58  ;;  %v1507_v31 = vpop.f32.mrb[26].mxu1 }
 0x10c   :  { %v490_v59 = vadd.f32 %v1475_v55, %v1960_v36  ;;  %v481_v60 = vpop.f32.mrb[27].mxu0  ;;  %v2238_v19 = vsel %vm639_vm2, %v487_v26, -inf  ;;  %v618_v43 = vadd.f32 %v1507_v31, %v1960_v36  ;;  %v609_v49 = vpop.f32.mrb[27].mxu1  ;;  %v2245_v38 = vsel %vm639_vm2, %v615_v18, -inf }
 0x10d   :  { %734 = vmax.xlane.f32.xlu1 %v2232_v25  ;;  %v482_v45 = vadd.f32 %v1960_v36, %v481_v60  ;;  %v2249_v55 = vsel %vm639_vm2, %v479_v37, -inf  ;;  %732 = vmax.xlane.f32.xlu0 %v2226_v53  ;;  %v610_v26 = vadd.f32 %v1960_v36, %v609_v49  ;;  %v2259_v60 = vsel %vm639_vm2, %v607_v2, -inf }
 0x10e   :  { %v2255_v58 = vsel %vm639_vm2, %v490_v59, -inf  ;;  %v431_v18 = vadd.f32 %v1960_v36, %v2047_v24  ;;  %v2265_v31 = vsel %vm639_vm2, %v618_v43, -inf  ;;  %v434_v49 = vadd.f32 %v1960_v36, %v2060_v30 }
 0x10f   :  { %v2269_v37 = vsel %vm639_vm2, %v482_v45, -inf  ;;  %v2275_v59 = vsel %vm639_vm2, %v570_v51, -inf  ;;  %v2279_v2 = vsel %vm639_vm2, %v610_v26, -inf  ;;  %v2284_v24 = vsel %vm639_vm2, %v567_v46, -inf }
 0x110   :  { %2931 = vst [vmem:[#allocation8_spill] sm:$0xff] %v2275_v59  ;;  %2932 = vst [vmem:[#allocation9_spill] sm:$0xff] %v2284_v24  ;;  %v559_v45 = vadd.f32 %v1960_v36, %v2053_v27  ;;  %v562_v26 = vadd.f32 %v1960_v36, %v2070_v34  ;;  %v2300_v27 = vsel %vm639_vm2, %v434_v49, -inf }
 0x111   :  { %798 = vmax.xlane.f32.xlu1 %v2275_v59  ;;  %v1478_v43 = vpop.f32.mrb[28].mxu0  ;;  %796 = vmax.xlane.f32.xlu0 %v2284_v24  ;;  %v1510_v53 = vpop.f32.mrb[28].mxu1  ;;  %v2294_v59 = vsel %vm639_vm2, %v431_v18, -inf }
 0x112   :  { %v503_v30 = vadd.f32 %v1478_v43, %v1960_v36  ;;  %v494_v51 = vpop.f32.mrb[29].mxu0  ;;  %v631_v23 = vadd.f32 %v1510_v53, %v1960_v36  ;;  %v622_v41 = vpop.f32.mrb[29].mxu1 }
 0x113   :  { %v495_v46 = vadd.f32 %v1960_v36, %v494_v51  ;;  %v1479_v25 = vpop.f32.mrb[30].mxu0  ;;  %v623_v44 = vadd.f32 %v1960_v36, %v622_v41  ;;  %v1511_v34 = vpop.f32.mrb[30].mxu1 }
 0x114   :  { %v506_v43 = vadd.f32 %v1479_v25, %v1960_v36  ;;  %v497_v24 = vpop.f32.mrb[31].mxu0  ;;  %v2306_v18 = vsel %vm639_vm2, %v503_v30, -inf  ;;  %v634_v53 = vadd.f32 %v1511_v34, %v1960_v36  ;;  %v625_v11 = vpop.f32.mrb[31].mxu1  ;;  %v2313_v49 = vsel %vm639_vm2, %v631_v23, -inf }
 0x115   :  { %2933 = vst [vmem:[#allocation10_spill] sm:$0xff] %v2306_v18  ;;  %730 = vmax.xlane.f32.xlu1 %v2300_v27  ;;  %v498_v51 = vadd.f32 %v1960_v36, %v497_v24  ;;  %2934 = vst [vmem:[#allocation11_spill] sm:$0xff] %v2313_v49  ;;  %v2317_v25 = vsel %vm639_vm2, %v495_v46, -inf  ;;  %728 = vmax.xlane.f32.xlu0 %v2294_v59  ;;  %v626_v41 = vadd.f32 %v1960_v36, %v625_v11 }
 0x116   :  { %2935 = vst [vmem:[#allocation12_spill] sm:$0xff] %v2317_v25  ;;  %v2323_v30 = vsel %vm639_vm2, %v506_v43, -inf  ;;  %v2327_v24 = vsel %vm639_vm2, %v623_v44, -inf  ;;  %v2331_v23 = vsel %vm639_vm2, %v634_v53, -inf  ;;  %v2339_v34 = vsel %vm639_vm2, %v562_v26, -inf }
 0x117   :  { %2936 = vst [vmem:[#allocation13_spill] sm:$0xff] %v2327_v24  ;;  %2937 = vst [vmem:[#allocation14_spill] sm:$0xff] %v2331_v23  ;;  %v2335_v46 = vsel %vm639_vm2, %v498_v51, -inf  ;;  %v2343_v36 = vsel %vm639_vm2, %v626_v41, -inf  ;;  %v2348_v44 = vsel %vm639_vm2, %v559_v45, -inf }
 0x118   :  { %2938 = vst [vmem:[#allocation15_spill] sm:$0xff] %v2335_v46  ;;  %2939 = vst [vmem:[#allocation16_spill] sm:$0xff] %v2343_v36 }
 0x119   :  { %794 = vmax.xlane.f32.xlu1 %v2339_v34  ;;  %792 = vmax.xlane.f32.xlu0 %v2348_v44 }
 0x11d   :  { %742 = vmax.xlane.f32.xlu1 %v2119_v9  ;;  %740 = vmax.xlane.f32.xlu0 %v2102_v62 }
 0x121   :  { %806 = vmax.xlane.f32.xlu1 %v2129_v15  ;;  %804 = vmax.xlane.f32.xlu0 %v2109_v3 }
 0x125   :  { %738 = vmax.xlane.f32.xlu1 %v2133_v16  ;;  %736 = vmax.xlane.f32.xlu0 %v2113_v5 }
 0x129   :  { %802 = vmax.xlane.f32.xlu1 %v2143_v28  ;;  %800 = vmax.xlane.f32.xlu0 %v2123_v10 }
 0x12d   :  { %750 = vmax.xlane.f32.xlu1 %v2187_v7  ;;  %748 = vmax.xlane.f32.xlu0 %v2170_v57 }
 0x131   :  { %814 = vmax.xlane.f32.xlu1 %v2197_v32  ;;  %812 = vmax.xlane.f32.xlu0 %v2177_v63 }
 0x135   :  { %746 = vmax.xlane.f32.xlu1 %v2201_v14  ;;  %744 = vmax.xlane.f32.xlu0 %v2181_v0 }
 0x139   :  { %810 = vmax.xlane.f32.xlu1 %v2211_v42  ;;  %808 = vmax.xlane.f32.xlu0 %v2191_v12 }
 0x13d   :  { %758 = vmax.xlane.f32.xlu1 %v2255_v58  ;;  %756 = vmax.xlane.f32.xlu0 %v2238_v19 }
 0x141   :  { %822 = vmax.xlane.f32.xlu1 %v2265_v31  ;;  %820 = vmax.xlane.f32.xlu0 %v2245_v38 }
 0x145   :  { %754 = vmax.xlane.f32.xlu1 %v2269_v37  ;;  %752 = vmax.xlane.f32.xlu0 %v2249_v55 }
 0x149   :  { %818 = vmax.xlane.f32.xlu1 %v2279_v2  ;;  %816 = vmax.xlane.f32.xlu0 %v2259_v60 }
 0x14d   :  { %766 = vmax.xlane.f32.xlu1 %v2323_v30  ;;  %764 = vmax.xlane.f32.xlu0 %v2306_v18 }
 0x151   :  { %830 = vmax.xlane.f32.xlu1 %v2331_v23  ;;  %828 = vmax.xlane.f32.xlu0 %v2313_v49 }
 0x155   :  { %762 = vmax.xlane.f32.xlu1 %v2335_v46  ;;  %760 = vmax.xlane.f32.xlu0 %v2317_v25 }
 0x159   :  { %826 = vmax.xlane.f32.xlu1 %v2343_v36  ;;  %824 = vmax.xlane.f32.xlu0 %v2327_v24 }
 0x16a   :  { %v709_v35 = vpop.xlane.xlu1 %708  ;;  %v773_v11 = vpop.xlane.xlu0 %772 }
 0x16b   :  { %v834_v45 = vsub.f32 %v1968_v47, %v709_v35  ;;  %v866_v26 = vsub.f32 %v1973_v50, %v773_v11 }
 0x16d   :  { %v900_v43 = vmul.f32 1.442695, %v834_v45  ;;  %v964_v51 = vmul.f32 1.442695, %v866_v26 }
 0x16e   :  { %v711_v53 = vpop.xlane.xlu1 %710  ;;  %v705_v49 = vpop.xlane.xlu0 %704 }
 0x16f   :  { %1548 = vpow2.f32 %v900_v43  ;;  %v835_v41 = vsub.f32 %v1980_v52, %v711_v53  ;;  %v832_v23 = vsub.f32 %v1986_v54, %v705_v49 }
 0x170   :  { %1550 = vpow2.f32 %v964_v51 }
 0x171   :  { %v902_v25 = vmul.f32 1.442695, %v835_v41  ;;  %v896_v36 = vmul.f32 1.442695, %v832_v23 }
 0x172   :  { %v775_v46 = vpop.xlane.xlu1 %774  ;;  %v769_v18 = vpop.xlane.xlu0 %768 }
 0x173   :  { %1552 = vpow2.f32 %v902_v25  ;;  %v867_v24 = vsub.f32 %v1992_v61, %v775_v46  ;;  %v864_v47 = vsub.f32 %v1998_v1, %v769_v18 }
 0x174   :  { %1554 = vpow2.f32 %v896_v36 }
 0x175   :  { %v966_v50 = vmul.f32 1.442695, %v867_v24  ;;  %v960_v11 = vmul.f32 1.442695, %v864_v47 }
 0x176   :  { %v771_v35 = vpop.xlane.xlu1 %770  ;;  %v707_v45 = vpop.xlane.xlu0 %706 }
 0x177   :  { %1556 = vpow2.f32 %v966_v50  ;;  %v865_v52 = vsub.f32 %v2004_v4, %v771_v35  ;;  %v833_v54 = vsub.f32 %v2010_v6, %v707_v45 }
 0x178   :  { %1558 = vpow2.f32 %v960_v11 }
 0x179   :  { %v2391_v49 = vpop.eup %1548  ;;  %v898_v23 = vmul.f32 1.442695, %v833_v54  ;;  %v962_v61 = vmul.f32 1.442695, %v865_v52 }
 0x17a   :  { %v719_v26 = vpop.xlane.xlu1 %718  ;;  %1028 = vadd.xlane.f32.xlu0 %v2391_v49  ;;  %v717_v18 = vpop.xlane.xlu0 %716 }
 0x17b   :  { %v839_v1 = vsub.f32 %v2020_v13, %v719_v26  ;;  %v2395_v25 = vpop.eup %1550  ;;  %1560 = vpow2.f32 %v898_v23  ;;  %v838_v24 = vsub.f32 %v2028_v17, %v717_v18 }
 0x17c   :  { %1562 = vpow2.f32 %v962_v61 }
 0x17d   :  { %v2398_v4 = vpop.eup %1552  ;;  %v908_v46 = vmul.f32 1.442695, %v838_v24  ;;  %v910_v36 = vmul.f32 1.442695, %v839_v1 }
 0x17e   :  { %v783_v6 = vpop.xlane.xlu1 %782  ;;  %1030 = vadd.xlane.f32.xlu1 %v2398_v4  ;;  %1092 = vadd.xlane.f32.xlu0 %v2395_v25  ;;  %v781_v51 = vpop.xlane.xlu0 %780 }
 0x17f   :  { %v871_v43 = vsub.f32 %v2036_v20, %v783_v6  ;;  %v2403_v13 = vpop.eup %1554  ;;  %1564 = vpow2.f32 %v908_v46  ;;  %v870_v53 = vsub.f32 %v2042_v22, %v781_v51 }
 0x180   :  { %1566 = vpow2.f32 %v910_v36 }
 0x181   :  { %v2406_v41 = vpop.eup %1556  ;;  %v972_v17 = vmul.f32 1.442695, %v870_v53  ;;  %v974_v50 = vmul.f32 1.442695, %v871_v43 }
 0x182   :  { %1094 = vadd.xlane.f32.xlu1 %v2406_v41  ;;  %v715_v47 = vpop.xlane.xlu1 %714  ;;  %1024 = vadd.xlane.f32.xlu0 %v2403_v13  ;;  %v713_v11 = vpop.xlane.xlu0 %712 }
 0x183   :  { %v837_v35 = vsub.f32 %v2058_v29, %v715_v47  ;;  %1568 = vpow2.f32 %v972_v17  ;;  %v836_v20 = vsub.f32 %v2068_v33, %v713_v11  ;;  %v2412_v52 = vpop.eup %1558 }
 0x184   :  { %1570 = vpow2.f32 %v974_v50 }
 0x185   :  { %v2414_v45 = vpop.eup %1560  ;;  %v904_v22 = vmul.f32 1.442695, %v836_v20  ;;  %v906_v23 = vmul.f32 1.442695, %v837_v35 }
 0x186   :  { %v779_v54 = vpop.xlane.xlu1 %778  ;;  %1088 = vadd.xlane.f32.xlu0 %v2412_v52  ;;  %1026 = vadd.xlane.f32.xlu1 %v2414_v45  ;;  %v777_v61 = vpop.xlane.xlu0 %776 }
 0x187   :  { %v869_v26 = vsub.f32 %v2077_v39, %v779_v54  ;;  %1572 = vpow2.f32 %v904_v22  ;;  %v868_v29 = vsub.f32 %v2082_v40, %v777_v61  ;;  %v2420_v1 = vpop.eup %1562  ;;  %v2940_v54 = vld [vmem:[#allocation3_spill] sm:$0xff] }
 0x188   :  { %1574 = vpow2.f32 %v906_v23 }
 0x189   :  { %v2422_v33 = vpop.eup %1564  ;;  %v968_v18 = vmul.f32 1.442695, %v868_v29  ;;  %v970_v46 = vmul.f32 1.442695, %v869_v26  ;;  %v2941_v26 = vld [vmem:[#allocation2_spill] sm:$0xff] }
 0x18a   :  { %v727_v24 = vpop.xlane.xlu1 %726  ;;  %1090 = vadd.xlane.f32.xlu1 %v2420_v1  ;;  %1036 = vadd.xlane.f32.xlu0 %v2422_v33  ;;  %v725_v39 = vpop.xlane.xlu0 %724 }
 0x18b   :  { %v843_v6 = vsub.f32 %v2096_v56, %v727_v24  ;;  %1576 = vpow2.f32 %v968_v18  ;;  %v842_v36 = vsub.f32 %v2090_v48, %v725_v39  ;;  %v2428_v43 = vpop.eup %1566 }
 0x18c   :  { %1578 = vpow2.f32 %v970_v46 }
 0x18d   :  { %v2430_v40 = vpop.eup %1568  ;;  %v916_v51 = vmul.f32 1.442695, %v842_v36  ;;  %v918_v17 = vmul.f32 1.442695, %v843_v6  ;;  %v2942_v6 = vld [vmem:[#allocation4_spill] sm:$0xff] }
 0x18e   :  { %v791_v53 = vpop.xlane.xlu1 %790  ;;  %1038 = vadd.xlane.f32.xlu1 %v2428_v43  ;;  %1100 = vadd.xlane.f32.xlu0 %v2430_v40  ;;  %v789_v56 = vpop.xlane.xlu0 %788 }
 0x18f   :  { %v875_v47 = vsub.f32 %v2139_v21, %v791_v53  ;;  %1580 = vpow2.f32 %v916_v51  ;;  %v874_v50 = vsub.f32 %v2148_v8, %v789_v56  ;;  %v2436_v35 = vpop.eup %1570  ;;  %v2943_v51 = vld [vmem:[#allocation5_spill] sm:$0xff] }
 0x190   :  { %1582 = vpow2.f32 %v918_v17 }
 0x191   :  { %v2438_v48 = vpop.eup %1572  ;;  %v980_v11 = vmul.f32 1.442695, %v874_v50  ;;  %v982_v22 = vmul.f32 1.442695, %v875_v47 }
 0x192   :  { %v723_v20 = vpop.xlane.xlu1 %722  ;;  %1102 = vadd.xlane.f32.xlu1 %v2436_v35  ;;  %1032 = vadd.xlane.f32.xlu0 %v2438_v48  ;;  %v721_v21 = vpop.xlane.xlu0 %720 }
 0x193   :  { %v841_v23 = vsub.f32 %v2940_v54, %v723_v20  ;;  %1584 = vpow2.f32 %v980_v11  ;;  %v840_v61 = vsub.f32 %v2941_v26, %v721_v21  ;;  %v2444_v29 = vpop.eup %1574  ;;  %v2944_v20 = vld [vmem:[#allocation7_spill] sm:$0xff] }
 0x194   :  { %1586 = vpow2.f32 %v982_v22 }
 0x195   :  { %v2446_v8 = vpop.eup %1576  ;;  %v912_v18 = vmul.f32 1.442695, %v840_v61  ;;  %v914_v46 = vmul.f32 1.442695, %v841_v23  ;;  %v2945_v23 = vld [vmem:[#allocation6_spill] sm:$0xff] }
 0x196   :  { %v787_v24 = vpop.xlane.xlu1 %786  ;;  %1034 = vadd.xlane.f32.xlu1 %v2444_v29  ;;  %1096 = vadd.xlane.f32.xlu0 %v2446_v8  ;;  %v785_v36 = vpop.xlane.xlu0 %784 }
 0x197   :  { %v873_v39 = vsub.f32 %v2942_v6, %v787_v24  ;;  %1588 = vpow2.f32 %v912_v18  ;;  %v872_v53 = vsub.f32 %v2943_v51, %v785_v36  ;;  %v2452_v17 = vpop.eup %1578  ;;  %v2947_v51 = vld [vmem:[#allocation9_spill] sm:$0xff] }
 0x198   :  { %1590 = vpow2.f32 %v914_v46  ;;  %v2946_v46 = vld [vmem:[#allocation8_spill] sm:$0xff] }
 0x199   :  { %v2454_v47 = vpop.eup %1580  ;;  %v976_v56 = vmul.f32 1.442695, %v872_v53  ;;  %v978_v11 = vmul.f32 1.442695, %v873_v39 }
 0x19a   :  { %v735_v50 = vpop.xlane.xlu1 %734  ;;  %1098 = vadd.xlane.f32.xlu1 %v2452_v17  ;;  %1044 = vadd.xlane.f32.xlu0 %v2454_v47  ;;  %v733_v54 = vpop.xlane.xlu0 %732 }
 0x19b   :  { %v847_v22 = vsub.f32 %v2944_v20, %v735_v50  ;;  %1592 = vpow2.f32 %v976_v56  ;;  %v846_v21 = vsub.f32 %v2945_v23, %v733_v54  ;;  %v2460_v26 = vpop.eup %1582 }
 0x19c   :  { %1594 = vpow2.f32 %v978_v11 }
 0x19d   :  { %v2462_v61 = vpop.eup %1584  ;;  %v924_v18 = vmul.f32 1.442695, %v846_v21  ;;  %v926_v6 = vmul.f32 1.442695, %v847_v22 }
 0x19e   :  { %v799_v24 = vpop.xlane.xlu1 %798  ;;  %1046 = vadd.xlane.f32.xlu1 %v2460_v26  ;;  %1108 = vadd.xlane.f32.xlu0 %v2462_v61  ;;  %v797_v36 = vpop.xlane.xlu0 %796 }
 0x19f   :  { %v879_v39 = vsub.f32 %v2946_v46, %v799_v24  ;;  %1596 = vpow2.f32 %v924_v18  ;;  %v878_v53 = vsub.f32 %v2947_v51, %v797_v36  ;;  %v2468_v56 = vpop.eup %1586 }
 0x1a0   :  { %1598 = vpow2.f32 %v926_v6 }
 0x1a1   :  { %v2470_v50 = vpop.eup %1588  ;;  %v988_v20 = vmul.f32 1.442695, %v878_v53  ;;  %v990_v23 = vmul.f32 1.442695, %v879_v39 }
 0x1a2   :  { %v731_v54 = vpop.xlane.xlu1 %730  ;;  %1110 = vadd.xlane.f32.xlu1 %v2468_v56  ;;  %1040 = vadd.xlane.f32.xlu0 %v2470_v50  ;;  %v729_v22 = vpop.xlane.xlu0 %728 }
 0x1a3   :  { %v845_v11 = vsub.f32 %v2300_v27, %v731_v54  ;;  %1600 = vpow2.f32 %v988_v20  ;;  %v844_v21 = vsub.f32 %v2294_v59, %v729_v22  ;;  %v2476_v18 = vpop.eup %1590 }
 0x1a4   :  { %1602 = vpow2.f32 %v990_v23 }
 0x1a5   :  { %v2478_v24 = vpop.eup %1592  ;;  %v920_v46 = vmul.f32 1.442695, %v844_v21  ;;  %v922_v51 = vmul.f32 1.442695, %v845_v11 }
 0x1a6   :  { %v795_v36 = vpop.xlane.xlu1 %794  ;;  %1042 = vadd.xlane.f32.xlu1 %v2476_v18  ;;  %1104 = vadd.xlane.f32.xlu0 %v2478_v24  ;;  %v793_v27 = vpop.xlane.xlu0 %792 }
 0x1a7   :  { %v877_v6 = vsub.f32 %v2339_v34, %v795_v36  ;;  %1604 = vpow2.f32 %v920_v46  ;;  %v876_v39 = vsub.f32 %v2348_v44, %v793_v27  ;;  %v2484_v53 = vpop.eup %1594 }
 0x1a8   :  { %1606 = vpow2.f32 %v922_v51 }
 0x1a9   :  { %v2486_v59 = vpop.eup %1596  ;;  %v984_v20 = vmul.f32 1.442695, %v876_v39  ;;  %v986_v22 = vmul.f32 1.442695, %v877_v6 }
 0x1aa   :  { %v743_v54 = vpop.xlane.xlu1 %742  ;;  %1106 = vadd.xlane.f32.xlu1 %v2484_v53  ;;  %1052 = vadd.xlane.f32.xlu0 %v2486_v59  ;;  %v741_v34 = vpop.xlane.xlu0 %740 }
 0x1ab   :  { %v851_v23 = vsub.f32 %v2119_v9, %v743_v54  ;;  %1608 = vpow2.f32 %v984_v20  ;;  %v850_v11 = vsub.f32 %v2102_v62, %v741_v34  ;;  %v2492_v21 = vpop.eup %1598 }
 0x1ac   :  { %1610 = vpow2.f32 %v986_v22 }
 0x1ad   :  { %v2494_v44 = vpop.eup %1600  ;;  %v932_v46 = vmul.f32 1.442695, %v850_v11  ;;  %v934_v27 = vmul.f32 1.442695, %v851_v23 }
 0x1ae   :  { %v807_v36 = vpop.xlane.xlu1 %806  ;;  %1054 = vadd.xlane.f32.xlu1 %v2492_v21  ;;  %1116 = vadd.xlane.f32.xlu0 %v2494_v44  ;;  %v805_v9 = vpop.xlane.xlu0 %804 }
 0x1af   :  { %v883_v51 = vsub.f32 %v2129_v15, %v807_v36  ;;  %1612 = vpow2.f32 %v932_v46  ;;  %v882_v6 = vsub.f32 %v2109_v3, %v805_v9  ;;  %v2500_v39 = vpop.eup %1602 }
 0x1b0   :  { %1614 = vpow2.f32 %v934_v27 }
 0x1b1   :  { %v2502_v62 = vpop.eup %1604  ;;  %v996_v20 = vmul.f32 1.442695, %v882_v6  ;;  %v998_v34 = vmul.f32 1.442695, %v883_v51 }
 0x1b2   :  { %v739_v54 = vpop.xlane.xlu1 %738  ;;  %1118 = vadd.xlane.f32.xlu1 %v2500_v39  ;;  %1048 = vadd.xlane.f32.xlu0 %v2502_v62  ;;  %v737_v15 = vpop.xlane.xlu0 %736 }
 0x1b3   :  { %v849_v22 = vsub.f32 %v2133_v16, %v739_v54  ;;  %1616 = vpow2.f32 %v996_v20  ;;  %v848_v23 = vsub.f32 %v2113_v5, %v737_v15  ;;  %v2508_v11 = vpop.eup %1606 }
 0x1b4   :  { %1618 = vpow2.f32 %v998_v34 }
 0x1b5   :  { %v2510_v3 = vpop.eup %1608  ;;  %v928_v46 = vmul.f32 1.442695, %v848_v23  ;;  %v930_v9 = vmul.f32 1.442695, %v849_v22 }
 0x1b6   :  { %v803_v36 = vpop.xlane.xlu1 %802  ;;  %1050 = vadd.xlane.f32.xlu1 %v2508_v11  ;;  %1112 = vadd.xlane.f32.xlu0 %v2510_v3  ;;  %v801_v16 = vpop.xlane.xlu0 %800 }
 0x1b7   :  { %v881_v27 = vsub.f32 %v2143_v28, %v803_v36  ;;  %1620 = vpow2.f32 %v928_v46  ;;  %v880_v51 = vsub.f32 %v2123_v10, %v801_v16  ;;  %v2516_v6 = vpop.eup %1610 }
 0x1b8   :  { %1622 = vpow2.f32 %v930_v9 }
 0x1b9   :  { %v2518_v5 = vpop.eup %1612  ;;  %v992_v20 = vmul.f32 1.442695, %v880_v51  ;;  %v994_v15 = vmul.f32 1.442695, %v881_v27 }
 0x1ba   :  { %v751_v54 = vpop.xlane.xlu1 %750  ;;  %1114 = vadd.xlane.f32.xlu1 %v2516_v6  ;;  %1060 = vadd.xlane.f32.xlu0 %v2518_v5  ;;  %v749_v28 = vpop.xlane.xlu0 %748 }
 0x1bb   :  { %v855_v34 = vsub.f32 %v2187_v7, %v751_v54  ;;  %1624 = vpow2.f32 %v992_v20  ;;  %v854_v22 = vsub.f32 %v2170_v57, %v749_v28  ;;  %v2524_v23 = vpop.eup %1614 }
 0x1bc   :  { %1626 = vpow2.f32 %v994_v15 }
 0x1bd   :  { %v2526_v10 = vpop.eup %1616  ;;  %v940_v46 = vmul.f32 1.442695, %v854_v22  ;;  %v942_v16 = vmul.f32 1.442695, %v855_v34 }
 0x1be   :  { %v815_v36 = vpop.xlane.xlu1 %814  ;;  %1062 = vadd.xlane.f32.xlu1 %v2524_v23  ;;  %1124 = vadd.xlane.f32.xlu0 %v2526_v10  ;;  %v813_v7 = vpop.xlane.xlu0 %812 }
 0x1bf   :  { %v887_v9 = vsub.f32 %v2197_v32, %v815_v36  ;;  %1628 = vpow2.f32 %v940_v46  ;;  %v886_v27 = vsub.f32 %v2177_v63, %v813_v7  ;;  %v2532_v51 = vpop.eup %1618 }
 0x1c0   :  { %1630 = vpow2.f32 %v942_v16 }
 0x1c1   :  { %v2534_v57 = vpop.eup %1620  ;;  %v1004_v20 = vmul.f32 1.442695, %v886_v27  ;;  %v1006_v28 = vmul.f32 1.442695, %v887_v9 }
 0x1c2   :  { %v747_v54 = vpop.xlane.xlu1 %746  ;;  %1126 = vadd.xlane.f32.xlu1 %v2532_v51  ;;  %1056 = vadd.xlane.f32.xlu0 %v2534_v57  ;;  %v745_v32 = vpop.xlane.xlu0 %744 }
 0x1c3   :  { %v853_v15 = vsub.f32 %v2201_v14, %v747_v54  ;;  %1632 = vpow2.f32 %v1004_v20  ;;  %v852_v34 = vsub.f32 %v2181_v0, %v745_v32  ;;  %v2540_v22 = vpop.eup %1622 }
 0x1c4   :  { %1634 = vpow2.f32 %v1006_v28 }
 0x1c5   :  { %v2542_v63 = vpop.eup %1624  ;;  %v936_v46 = vmul.f32 1.442695, %v852_v34  ;;  %v938_v7 = vmul.f32 1.442695, %v853_v15 }
 0x1c6   :  { %v811_v36 = vpop.xlane.xlu1 %810  ;;  %1058 = vadd.xlane.f32.xlu1 %v2540_v22  ;;  %1120 = vadd.xlane.f32.xlu0 %v2542_v63  ;;  %v809_v14 = vpop.xlane.xlu0 %808 }
 0x1c7   :  { %v885_v16 = vsub.f32 %v2211_v42, %v811_v36  ;;  %1636 = vpow2.f32 %v936_v46  ;;  %v884_v9 = vsub.f32 %v2191_v12, %v809_v14  ;;  %v2548_v27 = vpop.eup %1626 }
 0x1c8   :  { %1638 = vpow2.f32 %v938_v7 }
 0x1c9   :  { %v2550_v0 = vpop.eup %1628  ;;  %v1000_v20 = vmul.f32 1.442695, %v884_v9  ;;  %v1002_v32 = vmul.f32 1.442695, %v885_v16 }
 0x1ca   :  { %v759_v54 = vpop.xlane.xlu1 %758  ;;  %1122 = vadd.xlane.f32.xlu1 %v2548_v27  ;;  %1068 = vadd.xlane.f32.xlu0 %v2550_v0  ;;  %v757_v42 = vpop.xlane.xlu0 %756 }
 0x1cb   :  { %v859_v28 = vsub.f32 %v2255_v58, %v759_v54  ;;  %1640 = vpow2.f32 %v1000_v20  ;;  %v858_v15 = vsub.f32 %v2238_v19, %v757_v42  ;;  %v2556_v34 = vpop.eup %1630 }
 0x1cc   :  { %1642 = vpow2.f32 %v1002_v32 }
 0x1cd   :  { %v2558_v12 = vpop.eup %1632  ;;  %v948_v46 = vmul.f32 1.442695, %v858_v15  ;;  %v950_v14 = vmul.f32 1.442695, %v859_v28 }
 0x1ce   :  { %v823_v36 = vpop.xlane.xlu1 %822  ;;  %1070 = vadd.xlane.f32.xlu1 %v2556_v34  ;;  %1132 = vadd.xlane.f32.xlu0 %v2558_v12  ;;  %v821_v58 = vpop.xlane.xlu0 %820 }
 0x1cf   :  { %v891_v7 = vsub.f32 %v2265_v31, %v823_v36  ;;  %1644 = vpow2.f32 %v948_v46  ;;  %v890_v16 = vsub.f32 %v2245_v38, %v821_v58  ;;  %v2564_v9 = vpop.eup %1634 }
 0x1d0   :  { %1646 = vpow2.f32 %v950_v14 }
 0x1d1   :  { %v2566_v19 = vpop.eup %1636  ;;  %v1012_v20 = vmul.f32 1.442695, %v890_v16  ;;  %v1014_v42 = vmul.f32 1.442695, %v891_v7 }
 0x1d2   :  { %2948 = vst [vmem:[#allocation3_spill] sm:$0xff] %v2566_v19  ;;  %v755_v54 = vpop.xlane.xlu1 %754  ;;  %1134 = vadd.xlane.f32.xlu1 %v2564_v9  ;;  %1064 = vadd.xlane.f32.xlu0 %v2566_v19  ;;  %v753_v31 = vpop.xlane.xlu0 %752 }
 0x1d3   :  { %v857_v32 = vsub.f32 %v2269_v37, %v755_v54  ;;  %1648 = vpow2.f32 %v1012_v20  ;;  %v856_v28 = vsub.f32 %v2249_v55, %v753_v31  ;;  %v2572_v15 = vpop.eup %1638 }
 0x1d4   :  { %2949 = vst [vmem:[#allocation2_spill] sm:$0xff] %v2572_v15  ;;  %1650 = vpow2.f32 %v1014_v42 }
 0x1d5   :  { %v2574_v38 = vpop.eup %1640  ;;  %v944_v46 = vmul.f32 1.442695, %v856_v28  ;;  %v946_v58 = vmul.f32 1.442695, %v857_v32  ;;  %v2953_v32 = vld [vmem:[#allocation10_spill] sm:$0xff] }
 0x1d6   :  { %2950 = vst [vmem:[#allocation4_spill] sm:$0xff] %v2574_v38  ;;  %v819_v36 = vpop.xlane.xlu1 %818  ;;  %1066 = vadd.xlane.f32.xlu1 %v2572_v15  ;;  %1128 = vadd.xlane.f32.xlu0 %v2574_v38  ;;  %v817_v37 = vpop.xlane.xlu0 %816  ;;  %v2961_v15 = vld [vmem:[#allocation16_spill] sm:$0xff] }
 0x1d7   :  { %v889_v14 = vsub.f32 %v2279_v2, %v819_v36  ;;  %1652 = vpow2.f32 %v944_v46  ;;  %v888_v7 = vsub.f32 %v2259_v60, %v817_v37  ;;  %v2580_v16 = vpop.eup %1642 }
 0x1d8   :  { %2951 = vst [vmem:[#allocation5_spill] sm:$0xff] %v2580_v16  ;;  %1654 = vpow2.f32 %v946_v58 }
 0x1d9   :  { %v2582_v55 = vpop.eup %1644  ;;  %v1008_v20 = vmul.f32 1.442695, %v888_v7  ;;  %v1010_v31 = vmul.f32 1.442695, %v889_v14 }
 0x1da   :  { %2952 = vst [vmem:[#allocation7_spill] sm:$0xff] %v2582_v55  ;;  %v767_v54 = vpop.xlane.xlu1 %766  ;;  %1130 = vadd.xlane.f32.xlu1 %v2580_v16  ;;  %1076 = vadd.xlane.f32.xlu0 %v2582_v55  ;;  %v765_v2 = vpop.xlane.xlu0 %764  ;;  %v2960_v16 = vld [vmem:[#allocation14_spill] sm:$0xff] }
 0x1db   :  { %1656 = vpow2.f32 %v1008_v20  ;;  %v863_v42 = vsub.f32 %v2323_v30, %v767_v54  ;;  %v862_v28 = vsub.f32 %v2953_v32, %v765_v2  ;;  %v2588_v46 = vpop.eup %1646  ;;  %v2958_v54 = vld [vmem:[#allocation15_spill] sm:$0xff] }
 0x1dc   :  { %2954 = vst [vmem:[#allocation6_spill] sm:$0xff] %v2588_v46  ;;  %1658 = vpow2.f32 %v1010_v31  ;;  %v2959_v31 = vld [vmem:[#allocation12_spill] sm:$0xff] }
 0x1dd   :  { %v2590_v60 = vpop.eup %1648  ;;  %v956_v36 = vmul.f32 1.442695, %v862_v28  ;;  %v958_v14 = vmul.f32 1.442695, %v863_v42 }
 0x1de   :  { %2955 = vst [vmem:[#allocation8_spill] sm:$0xff] %v2590_v60  ;;  %v831_v37 = vpop.xlane.xlu1 %830  ;;  %1078 = vadd.xlane.f32.xlu1 %v2588_v46  ;;  %1140 = vadd.xlane.f32.xlu0 %v2590_v60  ;;  %v829_v58 = vpop.xlane.xlu0 %828 }
 0x1df   :  { %1660 = vpow2.f32 %v956_v36  ;;  %v2594_v7 = vpop.eup %1650  ;;  %v895_v38 = vsub.f32 %v2960_v16, %v831_v37 }
 0x1e0   :  { %2956 = vst [vmem:[#allocation9_spill] sm:$0xff] %v2594_v7  ;;  %1662 = vpow2.f32 %v958_v14  ;;  %v2962_v14 = vld [vmem:[#allocation11_spill] sm:$0xff] }
 0x1e1   :  { %v2596_v20 = vpop.eup %1652  ;;  %v1022_v16 = vmul.f32 1.442695, %v895_v38 }
 0x1e2   :  { %2957 = vst [vmem:[#allocation10_spill] sm:$0xff] %v2596_v20  ;;  %v763_v30 = vpop.xlane.xlu1 %762  ;;  %1142 = vadd.xlane.f32.xlu1 %v2594_v7  ;;  %1072 = vadd.xlane.f32.xlu0 %v2596_v20  ;;  %v761_v32 = vpop.xlane.xlu0 %760  ;;  %v894_v20 = vsub.f32 %v2962_v14, %v829_v58 }
 0x1e3   :  { %v861_v2 = vsub.f32 %v2958_v54, %v763_v30  ;;  %v860_v28 = vsub.f32 %v2959_v31, %v761_v32  ;;  %v2602_v46 = vpop.eup %1654  ;;  %v2963_v32 = vld [vmem:[#allocation13_spill] sm:$0xff] }
 0x1e5   :  { %v954_v60 = vmul.f32 1.442695, %v861_v2  ;;  %v2604_v42 = vpop.eup %1656  ;;  %v952_v36 = vmul.f32 1.442695, %v860_v28 }
 0x1e6   :  { %v827_v55 = vpop.xlane.xlu1 %826  ;;  %1074 = vadd.xlane.f32.xlu1 %v2602_v46  ;;  %1136 = vadd.xlane.f32.xlu0 %v2604_v42  ;;  %v825_v54 = vpop.xlane.xlu0 %824 }
 0x1e7   :  { %1664 = vpow2.f32 %v954_v60  ;;  %v893_v30 = vsub.f32 %v2961_v15, %v827_v55  ;;  %v892_v31 = vsub.f32 %v2963_v32, %v825_v54  ;;  %v2612_v2 = vpop.eup %1658  ;;  %v1020_v15 = vmul.f32 1.442695, %v894_v20 }
 0x1e8   :  { %1666 = vpow2.f32 %v952_v36 }
 0x1e9   :  { %v1018_v7 = vmul.f32 1.442695, %v893_v30  ;;  %v2614_v28 = vpop.eup %1660  ;;  %v1016_v19 = vmul.f32 1.442695, %v892_v31 }
 0x1ea   :  { %1138 = vadd.xlane.f32.xlu1 %v2612_v2  ;;  %1084 = vadd.xlane.f32.xlu0 %v2614_v28  ;;  %v2618_v55 = vpop.eup %1662 }
 0x1eb   :  { %1668 = vpow2.f32 %v1018_v7 }
 0x1ec   :  { %1670 = vpow2.f32 %v1016_v19 }
 0x1ed   :  { %1672 = vpow2.f32 %v1022_v16 }
 0x1ee   :  { %1086 = vadd.xlane.f32.xlu1 %v2618_v55  ;;  %1674 = vpow2.f32 %v1020_v15 }
 0x1f1   :  { %v2621_v60 = vpop.eup %1664 }
 0x1f2   :  { %v2623_v37 = vpop.eup %1666  ;;  %1082 = vadd.xlane.f32.xlu1 %v2621_v60 }
 0x1f3   :  { %1080 = vadd.xlane.f32.xlu0 %v2623_v37 }
 0x1f5   :  { %v2627_v38 = vpop.eup %1668 }
 0x1f6   :  { %v2629_v58 = vpop.eup %1670  ;;  %1146 = vadd.xlane.f32.xlu1 %v2627_v38 }
 0x1f7   :  { %1144 = vadd.xlane.f32.xlu0 %v2629_v58  ;;  %v2633_v19 = vpop.eup %1672 }
 0x1f8   :  { %2964 = vst [vmem:[#allocation15_spill] sm:$0xff] %v2633_v19  ;;  %v2635_v7 = vpop.eup %1674 }
 0x1f9   :  { %2965 = vst [vmem:[#allocation12_spill] sm:$0xff] %v2635_v7 }
 0x1fa   :  { %1150 = vadd.xlane.f32.xlu1 %v2633_v19 }
 0x1fb   :  { %1148 = vadd.xlane.f32.xlu0 %v2635_v7 }
 0x207   :  { %v1029_v20 = vpop.xlane.xlu0 %1028 }
 0x208   :  { %1676 = vrcp.f32 %v1029_v20 }
 0x20b   :  { %v1031_v36 = vpop.xlane.xlu1 %1030  ;;  %v1093_v30 = vpop.xlane.xlu0 %1092 }
 0x20c   :  { %1678 = vrcp.f32 %v1031_v36 }
 0x20d   :  { %1680 = vrcp.f32 %v1093_v30 }
 0x20f   :  { %v1095_v54 = vpop.xlane.xlu1 %1094  ;;  %v1025_v14 = vpop.xlane.xlu0 %1024 }
 0x210   :  { %1682 = vrcp.f32 %v1095_v54 }
 0x211   :  { %1684 = vrcp.f32 %v1025_v14 }
 0x212   :  { %v1677_v32 = vpop.eup %1676 }
 0x213   :  { %v1218_v31 = vmul.f32 %v1677_v32, %v2391_v49  ;;  %v1089_v16 = vpop.xlane.xlu0 %1088  ;;  %v1027_v15 = vpop.xlane.xlu1 %1026 }
 0x214   :  { %1686 = vrcp.f32 %v1089_v16 }
 0x215   :  { %1282 = vst [vmem:[%s2898_s3 + $0x10] sm:$0xff] %v1218_v31  ;;  %1688 = vrcp.f32 %v1027_v15 }
 0x216   :  { %v1679_v20 = vpop.eup %1678 }
 0x217   :  { %v1681_v7 = vpop.eup %1680  ;;  %v1219_v36 = vmul.f32 %v1679_v20, %v2398_v4  ;;  %v1091_v19 = vpop.xlane.xlu1 %1090 }
 0x218   :  { %v1250_v30 = vmul.f32 %v1681_v7, %v2395_v25  ;;  %v1037_v54 = vpop.xlane.xlu0 %1036  ;;  %1690 = vrcp.f32 %v1091_v19 }
 0x219   :  { %1283 = vst [vmem:[%s2898_s3 + $0x18] sm:$0xff] %v1219_v36  ;;  %1692 = vrcp.f32 %v1037_v54 }
 0x21a   :  { %v1683_v49 = vpop.eup %1682  ;;  %1314 = vst [vmem:[%s2898_s3 + $0x110] sm:$0xff] %v1250_v30 }
 0x21b   :  { %v1685_v14 = vpop.eup %1684  ;;  %v1251_v32 = vmul.f32 %v1683_v49, %v2406_v41  ;;  %v1039_v31 = vpop.xlane.xlu1 %1038 }
 0x21c   :  { %v1216_v4 = vmul.f32 %v1685_v14, %v2403_v13  ;;  %v1101_v25 = vpop.xlane.xlu0 %1100  ;;  %1694 = vrcp.f32 %v1039_v31 }
 0x21d   :  { %1315 = vst [vmem:[%s2898_s3 + $0x118] sm:$0xff] %v1251_v32  ;;  %1696 = vrcp.f32 %v1101_v25 }
 0x21e   :  { %v1687_v7 = vpop.eup %1686  ;;  %1280 = vst [vmem:[%s2898_s3] sm:$0xff] %v1216_v4 }
 0x21f   :  { %v1689_v19 = vpop.eup %1688  ;;  %v1248_v16 = vmul.f32 %v1687_v7, %v2412_v52  ;;  %v1103_v15 = vpop.xlane.xlu1 %1102 }
 0x220   :  { %v1217_v41 = vmul.f32 %v1689_v19, %v2414_v45  ;;  %v1033_v13 = vpop.xlane.xlu0 %1032  ;;  %1698 = vrcp.f32 %v1103_v15 }
 0x221   :  { %1312 = vst [vmem:[%s2898_s3 + $0x100] sm:$0xff] %v1248_v16  ;;  %1700 = vrcp.f32 %v1033_v13 }
 0x222   :  { %1281 = vst [vmem:[%s2898_s3 + $0x8] sm:$0xff] %v1217_v41  ;;  %v1691_v20 = vpop.eup %1690 }
 0x223   :  { %v1693_v36 = vpop.eup %1692  ;;  %v1249_v30 = vmul.f32 %v1691_v20, %v2420_v1  ;;  %v1035_v54 = vpop.xlane.xlu1 %1034 }
 0x224   :  { %v1097_v52 = vpop.xlane.xlu0 %1096  ;;  %v1222_v45 = vmul.f32 %v1693_v36, %v2422_v33  ;;  %1702 = vrcp.f32 %v1035_v54 }
 0x225   :  { %1313 = vst [vmem:[%s2898_s3 + $0x108] sm:$0xff] %v1249_v30  ;;  %1704 = vrcp.f32 %v1097_v52 }
 0x226   :  { %v1695_v49 = vpop.eup %1694  ;;  %1286 = vst [vmem:[%s2898_s3 + $0x30] sm:$0xff] %v1222_v45 }
 0x227   :  { %v1697_v14 = vpop.eup %1696  ;;  %v1223_v32 = vmul.f32 %v1695_v49, %v2428_v43  ;;  %v1099_v4 = vpop.xlane.xlu1 %1098 }
 0x228   :  { %v1045_v1 = vpop.xlane.xlu0 %1044  ;;  %v1254_v31 = vmul.f32 %v1697_v14, %v2430_v40  ;;  %1706 = vrcp.f32 %v1099_v4 }
 0x229   :  { %1287 = vst [vmem:[%s2898_s3 + $0x38] sm:$0xff] %v1223_v32  ;;  %1708 = vrcp.f32 %v1045_v1 }
 0x22a   :  { %v1699_v33 = vpop.eup %1698  ;;  %1318 = vst [vmem:[%s2898_s3 + $0x130] sm:$0xff] %v1254_v31 }
 0x22b   :  { %v1701_v25 = vpop.eup %1700  ;;  %v1255_v7 = vmul.f32 %v1699_v33, %v2436_v35  ;;  %v1047_v19 = vpop.xlane.xlu1 %1046 }
 0x22c   :  { %v1109_v43 = vpop.xlane.xlu0 %1108  ;;  %v1220_v16 = vmul.f32 %v1701_v25, %v2438_v48  ;;  %1710 = vrcp.f32 %v1047_v19 }
 0x22d   :  { %1319 = vst [vmem:[%s2898_s3 + $0x138] sm:$0xff] %v1255_v7  ;;  %1712 = vrcp.f32 %v1109_v43 }
 0x22e   :  { %v1703_v40 = vpop.eup %1702  ;;  %1284 = vst [vmem:[%s2898_s3 + $0x20] sm:$0xff] %v1220_v16 }
 0x22f   :  { %v1705_v41 = vpop.eup %1704  ;;  %v1221_v15 = vmul.f32 %v1703_v40, %v2444_v29  ;;  %v1111_v13 = vpop.xlane.xlu1 %1110 }
 0x230   :  { %v1041_v35 = vpop.xlane.xlu0 %1040  ;;  %v1252_v20 = vmul.f32 %v1705_v41, %v2446_v8  ;;  %1714 = vrcp.f32 %v1111_v13 }
 0x231   :  { %1285 = vst [vmem:[%s2898_s3 + $0x28] sm:$0xff] %v1221_v15  ;;  %1716 = vrcp.f32 %v1041_v35 }
 0x232   :  { %v1707_v48 = vpop.eup %1706  ;;  %1316 = vst [vmem:[%s2898_s3 + $0x120] sm:$0xff] %v1252_v20 }
 0x233   :  { %v1709_v36 = vpop.eup %1708  ;;  %v1253_v30 = vmul.f32 %v1707_v48, %v2452_v17  ;;  %v1043_v54 = vpop.xlane.xlu1 %1042 }
 0x234   :  { %v1105_v29 = vpop.xlane.xlu0 %1104  ;;  %v1226_v52 = vmul.f32 %v1709_v36, %v2454_v47  ;;  %1718 = vrcp.f32 %v1043_v54 }
 0x235   :  { %1317 = vst [vmem:[%s2898_s3 + $0x128] sm:$0xff] %v1253_v30  ;;  %1720 = vrcp.f32 %v1105_v29 }
 0x236   :  { %v1711_v8 = vpop.eup %1710  ;;  %1290 = vst [vmem:[%s2898_s3 + $0x50] sm:$0xff] %v1226_v52 }
 0x237   :  { %v1713_v45 = vpop.eup %1712  ;;  %v1227_v49 = vmul.f32 %v1711_v8, %v2460_v26  ;;  %v1107_v14 = vpop.xlane.xlu1 %1106 }
 0x238   :  { %v1053_v17 = vpop.xlane.xlu0 %1052  ;;  %v1258_v32 = vmul.f32 %v1713_v45, %v2462_v61  ;;  %1722 = vrcp.f32 %v1107_v14 }
 0x239   :  { %1291 = vst [vmem:[%s2898_s3 + $0x58] sm:$0xff] %v1227_v49  ;;  %1724 = vrcp.f32 %v1053_v17 }
 0x23a   :  { %v1715_v47 = vpop.eup %1714  ;;  %1322 = vst [vmem:[%s2898_s3 + $0x150] sm:$0xff] %v1258_v32 }
 0x23b   :  { %v1717_v4 = vpop.eup %1716  ;;  %v1259_v1 = vmul.f32 %v1715_v47, %v2468_v56  ;;  %v1055_v31 = vpop.xlane.xlu1 %1054 }
 0x23c   :  { %v1117_v26 = vpop.xlane.xlu0 %1116  ;;  %v1224_v33 = vmul.f32 %v1717_v4, %v2470_v50  ;;  %1726 = vrcp.f32 %v1055_v31 }
 0x23d   :  { %1323 = vst [vmem:[%s2898_s3 + $0x158] sm:$0xff] %v1259_v1  ;;  %1728 = vrcp.f32 %v1117_v26 }
 0x23e   :  { %v1719_v61 = vpop.eup %1718  ;;  %1288 = vst [vmem:[%s2898_s3 + $0x40] sm:$0xff] %v1224_v33 }
 0x23f   :  { %v1721_v25 = vpop.eup %1720  ;;  %v1225_v7 = vmul.f32 %v1719_v61, %v2476_v18  ;;  %v1119_v19 = vpop.xlane.xlu1 %1118 }
 0x240   :  { %v1049_v56 = vpop.xlane.xlu0 %1048  ;;  %v1256_v43 = vmul.f32 %v1721_v25, %v2478_v24  ;;  %1730 = vrcp.f32 %v1119_v19 }
 0x241   :  { %1289 = vst [vmem:[%s2898_s3 + $0x48] sm:$0xff] %v1225_v7  ;;  %1732 = vrcp.f32 %v1049_v56 }
 0x242   :  { %v1723_v50 = vpop.eup %1722  ;;  %1320 = vst [vmem:[%s2898_s3 + $0x140] sm:$0xff] %v1256_v43 }
 0x243   :  { %v1725_v16 = vpop.eup %1724  ;;  %v1257_v40 = vmul.f32 %v1723_v50, %v2484_v53  ;;  %v1051_v41 = vpop.xlane.xlu1 %1050 }
 0x244   :  { %v1113_v18 = vpop.xlane.xlu0 %1112  ;;  %v1230_v15 = vmul.f32 %v1725_v16, %v2486_v59  ;;  %1734 = vrcp.f32 %v1051_v41 }
 0x245   :  { %1321 = vst [vmem:[%s2898_s3 + $0x148] sm:$0xff] %v1257_v40  ;;  %1736 = vrcp.f32 %v1113_v18 }
 0x246   :  { %v1727_v24 = vpop.eup %1726  ;;  %1294 = vst [vmem:[%s2898_s3 + $0x70] sm:$0xff] %v1230_v15 }
 0x247   :  { %v1729_v13 = vpop.eup %1728  ;;  %v1231_v35 = vmul.f32 %v1727_v24, %v2492_v21  ;;  %v1115_v20 = vpop.xlane.xlu1 %1114 }
 0x248   :  { %v1061_v53 = vpop.xlane.xlu0 %1060  ;;  %v1262_v48 = vmul.f32 %v1729_v13, %v2494_v44  ;;  %1738 = vrcp.f32 %v1115_v20 }
 0x249   :  { %1295 = vst [vmem:[%s2898_s3 + $0x78] sm:$0xff] %v1231_v35  ;;  %1740 = vrcp.f32 %v1061_v53 }
 0x24a   :  { %v1731_v59 = vpop.eup %1730  ;;  %1326 = vst [vmem:[%s2898_s3 + $0x170] sm:$0xff] %v1262_v48 }
 0x24b   :  { %v1733_v36 = vpop.eup %1732  ;;  %v1263_v30 = vmul.f32 %v1731_v59, %v2500_v39  ;;  %v1063_v54 = vpop.xlane.xlu1 %1062  ;;  %v2966_v59 = vld [vmem:[#allocation3_spill] sm:$0xff] }
 0x24c   :  { %v1125_v21 = vpop.xlane.xlu0 %1124  ;;  %v1228_v29 = vmul.f32 %v1733_v36, %v2502_v62  ;;  %1742 = vrcp.f32 %v1063_v54  ;;  %v2967_v54 = vld [vmem:[#allocation2_spill] sm:$0xff] }
 0x24d   :  { %1327 = vst [vmem:[%s2898_s3 + $0x178] sm:$0xff] %v1263_v30  ;;  %1744 = vrcp.f32 %v1125_v21 }
 0x24e   :  { %v1735_v44 = vpop.eup %1734  ;;  %1292 = vst [vmem:[%s2898_s3 + $0x60] sm:$0xff] %v1228_v29 }
 0x24f   :  { %v1737_v52 = vpop.eup %1736  ;;  %v1229_v8 = vmul.f32 %v1735_v44, %v2508_v11  ;;  %v1127_v45 = vpop.xlane.xlu1 %1126  ;;  %v2968_v44 = vld [vmem:[#allocation4_spill] sm:$0xff] }
 0x250   :  { %v1057_v39 = vpop.xlane.xlu0 %1056  ;;  %v1260_v49 = vmul.f32 %v1737_v52, %v2510_v3  ;;  %1746 = vrcp.f32 %v1127_v45 }
 0x251   :  { %1293 = vst [vmem:[%s2898_s3 + $0x68] sm:$0xff] %v1229_v8  ;;  %1748 = vrcp.f32 %v1057_v39  ;;  %v2969_v39 = vld [vmem:[#allocation5_spill] sm:$0xff] }
 0x252   :  { %v1739_v62 = vpop.eup %1738  ;;  %1324 = vst [vmem:[%s2898_s3 + $0x160] sm:$0xff] %v1260_v49 }
 0x253   :  { %v1741_v14 = vpop.eup %1740  ;;  %v1261_v17 = vmul.f32 %v1739_v62, %v2516_v6  ;;  %v1059_v32 = vpop.xlane.xlu1 %1058 }
 0x254   :  { %v1121_v11 = vpop.xlane.xlu0 %1120  ;;  %v1234_v47 = vmul.f32 %v1741_v14, %v2518_v5  ;;  %1750 = vrcp.f32 %v1059_v32 }
 0x255   :  { %1325 = vst [vmem:[%s2898_s3 + $0x168] sm:$0xff] %v1261_v17  ;;  %1752 = vrcp.f32 %v1121_v11  ;;  %v2970_v17 = vld [vmem:[#allocation7_spill] sm:$0xff] }
 0x256   :  { %v1743_v3 = vpop.eup %1742  ;;  %1298 = vst [vmem:[%s2898_s3 + $0x90] sm:$0xff] %v1234_v47 }
 0x257   :  { %v1745_v4 = vpop.eup %1744  ;;  %v1235_v1 = vmul.f32 %v1743_v3, %v2524_v23  ;;  %v1123_v31 = vpop.xlane.xlu1 %1122  ;;  %v2971_v3 = vld [vmem:[#allocation6_spill] sm:$0xff] }
 0x258   :  { %v1069_v6 = vpop.xlane.xlu0 %1068  ;;  %v1266_v26 = vmul.f32 %v1745_v4, %v2526_v10  ;;  %1754 = vrcp.f32 %v1123_v31 }
 0x259   :  { %1299 = vst [vmem:[%s2898_s3 + $0x98] sm:$0xff] %v1235_v1  ;;  %1756 = vrcp.f32 %v1069_v6  ;;  %v2972_v6 = vld [vmem:[#allocation8_spill] sm:$0xff] }
 0x25a   :  { %v1747_v5 = vpop.eup %1746  ;;  %1330 = vst [vmem:[%s2898_s3 + $0x190] sm:$0xff] %v1266_v26 }
 0x25b   :  { %v1749_v33 = vpop.eup %1748  ;;  %v1267_v61 = vmul.f32 %v1747_v5, %v2532_v51  ;;  %v1071_v25 = vpop.xlane.xlu1 %1070 }
 0x25c   :  { %v1133_v23 = vpop.xlane.xlu0 %1132  ;;  %v1232_v7 = vmul.f32 %v1749_v33, %v2534_v57  ;;  %1758 = vrcp.f32 %v1071_v25 }
 0x25d   :  { %1331 = vst [vmem:[%s2898_s3 + $0x198] sm:$0xff] %v1267_v61  ;;  %1760 = vrcp.f32 %v1133_v23  ;;  %v2973_v61 = vld [vmem:[#allocation9_spill] sm:$0xff] }
 0x25e   :  { %v1751_v10 = vpop.eup %1750  ;;  %1296 = vst [vmem:[%s2898_s3 + $0x80] sm:$0xff] %v1232_v7  ;;  %v2974_v7 = vld [vmem:[#allocation10_spill] sm:$0xff] }
 0x25f   :  { %v1753_v19 = vpop.eup %1752  ;;  %v1233_v56 = vmul.f32 %v1751_v10, %v2540_v22  ;;  %v1135_v43 = vpop.xlane.xlu1 %1134 }
 0x260   :  { %v1065_v51 = vpop.xlane.xlu0 %1064  ;;  %v1264_v50 = vmul.f32 %v1753_v19, %v2542_v63  ;;  %1762 = vrcp.f32 %v1135_v43 }
 0x261   :  { %1297 = vst [vmem:[%s2898_s3 + $0x88] sm:$0xff] %v1233_v56  ;;  %1764 = vrcp.f32 %v1065_v51 }
 0x262   :  { %v1755_v57 = vpop.eup %1754  ;;  %1328 = vst [vmem:[%s2898_s3 + $0x180] sm:$0xff] %v1264_v50 }
 0x263   :  { %v1757_v16 = vpop.eup %1756  ;;  %v1265_v40 = vmul.f32 %v1755_v57, %v2548_v27  ;;  %v1067_v41 = vpop.xlane.xlu1 %1066 }
 0x264   :  { %v1129_v22 = vpop.xlane.xlu0 %1128  ;;  %v1238_v18 = vmul.f32 %v1757_v16, %v2550_v0  ;;  %1766 = vrcp.f32 %v1067_v41 }
 0x265   :  { %1329 = vst [vmem:[%s2898_s3 + $0x188] sm:$0xff] %v1265_v40  ;;  %1768 = vrcp.f32 %v1129_v22 }
 0x266   :  { %v1759_v63 = vpop.eup %1758  ;;  %1302 = vst [vmem:[%s2898_s3 + $0xb0] sm:$0xff] %v1238_v18 }
 0x267   :  { %v1761_v15 = vpop.eup %1760  ;;  %v1239_v24 = vmul.f32 %v1759_v63, %v2556_v34  ;;  %v1131_v13 = vpop.xlane.xlu1 %1130 }
 0x268   :  { %v1077_v27 = vpop.xlane.xlu0 %1076  ;;  %v1270_v35 = vmul.f32 %v1761_v15, %v2558_v12  ;;  %1770 = vrcp.f32 %v1131_v13 }
 0x269   :  { %1303 = vst [vmem:[%s2898_s3 + $0xb8] sm:$0xff] %v1239_v24  ;;  %1772 = vrcp.f32 %v1077_v27 }
 0x26a   :  { %v1763_v0 = vpop.eup %1762  ;;  %1334 = vst [vmem:[%s2898_s3 + $0x1b0] sm:$0xff] %v1270_v35 }
 0x26b   :  { %v1765_v20 = vpop.eup %1764  ;;  %v1271_v53 = vmul.f32 %v1763_v0, %v2564_v9  ;;  %v1079_v48 = vpop.xlane.xlu1 %1078 }
 0x26c   :  { %v1141_v34 = vpop.xlane.xlu0 %1140  ;;  %v1236_v36 = vmul.f32 %v1765_v20, %v2966_v59  ;;  %1774 = vrcp.f32 %v1079_v48 }
 0x26d   :  { %1335 = vst [vmem:[%s2898_s3 + $0x1b8] sm:$0xff] %v1271_v53  ;;  %1776 = vrcp.f32 %v1141_v34  ;;  %v2975_v53 = vld [vmem:[#allocation15_spill] sm:$0xff]  ;;  %v2976_v34 = vld [vmem:[#allocation12_spill] sm:$0xff] }
 0x26e   :  { %v1767_v12 = vpop.eup %1766  ;;  %1300 = vst [vmem:[%s2898_s3 + $0xa0] sm:$0xff] %v1236_v36 }
 0x26f   :  { %v1769_v30 = vpop.eup %1768  ;;  %v1237_v21 = vmul.f32 %v1767_v12, %v2967_v54  ;;  %v1143_v29 = vpop.xlane.xlu1 %1142 }
 0x270   :  { %v1073_v9 = vpop.xlane.xlu0 %1072  ;;  %v1268_v52 = vmul.f32 %v1769_v30, %v2968_v44  ;;  %1778 = vrcp.f32 %v1143_v29 }
 0x271   :  { %1301 = vst [vmem:[%s2898_s3 + $0xa8] sm:$0xff] %v1237_v21  ;;  %1780 = vrcp.f32 %v1073_v9 }
 0x272   :  { %v1771_v8 = vpop.eup %1770  ;;  %1332 = vst [vmem:[%s2898_s3 + $0x1a0] sm:$0xff] %v1268_v52 }
 0x273   :  { %v1773_v45 = vpop.eup %1772  ;;  %v1269_v49 = vmul.f32 %v1771_v8, %v2969_v39  ;;  %v1075_v62 = vpop.xlane.xlu1 %1074 }
 0x274   :  { %v1137_v14 = vpop.xlane.xlu0 %1136  ;;  %v1242_v32 = vmul.f32 %v1773_v45, %v2970_v17  ;;  %1782 = vrcp.f32 %v1075_v62 }
 0x275   :  { %1333 = vst [vmem:[%s2898_s3 + $0x1a8] sm:$0xff] %v1269_v49  ;;  %1784 = vrcp.f32 %v1137_v14 }
 0x276   :  { %v1775_v11 = vpop.eup %1774  ;;  %1306 = vst [vmem:[%s2898_s3 + $0xd0] sm:$0xff] %v1242_v32 }
 0x277   :  { %v1777_v47 = vpop.eup %1776  ;;  %v1243_v4 = vmul.f32 %v1775_v11, %v2971_v3  ;;  %v1139_v1 = vpop.xlane.xlu1 %1138 }
 0x278   :  { %v1085_v31 = vpop.xlane.xlu0 %1084  ;;  %v1274_v26 = vmul.f32 %v1777_v47, %v2972_v6  ;;  %1786 = vrcp.f32 %v1139_v1 }
 0x279   :  { %1307 = vst [vmem:[%s2898_s3 + $0xd8] sm:$0xff] %v1243_v4  ;;  %1788 = vrcp.f32 %v1085_v31 }
 0x27a   :  { %v1779_v5 = vpop.eup %1778  ;;  %1338 = vst [vmem:[%s2898_s3 + $0x1d0] sm:$0xff] %v1274_v26 }
 0x27b   :  { %v1781_v33 = vpop.eup %1780  ;;  %v1275_v25 = vmul.f32 %v1779_v5, %v2973_v61  ;;  %v1087_v23 = vpop.xlane.xlu1 %1086 }
 0x27c   :  { %v1240_v10 = vmul.f32 %v1781_v33, %v2974_v7  ;;  %1790 = vrcp.f32 %v1087_v23 }
 0x27d   :  { %1339 = vst [vmem:[%s2898_s3 + $0x1d8] sm:$0xff] %v1275_v25 }
 0x27e   :  { %v1783_v19 = vpop.eup %1782  ;;  %1304 = vst [vmem:[%s2898_s3 + $0xc0] sm:$0xff] %v1240_v10 }
 0x27f   :  { %v1785_v56 = vpop.eup %1784  ;;  %v1241_v43 = vmul.f32 %v1783_v19, %v2602_v46  ;;  %v1083_v51 = vpop.xlane.xlu1 %1082 }
 0x280   :  { %v1081_v50 = vpop.xlane.xlu0 %1080  ;;  %v1272_v57 = vmul.f32 %v1785_v56, %v2604_v42  ;;  %1792 = vrcp.f32 %v1083_v51 }
 0x281   :  { %1305 = vst [vmem:[%s2898_s3 + $0xc8] sm:$0xff] %v1241_v43  ;;  %1794 = vrcp.f32 %v1081_v50 }
 0x282   :  { %v1787_v16 = vpop.eup %1786  ;;  %1336 = vst [vmem:[%s2898_s3 + $0x1c0] sm:$0xff] %v1272_v57 }
 0x283   :  { %v1789_v40 = vpop.eup %1788  ;;  %v1273_v41 = vmul.f32 %v1787_v16, %v2612_v2  ;;  %v1147_v22 = vpop.xlane.xlu1 %1146 }
 0x284   :  { %v1145_v46 = vpop.xlane.xlu0 %1144  ;;  %v1246_v18 = vmul.f32 %v1789_v40, %v2614_v28  ;;  %1796 = vrcp.f32 %v1147_v22 }
 0x285   :  { %1337 = vst [vmem:[%s2898_s3 + $0x1c8] sm:$0xff] %v1273_v41  ;;  %1798 = vrcp.f32 %v1145_v46 }
 0x286   :  { %v1791_v42 = vpop.eup %1790  ;;  %1310 = vst [vmem:[%s2898_s3 + $0xf0] sm:$0xff] %v1246_v18 }
 0x287   :  { %v1247_v63 = vmul.f32 %v1791_v42, %v2618_v55  ;;  %v1151_v15 = vpop.xlane.xlu1 %1150 }
 0x288   :  { %v1149_v24 = vpop.xlane.xlu0 %1148  ;;  %1800 = vrcp.f32 %v1151_v15 }
 0x289   :  { %1311 = vst [vmem:[%s2898_s3 + $0xf8] sm:$0xff] %v1247_v63  ;;  %1802 = vrcp.f32 %v1149_v24 }
 0x28a   :  { %v1793_v2 = vpop.eup %1792 }
 0x28b   :  { %v1795_v28 = vpop.eup %1794  ;;  %v1245_v13 = vmul.f32 %v1793_v2, %v2621_v60 }
 0x28c   :  { %v1244_v27 = vmul.f32 %v1795_v28, %v2623_v37 }
 0x28d   :  { %1309 = vst [vmem:[%s2898_s3 + $0xe8] sm:$0xff] %v1245_v13 }
 0x28e   :  { %v1797_v35 = vpop.eup %1796  ;;  %1308 = vst [vmem:[%s2898_s3 + $0xe0] sm:$0xff] %v1244_v27 }
 0x28f   :  { %v1799_v55 = vpop.eup %1798  ;;  %v1277_v0 = vmul.f32 %v1797_v35, %v2627_v38 }
 0x290   :  { %v1276_v20 = vmul.f32 %v1799_v55, %v2629_v58 }
 0x291   :  { %1341 = vst [vmem:[%s2898_s3 + $0x1e8] sm:$0xff] %v1277_v0 }
 0x292   :  { %v1801_v60 = vpop.eup %1800  ;;  %1340 = vst [vmem:[%s2898_s3 + $0x1e0] sm:$0xff] %v1276_v20 }
 0x293   :  { %v1803_v37 = vpop.eup %1802  ;;  %v1279_v48 = vmul.f32 %v1801_v60, %v2975_v53 }
 0x294   :  { %v1278_v59 = vmul.f32 %v1803_v37, %v2976_v34 }
 0x295   :  { %1343 = vst [vmem:[%s2898_s3 + $0x1f8] sm:$0xff] %v1279_v48 }
 0x296   :  { %1342 = vst [vmem:[%s2898_s3 + $0x1f0] sm:$0xff] %v1278_v59 }

// kernel: local_feddis_forward.37
= control target key start
LH: loop header
LB: loop body
LE: loop exit
PB: predicated region body
PF: predicated region fallthrough
CT: control target
= control target key end

     0   :  { %vm81_vm0 = vcmask 818176   ;;  %vm88_vm1 = vcmask 1041408   ;;  %v240_v10 = vmov 0.0   ;;  %s325_s1 = inlined_call_operand.vmem [shape: bf16[100,128], index: 1, kind: input, shape index: {}]   ;;  %s326_s0 = inlined_call_operand.vmem [shape: bf16[32,100], index: 0, kind: input, shape index: {}]   ;;  %s327_s3 = inlined_call_operand.vmem [shape: f32[1,128], index: 3, kind: output, shape index: {1}]   ;;  %s328_s4 = inlined_call_operand.vmem [shape: f32[1,128], index: 4, kind: output, shape index: {2}]   ;;  %s329_s2 = inlined_call_operand.vmem [shape: f32[32,128], index: 2, kind: output, shape index: {0}]  }
   0x1   :  { %v231_v0 = vld [vmem:[%s325_s1] sm:$0xff]   ;;  %v232_v1 = vld [vmem:[%s325_s1 + $0x8] sm:$0xff]   ;;  %v233_v2 = vld [vmem:[%s325_s1 + $0x10] sm:$0xff]   ;;  %149 = vst [vmem:[%s327_s3] sm:$0x1] %v240_v10 }
   0x2   :  { %211 = vmatprep.subr.bf16.mxu0 %v231_v0  ;;  %v238_v3 = vld [vmem:[%s326_s0] sm:$0xff]   ;;  %v234_v4 = vld [vmem:[%s325_s1 + $0x18] sm:$0xff]   ;;  %v236_v6 = vld [vmem:[%s325_s1 + $0x28] sm:$0xff]   ;;  %150 = vst [vmem:[%s328_s4] sm:$0x1] %v240_v10 }
   0x3   :  { %212 = vmatpush3.bf16.msra.mxu0 %v231_v0  ;;  %225 = vmatprep.mubr.msk.bf16.mxu0 %vm81_vm0, %v238_v3  ;;  %v235_v5 = vld [vmem:[%s325_s1 + $0x20] sm:$0xff]   ;;  %v237_v7 = vld [vmem:[%s325_s1 + $0x30] ss:$0 sps:$4 sm:$0x33]   ;;  %v239_v9 = vld [vmem:[%s326_s0 + $0x8] sm:$0xff]  }
   0x4   :  { %213 = vmatprep.subr.bf16.mxu0 %v232_v1  ;;  %v90_v8 = vsel %vm88_vm1, %v237_v7, 0 }
   0x7   :  { %214 = vmatpush3.bf16.msra.mxu0 %v232_v1 }
   0x8   :  { %215 = vmatprep.subr.bf16.mxu0 %v233_v2  ;;  %v151_v34 = vld [vmem:[%s327_s3] sm:$0x1] }
   0x9   :  { %v163_v37 = vld [vmem:[%s328_s4] sm:$0x1] }
   0xb   :  { %216 = vmatpush3.bf16.msra.mxu0 %v233_v2 }
   0xc   :  { %217 = vmatprep.subr.bf16.mxu0 %v234_v4 }
   0xf   :  { %218 = vmatpush3.bf16.msra.mxu0 %v234_v4 }
  0x10   :  { %219 = vmatprep.subr.bf16.mxu0 %v235_v5 }
  0x13   :  { %220 = vmatpush3.bf16.msra.mxu0 %v235_v5 }
  0x14   :  { %221 = vmatprep.subr.bf16.mxu0 %v236_v6 }
  0x17   :  { %222 = vmatpush3.bf16.msra.mxu0 %v236_v6 }
  0x18   :  { %229 = vmatprep.subr.msk.bf16.mxu0 %vm88_vm1, %v237_v7 }
  0x1b   :  { %224 = vmatpush3.bf16.msra.mxu0 %v90_v8 }
  0x1e   :  { %226 = vmatmul.mubr.msk.bf16.vlgmr.msra.gmra.mrb[0].mxu0 %vm81_vm0, %v239_v9 }
  0xf1   :  { %v227_v11 = vpop.f32.mrb[0].mxu0 }
  0xf2   :  { %143 = vst [vmem:[%s329_s2 + $0x10] sm:$0xff] %v227_v11  ;;  %v126_v12 = vpop.f32.mrb[1].mxu0  ;;  %v166_v18 = vmul.f32 %v227_v11, %v227_v11 }
  0xf3   :  { %141 = vst [vmem:[%s329_s2] sm:$0xff] %v126_v12  ;;  %v228_v13 = vpop.f32.mrb[2].mxu0  ;;  %v164_v15 = vmul.f32 %v126_v12, %v126_v12 }
  0xf4   :  { %144 = vst [vmem:[%s329_s2 + $0x18] sm:$0xff] %v228_v13  ;;  %v129_v14 = vpop.f32.mrb[3].mxu0  ;;  %v167_v21 = vmul.f32 %v228_v13, %v228_v13 }
  0xf5   :  { %142 = vst [vmem:[%s329_s2 + $0x8] sm:$0xff] %v129_v14  ;;  %v152_v16 = vadd.f32 %v129_v14, %v126_v12  ;;  %v165_v17 = vmul.f32 %v129_v14, %v129_v14 }
  0xf7   :  { %v153_v19 = vadd.f32 %v227_v11, %v152_v16  ;;  %v168_v20 = vadd.f32 %v165_v17, %v164_v15 }
  0xf9   :  { %v154_v22 = vadd.f32 %v228_v13, %v153_v19  ;;  %v169_v23 = vadd.f32 %v168_v20, %v166_v18 }
  0xfb   :  { %v155_v24 = vrot.slane %v154_v22, 4  ;;  %v170_v25 = vadd.f32 %v169_v23, %v167_v21 }
  0xfd   :  { %v156_v26 = vadd.f32 %v155_v24, %v154_v22  ;;  %v171_v27 = vrot.slane %v170_v25, 4 }
  0xff   :  { %v157_v28 = vrot.slane %v156_v26, 2  ;;  %v172_v29 = vadd.f32 %v171_v27, %v170_v25 }
 0x101   :  { %v158_v30 = vadd.f32 %v157_v28, %v156_v26  ;;  %v173_v31 = vrot.slane %v172_v29, 2 }
 0x103   :  { %v159_v32 = vrot.slane %v158_v30, 1  ;;  %v174_v33 = vadd.f32 %v173_v31, %v172_v29 }
 0x105   :  { %v160_v35 = vadd.f32 %v159_v32, %v158_v30  ;;  %v175_v36 = vrot.slane %v174_v33, 1 }
 0x107   :  { %v161_v38 = vadd.f32 %v160_v35, %v151_v34  ;;  %v176_v39 = vadd.f32 %v175_v36, %v174_v33 }
 0x109   :  { %162 = vst [vmem:[%s327_s3] sm:$0x1] %v161_v38  ;;  %v177_v40 = vadd.f32 %v176_v39, %v163_v37 }
 0x10b   :  { %178 = vst [vmem:[%s328_s4] sm:$0x1] %v177_v40 }

// kernel: local_feddis_forward.39
= control target key start
LH: loop header
LB: loop body
LE: loop exit
PB: predicated region body
PF: predicated region fallthrough
CT: control target
= control target key end

     0   :  { %v241_v0 = vmov 0   ;;  %vm122_vm0 = vcmask 588800   ;;  %vm126_vm1 = vcmask 1043456   ;;  %v242_v18 = vmov 0.0   ;;  %s331_s1 = inlined_call_operand.vmem [shape: bf16[200,128], index: 1, kind: input, shape index: {}]   ;;  %s332_s0 = inlined_call_operand.vmem [shape: bf16[8,200], index: 0, kind: input, shape index: {}]   ;;  %s333_s3 = inlined_call_operand.vmem [shape: f32[1,128], index: 3, kind: output, shape index: {1}]   ;;  %s334_s4 = inlined_call_operand.vmem [shape: f32[1,128], index: 4, kind: output, shape index: {2}]   ;;  %s335_s2 = inlined_call_operand.vmem [shape: f32[8,128], index: 2, kind: output, shape index: {0}]  }
   0x1   :  { %130 = vmatprep.subr.bf16.mxu0 %v241_v0  ;;  %v226_v1 = vld [vmem:[%s331_s1] sm:$0xff]   ;;  %v227_v2 = vld [vmem:[%s331_s1 + $0x8] sm:$0xff]   ;;  %v228_v3 = vld [vmem:[%s331_s1 + $0x10] sm:$0xff]   ;;  %175 = vst [vmem:[%s333_s3] sm:$0x1] %v242_v18 }
   0x2   :  { %131 = vmatpush1.bf16.msra.mxu0 %v226_v1  ;;  %v229_v4 = vld [vmem:[%s331_s1 + $0x18] sm:$0xff]   ;;  %v15_v5 = vld [vmem:[%s332_s0] sm:$0xff]  ;;  %v231_v8 = vld [vmem:[%s331_s1 + $0x28] sm:$0xff]   ;;  %176 = vst [vmem:[%s334_s4] sm:$0x1] %v242_v18 }
   0x3   :  { %132 = vmatprep.subr.bf16.mxu0 %v241_v0  ;;  %v209_v6 = vcombine.high %v15_v5, %v15_v5  ;;  %v230_v7 = vld [vmem:[%s331_s1 + $0x20] sm:$0xff]   ;;  %v232_v9 = vld [vmem:[%s331_s1 + $0x30] sm:$0xff]   ;;  %v233_v10 = vld [vmem:[%s331_s1 + $0x38] sm:$0xff]   ;;  %v208_v17 = vcombine.low %v15_v5, %v15_v5 }
   0x4   :  { %v234_v11 = vld [vmem:[%s331_s1 + $0x40] sm:$0xff]   ;;  %v235_v12 = vld [vmem:[%s331_s1 + $0x48] sm:$0xff]   ;;  %v236_v13 = vld [vmem:[%s331_s1 + $0x50] sm:$0xff]  }
   0x5   :  { %223 = vmatprep.mubr.msk.bf16.mxu0 %vm122_vm0, %v209_v6  ;;  %v237_v14 = vld [vmem:[%s331_s1 + $0x58] sm:$0xff]   ;;  %v238_v15 = vld [vmem:[%s331_s1 + $0x60] ss:$0 sps:$4 sm:$0xff]  }
   0x6   :  { %133 = vmatpush1.bf16.msra.mxu0 %v227_v2  ;;  %v128_v16 = vsel %vm126_vm1, %v238_v15, 0 }
   0x7   :  { %134 = vmatprep.subr.bf16.mxu0 %v241_v0 }
   0x8   :  { %v177_v33 = vld [vmem:[%s333_s3] sm:$0x1] }
   0x9   :  { %v186_v36 = vld [vmem:[%s334_s4] sm:$0x1] }
   0xa   :  { %135 = vmatpush1.bf16.msra.mxu0 %v228_v3 }
   0xb   :  { %136 = vmatprep.subr.bf16.mxu0 %v241_v0 }
   0xe   :  { %137 = vmatpush1.bf16.msra.mxu0 %v229_v4 }
   0xf   :  { %138 = vmatprep.subr.bf16.mxu0 %v241_v0 }
  0x12   :  { %139 = vmatpush1.bf16.msra.mxu0 %v230_v7 }
  0x13   :  { %140 = vmatprep.subr.bf16.mxu0 %v241_v0 }
  0x16   :  { %141 = vmatpush1.bf16.msra.mxu0 %v231_v8 }
  0x17   :  { %142 = vmatprep.subr.bf16.mxu0 %v241_v0 }
  0x1a   :  { %143 = vmatpush1.bf16.msra.mxu0 %v232_v9 }
  0x1b   :  { %144 = vmatprep.subr.bf16.mxu0 %v241_v0 }
  0x1e   :  { %145 = vmatpush1.bf16.msra.mxu0 %v233_v10 }
  0x1f   :  { %146 = vmatprep.subr.bf16.mxu0 %v241_v0 }
  0x22   :  { %147 = vmatpush1.bf16.msra.mxu0 %v234_v11 }
  0x23   :  { %148 = vmatprep.subr.bf16.mxu0 %v241_v0 }
  0x26   :  { %149 = vmatpush1.bf16.msra.mxu0 %v235_v12 }
  0x27   :  { %150 = vmatprep.subr.bf16.mxu0 %v241_v0 }
  0x2a   :  { %151 = vmatpush1.bf16.msra.mxu0 %v236_v13 }
  0x2b   :  { %152 = vmatprep.subr.bf16.mxu0 %v241_v0 }
  0x2e   :  { %153 = vmatpush1.bf16.msra.mxu0 %v237_v14 }
  0x2f   :  { %154 = vmatprep.subr.bf16.mxu0 %v241_v0 }
  0x32   :  { %155 = vmatpush1.bf16.msra.mxu0 %v128_v16 }
  0x35   :  { %163 = vmatmul.mubr.bf16.vlgmr.msra.gmra.mrb[0].mxu0 %v208_v17 }
 0x108   :  { %v164_v19 = vpop.f32.mrb[0].mxu0 }
 0x109   :  { %170 = vst [vmem:[%s335_s2] sm:$0xff] %v164_v19  ;;  %v178_v20 = vrot.slane %v164_v19, 4  ;;  %v187_v21 = vmul.f32 %v164_v19, %v164_v19  ;;  %v166_v22 = vpop.f32.mrb[1].mxu0 }
 0x10a   :  { %v167_v23 = vpop.f32.mrb[2].mxu0 }
 0x10b   :  { %v179_v24 = vadd.f32 %v178_v20, %v164_v19  ;;  %v188_v25 = vrot.slane %v187_v21, 4  ;;  %v168_v26 = vpop.f32.mrb[3].mxu0 }
 0x10d   :  { %v180_v27 = vrot.slane %v179_v24, 2  ;;  %v189_v28 = vadd.f32 %v188_v25, %v187_v21 }
 0x10f   :  { %v181_v29 = vadd.f32 %v180_v27, %v179_v24  ;;  %v190_v30 = vrot.slane %v189_v28, 2 }
 0x111   :  { %v182_v31 = vrot.slane %v181_v29, 1  ;;  %v191_v32 = vadd.f32 %v190_v30, %v189_v28 }
 0x113   :  { %v183_v34 = vadd.f32 %v182_v31, %v181_v29  ;;  %v192_v35 = vrot.slane %v191_v32, 1 }
 0x115   :  { %v184_v37 = vadd.f32 %v183_v34, %v177_v33  ;;  %v193_v38 = vadd.f32 %v192_v35, %v191_v32 }
 0x117   :  { %185 = vst [vmem:[%s333_s3] sm:$0x1] %v184_v37  ;;  %v194_v39 = vadd.f32 %v193_v38, %v186_v36 }
 0x119   :  { %195 = vst [vmem:[%s334_s4] sm:$0x1] %v194_v39 }

// kernel: local_feddis_forward.53
= control target key start
LH: loop header
LB: loop body
LE: loop exit
PB: predicated region body
PF: predicated region fallthrough
CT: control target
= control target key end

     0   :  { %v201_v0 = vmov 0   ;;  %vm94_vm0 = vcmask 130048   ;;  %v202_v13 = vmov 0.0   ;;  %s279_s1 = inlined_call_operand.vmem [shape: bf16[144,128], index: 1, kind: input, shape index: {}]   ;;  %s280_s0 = inlined_call_operand.vmem [shape: bf16[8,144], index: 0, kind: input, shape index: {}]   ;;  %s281_s3 = inlined_call_operand.vmem [shape: f32[1,128], index: 3, kind: output, shape index: {1}]   ;;  %s282_s4 = inlined_call_operand.vmem [shape: f32[1,128], index: 4, kind: output, shape index: {2}]   ;;  %s283_s2 = inlined_call_operand.vmem [shape: f32[8,128], index: 2, kind: output, shape index: {0}]  }
   0x1   :  { %98 = vmatprep.subr.bf16.mxu0 %v201_v0  ;;  %v190_v1 = vld [vmem:[%s279_s1] sm:$0xff]   ;;  %v191_v2 = vld [vmem:[%s279_s1 + $0x8] sm:$0xff]   ;;  %v192_v3 = vld [vmem:[%s279_s1 + $0x10] sm:$0xff]   ;;  %143 = vst [vmem:[%s281_s3] sm:$0x1] %v202_v13 }
   0x2   :  { %99 = vmatpush1.bf16.msra.mxu0 %v190_v1  ;;  %v15_v4 = vld [vmem:[%s280_s0] sm:$0xff]  ;;  %v193_v5 = vld [vmem:[%s279_s1 + $0x18] sm:$0xff]   ;;  %v195_v8 = vld [vmem:[%s279_s1 + $0x28] sm:$0xff]   ;;  %144 = vst [vmem:[%s282_s4] sm:$0x1] %v202_v13 }
   0x3   :  { %100 = vmatprep.subr.bf16.mxu0 %v201_v0  ;;  %v177_v6 = vcombine.high %v15_v4, %v15_v4  ;;  %v194_v7 = vld [vmem:[%s279_s1 + $0x20] sm:$0xff]   ;;  %v196_v9 = vld [vmem:[%s279_s1 + $0x30] sm:$0xff]   ;;  %v197_v10 = vld [vmem:[%s279_s1 + $0x38] sm:$0xff]   ;;  %v176_v12 = vcombine.low %v15_v4, %v15_v4 }
   0x4   :  { %v198_v11 = vld [vmem:[%s279_s1 + $0x40] sm:$0xff]  }
   0x5   :  { %187 = vmatprep.mubr.msk.bf16.mxu0 %vm94_vm0, %v177_v6 }
   0x6   :  { %101 = vmatpush1.bf16.msra.mxu0 %v191_v2 }
   0x7   :  { %102 = vmatprep.subr.bf16.mxu0 %v201_v0 }
   0x8   :  { %v145_v28 = vld [vmem:[%s281_s3] sm:$0x1] }
   0x9   :  { %v154_v31 = vld [vmem:[%s282_s4] sm:$0x1] }
   0xa   :  { %103 = vmatpush1.bf16.msra.mxu0 %v192_v3 }
   0xb   :  { %104 = vmatprep.subr.bf16.mxu0 %v201_v0 }
   0xe   :  { %105 = vmatpush1.bf16.msra.mxu0 %v193_v5 }
   0xf   :  { %106 = vmatprep.subr.bf16.mxu0 %v201_v0 }
  0x12   :  { %107 = vmatpush1.bf16.msra.mxu0 %v194_v7 }
  0x13   :  { %108 = vmatprep.subr.bf16.mxu0 %v201_v0 }
  0x16   :  { %109 = vmatpush1.bf16.msra.mxu0 %v195_v8 }
  0x17   :  { %110 = vmatprep.subr.bf16.mxu0 %v201_v0 }
  0x1a   :  { %111 = vmatpush1.bf16.msra.mxu0 %v196_v9 }
  0x1b   :  { %112 = vmatprep.subr.bf16.mxu0 %v201_v0 }
  0x1e   :  { %113 = vmatpush1.bf16.msra.mxu0 %v197_v10 }
  0x1f   :  { %114 = vmatprep.subr.bf16.mxu0 %v201_v0 }
  0x22   :  { %115 = vmatpush1.bf16.msra.mxu0 %v198_v11 }
  0x25   :  { %131 = vmatmul.mubr.bf16.vlgmr.msra.gmra.mrb[0].mxu0 %v176_v12 }
  0xf8   :  { %v132_v14 = vpop.f32.mrb[0].mxu0 }
  0xf9   :  { %138 = vst [vmem:[%s283_s2] sm:$0xff] %v132_v14  ;;  %v146_v15 = vrot.slane %v132_v14, 4  ;;  %v155_v16 = vmul.f32 %v132_v14, %v132_v14  ;;  %v134_v17 = vpop.f32.mrb[1].mxu0 }
  0xfa   :  { %v135_v18 = vpop.f32.mrb[2].mxu0 }
  0xfb   :  { %v147_v19 = vadd.f32 %v146_v15, %v132_v14  ;;  %v156_v20 = vrot.slane %v155_v16, 4  ;;  %v136_v21 = vpop.f32.mrb[3].mxu0 }
  0xfd   :  { %v148_v22 = vrot.slane %v147_v19, 2  ;;  %v157_v23 = vadd.f32 %v156_v20, %v155_v16 }
  0xff   :  { %v149_v24 = vadd.f32 %v148_v22, %v147_v19  ;;  %v158_v25 = vrot.slane %v157_v23, 2 }
 0x101   :  { %v150_v26 = vrot.slane %v149_v24, 1  ;;  %v159_v27 = vadd.f32 %v158_v25, %v157_v23 }
 0x103   :  { %v151_v29 = vadd.f32 %v150_v26, %v149_v24  ;;  %v160_v30 = vrot.slane %v159_v27, 1 }
 0x105   :  { %v152_v32 = vadd.f32 %v151_v29, %v145_v28  ;;  %v161_v33 = vadd.f32 %v160_v30, %v159_v27 }
 0x107   :  { %153 = vst [vmem:[%s281_s3] sm:$0x1] %v152_v32  ;;  %v162_v34 = vadd.f32 %v161_v33, %v154_v31 }
 0x109   :  { %163 = vst [vmem:[%s282_s4] sm:$0x1] %v162_v34 }

// kernel: local_feddis_forward.55
= control target key start
LH: loop header
LB: loop body
LE: loop exit
PB: predicated region body
PF: predicated region fallthrough
CT: control target
= control target key end

     0   :  { %v265_v0 = vmov 0   ;;  %vm109_vm0 = vcmask 130048   ;;  %v266_v14 = vmov 0.0   ;;  %s361_s1 = inlined_call_operand.vmem [shape: bf16[144,128], index: 1, kind: input, shape index: {}]   ;;  %s362_s0 = inlined_call_operand.vmem [shape: bf16[32,144], index: 0, kind: input, shape index: {}]   ;;  %s363_s3 = inlined_call_operand.vmem [shape: f32[1,128], index: 3, kind: output, shape index: {1}]   ;;  %s364_s4 = inlined_call_operand.vmem [shape: f32[1,128], index: 4, kind: output, shape index: {2}]   ;;  %s365_s2 = inlined_call_operand.vmem [shape: f32[32,128], index: 2, kind: output, shape index: {0}]  }
   0x1   :  { %116 = vmatprep.subr.bf16.mxu0 %v265_v0  ;;  %230 = vmatprep.subr.bf16.mxu1 %v265_v0  ;;  %v250_v1 = vld [vmem:[%s361_s1] sm:$0xff]   ;;  %v251_v2 = vld [vmem:[%s361_s1 + $0x8] sm:$0xff]   ;;  %v252_v3 = vld [vmem:[%s361_s1 + $0x10] sm:$0xff]   ;;  %173 = vst [vmem:[%s363_s3] sm:$0x1] %v266_v14 }
   0x2   :  { %117 = vmatpush1.bf16.msra.mxu0 %v250_v1  ;;  %239 = vmatpush1.bf16.msra.mxu1 %v250_v1  ;;  %v253_v4 = vld [vmem:[%s361_s1 + $0x18] sm:$0xff]   ;;  %v261_v5 = vld [vmem:[%s362_s0 + $0x4] ss:$8 sps:$4 sm:$0xff]   ;;  %v256_v9 = vld [vmem:[%s361_s1 + $0x30] sm:$0xff]   ;;  %174 = vst [vmem:[%s364_s4] sm:$0x1] %v266_v14 }
   0x3   :  { %118 = vmatprep.subr.bf16.mxu0 %v265_v0  ;;  %231 = vmatprep.subr.bf16.mxu1 %v265_v0  ;;  %v264_v6 = vld [vmem:[%s362_s0 + $0x14] ss:$8 sps:$4 sm:$0xff]   ;;  %v254_v7 = vld [vmem:[%s361_s1 + $0x20] sm:$0xff]   ;;  %v255_v8 = vld [vmem:[%s361_s1 + $0x28] sm:$0xff]  }
   0x4   :  { %228 = vmatprep.mubr.msk.bf16.mxu0 %vm109_vm0, %v261_v5  ;;  %229 = vmatprep.mubr.msk.bf16.mxu1 %vm109_vm0, %v264_v6  ;;  %v257_v10 = vld [vmem:[%s361_s1 + $0x38] sm:$0xff]   ;;  %v258_v11 = vld [vmem:[%s361_s1 + $0x40] sm:$0xff]  }
   0x5   :  { %v259_v12 = vld [vmem:[%s362_s0] ss:$8 sps:$4 sm:$0xff]   ;;  %v262_v13 = vld [vmem:[%s362_s0 + $0x10] ss:$8 sps:$4 sm:$0xff]  }
   0x6   :  { %119 = vmatpush1.bf16.msra.mxu0 %v251_v2  ;;  %240 = vmatpush1.bf16.msra.mxu1 %v251_v2 }
   0x7   :  { %120 = vmatprep.subr.bf16.mxu0 %v265_v0  ;;  %232 = vmatprep.subr.bf16.mxu1 %v265_v0 }
   0x8   :  { %v175_v42 = vld [vmem:[%s363_s3] sm:$0x1] }
   0x9   :  { %v187_v45 = vld [vmem:[%s364_s4] sm:$0x1] }
   0xa   :  { %121 = vmatpush1.bf16.msra.mxu0 %v252_v3  ;;  %241 = vmatpush1.bf16.msra.mxu1 %v252_v3 }
   0xb   :  { %122 = vmatprep.subr.bf16.mxu0 %v265_v0  ;;  %233 = vmatprep.subr.bf16.mxu1 %v265_v0 }
   0xe   :  { %123 = vmatpush1.bf16.msra.mxu0 %v253_v4  ;;  %242 = vmatpush1.bf16.msra.mxu1 %v253_v4 }
   0xf   :  { %124 = vmatprep.subr.bf16.mxu0 %v265_v0  ;;  %234 = vmatprep.subr.bf16.mxu1 %v265_v0 }
  0x12   :  { %125 = vmatpush1.bf16.msra.mxu0 %v254_v7  ;;  %243 = vmatpush1.bf16.msra.mxu1 %v254_v7 }
  0x13   :  { %126 = vmatprep.subr.bf16.mxu0 %v265_v0  ;;  %235 = vmatprep.subr.bf16.mxu1 %v265_v0 }
  0x16   :  { %127 = vmatpush1.bf16.msra.mxu0 %v255_v8  ;;  %244 = vmatpush1.bf16.msra.mxu1 %v255_v8 }
  0x17   :  { %128 = vmatprep.subr.bf16.mxu0 %v265_v0  ;;  %236 = vmatprep.subr.bf16.mxu1 %v265_v0 }
  0x1a   :  { %129 = vmatpush1.bf16.msra.mxu0 %v256_v9  ;;  %245 = vmatpush1.bf16.msra.mxu1 %v256_v9 }
  0x1b   :  { %130 = vmatprep.subr.bf16.mxu0 %v265_v0  ;;  %237 = vmatprep.subr.bf16.mxu1 %v265_v0 }
  0x1e   :  { %131 = vmatpush1.bf16.msra.mxu0 %v257_v10  ;;  %246 = vmatpush1.bf16.msra.mxu1 %v257_v10 }
  0x1f   :  { %132 = vmatprep.subr.bf16.mxu0 %v265_v0  ;;  %238 = vmatprep.subr.bf16.mxu1 %v265_v0 }
  0x22   :  { %133 = vmatpush1.bf16.msra.mxu0 %v258_v11  ;;  %247 = vmatpush1.bf16.msra.mxu1 %v258_v11 }
  0x25   :  { %149 = vmatmul.mubr.bf16.vlgmr.msra.gmra.mrb[0].mxu0 %v259_v12  ;;  %157 = vmatmul.mubr.bf16.vlgmr.msra.gmra.mrb[0].mxu1 %v262_v13 }
  0xf8   :  { %v150_v15 = vpop.f32.mrb[0].mxu0  ;;  %v158_v16 = vpop.f32.mrb[0].mxu1 }
  0xf9   :  { %165 = vst [vmem:[%s365_s2] sm:$0xff] %v150_v15  ;;  %v152_v17 = vpop.f32.mrb[1].mxu0  ;;  %167 = vst [vmem:[%s365_s2 + $0x10] sm:$0xff] %v158_v16  ;;  %v160_v18 = vpop.f32.mrb[1].mxu1  ;;  %v188_v21 = vmul.f32 %v150_v15, %v150_v15  ;;  %v190_v22 = vmul.f32 %v158_v16, %v158_v16 }
  0xfa   :  { %v153_v19 = vpop.f32.mrb[2].mxu0  ;;  %v161_v20 = vpop.f32.mrb[2].mxu1 }
  0xfb   :  { %166 = vst [vmem:[%s365_s2 + $0x8] sm:$0xff] %v153_v19  ;;  %v176_v23 = vadd.f32 %v153_v19, %v150_v15  ;;  %v189_v24 = vmul.f32 %v153_v19, %v153_v19  ;;  %v155_v25 = vpop.f32.mrb[3].mxu0  ;;  %168 = vst [vmem:[%s365_s2 + $0x18] sm:$0xff] %v161_v20  ;;  %v163_v26 = vpop.f32.mrb[3].mxu1  ;;  %v191_v30 = vmul.f32 %v161_v20, %v161_v20 }
  0xfd   :  { %v192_v27 = vadd.f32 %v189_v24, %v188_v21  ;;  %v177_v28 = vadd.f32 %v176_v23, %v158_v16 }
  0xff   :  { %v178_v29 = vadd.f32 %v177_v28, %v161_v20  ;;  %v193_v31 = vadd.f32 %v192_v27, %v190_v22 }
 0x101   :  { %v179_v32 = vrot.slane %v178_v29, 4  ;;  %v194_v33 = vadd.f32 %v193_v31, %v191_v30 }
 0x103   :  { %v180_v34 = vadd.f32 %v179_v32, %v178_v29  ;;  %v195_v35 = vrot.slane %v194_v33, 4 }
 0x105   :  { %v181_v36 = vrot.slane %v180_v34, 2  ;;  %v196_v37 = vadd.f32 %v195_v35, %v194_v33 }
 0x107   :  { %v182_v38 = vadd.f32 %v181_v36, %v180_v34  ;;  %v197_v39 = vrot.slane %v196_v37, 2 }
 0x109   :  { %v183_v40 = vrot.slane %v182_v38, 1  ;;  %v198_v41 = vadd.f32 %v197_v39, %v196_v37 }
 0x10b   :  { %v184_v43 = vadd.f32 %v183_v40, %v182_v38  ;;  %v199_v44 = vrot.slane %v198_v41, 1 }
 0x10d   :  { %v185_v46 = vadd.f32 %v184_v43, %v175_v42  ;;  %v200_v47 = vadd.f32 %v199_v44, %v198_v41 }
 0x10f   :  { %186 = vst [vmem:[%s363_s3] sm:$0x1] %v185_v46  ;;  %v201_v48 = vadd.f32 %v200_v47, %v187_v45 }
 0x111   :  { %202 = vst [vmem:[%s364_s4] sm:$0x1] %v201_v48 }

// kernel: squeeze.508
= control target key start
LH: loop header
LB: loop body
LE: loop exit
PB: predicated region body
PF: predicated region fallthrough
CT: control target
= control target key end

     0   :  { %s37_s8 = smov 116   ;;  %vm7_vm0 = vcmask 31744   ;;  %s38_s9 = smov 120   ;;  %s55_s0 = inlined_call_operand.vmem [shape: f32[16], index: 0, kind: input, shape index: {}]   ;;  %s56_s1 = inlined_call_operand.vmem [shape: f32[4,4], index: 1, kind: output, shape index: {}]  }
   0x1   :  { %v4_v0 = vld [vmem:[%s55_s0] sm:$0x1]  ;;  %s36_s0 = smov 124  }
   0x2   :  { %5 = vst [vmem:[#allocation1] sm:$0x1] %v4_v0 }
   0x9   :  { %v9_v1 = vld [vmem:[#allocation1] sm:$0x1]  }
   0xa   :  { %v21_v2 = vld [vmem:[#allocation1] sm:$0x1]   ;;  %10 = vrot.lane.b32.xlu0 %v9_v1, %s36_s0 }
   0xb   :  { %22 = vrot.lane.b32.xlu1 %v21_v2, %s37_s8  ;;  %v6_v3 = vld [vmem:[#allocation1] sm:$0x1]  }
   0xc   :  { %v15_v4 = vld [vmem:[#allocation1] sm:$0x1]   ;;  %8 = vst.msk [vmem:[#allocation0] sm:$0x1] %vm7_vm0, %v6_v3  }
   0xe   :  { %16 = vrot.lane.b32.xlu0 %v15_v4, %s38_s9 }
  0x7c   :  { %v11_v5 = vpop.permute.xlu0 %10  }
  0x7d   :  { %v23_v6 = vpop.permute.xlu1 %22   ;;  %14 = vst.msk [vmem:[#allocation0 + $0x1] sm:$0x1] %vm7_vm0, %v11_v5  }
  0x7e   :  { %26 = vst.msk [vmem:[#allocation0 + $0x3] sm:$0x1] %vm7_vm0, %v23_v6  }
  0x80   :  { %v17_v7 = vpop.permute.xlu0 %16  }
  0x81   :  { %20 = vst.msk [vmem:[#allocation0 + $0x2] sm:$0x1] %vm7_vm0, %v17_v7  }
  0x88   :  { %v30_v8 = vld [vmem:[#allocation0] sm:$0xf] }
  0x89   :  { %32 = vst [vmem:[%s56_s1] sm:$0xf] %v30_v8 }

// kernel: tile.173
= control target key start
LH: loop header
LB: loop body
LE: loop exit
PB: predicated region body
PF: predicated region fallthrough
CT: control target
= control target key end

     0   :  { %s22_s0 = inlined_call_operand.vmem [shape: f32[4], index: 0, kind: input, shape index: {}]   ;;  %s23_s1 = inlined_call_operand.vmem [shape: f32[4,4], index: 1, kind: output, shape index: {}]  }
   0x1   :  { %v4_v0 = vld [vmem:[%s22_s0] ss:$0 sm:$0xff] }
   0x2   :  { %5 = vst [vmem:[%s23_s1] sm:$0xf] %v4_v0 }

// kernel: tile.174
= control target key start
LH: loop header
LB: loop body
LE: loop exit
PB: predicated region body
PF: predicated region fallthrough
CT: control target
= control target key end

     0   :  { %vm7_vm0 = vcmask 31744   ;;  %s37_s8 = smov 4   ;;  %s38_s9 = smov 8   ;;  %vm13_vm1 = vcmask 130144   ;;  %vm19_vm2 = vcmask 97344   ;;  %vm25_vm3 = vcmask 64544   ;;  %s55_s0 = inlined_call_operand.vmem [shape: f32[4,4], index: 0, kind: input, shape index: {}]   ;;  %s56_s1 = inlined_call_operand.vmem [shape: f32[16], index: 1, kind: output, shape index: {}]  }
   0x1   :  { %v4_v0 = vld [vmem:[%s55_s0] sm:$0xf]  ;;  %s36_s0 = smov 12  }
   0x2   :  { %5 = vst [vmem:[#allocation1] sm:$0xf] %v4_v0 }
   0x9   :  { %v10_v1 = vld [vmem:[#allocation1 + $0x3] sm:$0x1]   ;;  %v22_v2 = vld [vmem:[#allocation1 + $0x1] sm:$0x1]   ;;  %v6_v3 = vld [vmem:[#allocation1] sm:$0x1]  }
   0xa   :  { %11 = vrot.lane.b32.xlu0 %v10_v1, %s36_s0  ;;  %23 = vrot.lane.b32.xlu1 %v22_v2, %s37_s8  ;;  %v16_v4 = vld [vmem:[#allocation1 + $0x2] sm:$0x1]   ;;  %8 = vst.msk [vmem:[#allocation0] sm:$0x1] %vm7_vm0, %v6_v3  }
   0xe   :  { %17 = vrot.lane.b32.xlu0 %v16_v4, %s38_s9 }
  0x7c   :  { %v12_v5 = vpop.permute.xlu0 %11   ;;  %v24_v6 = vpop.permute.xlu1 %23  }
  0x7d   :  { %14 = vst.msk [vmem:[#allocation0] sm:$0x1] %vm13_vm1, %v12_v5  }
  0x80   :  { %v18_v7 = vpop.permute.xlu0 %17  }
  0x81   :  { %20 = vst.msk [vmem:[#allocation0] sm:$0x1] %vm19_vm2, %v18_v7  }
  0x82   :  { %26 = vst.msk [vmem:[#allocation0] sm:$0x1] %vm25_vm3, %v24_v6  }
  0x89   :  { %v30_v8 = vld [vmem:[#allocation0] sm:$0x1] }
  0x8a   :  { %32 = vst [vmem:[%s56_s1] sm:$0x1] %v30_v8 }

// kernel: local_feddis_forward.57
= control target key start
LH: loop header
LB: loop body
LE: loop exit
PB: predicated region body
PF: predicated region fallthrough
CT: control target
= control target key end

     0   :  { %vm107_vm0 = vcmask 588800   ;;  %vm132_vm1 = vcmask 1043456   ;;  %v417_v14 = vmov 0.0   ;;  %s556_s1 = inlined_call_operand.vmem [shape: bf16[72,128], index: 1, kind: input, shape index: {}]   ;;  %s557_s0 = inlined_call_operand.vmem [shape: bf16[128,72], index: 0, kind: input, shape index: {}]   ;;  %s558_s3 = inlined_call_operand.vmem [shape: f32[1,128], index: 3, kind: output, shape index: {1}]   ;;  %s559_s4 = inlined_call_operand.vmem [shape: f32[1,128], index: 4, kind: output, shape index: {2}]   ;;  %s560_s2 = inlined_call_operand.vmem [shape: f32[128,128], index: 2, kind: output, shape index: {0}]  }
   0x1   :  { %v404_v0 = vld [vmem:[%s556_s1] sm:$0xff]   ;;  %v405_v1 = vld [vmem:[%s556_s1 + $0x8] sm:$0xff]   ;;  %v406_v2 = vld [vmem:[%s556_s1 + $0x10] sm:$0xff]   ;;  %253 = vst [vmem:[%s558_s3] sm:$0x1] %v417_v14 }
   0x2   :  { %365 = vmatprep.subr.bf16.mxu0 %v404_v0  ;;  %391 = vmatprep.subr.bf16.mxu1 %v404_v0  ;;  %v409_v3 = vld [vmem:[%s557_s0] sm:$0xff]   ;;  %v407_v4 = vld [vmem:[%s556_s1 + $0x18] sm:$0xff]   ;;  %v410_v8 = vld [vmem:[%s557_s0 + $0x8] sm:$0xff]   ;;  %254 = vst [vmem:[%s559_s4] sm:$0x1] %v417_v14 }
   0x3   :  { %366 = vmatpush3.bf16.msra.mxu0 %v404_v0  ;;  %396 = vmatpush3.bf16.msra.mxu1 %v404_v0  ;;  %v413_v5 = vld [vmem:[%s557_s0 + $0x20] sm:$0xff]   ;;  %v414_v9 = vld [vmem:[%s557_s0 + $0x28] sm:$0xff]   ;;  %v411_v10 = vld [vmem:[%s557_s0 + $0x10] sm:$0xff]  }
   0x4   :  { %367 = vmatprep.subr.bf16.mxu0 %v405_v1  ;;  %392 = vmatprep.subr.bf16.mxu1 %v405_v1  ;;  %v408_v6 = vld [vmem:[%s556_s1 + $0x20] ss:$0 sps:$4 sm:$0xff]   ;;  %v415_v11 = vld [vmem:[%s557_s0 + $0x30] sm:$0xff]   ;;  %v412_v12 = vld [vmem:[%s557_s0 + $0x18] sm:$0xff]  }
   0x5   :  { %375 = vmatprep.mubr.msk.bf16.mxu0 %vm107_vm0, %v409_v3  ;;  %383 = vmatprep.mubr.msk.bf16.mxu1 %vm107_vm0, %v413_v5  ;;  %v134_v7 = vsel %vm132_vm1, %v408_v6, 0  ;;  %v416_v13 = vld [vmem:[%s557_s0 + $0x38] sm:$0xff]  }
   0x7   :  { %368 = vmatpush3.bf16.msra.mxu0 %v405_v1  ;;  %397 = vmatpush3.bf16.msra.mxu1 %v405_v1 }
   0x8   :  { %369 = vmatprep.subr.bf16.mxu0 %v406_v2  ;;  %393 = vmatprep.subr.bf16.mxu1 %v406_v2 }
   0xb   :  { %370 = vmatpush3.bf16.msra.mxu0 %v406_v2  ;;  %398 = vmatpush3.bf16.msra.mxu1 %v406_v2 }
   0xc   :  { %371 = vmatprep.subr.bf16.mxu0 %v407_v4  ;;  %394 = vmatprep.subr.bf16.mxu1 %v407_v4 }
   0xf   :  { %372 = vmatpush3.bf16.msra.mxu0 %v407_v4  ;;  %399 = vmatpush3.bf16.msra.mxu1 %v407_v4 }
  0x10   :  { %401 = vmatprep.subr.msk.bf16.mxu0 %vm132_vm1, %v408_v6  ;;  %402 = vmatprep.subr.msk.bf16.mxu1 %vm132_vm1, %v408_v6 }
  0x13   :  { %374 = vmatpush3.bf16.msra.mxu0 %v134_v7  ;;  %400 = vmatpush3.bf16.msra.mxu1 %v134_v7 }
  0x16   :  { %376 = vmatmul.mubr.msk.bf16.vlgmr.msra.gmra.mrb[0].mxu0 %vm107_vm0, %v410_v8  ;;  %384 = vmatmul.mubr.msk.bf16.vlgmr.msra.gmra.mrb[0].mxu1 %vm107_vm0, %v414_v9 }
  0x17   :  { %379 = vmatprep.mubr.msk.bf16.mxu0 %vm107_vm0, %v411_v10  ;;  %387 = vmatprep.mubr.msk.bf16.mxu1 %vm107_vm0, %v415_v11 }
  0x1e   :  { %380 = vmatmul.mubr.msk.bf16.gmra.mrb[4].mxu0 %vm107_vm0, %v412_v12  ;;  %388 = vmatmul.mubr.msk.bf16.gmra.mrb[4].mxu1 %vm107_vm0, %v416_v13 }
  0xe9   :  { %v377_v15 = vpop.f32.mrb[0].mxu0  ;;  %v385_v16 = vpop.f32.mrb[0].mxu1 }
  0xea   :  { %235 = vst [vmem:[%s560_s2 + $0x10] sm:$0xff] %v377_v15  ;;  %v170_v17 = vpop.f32.mrb[1].mxu0  ;;  %243 = vst [vmem:[%s560_s2 + $0x50] sm:$0xff] %v385_v16  ;;  %v202_v18 = vpop.f32.mrb[1].mxu1  ;;  %v282_v26 = vmul.f32 %v377_v15, %v377_v15  ;;  %v290_v58 = vmul.f32 %v385_v16, %v385_v16 }
  0xeb   :  { %233 = vst [vmem:[%s560_s2] sm:$0xff] %v170_v17  ;;  %v378_v19 = vpop.f32.mrb[2].mxu0  ;;  %241 = vst [vmem:[%s560_s2 + $0x40] sm:$0xff] %v202_v18  ;;  %v386_v20 = vpop.f32.mrb[2].mxu1  ;;  %v280_v23 = vmul.f32 %v170_v17, %v170_v17  ;;  %v288_v52 = vmul.f32 %v202_v18, %v202_v18 }
  0xec   :  { %236 = vst [vmem:[%s560_s2 + $0x18] sm:$0xff] %v378_v19  ;;  %v173_v21 = vpop.f32.mrb[3].mxu0  ;;  %244 = vst [vmem:[%s560_s2 + $0x58] sm:$0xff] %v386_v20  ;;  %v205_v22 = vpop.f32.mrb[3].mxu1  ;;  %v283_v29 = vmul.f32 %v378_v19, %v378_v19  ;;  %v291_v61 = vmul.f32 %v386_v20, %v386_v20 }
  0xed   :  { %234 = vst [vmem:[%s560_s2 + $0x8] sm:$0xff] %v173_v21  ;;  %v256_v24 = vadd.f32 %v173_v21, %v170_v17  ;;  %v281_v25 = vmul.f32 %v173_v21, %v173_v21  ;;  %242 = vst [vmem:[%s560_s2 + $0x48] sm:$0xff] %v205_v22  ;;  %v289_v57 = vmul.f32 %v205_v22, %v205_v22 }
  0xef   :  { %v257_v27 = vadd.f32 %v377_v15, %v256_v24  ;;  %v296_v28 = vadd.f32 %v281_v25, %v280_v23  ;;  %v279_v25 = vld [vmem:[%s559_s4] sm:$0x1] }
  0xf1   :  { %v297_v30 = vadd.f32 %v296_v28, %v282_v26  ;;  %v381_v31 = vpop.f32.mrb[4].mxu0  ;;  %v258_v32 = vadd.f32 %v378_v19, %v257_v27  ;;  %v389_v33 = vpop.f32.mrb[4].mxu1 }
  0xf2   :  { %239 = vst [vmem:[%s560_s2 + $0x30] sm:$0xff] %v381_v31  ;;  %v186_v34 = vpop.f32.mrb[5].mxu0  ;;  %247 = vst [vmem:[%s560_s2 + $0x70] sm:$0xff] %v389_v33  ;;  %v218_v35 = vpop.f32.mrb[5].mxu1  ;;  %v286_v46 = vmul.f32 %v381_v31, %v381_v31  ;;  %v294_v6 = vmul.f32 %v389_v33, %v389_v33 }
  0xf3   :  { %237 = vst [vmem:[%s560_s2 + $0x20] sm:$0xff] %v186_v34  ;;  %v259_v36 = vadd.f32 %v258_v32, %v186_v34  ;;  %v284_v37 = vmul.f32 %v186_v34, %v186_v34  ;;  %v298_v38 = vadd.f32 %v297_v30, %v283_v29  ;;  %v382_v39 = vpop.f32.mrb[6].mxu0  ;;  %245 = vst [vmem:[%s560_s2 + $0x60] sm:$0xff] %v218_v35  ;;  %v390_v40 = vpop.f32.mrb[6].mxu1 }
  0xf4   :  { %240 = vst [vmem:[%s560_s2 + $0x38] sm:$0xff] %v382_v39  ;;  %v189_v41 = vpop.f32.mrb[7].mxu0  ;;  %248 = vst [vmem:[%s560_s2 + $0x78] sm:$0xff] %v390_v40  ;;  %v221_v42 = vpop.f32.mrb[7].mxu1  ;;  %v287_v49 = vmul.f32 %v382_v39, %v382_v39  ;;  %v292_v0 = vmul.f32 %v218_v35, %v218_v35  ;;  %v295_v9 = vmul.f32 %v390_v40, %v390_v40 }
  0xf5   :  { %v299_v43 = vadd.f32 %v298_v38, %v284_v37  ;;  %238 = vst [vmem:[%s560_s2 + $0x28] sm:$0xff] %v189_v41  ;;  %v260_v44 = vadd.f32 %v259_v36, %v189_v41  ;;  %v285_v45 = vmul.f32 %v189_v41, %v189_v41  ;;  %246 = vst [vmem:[%s560_s2 + $0x68] sm:$0xff] %v221_v42 }
  0xf6   :  { %v293_v5 = vmul.f32 %v221_v42, %v221_v42 }
  0xf7   :  { %v261_v47 = vadd.f32 %v381_v31, %v260_v44  ;;  %v300_v48 = vadd.f32 %v299_v43, %v285_v45 }
  0xf9   :  { %v301_v50 = vadd.f32 %v300_v48, %v286_v46  ;;  %v262_v51 = vadd.f32 %v382_v39, %v261_v47 }
  0xfb   :  { %v263_v53 = vadd.f32 %v262_v51, %v202_v18  ;;  %v302_v54 = vadd.f32 %v301_v50, %v287_v49 }
  0xfd   :  { %v303_v55 = vadd.f32 %v302_v54, %v288_v52  ;;  %v264_v56 = vadd.f32 %v263_v53, %v205_v22  ;;  %v255_v22 = vld [vmem:[%s558_s3] sm:$0x1] }
  0xff   :  { %v265_v59 = vadd.f32 %v385_v16, %v264_v56  ;;  %v304_v60 = vadd.f32 %v303_v55, %v289_v57 }
 0x101   :  { %v305_v62 = vadd.f32 %v304_v60, %v290_v58  ;;  %v266_v63 = vadd.f32 %v386_v20, %v265_v59 }
 0x103   :  { %v267_v1 = vadd.f32 %v266_v63, %v218_v35  ;;  %v306_v2 = vadd.f32 %v305_v62, %v291_v61 }
 0x105   :  { %v307_v3 = vadd.f32 %v306_v2, %v292_v0  ;;  %v268_v4 = vadd.f32 %v267_v1, %v221_v42 }
 0x107   :  { %v269_v7 = vadd.f32 %v389_v33, %v268_v4  ;;  %v308_v8 = vadd.f32 %v307_v3, %v293_v5 }
 0x109   :  { %v270_v10 = vadd.f32 %v390_v40, %v269_v7  ;;  %v309_v11 = vadd.f32 %v308_v8, %v294_v6 }
 0x10b   :  { %v271_v12 = vrot.slane %v270_v10, 4  ;;  %v310_v13 = vadd.f32 %v309_v11, %v295_v9 }
 0x10d   :  { %v272_v14 = vadd.f32 %v271_v12, %v270_v10  ;;  %v311_v15 = vrot.slane %v310_v13, 4 }
 0x10f   :  { %v273_v16 = vrot.slane %v272_v14, 2  ;;  %v312_v17 = vadd.f32 %v311_v15, %v310_v13 }
 0x111   :  { %v274_v18 = vadd.f32 %v273_v16, %v272_v14  ;;  %v313_v19 = vrot.slane %v312_v17, 2 }
 0x113   :  { %v275_v20 = vrot.slane %v274_v18, 1  ;;  %v314_v21 = vadd.f32 %v313_v19, %v312_v17 }
 0x115   :  { %v276_v23 = vadd.f32 %v275_v20, %v274_v18  ;;  %v315_v24 = vrot.slane %v314_v21, 1 }
 0x117   :  { %v277_v26 = vadd.f32 %v276_v23, %v255_v22  ;;  %v316_v27 = vadd.f32 %v315_v24, %v314_v21 }
 0x119   :  { %278 = vst [vmem:[%s558_s3] sm:$0x1] %v277_v26  ;;  %v317_v28 = vadd.f32 %v316_v27, %v279_v25 }
 0x11b   :  { %318 = vst [vmem:[%s559_s4] sm:$0x1] %v317_v28 }

// kernel: local_feddis_forward.59
= control target key start
LH: loop header
LB: loop body
LE: loop exit
PB: predicated region body
PF: predicated region fallthrough
CT: control target
= control target key end

     0   :  { %vm344_vm0 = vcmask 1041408   ;;  %vm247_vm1 = vcmask 31744   ;;  %s1509_s1 = inlined_call_operand.vmem [shape: bf16[4,128], index: 1, kind: input, shape index: {}]   ;;  %s1510_s0 = inlined_call_operand.vmem [shape: bf16[512,4], index: 0, kind: input, shape index: {}]   ;;  %s1511_s2 = inlined_call_operand.vmem [shape: f32[1,128], index: 2, kind: input, shape index: {}]   ;;  %s1512_s3 = inlined_call_operand.vmem [shape: f32[512,128], index: 3, kind: output, shape index: {}]  }
   0x1   :  { %v79_v0 = vld [vmem:[%s1509_s1] sm:$0x3]  ;;  %v1067_v4 = vld [vmem:[%s1510_s0 + $0x8] sm:$0xff]   ;;  %v1069_v6 = vld [vmem:[%s1510_s0 + $0x10] sm:$0xff]  }
   0x2   :  { %1063 = vmatprep.subr.msk.bf16.mxu0 %vm344_vm0, %v79_v0  ;;  %1064 = vmatprep.subr.msk.bf16.mxu1 %vm344_vm0, %v79_v0  ;;  %v346_v1 = vsel %vm344_vm0, %v79_v0, 0  ;;  %v1065_v2 = vld [vmem:[%s1510_s0] sm:$0xff]   ;;  %v1068_v5 = vld [vmem:[%s1510_s0 + $0x88] sm:$0xff]   ;;  %v1070_v7 = vld [vmem:[%s1510_s0 + $0x90] sm:$0xff]  }
   0x3   :  { %996 = vmatpush3.bf16.msra.mxu0 %v346_v1  ;;  %1062 = vmatpush3.bf16.msra.mxu1 %v346_v1  ;;  %v1066_v3 = vld [vmem:[%s1510_s0 + $0x80] sm:$0xff]   ;;  %v1071_v8 = vld [vmem:[%s1510_s0 + $0x18] sm:$0xff]   ;;  %v1075_v12 = vld [vmem:[%s1510_s0 + $0x28] sm:$0xff]  }
   0x4   :  { %997 = vmatprep.mubr.msk.bf16.mxu0 %vm247_vm1, %v1065_v2  ;;  %1029 = vmatprep.mubr.msk.bf16.mxu1 %vm247_vm1, %v1066_v3  ;;  %v1072_v9 = vld [vmem:[%s1510_s0 + $0x98] sm:$0xff]   ;;  %v1073_v10 = vld [vmem:[%s1510_s0 + $0x20] sm:$0xff]   ;;  %v1076_v13 = vld [vmem:[%s1510_s0 + $0xa8] sm:$0xff]  }
   0x5   :  { %v1074_v11 = vld [vmem:[%s1510_s0 + $0xa0] sm:$0xff]   ;;  %v1077_v14 = vld [vmem:[%s1510_s0 + $0x30] sm:$0xff]   ;;  %v1079_v16 = vld [vmem:[%s1510_s0 + $0x38] sm:$0xff]  }
   0x6   :  { %998 = vmatmul.mubr.msk.bf16.vlgmr.msra.gmra.mrb[0].mxu0 %vm247_vm1, %v1067_v4  ;;  %1030 = vmatmul.mubr.msk.bf16.vlgmr.msra.gmra.mrb[0].mxu1 %vm247_vm1, %v1068_v5  ;;  %v1078_v15 = vld [vmem:[%s1510_s0 + $0xb0] sm:$0xff]   ;;  %v1080_v17 = vld [vmem:[%s1510_s0 + $0xb8] sm:$0xff]   ;;  %v1081_v18 = vld [vmem:[%s1510_s0 + $0x40] sm:$0xff]  }
   0x7   :  { %1001 = vmatprep.mubr.msk.bf16.mxu0 %vm247_vm1, %v1069_v6  ;;  %1033 = vmatprep.mubr.msk.bf16.mxu1 %vm247_vm1, %v1070_v7  ;;  %v1082_v19 = vld [vmem:[%s1510_s0 + $0xc0] sm:$0xff]   ;;  %v1083_v20 = vld [vmem:[%s1510_s0 + $0x48] sm:$0xff]   ;;  %v1085_v22 = vld [vmem:[%s1510_s0 + $0x50] sm:$0xff]  }
   0x8   :  { %v1084_v21 = vld [vmem:[%s1510_s0 + $0xc8] sm:$0xff]   ;;  %v1086_v23 = vld [vmem:[%s1510_s0 + $0xd0] sm:$0xff]   ;;  %v1087_v24 = vld [vmem:[%s1510_s0 + $0x58] sm:$0xff]  }
   0x9   :  { %v1088_v25 = vld [vmem:[%s1510_s0 + $0xd8] sm:$0xff]   ;;  %v1089_v26 = vld [vmem:[%s1510_s0 + $0x60] sm:$0xff]   ;;  %v1091_v28 = vld [vmem:[%s1510_s0 + $0x68] sm:$0xff]  }
   0xa   :  { %v1090_v27 = vld [vmem:[%s1510_s0 + $0xe0] sm:$0xff]   ;;  %v1092_v29 = vld [vmem:[%s1510_s0 + $0xe8] sm:$0xff]   ;;  %v1093_v30 = vld [vmem:[%s1510_s0 + $0x70] sm:$0xff]  }
   0xb   :  { %v1094_v31 = vld [vmem:[%s1510_s0 + $0xf0] sm:$0xff]   ;;  %v1095_v32 = vld [vmem:[%s1510_s0 + $0x78] sm:$0xff]   ;;  %v1251_v34 = vld [vmem:[%s1511_s2] ss:$0 sm:$0xff] }
   0xc   :  { %v1096_v33 = vld [vmem:[%s1510_s0 + $0xf8] sm:$0xff]  }
   0xe   :  { %1002 = vmatmul.mubr.msk.bf16.gmra.mrb[4].mxu0 %vm247_vm1, %v1071_v8  ;;  %1034 = vmatmul.mubr.msk.bf16.gmra.mrb[4].mxu1 %vm247_vm1, %v1072_v9 }
   0xf   :  { %1005 = vmatprep.mubr.msk.bf16.mxu0 %vm247_vm1, %v1073_v10  ;;  %1037 = vmatprep.mubr.msk.bf16.mxu1 %vm247_vm1, %v1074_v11 }
  0x16   :  { %1006 = vmatmul.mubr.msk.bf16.gmra.mrb[8].mxu0 %vm247_vm1, %v1075_v12  ;;  %1038 = vmatmul.mubr.msk.bf16.gmra.mrb[8].mxu1 %vm247_vm1, %v1076_v13 }
  0x17   :  { %1009 = vmatprep.mubr.msk.bf16.mxu0 %vm247_vm1, %v1077_v14  ;;  %1041 = vmatprep.mubr.msk.bf16.mxu1 %vm247_vm1, %v1078_v15 }
  0x1e   :  { %1010 = vmatmul.mubr.msk.bf16.gmra.mrb[12].mxu0 %vm247_vm1, %v1079_v16  ;;  %1042 = vmatmul.mubr.msk.bf16.gmra.mrb[12].mxu1 %vm247_vm1, %v1080_v17 }
  0x1f   :  { %1013 = vmatprep.mubr.msk.bf16.mxu0 %vm247_vm1, %v1081_v18  ;;  %1045 = vmatprep.mubr.msk.bf16.mxu1 %vm247_vm1, %v1082_v19 }
  0x26   :  { %1014 = vmatmul.mubr.msk.bf16.gmra.mrb[16].mxu0 %vm247_vm1, %v1083_v20  ;;  %1046 = vmatmul.mubr.msk.bf16.gmra.mrb[16].mxu1 %vm247_vm1, %v1084_v21 }
  0x27   :  { %1017 = vmatprep.mubr.msk.bf16.mxu0 %vm247_vm1, %v1085_v22  ;;  %1049 = vmatprep.mubr.msk.bf16.mxu1 %vm247_vm1, %v1086_v23 }
  0x2e   :  { %1018 = vmatmul.mubr.msk.bf16.gmra.mrb[20].mxu0 %vm247_vm1, %v1087_v24  ;;  %1050 = vmatmul.mubr.msk.bf16.gmra.mrb[20].mxu1 %vm247_vm1, %v1088_v25 }
  0x2f   :  { %1021 = vmatprep.mubr.msk.bf16.mxu0 %vm247_vm1, %v1089_v26  ;;  %1053 = vmatprep.mubr.msk.bf16.mxu1 %vm247_vm1, %v1090_v27 }
  0x36   :  { %1022 = vmatmul.mubr.msk.bf16.gmra.mrb[24].mxu0 %vm247_vm1, %v1091_v28  ;;  %1054 = vmatmul.mubr.msk.bf16.gmra.mrb[24].mxu1 %vm247_vm1, %v1092_v29 }
  0x37   :  { %1025 = vmatprep.mubr.msk.bf16.mxu0 %vm247_vm1, %v1093_v30  ;;  %1057 = vmatprep.mubr.msk.bf16.mxu1 %vm247_vm1, %v1094_v31 }
  0x3e   :  { %1026 = vmatmul.mubr.msk.bf16.gmra.mrb[28].mxu0 %vm247_vm1, %v1095_v32  ;;  %1058 = vmatmul.mubr.msk.bf16.gmra.mrb[28].mxu1 %vm247_vm1, %v1096_v33 }
  0xd9   :  { %v999_v35 = vpop.f32.mrb[0].mxu0  ;;  %v1031_v37 = vpop.f32.mrb[0].mxu1 }
  0xda   :  { %v391_v36 = vadd.f32 %v999_v35, %v1251_v34  ;;  %v382_v38 = vpop.f32.mrb[1].mxu0  ;;  %v519_v39 = vadd.f32 %v1031_v37, %v1251_v34  ;;  %v510_v41 = vpop.f32.mrb[1].mxu1 }
  0xdb   :  { %v383_v40 = vadd.f32 %v1251_v34, %v382_v38  ;;  %v1000_v42 = vpop.f32.mrb[2].mxu0  ;;  %v511_v44 = vadd.f32 %v1251_v34, %v510_v41  ;;  %v1032_v46 = vpop.f32.mrb[2].mxu1 }
  0xdc   :  { %vm639_vm2 = vcmp.ge.f32.partialorder %v391_v36, 0.0  ;;  %v703_v43 = vmul.f32 0.01, %v391_v36  ;;  %v394_v45 = vadd.f32 %v1000_v42, %v1251_v34  ;;  %v385_v47 = vpop.f32.mrb[3].mxu0  ;;  %vm671_vm3 = vcmp.ge.f32.partialorder %v519_v39, 0.0  ;;  %v513_v52 = vpop.f32.mrb[3].mxu1 }
  0xdd   :  { %v735_v48 = vmul.f32 0.01, %v519_v39  ;;  %vm637_vm4 = vcmp.ge.f32.partialorder %v383_v40, 0.0  ;;  %v701_v49 = vmul.f32 0.01, %v383_v40  ;;  %vm669_vm5 = vcmp.ge.f32.partialorder %v511_v44, 0.0 }
  0xde   :  { %v767_v50 = vsel %vm639_vm2, %v391_v36, %v703_v43  ;;  %v733_v51 = vmul.f32 0.01, %v511_v44  ;;  %vm640_vm6 = vcmp.ge.f32.partialorder %v394_v45, 0.0  ;;  %v704_v55 = vmul.f32 0.01, %v394_v45 }
  0xdf   :  { %831 = vst [vmem:[%s1512_s3 + $0x10] sm:$0xff] %v767_v50  ;;  %v799_v53 = vsel %vm671_vm3, %v519_v39, %v735_v48  ;;  %v765_v54 = vsel %vm637_vm4, %v383_v40, %v701_v49  ;;  %v522_v56 = vadd.f32 %v1032_v46, %v1251_v34  ;;  %v386_v58 = vadd.f32 %v1251_v34, %v385_v47 }
  0xe0   :  { %863 = vst [vmem:[%s1512_s3 + $0x110] sm:$0xff] %v799_v53  ;;  %829 = vst [vmem:[%s1512_s3] sm:$0xff] %v765_v54  ;;  %v797_v57 = vsel %vm669_vm5, %v511_v44, %v733_v51  ;;  %v514_v59 = vadd.f32 %v1251_v34, %v513_v52  ;;  %v768_v60 = vsel %vm640_vm6, %v394_v45, %v704_v55 }
  0xe1   :  { %861 = vst [vmem:[%s1512_s3 + $0x100] sm:$0xff] %v797_v57  ;;  %vm672_vm7 = vcmp.ge.f32.partialorder %v522_v56, 0.0  ;;  %v736_v61 = vmul.f32 0.01, %v522_v56  ;;  %v1003_v62 = vpop.f32.mrb[4].mxu0  ;;  %832 = vst [vmem:[%s1512_s3 + $0x18] sm:$0xff] %v768_v60 }
  0xe2   :  { %vm638_vm8 = vcmp.ge.f32.partialorder %v386_v58, 0.0  ;;  %v702_v63 = vmul.f32 0.01, %v386_v58  ;;  %vm670_vm9 = vcmp.ge.f32.partialorder %v514_v59, 0.0  ;;  %v734_v0 = vmul.f32 0.01, %v514_v59 }
  0xe3   :  { %v800_v1 = vsel %vm672_vm7, %v522_v56, %v736_v61  ;;  %v407_v2 = vadd.f32 %v1003_v62, %v1251_v34  ;;  %v1035_v3 = vpop.f32.mrb[4].mxu1  ;;  %v398_v4 = vpop.f32.mrb[5].mxu0 }
  0xe4   :  { %864 = vst [vmem:[%s1512_s3 + $0x118] sm:$0xff] %v800_v1  ;;  %v766_v5 = vsel %vm638_vm8, %v386_v58, %v702_v63  ;;  %v798_v6 = vsel %vm670_vm9, %v514_v59, %v734_v0  ;;  %v535_v7 = vadd.f32 %v1035_v3, %v1251_v34  ;;  %v399_v8 = vadd.f32 %v1251_v34, %v398_v4  ;;  %v526_v9 = vpop.f32.mrb[5].mxu1  ;;  %v1004_v10 = vpop.f32.mrb[6].mxu0 }
  0xe5   :  { %830 = vst [vmem:[%s1512_s3 + $0x8] sm:$0xff] %v766_v5  ;;  %862 = vst [vmem:[%s1512_s3 + $0x108] sm:$0xff] %v798_v6  ;;  %vm643_vm10 = vcmp.ge.f32.partialorder %v407_v2, 0.0  ;;  %v707_v11 = vmul.f32 0.01, %v407_v2  ;;  %v527_v12 = vadd.f32 %v1251_v34, %v526_v9  ;;  %v410_v13 = vadd.f32 %v1004_v10, %v1251_v34  ;;  %v1036_v14 = vpop.f32.mrb[6].mxu1 }
  0xe6   :  { %v401_v15 = vpop.f32.mrb[7].mxu0  ;;  %vm675_vm11 = vcmp.ge.f32.partialorder %v535_v7, 0.0  ;;  %v739_v16 = vmul.f32 0.01, %v535_v7  ;;  %vm641_vm12 = vcmp.ge.f32.partialorder %v399_v8, 0.0  ;;  %v529_v20 = vpop.f32.mrb[7].mxu1  ;;  %v538_v24 = vadd.f32 %v1036_v14, %v1251_v34 }
  0xe7   :  { %v705_v17 = vmul.f32 0.01, %v399_v8  ;;  %v771_v18 = vsel %vm643_vm10, %v407_v2, %v707_v11  ;;  %vm673_vm13 = vcmp.ge.f32.partialorder %v527_v12, 0.0  ;;  %v737_v19 = vmul.f32 0.01, %v527_v12 }
  0xe8   :  { %vm644_vm14 = vcmp.ge.f32.partialorder %v410_v13, 0.0  ;;  %835 = vst [vmem:[%s1512_s3 + $0x30] sm:$0xff] %v771_v18  ;;  %v803_v21 = vsel %vm675_vm11, %v535_v7, %v739_v16  ;;  %v708_v23 = vmul.f32 0.01, %v410_v13  ;;  %v402_v26 = vadd.f32 %v1251_v34, %v401_v15 }
  0xe9   :  { %v769_v22 = vsel %vm641_vm12, %v399_v8, %v705_v17  ;;  %867 = vst [vmem:[%s1512_s3 + $0x130] sm:$0xff] %v803_v21  ;;  %v801_v25 = vsel %vm673_vm13, %v527_v12, %v737_v19  ;;  %v530_v27 = vadd.f32 %v1251_v34, %v529_v20  ;;  %v1007_v28 = vpop.f32.mrb[8].mxu0  ;;  %vm676_vm15 = vcmp.ge.f32.partialorder %v538_v24, 0.0  ;;  %v1039_v32 = vpop.f32.mrb[8].mxu1 }
  0xea   :  { %833 = vst [vmem:[%s1512_s3 + $0x20] sm:$0xff] %v769_v22  ;;  %865 = vst [vmem:[%s1512_s3 + $0x120] sm:$0xff] %v801_v25  ;;  %v772_v29 = vsel %vm644_vm14, %v410_v13, %v708_v23  ;;  %v740_v30 = vmul.f32 0.01, %v538_v24  ;;  %v423_v31 = vadd.f32 %v1007_v28, %v1251_v34  ;;  %v414_v33 = vpop.f32.mrb[9].mxu0  ;;  %vm642_vm0 = vcmp.ge.f32.partialorder %v402_v26, 0.0 }
  0xeb   :  { %836 = vst [vmem:[%s1512_s3 + $0x38] sm:$0xff] %v772_v29  ;;  %v706_v35 = vmul.f32 0.01, %v402_v26  ;;  %vm674_vm1 = vcmp.ge.f32.partialorder %v530_v27, 0.0  ;;  %v738_v36 = vmul.f32 0.01, %v530_v27  ;;  %v551_v39 = vadd.f32 %v1039_v32, %v1251_v34 }
  0xec   :  { %v804_v37 = vsel %vm676_vm15, %v538_v24, %v740_v30  ;;  %vm647_vm2 = vcmp.ge.f32.partialorder %v423_v31, 0.0  ;;  %v711_v38 = vmul.f32 0.01, %v423_v31  ;;  %v542_v40 = vpop.f32.mrb[9].mxu1  ;;  %v1008_v41 = vpop.f32.mrb[10].mxu0  ;;  %v415_v44 = vadd.f32 %v1251_v34, %v414_v33 }
  0xed   :  { %868 = vst [vmem:[%s1512_s3 + $0x138] sm:$0xff] %v804_v37  ;;  %v770_v42 = vsel %vm642_vm0, %v402_v26, %v706_v35  ;;  %v802_v43 = vsel %vm674_vm1, %v530_v27, %v738_v36  ;;  %v543_v45 = vadd.f32 %v1251_v34, %v542_v40  ;;  %v1040_v46 = vpop.f32.mrb[10].mxu1  ;;  %v417_v47 = vpop.f32.mrb[11].mxu0  ;;  %vm679_vm3 = vcmp.ge.f32.partialorder %v551_v39, 0.0 }
  0xee   :  { %834 = vst [vmem:[%s1512_s3 + $0x28] sm:$0xff] %v770_v42  ;;  %866 = vst [vmem:[%s1512_s3 + $0x128] sm:$0xff] %v802_v43  ;;  %v775_v48 = vsel %vm647_vm2, %v423_v31, %v711_v38  ;;  %v743_v49 = vmul.f32 0.01, %v551_v39  ;;  %v426_v50 = vadd.f32 %v1008_v41, %v1251_v34  ;;  %v545_v51 = vpop.f32.mrb[11].mxu1  ;;  %vm645_vm4 = vcmp.ge.f32.partialorder %v415_v44, 0.0 }
  0xef   :  { %839 = vst [vmem:[%s1512_s3 + $0x50] sm:$0xff] %v775_v48  ;;  %v709_v52 = vmul.f32 0.01, %v415_v44  ;;  %vm677_vm5 = vcmp.ge.f32.partialorder %v543_v45, 0.0  ;;  %v741_v53 = vmul.f32 0.01, %v543_v45  ;;  %v554_v56 = vadd.f32 %v1040_v46, %v1251_v34 }
  0xf0   :  { %v807_v54 = vsel %vm679_vm3, %v551_v39, %v743_v49  ;;  %vm648_vm6 = vcmp.ge.f32.partialorder %v426_v50, 0.0  ;;  %v712_v55 = vmul.f32 0.01, %v426_v50  ;;  %v418_v59 = vadd.f32 %v1251_v34, %v417_v47 }
  0xf1   :  { %871 = vst [vmem:[%s1512_s3 + $0x150] sm:$0xff] %v807_v54  ;;  %v773_v57 = vsel %vm645_vm4, %v415_v44, %v709_v52  ;;  %v805_v58 = vsel %vm677_vm5, %v543_v45, %v741_v53  ;;  %v546_v60 = vadd.f32 %v1251_v34, %v545_v51  ;;  %v1011_v61 = vpop.f32.mrb[12].mxu0  ;;  %vm680_vm7 = vcmp.ge.f32.partialorder %v554_v56, 0.0  ;;  %v1043_v1 = vpop.f32.mrb[12].mxu1 }
  0xf2   :  { %837 = vst [vmem:[%s1512_s3 + $0x40] sm:$0xff] %v773_v57  ;;  %869 = vst [vmem:[%s1512_s3 + $0x140] sm:$0xff] %v805_v58  ;;  %v776_v62 = vsel %vm648_vm6, %v426_v50, %v712_v55  ;;  %v744_v63 = vmul.f32 0.01, %v554_v56  ;;  %v439_v0 = vadd.f32 %v1011_v61, %v1251_v34  ;;  %v430_v2 = vpop.f32.mrb[13].mxu0  ;;  %vm646_vm8 = vcmp.ge.f32.partialorder %v418_v59, 0.0 }
  0xf3   :  { %840 = vst [vmem:[%s1512_s3 + $0x58] sm:$0xff] %v776_v62  ;;  %v710_v3 = vmul.f32 0.01, %v418_v59  ;;  %vm678_vm9 = vcmp.ge.f32.partialorder %v546_v60, 0.0  ;;  %v742_v4 = vmul.f32 0.01, %v546_v60  ;;  %v567_v7 = vadd.f32 %v1043_v1, %v1251_v34 }
  0xf4   :  { %v808_v5 = vsel %vm680_vm7, %v554_v56, %v744_v63  ;;  %vm651_vm10 = vcmp.ge.f32.partialorder %v439_v0, 0.0  ;;  %v715_v6 = vmul.f32 0.01, %v439_v0  ;;  %v558_v8 = vpop.f32.mrb[13].mxu1  ;;  %v1012_v9 = vpop.f32.mrb[14].mxu0  ;;  %v431_v12 = vadd.f32 %v1251_v34, %v430_v2 }
  0xf5   :  { %872 = vst [vmem:[%s1512_s3 + $0x158] sm:$0xff] %v808_v5  ;;  %v774_v10 = vsel %vm646_vm8, %v418_v59, %v710_v3  ;;  %v806_v11 = vsel %vm678_vm9, %v546_v60, %v742_v4  ;;  %v559_v13 = vadd.f32 %v1251_v34, %v558_v8  ;;  %v1044_v14 = vpop.f32.mrb[14].mxu1  ;;  %v433_v15 = vpop.f32.mrb[15].mxu0  ;;  %vm683_vm11 = vcmp.ge.f32.partialorder %v567_v7, 0.0 }
  0xf6   :  { %838 = vst [vmem:[%s1512_s3 + $0x48] sm:$0xff] %v774_v10  ;;  %870 = vst [vmem:[%s1512_s3 + $0x148] sm:$0xff] %v806_v11  ;;  %v779_v16 = vsel %vm651_vm10, %v439_v0, %v715_v6  ;;  %v747_v17 = vmul.f32 0.01, %v567_v7  ;;  %v442_v18 = vadd.f32 %v1012_v9, %v1251_v34  ;;  %v561_v19 = vpop.f32.mrb[15].mxu1  ;;  %vm649_vm12 = vcmp.ge.f32.partialorder %v431_v12, 0.0 }
  0xf7   :  { %843 = vst [vmem:[%s1512_s3 + $0x70] sm:$0xff] %v779_v16  ;;  %v713_v20 = vmul.f32 0.01, %v431_v12  ;;  %vm681_vm13 = vcmp.ge.f32.partialorder %v559_v13, 0.0  ;;  %v745_v21 = vmul.f32 0.01, %v559_v13  ;;  %v570_v24 = vadd.f32 %v1044_v14, %v1251_v34 }
  0xf8   :  { %v811_v22 = vsel %vm683_vm11, %v567_v7, %v747_v17  ;;  %vm652_vm14 = vcmp.ge.f32.partialorder %v442_v18, 0.0  ;;  %v716_v23 = vmul.f32 0.01, %v442_v18  ;;  %v434_v27 = vadd.f32 %v1251_v34, %v433_v15 }
  0xf9   :  { %875 = vst [vmem:[%s1512_s3 + $0x170] sm:$0xff] %v811_v22  ;;  %v777_v25 = vsel %vm649_vm12, %v431_v12, %v713_v20  ;;  %v809_v26 = vsel %vm681_vm13, %v559_v13, %v745_v21  ;;  %v562_v28 = vadd.f32 %v1251_v34, %v561_v19  ;;  %v1015_v29 = vpop.f32.mrb[16].mxu0  ;;  %vm684_vm15 = vcmp.ge.f32.partialorder %v570_v24, 0.0  ;;  %v1047_v33 = vpop.f32.mrb[16].mxu1 }
  0xfa   :  { %841 = vst [vmem:[%s1512_s3 + $0x60] sm:$0xff] %v777_v25  ;;  %873 = vst [vmem:[%s1512_s3 + $0x160] sm:$0xff] %v809_v26  ;;  %v780_v30 = vsel %vm652_vm14, %v442_v18, %v716_v23  ;;  %v748_v31 = vmul.f32 0.01, %v570_v24  ;;  %v455_v32 = vadd.f32 %v1015_v29, %v1251_v34  ;;  %v446_v35 = vpop.f32.mrb[17].mxu0  ;;  %vm650_vm0 = vcmp.ge.f32.partialorder %v434_v27, 0.0 }
  0xfb   :  { %844 = vst [vmem:[%s1512_s3 + $0x78] sm:$0xff] %v780_v30  ;;  %v714_v36 = vmul.f32 0.01, %v434_v27  ;;  %vm682_vm1 = vcmp.ge.f32.partialorder %v562_v28, 0.0  ;;  %v746_v37 = vmul.f32 0.01, %v562_v28  ;;  %v583_v40 = vadd.f32 %v1047_v33, %v1251_v34 }
  0xfc   :  { %v812_v38 = vsel %vm684_vm15, %v570_v24, %v748_v31  ;;  %vm655_vm2 = vcmp.ge.f32.partialorder %v455_v32, 0.0  ;;  %v719_v39 = vmul.f32 0.01, %v455_v32  ;;  %v574_v41 = vpop.f32.mrb[17].mxu1  ;;  %v1016_v42 = vpop.f32.mrb[18].mxu0  ;;  %v447_v45 = vadd.f32 %v1251_v34, %v446_v35 }
  0xfd   :  { %876 = vst [vmem:[%s1512_s3 + $0x178] sm:$0xff] %v812_v38  ;;  %v778_v43 = vsel %vm650_vm0, %v434_v27, %v714_v36  ;;  %v810_v44 = vsel %vm682_vm1, %v562_v28, %v746_v37  ;;  %v575_v46 = vadd.f32 %v1251_v34, %v574_v41  ;;  %v1048_v47 = vpop.f32.mrb[18].mxu1  ;;  %v449_v48 = vpop.f32.mrb[19].mxu0  ;;  %vm687_vm3 = vcmp.ge.f32.partialorder %v583_v40, 0.0 }
  0xfe   :  { %842 = vst [vmem:[%s1512_s3 + $0x68] sm:$0xff] %v778_v43  ;;  %874 = vst [vmem:[%s1512_s3 + $0x168] sm:$0xff] %v810_v44  ;;  %v783_v49 = vsel %vm655_vm2, %v455_v32, %v719_v39  ;;  %v751_v50 = vmul.f32 0.01, %v583_v40  ;;  %v458_v51 = vadd.f32 %v1016_v42, %v1251_v34  ;;  %v577_v52 = vpop.f32.mrb[19].mxu1  ;;  %vm653_vm4 = vcmp.ge.f32.partialorder %v447_v45, 0.0 }
  0xff   :  { %847 = vst [vmem:[%s1512_s3 + $0x90] sm:$0xff] %v783_v49  ;;  %v717_v53 = vmul.f32 0.01, %v447_v45  ;;  %vm685_vm5 = vcmp.ge.f32.partialorder %v575_v46, 0.0  ;;  %v749_v54 = vmul.f32 0.01, %v575_v46  ;;  %v586_v57 = vadd.f32 %v1048_v47, %v1251_v34 }
 0x100   :  { %v815_v55 = vsel %vm687_vm3, %v583_v40, %v751_v50  ;;  %vm656_vm6 = vcmp.ge.f32.partialorder %v458_v51, 0.0  ;;  %v720_v56 = vmul.f32 0.01, %v458_v51  ;;  %v450_v60 = vadd.f32 %v1251_v34, %v449_v48 }
 0x101   :  { %879 = vst [vmem:[%s1512_s3 + $0x190] sm:$0xff] %v815_v55  ;;  %v781_v58 = vsel %vm653_vm4, %v447_v45, %v717_v53  ;;  %v813_v59 = vsel %vm685_vm5, %v575_v46, %v749_v54  ;;  %v578_v61 = vadd.f32 %v1251_v34, %v577_v52  ;;  %v1019_v62 = vpop.f32.mrb[20].mxu0  ;;  %vm688_vm7 = vcmp.ge.f32.partialorder %v586_v57, 0.0  ;;  %v1051_v2 = vpop.f32.mrb[20].mxu1 }
 0x102   :  { %845 = vst [vmem:[%s1512_s3 + $0x80] sm:$0xff] %v781_v58  ;;  %877 = vst [vmem:[%s1512_s3 + $0x180] sm:$0xff] %v813_v59  ;;  %v784_v63 = vsel %vm656_vm6, %v458_v51, %v720_v56  ;;  %v752_v0 = vmul.f32 0.01, %v586_v57  ;;  %v471_v1 = vadd.f32 %v1019_v62, %v1251_v34  ;;  %v462_v3 = vpop.f32.mrb[21].mxu0  ;;  %vm654_vm8 = vcmp.ge.f32.partialorder %v450_v60, 0.0 }
 0x103   :  { %848 = vst [vmem:[%s1512_s3 + $0x98] sm:$0xff] %v784_v63  ;;  %v718_v4 = vmul.f32 0.01, %v450_v60  ;;  %vm686_vm9 = vcmp.ge.f32.partialorder %v578_v61, 0.0  ;;  %v750_v5 = vmul.f32 0.01, %v578_v61  ;;  %v599_v8 = vadd.f32 %v1051_v2, %v1251_v34 }
 0x104   :  { %v816_v6 = vsel %vm688_vm7, %v586_v57, %v752_v0  ;;  %vm659_vm10 = vcmp.ge.f32.partialorder %v471_v1, 0.0  ;;  %v723_v7 = vmul.f32 0.01, %v471_v1  ;;  %v590_v9 = vpop.f32.mrb[21].mxu1  ;;  %v1020_v10 = vpop.f32.mrb[22].mxu0  ;;  %v463_v13 = vadd.f32 %v1251_v34, %v462_v3 }
 0x105   :  { %880 = vst [vmem:[%s1512_s3 + $0x198] sm:$0xff] %v816_v6  ;;  %v782_v11 = vsel %vm654_vm8, %v450_v60, %v718_v4  ;;  %v814_v12 = vsel %vm686_vm9, %v578_v61, %v750_v5  ;;  %v591_v14 = vadd.f32 %v1251_v34, %v590_v9  ;;  %v1052_v15 = vpop.f32.mrb[22].mxu1  ;;  %v465_v16 = vpop.f32.mrb[23].mxu0  ;;  %vm691_vm11 = vcmp.ge.f32.partialorder %v599_v8, 0.0 }
 0x106   :  { %846 = vst [vmem:[%s1512_s3 + $0x88] sm:$0xff] %v782_v11  ;;  %878 = vst [vmem:[%s1512_s3 + $0x188] sm:$0xff] %v814_v12  ;;  %v787_v17 = vsel %vm659_vm10, %v471_v1, %v723_v7  ;;  %v755_v18 = vmul.f32 0.01, %v599_v8  ;;  %v474_v19 = vadd.f32 %v1020_v10, %v1251_v34  ;;  %v593_v20 = vpop.f32.mrb[23].mxu1  ;;  %vm657_vm12 = vcmp.ge.f32.partialorder %v463_v13, 0.0 }
 0x107   :  { %851 = vst [vmem:[%s1512_s3 + $0xb0] sm:$0xff] %v787_v17  ;;  %v721_v21 = vmul.f32 0.01, %v463_v13  ;;  %vm689_vm13 = vcmp.ge.f32.partialorder %v591_v14, 0.0  ;;  %v753_v22 = vmul.f32 0.01, %v591_v14  ;;  %v602_v25 = vadd.f32 %v1052_v15, %v1251_v34 }
 0x108   :  { %v819_v23 = vsel %vm691_vm11, %v599_v8, %v755_v18  ;;  %vm660_vm14 = vcmp.ge.f32.partialorder %v474_v19, 0.0  ;;  %v724_v24 = vmul.f32 0.01, %v474_v19  ;;  %v466_v28 = vadd.f32 %v1251_v34, %v465_v16 }
 0x109   :  { %883 = vst [vmem:[%s1512_s3 + $0x1b0] sm:$0xff] %v819_v23  ;;  %v785_v26 = vsel %vm657_vm12, %v463_v13, %v721_v21  ;;  %v817_v27 = vsel %vm689_vm13, %v591_v14, %v753_v22  ;;  %v594_v29 = vadd.f32 %v1251_v34, %v593_v20  ;;  %v1023_v30 = vpop.f32.mrb[24].mxu0  ;;  %vm692_vm15 = vcmp.ge.f32.partialorder %v602_v25, 0.0  ;;  %v1055_v35 = vpop.f32.mrb[24].mxu1 }
 0x10a   :  { %849 = vst [vmem:[%s1512_s3 + $0xa0] sm:$0xff] %v785_v26  ;;  %881 = vst [vmem:[%s1512_s3 + $0x1a0] sm:$0xff] %v817_v27  ;;  %v788_v31 = vsel %vm660_vm14, %v474_v19, %v724_v24  ;;  %v756_v32 = vmul.f32 0.01, %v602_v25  ;;  %v487_v33 = vadd.f32 %v1023_v30, %v1251_v34  ;;  %v478_v36 = vpop.f32.mrb[25].mxu0  ;;  %vm658_vm0 = vcmp.ge.f32.partialorder %v466_v28, 0.0 }
 0x10b   :  { %852 = vst [vmem:[%s1512_s3 + $0xb8] sm:$0xff] %v788_v31  ;;  %v722_v37 = vmul.f32 0.01, %v466_v28  ;;  %vm690_vm1 = vcmp.ge.f32.partialorder %v594_v29, 0.0  ;;  %v754_v38 = vmul.f32 0.01, %v594_v29  ;;  %v615_v41 = vadd.f32 %v1055_v35, %v1251_v34 }
 0x10c   :  { %v820_v39 = vsel %vm692_vm15, %v602_v25, %v756_v32  ;;  %vm663_vm2 = vcmp.ge.f32.partialorder %v487_v33, 0.0  ;;  %v727_v40 = vmul.f32 0.01, %v487_v33  ;;  %v606_v42 = vpop.f32.mrb[25].mxu1  ;;  %v1024_v43 = vpop.f32.mrb[26].mxu0  ;;  %v479_v46 = vadd.f32 %v1251_v34, %v478_v36 }
 0x10d   :  { %884 = vst [vmem:[%s1512_s3 + $0x1b8] sm:$0xff] %v820_v39  ;;  %v786_v44 = vsel %vm658_vm0, %v466_v28, %v722_v37  ;;  %v818_v45 = vsel %vm690_vm1, %v594_v29, %v754_v38  ;;  %v607_v47 = vadd.f32 %v1251_v34, %v606_v42  ;;  %v1056_v48 = vpop.f32.mrb[26].mxu1  ;;  %v481_v49 = vpop.f32.mrb[27].mxu0  ;;  %vm695_vm3 = vcmp.ge.f32.partialorder %v615_v41, 0.0 }
 0x10e   :  { %850 = vst [vmem:[%s1512_s3 + $0xa8] sm:$0xff] %v786_v44  ;;  %882 = vst [vmem:[%s1512_s3 + $0x1a8] sm:$0xff] %v818_v45  ;;  %v791_v50 = vsel %vm663_vm2, %v487_v33, %v727_v40  ;;  %v759_v51 = vmul.f32 0.01, %v615_v41  ;;  %v490_v52 = vadd.f32 %v1024_v43, %v1251_v34  ;;  %v609_v53 = vpop.f32.mrb[27].mxu1  ;;  %vm661_vm4 = vcmp.ge.f32.partialorder %v479_v46, 0.0 }
 0x10f   :  { %855 = vst [vmem:[%s1512_s3 + $0xd0] sm:$0xff] %v791_v50  ;;  %v725_v54 = vmul.f32 0.01, %v479_v46  ;;  %vm693_vm5 = vcmp.ge.f32.partialorder %v607_v47, 0.0  ;;  %v757_v55 = vmul.f32 0.01, %v607_v47  ;;  %v618_v58 = vadd.f32 %v1056_v48, %v1251_v34 }
 0x110   :  { %v823_v56 = vsel %vm695_vm3, %v615_v41, %v759_v51  ;;  %vm664_vm6 = vcmp.ge.f32.partialorder %v490_v52, 0.0  ;;  %v728_v57 = vmul.f32 0.01, %v490_v52  ;;  %v482_v61 = vadd.f32 %v1251_v34, %v481_v49 }
 0x111   :  { %887 = vst [vmem:[%s1512_s3 + $0x1d0] sm:$0xff] %v823_v56  ;;  %v789_v59 = vsel %vm661_vm4, %v479_v46, %v725_v54  ;;  %v821_v60 = vsel %vm693_vm5, %v607_v47, %v757_v55  ;;  %v610_v62 = vadd.f32 %v1251_v34, %v609_v53  ;;  %v1027_v63 = vpop.f32.mrb[28].mxu0  ;;  %vm696_vm7 = vcmp.ge.f32.partialorder %v618_v58, 0.0  ;;  %v1059_v3 = vpop.f32.mrb[28].mxu1 }
 0x112   :  { %853 = vst [vmem:[%s1512_s3 + $0xc0] sm:$0xff] %v789_v59  ;;  %885 = vst [vmem:[%s1512_s3 + $0x1c0] sm:$0xff] %v821_v60  ;;  %v792_v0 = vsel %vm664_vm6, %v490_v52, %v728_v57  ;;  %v760_v1 = vmul.f32 0.01, %v618_v58  ;;  %v503_v2 = vadd.f32 %v1027_v63, %v1251_v34  ;;  %v494_v4 = vpop.f32.mrb[29].mxu0  ;;  %vm662_vm8 = vcmp.ge.f32.partialorder %v482_v61, 0.0 }
 0x113   :  { %856 = vst [vmem:[%s1512_s3 + $0xd8] sm:$0xff] %v792_v0  ;;  %v726_v5 = vmul.f32 0.01, %v482_v61  ;;  %vm694_vm9 = vcmp.ge.f32.partialorder %v610_v62, 0.0  ;;  %v758_v6 = vmul.f32 0.01, %v610_v62  ;;  %v631_v9 = vadd.f32 %v1059_v3, %v1251_v34 }
 0x114   :  { %v824_v7 = vsel %vm696_vm7, %v618_v58, %v760_v1  ;;  %vm667_vm10 = vcmp.ge.f32.partialorder %v503_v2, 0.0  ;;  %v731_v8 = vmul.f32 0.01, %v503_v2  ;;  %v622_v10 = vpop.f32.mrb[29].mxu1  ;;  %v1028_v11 = vpop.f32.mrb[30].mxu0  ;;  %v495_v14 = vadd.f32 %v1251_v34, %v494_v4 }
 0x115   :  { %888 = vst [vmem:[%s1512_s3 + $0x1d8] sm:$0xff] %v824_v7  ;;  %v790_v12 = vsel %vm662_vm8, %v482_v61, %v726_v5  ;;  %v822_v13 = vsel %vm694_vm9, %v610_v62, %v758_v6  ;;  %v623_v15 = vadd.f32 %v1251_v34, %v622_v10  ;;  %v1060_v16 = vpop.f32.mrb[30].mxu1  ;;  %v497_v17 = vpop.f32.mrb[31].mxu0  ;;  %vm699_vm11 = vcmp.ge.f32.partialorder %v631_v9, 0.0 }
 0x116   :  { %854 = vst [vmem:[%s1512_s3 + $0xc8] sm:$0xff] %v790_v12  ;;  %886 = vst [vmem:[%s1512_s3 + $0x1c8] sm:$0xff] %v822_v13  ;;  %v795_v18 = vsel %vm667_vm10, %v503_v2, %v731_v8  ;;  %v763_v19 = vmul.f32 0.01, %v631_v9  ;;  %v506_v20 = vadd.f32 %v1028_v11, %v1251_v34  ;;  %v625_v21 = vpop.f32.mrb[31].mxu1  ;;  %vm665_vm12 = vcmp.ge.f32.partialorder %v495_v14, 0.0 }
 0x117   :  { %859 = vst [vmem:[%s1512_s3 + $0xf0] sm:$0xff] %v795_v18  ;;  %v729_v22 = vmul.f32 0.01, %v495_v14  ;;  %vm697_vm13 = vcmp.ge.f32.partialorder %v623_v15, 0.0  ;;  %v761_v23 = vmul.f32 0.01, %v623_v15  ;;  %v634_v26 = vadd.f32 %v1060_v16, %v1251_v34 }
 0x118   :  { %v827_v24 = vsel %vm699_vm11, %v631_v9, %v763_v19  ;;  %vm668_vm14 = vcmp.ge.f32.partialorder %v506_v20, 0.0  ;;  %v732_v25 = vmul.f32 0.01, %v506_v20  ;;  %v498_v29 = vadd.f32 %v1251_v34, %v497_v17 }
 0x119   :  { %891 = vst [vmem:[%s1512_s3 + $0x1f0] sm:$0xff] %v827_v24  ;;  %v793_v27 = vsel %vm665_vm12, %v495_v14, %v729_v22  ;;  %v825_v28 = vsel %vm697_vm13, %v623_v15, %v761_v23  ;;  %v626_v30 = vadd.f32 %v1251_v34, %v625_v21  ;;  %vm700_vm15 = vcmp.ge.f32.partialorder %v634_v26, 0.0 }
 0x11a   :  { %857 = vst [vmem:[%s1512_s3 + $0xe0] sm:$0xff] %v793_v27  ;;  %889 = vst [vmem:[%s1512_s3 + $0x1e0] sm:$0xff] %v825_v28  ;;  %v796_v31 = vsel %vm668_vm14, %v506_v20, %v732_v25  ;;  %v764_v32 = vmul.f32 0.01, %v634_v26  ;;  %vm666_vm0 = vcmp.ge.f32.partialorder %v498_v29, 0.0 }
 0x11b   :  { %860 = vst [vmem:[%s1512_s3 + $0xf8] sm:$0xff] %v796_v31  ;;  %v730_v33 = vmul.f32 0.01, %v498_v29  ;;  %vm698_vm1 = vcmp.ge.f32.partialorder %v626_v30, 0.0  ;;  %v762_v35 = vmul.f32 0.01, %v626_v30 }
 0x11c   :  { %v828_v34 = vsel %vm700_vm15, %v634_v26, %v764_v32 }
 0x11d   :  { %892 = vst [vmem:[%s1512_s3 + $0x1f8] sm:$0xff] %v828_v34  ;;  %v794_v36 = vsel %vm666_vm0, %v498_v29, %v730_v33  ;;  %v826_v37 = vsel %vm698_vm1, %v626_v30, %v762_v35 }
 0x11e   :  { %858 = vst [vmem:[%s1512_s3 + $0xe8] sm:$0xff] %v794_v36  ;;  %890 = vst [vmem:[%s1512_s3 + $0x1e8] sm:$0xff] %v826_v37 }

// kernel: local_feddis_forward.47
= control target key start
LH: loop header
LB: loop body
LE: loop exit
PB: predicated region body
PF: predicated region fallthrough
CT: control target
= control target key end

     0   :  { %vm344_vm0 = vcmask 1043456   ;;  %vm247_vm1 = vcmask 64512   ;;  %s1509_s1 = inlined_call_operand.vmem [shape: bf16[8,128], index: 1, kind: input, shape index: {}]   ;;  %s1510_s0 = inlined_call_operand.vmem [shape: bf16[512,8], index: 0, kind: input, shape index: {}]   ;;  %s1511_s2 = inlined_call_operand.vmem [shape: f32[1,128], index: 2, kind: input, shape index: {}]   ;;  %s1512_s3 = inlined_call_operand.vmem [shape: f32[512,128], index: 3, kind: output, shape index: {}]  }
   0x1   :  { %v79_v0 = vld [vmem:[%s1509_s1] sm:$0xf]  ;;  %v1067_v4 = vld [vmem:[%s1510_s0 + $0x8] sm:$0xff]   ;;  %v1069_v6 = vld [vmem:[%s1510_s0 + $0x10] sm:$0xff]  }
   0x2   :  { %1063 = vmatprep.subr.msk.bf16.mxu0 %vm344_vm0, %v79_v0  ;;  %1064 = vmatprep.subr.msk.bf16.mxu1 %vm344_vm0, %v79_v0  ;;  %v346_v1 = vsel %vm344_vm0, %v79_v0, 0  ;;  %v1065_v2 = vld [vmem:[%s1510_s0] sm:$0xff]   ;;  %v1068_v5 = vld [vmem:[%s1510_s0 + $0x88] sm:$0xff]   ;;  %v1070_v7 = vld [vmem:[%s1510_s0 + $0x90] sm:$0xff]  }
   0x3   :  { %996 = vmatpush3.bf16.msra.mxu0 %v346_v1  ;;  %1062 = vmatpush3.bf16.msra.mxu1 %v346_v1  ;;  %v1066_v3 = vld [vmem:[%s1510_s0 + $0x80] sm:$0xff]   ;;  %v1071_v8 = vld [vmem:[%s1510_s0 + $0x18] sm:$0xff]   ;;  %v1075_v12 = vld [vmem:[%s1510_s0 + $0x28] sm:$0xff]  }
   0x4   :  { %997 = vmatprep.mubr.msk.bf16.mxu0 %vm247_vm1, %v1065_v2  ;;  %1029 = vmatprep.mubr.msk.bf16.mxu1 %vm247_vm1, %v1066_v3  ;;  %v1072_v9 = vld [vmem:[%s1510_s0 + $0x98] sm:$0xff]   ;;  %v1073_v10 = vld [vmem:[%s1510_s0 + $0x20] sm:$0xff]   ;;  %v1076_v13 = vld [vmem:[%s1510_s0 + $0xa8] sm:$0xff]  }
   0x5   :  { %v1074_v11 = vld [vmem:[%s1510_s0 + $0xa0] sm:$0xff]   ;;  %v1077_v14 = vld [vmem:[%s1510_s0 + $0x30] sm:$0xff]   ;;  %v1079_v16 = vld [vmem:[%s1510_s0 + $0x38] sm:$0xff]  }
   0x6   :  { %998 = vmatmul.mubr.msk.bf16.vlgmr.msra.gmra.mrb[0].mxu0 %vm247_vm1, %v1067_v4  ;;  %1030 = vmatmul.mubr.msk.bf16.vlgmr.msra.gmra.mrb[0].mxu1 %vm247_vm1, %v1068_v5  ;;  %v1078_v15 = vld [vmem:[%s1510_s0 + $0xb0] sm:$0xff]   ;;  %v1080_v17 = vld [vmem:[%s1510_s0 + $0xb8] sm:$0xff]   ;;  %v1081_v18 = vld [vmem:[%s1510_s0 + $0x40] sm:$0xff]  }
   0x7   :  { %1001 = vmatprep.mubr.msk.bf16.mxu0 %vm247_vm1, %v1069_v6  ;;  %1033 = vmatprep.mubr.msk.bf16.mxu1 %vm247_vm1, %v1070_v7  ;;  %v1082_v19 = vld [vmem:[%s1510_s0 + $0xc0] sm:$0xff]   ;;  %v1083_v20 = vld [vmem:[%s1510_s0 + $0x48] sm:$0xff]   ;;  %v1085_v22 = vld [vmem:[%s1510_s0 + $0x50] sm:$0xff]  }
   0x8   :  { %v1084_v21 = vld [vmem:[%s1510_s0 + $0xc8] sm:$0xff]   ;;  %v1086_v23 = vld [vmem:[%s1510_s0 + $0xd0] sm:$0xff]   ;;  %v1087_v24 = vld [vmem:[%s1510_s0 + $0x58] sm:$0xff]  }
   0x9   :  { %v1088_v25 = vld [vmem:[%s1510_s0 + $0xd8] sm:$0xff]   ;;  %v1089_v26 = vld [vmem:[%s1510_s0 + $0x60] sm:$0xff]   ;;  %v1091_v28 = vld [vmem:[%s1510_s0 + $0x68] sm:$0xff]  }
   0xa   :  { %v1090_v27 = vld [vmem:[%s1510_s0 + $0xe0] sm:$0xff]   ;;  %v1092_v29 = vld [vmem:[%s1510_s0 + $0xe8] sm:$0xff]   ;;  %v1093_v30 = vld [vmem:[%s1510_s0 + $0x70] sm:$0xff]  }
   0xb   :  { %v1094_v31 = vld [vmem:[%s1510_s0 + $0xf0] sm:$0xff]   ;;  %v1095_v32 = vld [vmem:[%s1510_s0 + $0x78] sm:$0xff]   ;;  %v1251_v34 = vld [vmem:[%s1511_s2] ss:$0 sm:$0xff] }
   0xc   :  { %v1096_v33 = vld [vmem:[%s1510_s0 + $0xf8] sm:$0xff]  }
   0xe   :  { %1002 = vmatmul.mubr.msk.bf16.gmra.mrb[4].mxu0 %vm247_vm1, %v1071_v8  ;;  %1034 = vmatmul.mubr.msk.bf16.gmra.mrb[4].mxu1 %vm247_vm1, %v1072_v9 }
   0xf   :  { %1005 = vmatprep.mubr.msk.bf16.mxu0 %vm247_vm1, %v1073_v10  ;;  %1037 = vmatprep.mubr.msk.bf16.mxu1 %vm247_vm1, %v1074_v11 }
  0x16   :  { %1006 = vmatmul.mubr.msk.bf16.gmra.mrb[8].mxu0 %vm247_vm1, %v1075_v12  ;;  %1038 = vmatmul.mubr.msk.bf16.gmra.mrb[8].mxu1 %vm247_vm1, %v1076_v13 }
  0x17   :  { %1009 = vmatprep.mubr.msk.bf16.mxu0 %vm247_vm1, %v1077_v14  ;;  %1041 = vmatprep.mubr.msk.bf16.mxu1 %vm247_vm1, %v1078_v15 }
  0x1e   :  { %1010 = vmatmul.mubr.msk.bf16.gmra.mrb[12].mxu0 %vm247_vm1, %v1079_v16  ;;  %1042 = vmatmul.mubr.msk.bf16.gmra.mrb[12].mxu1 %vm247_vm1, %v1080_v17 }
  0x1f   :  { %1013 = vmatprep.mubr.msk.bf16.mxu0 %vm247_vm1, %v1081_v18  ;;  %1045 = vmatprep.mubr.msk.bf16.mxu1 %vm247_vm1, %v1082_v19 }
  0x26   :  { %1014 = vmatmul.mubr.msk.bf16.gmra.mrb[16].mxu0 %vm247_vm1, %v1083_v20  ;;  %1046 = vmatmul.mubr.msk.bf16.gmra.mrb[16].mxu1 %vm247_vm1, %v1084_v21 }
  0x27   :  { %1017 = vmatprep.mubr.msk.bf16.mxu0 %vm247_vm1, %v1085_v22  ;;  %1049 = vmatprep.mubr.msk.bf16.mxu1 %vm247_vm1, %v1086_v23 }
  0x2e   :  { %1018 = vmatmul.mubr.msk.bf16.gmra.mrb[20].mxu0 %vm247_vm1, %v1087_v24  ;;  %1050 = vmatmul.mubr.msk.bf16.gmra.mrb[20].mxu1 %vm247_vm1, %v1088_v25 }
  0x2f   :  { %1021 = vmatprep.mubr.msk.bf16.mxu0 %vm247_vm1, %v1089_v26  ;;  %1053 = vmatprep.mubr.msk.bf16.mxu1 %vm247_vm1, %v1090_v27 }
  0x36   :  { %1022 = vmatmul.mubr.msk.bf16.gmra.mrb[24].mxu0 %vm247_vm1, %v1091_v28  ;;  %1054 = vmatmul.mubr.msk.bf16.gmra.mrb[24].mxu1 %vm247_vm1, %v1092_v29 }
  0x37   :  { %1025 = vmatprep.mubr.msk.bf16.mxu0 %vm247_vm1, %v1093_v30  ;;  %1057 = vmatprep.mubr.msk.bf16.mxu1 %vm247_vm1, %v1094_v31 }
  0x3e   :  { %1026 = vmatmul.mubr.msk.bf16.gmra.mrb[28].mxu0 %vm247_vm1, %v1095_v32  ;;  %1058 = vmatmul.mubr.msk.bf16.gmra.mrb[28].mxu1 %vm247_vm1, %v1096_v33 }
  0xd9   :  { %v999_v35 = vpop.f32.mrb[0].mxu0  ;;  %v1031_v37 = vpop.f32.mrb[0].mxu1 }
  0xda   :  { %v391_v36 = vadd.f32 %v999_v35, %v1251_v34  ;;  %v382_v38 = vpop.f32.mrb[1].mxu0  ;;  %v519_v39 = vadd.f32 %v1031_v37, %v1251_v34  ;;  %v510_v41 = vpop.f32.mrb[1].mxu1 }
  0xdb   :  { %v383_v40 = vadd.f32 %v1251_v34, %v382_v38  ;;  %v1000_v42 = vpop.f32.mrb[2].mxu0  ;;  %v511_v44 = vadd.f32 %v1251_v34, %v510_v41  ;;  %v1032_v46 = vpop.f32.mrb[2].mxu1 }
  0xdc   :  { %vm639_vm2 = vcmp.ge.f32.partialorder %v391_v36, 0.0  ;;  %v703_v43 = vmul.f32 0.01, %v391_v36  ;;  %v394_v45 = vadd.f32 %v1000_v42, %v1251_v34  ;;  %v385_v47 = vpop.f32.mrb[3].mxu0  ;;  %vm671_vm3 = vcmp.ge.f32.partialorder %v519_v39, 0.0  ;;  %v513_v52 = vpop.f32.mrb[3].mxu1 }
  0xdd   :  { %v735_v48 = vmul.f32 0.01, %v519_v39  ;;  %vm637_vm4 = vcmp.ge.f32.partialorder %v383_v40, 0.0  ;;  %v701_v49 = vmul.f32 0.01, %v383_v40  ;;  %vm669_vm5 = vcmp.ge.f32.partialorder %v511_v44, 0.0 }
  0xde   :  { %v767_v50 = vsel %vm639_vm2, %v391_v36, %v703_v43  ;;  %v733_v51 = vmul.f32 0.01, %v511_v44  ;;  %vm640_vm6 = vcmp.ge.f32.partialorder %v394_v45, 0.0  ;;  %v704_v55 = vmul.f32 0.01, %v394_v45 }
  0xdf   :  { %831 = vst [vmem:[%s1512_s3 + $0x10] sm:$0xff] %v767_v50  ;;  %v799_v53 = vsel %vm671_vm3, %v519_v39, %v735_v48  ;;  %v765_v54 = vsel %vm637_vm4, %v383_v40, %v701_v49  ;;  %v522_v56 = vadd.f32 %v1032_v46, %v1251_v34  ;;  %v386_v58 = vadd.f32 %v1251_v34, %v385_v47 }
  0xe0   :  { %863 = vst [vmem:[%s1512_s3 + $0x110] sm:$0xff] %v799_v53  ;;  %829 = vst [vmem:[%s1512_s3] sm:$0xff] %v765_v54  ;;  %v797_v57 = vsel %vm669_vm5, %v511_v44, %v733_v51  ;;  %v514_v59 = vadd.f32 %v1251_v34, %v513_v52  ;;  %v768_v60 = vsel %vm640_vm6, %v394_v45, %v704_v55 }
  0xe1   :  { %861 = vst [vmem:[%s1512_s3 + $0x100] sm:$0xff] %v797_v57  ;;  %vm672_vm7 = vcmp.ge.f32.partialorder %v522_v56, 0.0  ;;  %v736_v61 = vmul.f32 0.01, %v522_v56  ;;  %v1003_v62 = vpop.f32.mrb[4].mxu0  ;;  %832 = vst [vmem:[%s1512_s3 + $0x18] sm:$0xff] %v768_v60 }
  0xe2   :  { %vm638_vm8 = vcmp.ge.f32.partialorder %v386_v58, 0.0  ;;  %v702_v63 = vmul.f32 0.01, %v386_v58  ;;  %vm670_vm9 = vcmp.ge.f32.partialorder %v514_v59, 0.0  ;;  %v734_v0 = vmul.f32 0.01, %v514_v59 }
  0xe3   :  { %v800_v1 = vsel %vm672_vm7, %v522_v56, %v736_v61  ;;  %v407_v2 = vadd.f32 %v1003_v62, %v1251_v34  ;;  %v1035_v3 = vpop.f32.mrb[4].mxu1  ;;  %v398_v4 = vpop.f32.mrb[5].mxu0 }
  0xe4   :  { %864 = vst [vmem:[%s1512_s3 + $0x118] sm:$0xff] %v800_v1  ;;  %v766_v5 = vsel %vm638_vm8, %v386_v58, %v702_v63  ;;  %v798_v6 = vsel %vm670_vm9, %v514_v59, %v734_v0  ;;  %v535_v7 = vadd.f32 %v1035_v3, %v1251_v34  ;;  %v399_v8 = vadd.f32 %v1251_v34, %v398_v4  ;;  %v526_v9 = vpop.f32.mrb[5].mxu1  ;;  %v1004_v10 = vpop.f32.mrb[6].mxu0 }
  0xe5   :  { %830 = vst [vmem:[%s1512_s3 + $0x8] sm:$0xff] %v766_v5  ;;  %862 = vst [vmem:[%s1512_s3 + $0x108] sm:$0xff] %v798_v6  ;;  %vm643_vm10 = vcmp.ge.f32.partialorder %v407_v2, 0.0  ;;  %v707_v11 = vmul.f32 0.01, %v407_v2  ;;  %v527_v12 = vadd.f32 %v1251_v34, %v526_v9  ;;  %v410_v13 = vadd.f32 %v1004_v10, %v1251_v34  ;;  %v1036_v14 = vpop.f32.mrb[6].mxu1 }
  0xe6   :  { %v401_v15 = vpop.f32.mrb[7].mxu0  ;;  %vm675_vm11 = vcmp.ge.f32.partialorder %v535_v7, 0.0  ;;  %v739_v16 = vmul.f32 0.01, %v535_v7  ;;  %vm641_vm12 = vcmp.ge.f32.partialorder %v399_v8, 0.0  ;;  %v529_v20 = vpop.f32.mrb[7].mxu1  ;;  %v538_v24 = vadd.f32 %v1036_v14, %v1251_v34 }
  0xe7   :  { %v705_v17 = vmul.f32 0.01, %v399_v8  ;;  %v771_v18 = vsel %vm643_vm10, %v407_v2, %v707_v11  ;;  %vm673_vm13 = vcmp.ge.f32.partialorder %v527_v12, 0.0  ;;  %v737_v19 = vmul.f32 0.01, %v527_v12 }
  0xe8   :  { %vm644_vm14 = vcmp.ge.f32.partialorder %v410_v13, 0.0  ;;  %835 = vst [vmem:[%s1512_s3 + $0x30] sm:$0xff] %v771_v18  ;;  %v803_v21 = vsel %vm675_vm11, %v535_v7, %v739_v16  ;;  %v708_v23 = vmul.f32 0.01, %v410_v13  ;;  %v402_v26 = vadd.f32 %v1251_v34, %v401_v15 }
  0xe9   :  { %v769_v22 = vsel %vm641_vm12, %v399_v8, %v705_v17  ;;  %867 = vst [vmem:[%s1512_s3 + $0x130] sm:$0xff] %v803_v21  ;;  %v801_v25 = vsel %vm673_vm13, %v527_v12, %v737_v19  ;;  %v530_v27 = vadd.f32 %v1251_v34, %v529_v20  ;;  %v1007_v28 = vpop.f32.mrb[8].mxu0  ;;  %vm676_vm15 = vcmp.ge.f32.partialorder %v538_v24, 0.0  ;;  %v1039_v32 = vpop.f32.mrb[8].mxu1 }
  0xea   :  { %833 = vst [vmem:[%s1512_s3 + $0x20] sm:$0xff] %v769_v22  ;;  %865 = vst [vmem:[%s1512_s3 + $0x120] sm:$0xff] %v801_v25  ;;  %v772_v29 = vsel %vm644_vm14, %v410_v13, %v708_v23  ;;  %v740_v30 = vmul.f32 0.01, %v538_v24  ;;  %v423_v31 = vadd.f32 %v1007_v28, %v1251_v34  ;;  %v414_v33 = vpop.f32.mrb[9].mxu0  ;;  %vm642_vm0 = vcmp.ge.f32.partialorder %v402_v26, 0.0 }
  0xeb   :  { %836 = vst [vmem:[%s1512_s3 + $0x38] sm:$0xff] %v772_v29  ;;  %v706_v35 = vmul.f32 0.01, %v402_v26  ;;  %vm674_vm1 = vcmp.ge.f32.partialorder %v530_v27, 0.0  ;;  %v738_v36 = vmul.f32 0.01, %v530_v27  ;;  %v551_v39 = vadd.f32 %v1039_v32, %v1251_v34 }
  0xec   :  { %v804_v37 = vsel %vm676_vm15, %v538_v24, %v740_v30  ;;  %vm647_vm2 = vcmp.ge.f32.partialorder %v423_v31, 0.0  ;;  %v711_v38 = vmul.f32 0.01, %v423_v31  ;;  %v542_v40 = vpop.f32.mrb[9].mxu1  ;;  %v1008_v41 = vpop.f32.mrb[10].mxu0  ;;  %v415_v44 = vadd.f32 %v1251_v34, %v414_v33 }
  0xed   :  { %868 = vst [vmem:[%s1512_s3 + $0x138] sm:$0xff] %v804_v37  ;;  %v770_v42 = vsel %vm642_vm0, %v402_v26, %v706_v35  ;;  %v802_v43 = vsel %vm674_vm1, %v530_v27, %v738_v36  ;;  %v543_v45 = vadd.f32 %v1251_v34, %v542_v40  ;;  %v1040_v46 = vpop.f32.mrb[10].mxu1  ;;  %v417_v47 = vpop.f32.mrb[11].mxu0  ;;  %vm679_vm3 = vcmp.ge.f32.partialorder %v551_v39, 0.0 }
  0xee   :  { %834 = vst [vmem:[%s1512_s3 + $0x28] sm:$0xff] %v770_v42  ;;  %866 = vst [vmem:[%s1512_s3 + $0x128] sm:$0xff] %v802_v43  ;;  %v775_v48 = vsel %vm647_vm2, %v423_v31, %v711_v38  ;;  %v743_v49 = vmul.f32 0.01, %v551_v39  ;;  %v426_v50 = vadd.f32 %v1008_v41, %v1251_v34  ;;  %v545_v51 = vpop.f32.mrb[11].mxu1  ;;  %vm645_vm4 = vcmp.ge.f32.partialorder %v415_v44, 0.0 }
  0xef   :  { %839 = vst [vmem:[%s1512_s3 + $0x50] sm:$0xff] %v775_v48  ;;  %v709_v52 = vmul.f32 0.01, %v415_v44  ;;  %vm677_vm5 = vcmp.ge.f32.partialorder %v543_v45, 0.0  ;;  %v741_v53 = vmul.f32 0.01, %v543_v45  ;;  %v554_v56 = vadd.f32 %v1040_v46, %v1251_v34 }
  0xf0   :  { %v807_v54 = vsel %vm679_vm3, %v551_v39, %v743_v49  ;;  %vm648_vm6 = vcmp.ge.f32.partialorder %v426_v50, 0.0  ;;  %v712_v55 = vmul.f32 0.01, %v426_v50  ;;  %v418_v59 = vadd.f32 %v1251_v34, %v417_v47 }
  0xf1   :  { %871 = vst [vmem:[%s1512_s3 + $0x150] sm:$0xff] %v807_v54  ;;  %v773_v57 = vsel %vm645_vm4, %v415_v44, %v709_v52  ;;  %v805_v58 = vsel %vm677_vm5, %v543_v45, %v741_v53  ;;  %v546_v60 = vadd.f32 %v1251_v34, %v545_v51  ;;  %v1011_v61 = vpop.f32.mrb[12].mxu0  ;;  %vm680_vm7 = vcmp.ge.f32.partialorder %v554_v56, 0.0  ;;  %v1043_v1 = vpop.f32.mrb[12].mxu1 }
  0xf2   :  { %837 = vst [vmem:[%s1512_s3 + $0x40] sm:$0xff] %v773_v57  ;;  %869 = vst [vmem:[%s1512_s3 + $0x140] sm:$0xff] %v805_v58  ;;  %v776_v62 = vsel %vm648_vm6, %v426_v50, %v712_v55  ;;  %v744_v63 = vmul.f32 0.01, %v554_v56  ;;  %v439_v0 = vadd.f32 %v1011_v61, %v1251_v34  ;;  %v430_v2 = vpop.f32.mrb[13].mxu0  ;;  %vm646_vm8 = vcmp.ge.f32.partialorder %v418_v59, 0.0 }
  0xf3   :  { %840 = vst [vmem:[%s1512_s3 + $0x58] sm:$0xff] %v776_v62  ;;  %v710_v3 = vmul.f32 0.01, %v418_v59  ;;  %vm678_vm9 = vcmp.ge.f32.partialorder %v546_v60, 0.0  ;;  %v742_v4 = vmul.f32 0.01, %v546_v60  ;;  %v567_v7 = vadd.f32 %v1043_v1, %v1251_v34 }
  0xf4   :  { %v808_v5 = vsel %vm680_vm7, %v554_v56, %v744_v63  ;;  %vm651_vm10 = vcmp.ge.f32.partialorder %v439_v0, 0.0  ;;  %v715_v6 = vmul.f32 0.01, %v439_v0  ;;  %v558_v8 = vpop.f32.mrb[13].mxu1  ;;  %v1012_v9 = vpop.f32.mrb[14].mxu0  ;;  %v431_v12 = vadd.f32 %v1251_v34, %v430_v2 }
  0xf5   :  { %872 = vst [vmem:[%s1512_s3 + $0x158] sm:$0xff] %v808_v5  ;;  %v774_v10 = vsel %vm646_vm8, %v418_v59, %v710_v3  ;;  %v806_v11 = vsel %vm678_vm9, %v546_v60, %v742_v4  ;;  %v559_v13 = vadd.f32 %v1251_v34, %v558_v8  ;;  %v1044_v14 = vpop.f32.mrb[14].mxu1  ;;  %v433_v15 = vpop.f32.mrb[15].mxu0  ;;  %vm683_vm11 = vcmp.ge.f32.partialorder %v567_v7, 0.0 }
  0xf6   :  { %838 = vst [vmem:[%s1512_s3 + $0x48] sm:$0xff] %v774_v10  ;;  %870 = vst [vmem:[%s1512_s3 + $0x148] sm:$0xff] %v806_v11  ;;  %v779_v16 = vsel %vm651_vm10, %v439_v0, %v715_v6  ;;  %v747_v17 = vmul.f32 0.01, %v567_v7  ;;  %v442_v18 = vadd.f32 %v1012_v9, %v1251_v34  ;;  %v561_v19 = vpop.f32.mrb[15].mxu1  ;;  %vm649_vm12 = vcmp.ge.f32.partialorder %v431_v12, 0.0 }
  0xf7   :  { %843 = vst [vmem:[%s1512_s3 + $0x70] sm:$0xff] %v779_v16  ;;  %v713_v20 = vmul.f32 0.01, %v431_v12  ;;  %vm681_vm13 = vcmp.ge.f32.partialorder %v559_v13, 0.0  ;;  %v745_v21 = vmul.f32 0.01, %v559_v13  ;;  %v570_v24 = vadd.f32 %v1044_v14, %v1251_v34 }
  0xf8   :  { %v811_v22 = vsel %vm683_vm11, %v567_v7, %v747_v17  ;;  %vm652_vm14 = vcmp.ge.f32.partialorder %v442_v18, 0.0  ;;  %v716_v23 = vmul.f32 0.01, %v442_v18  ;;  %v434_v27 = vadd.f32 %v1251_v34, %v433_v15 }
  0xf9   :  { %875 = vst [vmem:[%s1512_s3 + $0x170] sm:$0xff] %v811_v22  ;;  %v777_v25 = vsel %vm649_vm12, %v431_v12, %v713_v20  ;;  %v809_v26 = vsel %vm681_vm13, %v559_v13, %v745_v21  ;;  %v562_v28 = vadd.f32 %v1251_v34, %v561_v19  ;;  %v1015_v29 = vpop.f32.mrb[16].mxu0  ;;  %vm684_vm15 = vcmp.ge.f32.partialorder %v570_v24, 0.0  ;;  %v1047_v33 = vpop.f32.mrb[16].mxu1 }
  0xfa   :  { %841 = vst [vmem:[%s1512_s3 + $0x60] sm:$0xff] %v777_v25  ;;  %873 = vst [vmem:[%s1512_s3 + $0x160] sm:$0xff] %v809_v26  ;;  %v780_v30 = vsel %vm652_vm14, %v442_v18, %v716_v23  ;;  %v748_v31 = vmul.f32 0.01, %v570_v24  ;;  %v455_v32 = vadd.f32 %v1015_v29, %v1251_v34  ;;  %v446_v35 = vpop.f32.mrb[17].mxu0  ;;  %vm650_vm0 = vcmp.ge.f32.partialorder %v434_v27, 0.0 }
  0xfb   :  { %844 = vst [vmem:[%s1512_s3 + $0x78] sm:$0xff] %v780_v30  ;;  %v714_v36 = vmul.f32 0.01, %v434_v27  ;;  %vm682_vm1 = vcmp.ge.f32.partialorder %v562_v28, 0.0  ;;  %v746_v37 = vmul.f32 0.01, %v562_v28  ;;  %v583_v40 = vadd.f32 %v1047_v33, %v1251_v34 }
  0xfc   :  { %v812_v38 = vsel %vm684_vm15, %v570_v24, %v748_v31  ;;  %vm655_vm2 = vcmp.ge.f32.partialorder %v455_v32, 0.0  ;;  %v719_v39 = vmul.f32 0.01, %v455_v32  ;;  %v574_v41 = vpop.f32.mrb[17].mxu1  ;;  %v1016_v42 = vpop.f32.mrb[18].mxu0  ;;  %v447_v45 = vadd.f32 %v1251_v34, %v446_v35 }
  0xfd   :  { %876 = vst [vmem:[%s1512_s3 + $0x178] sm:$0xff] %v812_v38  ;;  %v778_v43 = vsel %vm650_vm0, %v434_v27, %v714_v36  ;;  %v810_v44 = vsel %vm682_vm1, %v562_v28, %v746_v37  ;;  %v575_v46 = vadd.f32 %v1251_v34, %v574_v41  ;;  %v1048_v47 = vpop.f32.mrb[18].mxu1  ;;  %v449_v48 = vpop.f32.mrb[19].mxu0  ;;  %vm687_vm3 = vcmp.ge.f32.partialorder %v583_v40, 0.0 }
  0xfe   :  { %842 = vst [vmem:[%s1512_s3 + $0x68] sm:$0xff] %v778_v43  ;;  %874 = vst [vmem:[%s1512_s3 + $0x168] sm:$0xff] %v810_v44  ;;  %v783_v49 = vsel %vm655_vm2, %v455_v32, %v719_v39  ;;  %v751_v50 = vmul.f32 0.01, %v583_v40  ;;  %v458_v51 = vadd.f32 %v1016_v42, %v1251_v34  ;;  %v577_v52 = vpop.f32.mrb[19].mxu1  ;;  %vm653_vm4 = vcmp.ge.f32.partialorder %v447_v45, 0.0 }
  0xff   :  { %847 = vst [vmem:[%s1512_s3 + $0x90] sm:$0xff] %v783_v49  ;;  %v717_v53 = vmul.f32 0.01, %v447_v45  ;;  %vm685_vm5 = vcmp.ge.f32.partialorder %v575_v46, 0.0  ;;  %v749_v54 = vmul.f32 0.01, %v575_v46  ;;  %v586_v57 = vadd.f32 %v1048_v47, %v1251_v34 }
 0x100   :  { %v815_v55 = vsel %vm687_vm3, %v583_v40, %v751_v50  ;;  %vm656_vm6 = vcmp.ge.f32.partialorder %v458_v51, 0.0  ;;  %v720_v56 = vmul.f32 0.01, %v458_v51  ;;  %v450_v60 = vadd.f32 %v1251_v34, %v449_v48 }
 0x101   :  { %879 = vst [vmem:[%s1512_s3 + $0x190] sm:$0xff] %v815_v55  ;;  %v781_v58 = vsel %vm653_vm4, %v447_v45, %v717_v53  ;;  %v813_v59 = vsel %vm685_vm5, %v575_v46, %v749_v54  ;;  %v578_v61 = vadd.f32 %v1251_v34, %v577_v52  ;;  %v1019_v62 = vpop.f32.mrb[20].mxu0  ;;  %vm688_vm7 = vcmp.ge.f32.partialorder %v586_v57, 0.0  ;;  %v1051_v2 = vpop.f32.mrb[20].mxu1 }
 0x102   :  { %845 = vst [vmem:[%s1512_s3 + $0x80] sm:$0xff] %v781_v58  ;;  %877 = vst [vmem:[%s1512_s3 + $0x180] sm:$0xff] %v813_v59  ;;  %v784_v63 = vsel %vm656_vm6, %v458_v51, %v720_v56  ;;  %v752_v0 = vmul.f32 0.01, %v586_v57  ;;  %v471_v1 = vadd.f32 %v1019_v62, %v1251_v34  ;;  %v462_v3 = vpop.f32.mrb[21].mxu0  ;;  %vm654_vm8 = vcmp.ge.f32.partialorder %v450_v60, 0.0 }
 0x103   :  { %848 = vst [vmem:[%s1512_s3 + $0x98] sm:$0xff] %v784_v63  ;;  %v718_v4 = vmul.f32 0.01, %v450_v60  ;;  %vm686_vm9 = vcmp.ge.f32.partialorder %v578_v61, 0.0  ;;  %v750_v5 = vmul.f32 0.01, %v578_v61  ;;  %v599_v8 = vadd.f32 %v1051_v2, %v1251_v34 }
 0x104   :  { %v816_v6 = vsel %vm688_vm7, %v586_v57, %v752_v0  ;;  %vm659_vm10 = vcmp.ge.f32.partialorder %v471_v1, 0.0  ;;  %v723_v7 = vmul.f32 0.01, %v471_v1  ;;  %v590_v9 = vpop.f32.mrb[21].mxu1  ;;  %v1020_v10 = vpop.f32.mrb[22].mxu0  ;;  %v463_v13 = vadd.f32 %v1251_v34, %v462_v3 }
 0x105   :  { %880 = vst [vmem:[%s1512_s3 + $0x198] sm:$0xff] %v816_v6  ;;  %v782_v11 = vsel %vm654_vm8, %v450_v60, %v718_v4  ;;  %v814_v12 = vsel %vm686_vm9, %v578_v61, %v750_v5  ;;  %v591_v14 = vadd.f32 %v1251_v34, %v590_v9  ;;  %v1052_v15 = vpop.f32.mrb[22].mxu1  ;;  %v465_v16 = vpop.f32.mrb[23].mxu0  ;;  %vm691_vm11 = vcmp.ge.f32.partialorder %v599_v8, 0.0 }
 0x106   :  { %846 = vst [vmem:[%s1512_s3 + $0x88] sm:$0xff] %v782_v11  ;;  %878 = vst [vmem:[%s1512_s3 + $0x188] sm:$0xff] %v814_v12  ;;  %v787_v17 = vsel %vm659_vm10, %v471_v1, %v723_v7  ;;  %v755_v18 = vmul.f32 0.01, %v599_v8  ;;  %v474_v19 = vadd.f32 %v1020_v10, %v1251_v34  ;;  %v593_v20 = vpop.f32.mrb[23].mxu1  ;;  %vm657_vm12 = vcmp.ge.f32.partialorder %v463_v13, 0.0 }
 0x107   :  { %851 = vst [vmem:[%s1512_s3 + $0xb0] sm:$0xff] %v787_v17  ;;  %v721_v21 = vmul.f32 0.01, %v463_v13  ;;  %vm689_vm13 = vcmp.ge.f32.partialorder %v591_v14, 0.0  ;;  %v753_v22 = vmul.f32 0.01, %v591_v14  ;;  %v602_v25 = vadd.f32 %v1052_v15, %v1251_v34 }
 0x108   :  { %v819_v23 = vsel %vm691_vm11, %v599_v8, %v755_v18  ;;  %vm660_vm14 = vcmp.ge.f32.partialorder %v474_v19, 0.0  ;;  %v724_v24 = vmul.f32 0.01, %v474_v19  ;;  %v466_v28 = vadd.f32 %v1251_v34, %v465_v16 }
 0x109   :  { %883 = vst [vmem:[%s1512_s3 + $0x1b0] sm:$0xff] %v819_v23  ;;  %v785_v26 = vsel %vm657_vm12, %v463_v13, %v721_v21  ;;  %v817_v27 = vsel %vm689_vm13, %v591_v14, %v753_v22  ;;  %v594_v29 = vadd.f32 %v1251_v34, %v593_v20  ;;  %v1023_v30 = vpop.f32.mrb[24].mxu0  ;;  %vm692_vm15 = vcmp.ge.f32.partialorder %v602_v25, 0.0  ;;  %v1055_v35 = vpop.f32.mrb[24].mxu1 }
 0x10a   :  { %849 = vst [vmem:[%s1512_s3 + $0xa0] sm:$0xff] %v785_v26  ;;  %881 = vst [vmem:[%s1512_s3 + $0x1a0] sm:$0xff] %v817_v27  ;;  %v788_v31 = vsel %vm660_vm14, %v474_v19, %v724_v24  ;;  %v756_v32 = vmul.f32 0.01, %v602_v25  ;;  %v487_v33 = vadd.f32 %v1023_v30, %v1251_v34  ;;  %v478_v36 = vpop.f32.mrb[25].mxu0  ;;  %vm658_vm0 = vcmp.ge.f32.partialorder %v466_v28, 0.0 }
 0x10b   :  { %852 = vst [vmem:[%s1512_s3 + $0xb8] sm:$0xff] %v788_v31  ;;  %v722_v37 = vmul.f32 0.01, %v466_v28  ;;  %vm690_vm1 = vcmp.ge.f32.partialorder %v594_v29, 0.0  ;;  %v754_v38 = vmul.f32 0.01, %v594_v29  ;;  %v615_v41 = vadd.f32 %v1055_v35, %v1251_v34 }
 0x10c   :  { %v820_v39 = vsel %vm692_vm15, %v602_v25, %v756_v32  ;;  %vm663_vm2 = vcmp.ge.f32.partialorder %v487_v33, 0.0  ;;  %v727_v40 = vmul.f32 0.01, %v487_v33  ;;  %v606_v42 = vpop.f32.mrb[25].mxu1  ;;  %v1024_v43 = vpop.f32.mrb[26].mxu0  ;;  %v479_v46 = vadd.f32 %v1251_v34, %v478_v36 }
 0x10d   :  { %884 = vst [vmem:[%s1512_s3 + $0x1b8] sm:$0xff] %v820_v39  ;;  %v786_v44 = vsel %vm658_vm0, %v466_v28, %v722_v37  ;;  %v818_v45 = vsel %vm690_vm1, %v594_v29, %v754_v38  ;;  %v607_v47 = vadd.f32 %v1251_v34, %v606_v42  ;;  %v1056_v48 = vpop.f32.mrb[26].mxu1  ;;  %v481_v49 = vpop.f32.mrb[27].mxu0  ;;  %vm695_vm3 = vcmp.ge.f32.partialorder %v615_v41, 0.0 }
 0x10e   :  { %850 = vst [vmem:[%s1512_s3 + $0xa8] sm:$0xff] %v786_v44  ;;  %882 = vst [vmem:[%s1512_s3 + $0x1a8] sm:$0xff] %v818_v45  ;;  %v791_v50 = vsel %vm663_vm2, %v487_v33, %v727_v40  ;;  %v759_v51 = vmul.f32 0.01, %v615_v41  ;;  %v490_v52 = vadd.f32 %v1024_v43, %v1251_v34  ;;  %v609_v53 = vpop.f32.mrb[27].mxu1  ;;  %vm661_vm4 = vcmp.ge.f32.partialorder %v479_v46, 0.0 }
 0x10f   :  { %855 = vst [vmem:[%s1512_s3 + $0xd0] sm:$0xff] %v791_v50  ;;  %v725_v54 = vmul.f32 0.01, %v479_v46  ;;  %vm693_vm5 = vcmp.ge.f32.partialorder %v607_v47, 0.0  ;;  %v757_v55 = vmul.f32 0.01, %v607_v47  ;;  %v618_v58 = vadd.f32 %v1056_v48, %v1251_v34 }
 0x110   :  { %v823_v56 = vsel %vm695_vm3, %v615_v41, %v759_v51  ;;  %vm664_vm6 = vcmp.ge.f32.partialorder %v490_v52, 0.0  ;;  %v728_v57 = vmul.f32 0.01, %v490_v52  ;;  %v482_v61 = vadd.f32 %v1251_v34, %v481_v49 }
 0x111   :  { %887 = vst [vmem:[%s1512_s3 + $0x1d0] sm:$0xff] %v823_v56  ;;  %v789_v59 = vsel %vm661_vm4, %v479_v46, %v725_v54  ;;  %v821_v60 = vsel %vm693_vm5, %v607_v47, %v757_v55  ;;  %v610_v62 = vadd.f32 %v1251_v34, %v609_v53  ;;  %v1027_v63 = vpop.f32.mrb[28].mxu0  ;;  %vm696_vm7 = vcmp.ge.f32.partialorder %v618_v58, 0.0  ;;  %v1059_v3 = vpop.f32.mrb[28].mxu1 }
 0x112   :  { %853 = vst [vmem:[%s1512_s3 + $0xc0] sm:$0xff] %v789_v59  ;;  %885 = vst [vmem:[%s1512_s3 + $0x1c0] sm:$0xff] %v821_v60  ;;  %v792_v0 = vsel %vm664_vm6, %v490_v52, %v728_v57  ;;  %v760_v1 = vmul.f32 0.01, %v618_v58  ;;  %v503_v2 = vadd.f32 %v1027_v63, %v1251_v34  ;;  %v494_v4 = vpop.f32.mrb[29].mxu0  ;;  %vm662_vm8 = vcmp.ge.f32.partialorder %v482_v61, 0.0 }
 0x113   :  { %856 = vst [vmem:[%s1512_s3 + $0xd8] sm:$0xff] %v792_v0  ;;  %v726_v5 = vmul.f32 0.01, %v482_v61  ;;  %vm694_vm9 = vcmp.ge.f32.partialorder %v610_v62, 0.0  ;;  %v758_v6 = vmul.f32 0.01, %v610_v62  ;;  %v631_v9 = vadd.f32 %v1059_v3, %v1251_v34 }
 0x114   :  { %v824_v7 = vsel %vm696_vm7, %v618_v58, %v760_v1  ;;  %vm667_vm10 = vcmp.ge.f32.partialorder %v503_v2, 0.0  ;;  %v731_v8 = vmul.f32 0.01, %v503_v2  ;;  %v622_v10 = vpop.f32.mrb[29].mxu1  ;;  %v1028_v11 = vpop.f32.mrb[30].mxu0  ;;  %v495_v14 = vadd.f32 %v1251_v34, %v494_v4 }
 0x115   :  { %888 = vst [vmem:[%s1512_s3 + $0x1d8] sm:$0xff] %v824_v7  ;;  %v790_v12 = vsel %vm662_vm8, %v482_v61, %v726_v5  ;;  %v822_v13 = vsel %vm694_vm9, %v610_v62, %v758_v6  ;;  %v623_v15 = vadd.f32 %v1251_v34, %v622_v10  ;;  %v1060_v16 = vpop.f32.mrb[30].mxu1  ;;  %v497_v17 = vpop.f32.mrb[31].mxu0  ;;  %vm699_vm11 = vcmp.ge.f32.partialorder %v631_v9, 0.0 }
 0x116   :  { %854 = vst [vmem:[%s1512_s3 + $0xc8] sm:$0xff] %v790_v12  ;;  %886 = vst [vmem:[%s1512_s3 + $0x1c8] sm:$0xff] %v822_v13  ;;  %v795_v18 = vsel %vm667_vm10, %v503_v2, %v731_v8  ;;  %v763_v19 = vmul.f32 0.01, %v631_v9  ;;  %v506_v20 = vadd.f32 %v1028_v11, %v1251_v34  ;;  %v625_v21 = vpop.f32.mrb[31].mxu1  ;;  %vm665_vm12 = vcmp.ge.f32.partialorder %v495_v14, 0.0 }
 0x117   :  { %859 = vst [vmem:[%s1512_s3 + $0xf0] sm:$0xff] %v795_v18  ;;  %v729_v22 = vmul.f32 0.01, %v495_v14  ;;  %vm697_vm13 = vcmp.ge.f32.partialorder %v623_v15, 0.0  ;;  %v761_v23 = vmul.f32 0.01, %v623_v15  ;;  %v634_v26 = vadd.f32 %v1060_v16, %v1251_v34 }
 0x118   :  { %v827_v24 = vsel %vm699_vm11, %v631_v9, %v763_v19  ;;  %vm668_vm14 = vcmp.ge.f32.partialorder %v506_v20, 0.0  ;;  %v732_v25 = vmul.f32 0.01, %v506_v20  ;;  %v498_v29 = vadd.f32 %v1251_v34, %v497_v17 }
 0x119   :  { %891 = vst [vmem:[%s1512_s3 + $0x1f0] sm:$0xff] %v827_v24  ;;  %v793_v27 = vsel %vm665_vm12, %v495_v14, %v729_v22  ;;  %v825_v28 = vsel %vm697_vm13, %v623_v15, %v761_v23  ;;  %v626_v30 = vadd.f32 %v1251_v34, %v625_v21  ;;  %vm700_vm15 = vcmp.ge.f32.partialorder %v634_v26, 0.0 }
 0x11a   :  { %857 = vst [vmem:[%s1512_s3 + $0xe0] sm:$0xff] %v793_v27  ;;  %889 = vst [vmem:[%s1512_s3 + $0x1e0] sm:$0xff] %v825_v28  ;;  %v796_v31 = vsel %vm668_vm14, %v506_v20, %v732_v25  ;;  %v764_v32 = vmul.f32 0.01, %v634_v26  ;;  %vm666_vm0 = vcmp.ge.f32.partialorder %v498_v29, 0.0 }
 0x11b   :  { %860 = vst [vmem:[%s1512_s3 + $0xf8] sm:$0xff] %v796_v31  ;;  %v730_v33 = vmul.f32 0.01, %v498_v29  ;;  %vm698_vm1 = vcmp.ge.f32.partialorder %v626_v30, 0.0  ;;  %v762_v35 = vmul.f32 0.01, %v626_v30 }
 0x11c   :  { %v828_v34 = vsel %vm700_vm15, %v634_v26, %v764_v32 }
 0x11d   :  { %892 = vst [vmem:[%s1512_s3 + $0x1f8] sm:$0xff] %v828_v34  ;;  %v794_v36 = vsel %vm666_vm0, %v498_v29, %v730_v33  ;;  %v826_v37 = vsel %vm698_vm1, %v626_v30, %v762_v35 }
 0x11e   :  { %858 = vst [vmem:[%s1512_s3 + $0xe8] sm:$0xff] %v794_v36  ;;  %890 = vst [vmem:[%s1512_s3 + $0x1e8] sm:$0xff] %v826_v37 }

// kernel: local_feddis_forward.61
= control target key start
LH: loop header
LB: loop body
LE: loop exit
PB: predicated region body
PF: predicated region fallthrough
CT: control target
= control target key end

     0   :  { %v143_v1 = vmov 0.0   ;;  %vm144_vm0 = vmmov 0   ;;  %s190_s0 = inlined_call_operand.vmem [shape: bf16[8,32], index: 0, kind: input, shape index: {}]   ;;  %s191_s1 = inlined_call_operand.vmem [shape: bf16[32,128], index: 1, kind: input, shape index: {}]   ;;  %s192_s2 = inlined_call_operand.vmem [shape: f32[1,128], index: 2, kind: input, shape index: {}]   ;;  %s193_s3 = inlined_call_operand.hbm [shape: f32[8,128], index: 3, kind: output, shape index: {}]  }
   0x1   :  { %v117_v0 = vld [vmem:[%s191_s1] sm:$0xff]   ;;  %106 = vmatprep.subr.bf16.mxu0 %v143_v1  ;;  %v118_v2 = vld [vmem:[%s191_s1 + $0x8] sm:$0xff]   ;;  %110 = vmatprep.mubr.msk.bf16.mxu0 %vm144_vm0, %v143_v1 }
   0x2   :  { %107 = vmatpush3.bf16.msra.mxu0 %v117_v0 }
   0x3   :  { %108 = vmatprep.subr.bf16.mxu0 %v143_v1 }
   0x4   :  { %8 = vsyncpa [#allocation3], 0  ;;  %v16_v3 = vld [vmem:[%s190_s0] sm:$0xf]  ;;  %vm40_vm1 = vcmask 261120   ;;  %s145_s20 = smov [#allocation2]  }
   0x5   :  { %v99_v4 = vld [vmem:[%s192_s2] ss:$0 sm:$0xff]  ;;  %s91_s21 = sshll.u32 %s145_s20, 4  ;;  %s92_s21 = int_to_ptr.vmem [resolvable:$true] %s91_s21 }
   0x6   :  { %109 = vmatpush3.bf16.msra.mxu0 %v118_v2  ;;  %s119_s1 = scalar_lea.vmem %s92_s21, 128  ;;  %p124_p1 = scmp.lt.s32.totalorder %s92_s21, %s92_s21 }
   0x7   :  { %p120_p0 = scmp.ne.s32.totalorder %s92_s21, %s119_s1  ;;  %p125_p2 = scmp.lt.s32.totalorder %s119_s1, %s119_s1 }
   0x9   :  { %111 = vmatmul.mubr.msk.bf16.vlgmr.msra.gmra.mrb[0].mxu0 %vm40_vm1, %v16_v3  ;;  %p126_p3 = por %p125_p2, %p124_p1 }
   0xb   :  { %p127_p4 = pnand %p126_p3, %p120_p0 }
  0xdc   :  { %v78_v5 = vpop.f32.mrb[0].mxu0 }
  0xdd   :  { %v79_v6 = vadd.f32 %v99_v4, %v78_v5  ;;  %v112_v7 = vpop.f32.mrb[1].mxu0 }
  0xde   :  { %v81_v8 = vpop.f32.mrb[2].mxu0 }
  0xdf   :  { %84 = vst [vmem:[#allocation2] sm:$0xff] %v79_v6  ;;  %v113_v9 = vpop.f32.mrb[3].mxu0 }
  0xe0   :  { %130 = shalt.err (!%p127_p4)
}
  0xe1   :  { %s131_s2 = scalar_lea.hbm %s193_s3, 128 }
  0xe2   :  { %p132_p5 = scmp.ne.s32.totalorder %s193_s3, %s131_s2  ;;  %p135_p6 = scmp.lt.u32.totalorder %s131_s2, %s193_s3 }
  0xe4   :  { %p137_p7 = pnand %p135_p6, %p132_p5 }
  0xe6   :  { %140 = shalt.err (!%p137_p7)
}
  0xe7   :  { %94 = dma.vmem_to_hbm [thread:$0]  %s92_s21, 128, %s193_s3, [#allocation3]  }
  0xe8   :  { %141 = dma.done.wait [#allocation3], 128  }
  0xe9   :  { %142 = vsyncadd [#allocation3], 4294967168 }
  0xea   :  { %98 = vsyncpa [#allocation3], 1 }

// kernel: local_feddis_forward.60
= control target key start
LH: loop header
LB: loop body
LE: loop exit
PB: predicated region body
PF: predicated region fallthrough
CT: control target
= control target key end

     0   :  { %vm344_vm0 = vcmask 1042432   ;;  %vm247_vm1 = vcmask 48128   ;;  %s1509_s1 = inlined_call_operand.vmem [shape: bf16[6,128], index: 1, kind: input, shape index: {}]   ;;  %s1510_s0 = inlined_call_operand.vmem [shape: bf16[512,6], index: 0, kind: input, shape index: {}]   ;;  %s1511_s2 = inlined_call_operand.vmem [shape: f32[1,128], index: 2, kind: input, shape index: {}]   ;;  %s1512_s3 = inlined_call_operand.vmem [shape: f32[512,128], index: 3, kind: output, shape index: {}]  }
   0x1   :  { %v79_v0 = vld [vmem:[%s1509_s1] sm:$0x7]  ;;  %v939_v4 = vld [vmem:[%s1510_s0 + $0x8] sm:$0xff]   ;;  %v941_v6 = vld [vmem:[%s1510_s0 + $0x10] sm:$0xff]  }
   0x2   :  { %935 = vmatprep.subr.msk.bf16.mxu0 %vm344_vm0, %v79_v0  ;;  %936 = vmatprep.subr.msk.bf16.mxu1 %vm344_vm0, %v79_v0  ;;  %v346_v1 = vsel %vm344_vm0, %v79_v0, 0  ;;  %v937_v2 = vld [vmem:[%s1510_s0] sm:$0xff]   ;;  %v940_v5 = vld [vmem:[%s1510_s0 + $0x88] sm:$0xff]   ;;  %v942_v7 = vld [vmem:[%s1510_s0 + $0x90] sm:$0xff]  }
   0x3   :  { %868 = vmatpush3.bf16.msra.mxu0 %v346_v1  ;;  %934 = vmatpush3.bf16.msra.mxu1 %v346_v1  ;;  %v938_v3 = vld [vmem:[%s1510_s0 + $0x80] sm:$0xff]   ;;  %v943_v8 = vld [vmem:[%s1510_s0 + $0x18] sm:$0xff]   ;;  %v947_v12 = vld [vmem:[%s1510_s0 + $0x28] sm:$0xff]  }
   0x4   :  { %869 = vmatprep.mubr.msk.bf16.mxu0 %vm247_vm1, %v937_v2  ;;  %901 = vmatprep.mubr.msk.bf16.mxu1 %vm247_vm1, %v938_v3  ;;  %v944_v9 = vld [vmem:[%s1510_s0 + $0x98] sm:$0xff]   ;;  %v945_v10 = vld [vmem:[%s1510_s0 + $0x20] sm:$0xff]   ;;  %v948_v13 = vld [vmem:[%s1510_s0 + $0xa8] sm:$0xff]  }
   0x5   :  { %v946_v11 = vld [vmem:[%s1510_s0 + $0xa0] sm:$0xff]   ;;  %v949_v14 = vld [vmem:[%s1510_s0 + $0x30] sm:$0xff]   ;;  %v951_v16 = vld [vmem:[%s1510_s0 + $0x38] sm:$0xff]  }
   0x6   :  { %870 = vmatmul.mubr.msk.bf16.vlgmr.msra.gmra.mrb[0].mxu0 %vm247_vm1, %v939_v4  ;;  %902 = vmatmul.mubr.msk.bf16.vlgmr.msra.gmra.mrb[0].mxu1 %vm247_vm1, %v940_v5  ;;  %v950_v15 = vld [vmem:[%s1510_s0 + $0xb0] sm:$0xff]   ;;  %v952_v17 = vld [vmem:[%s1510_s0 + $0xb8] sm:$0xff]   ;;  %v953_v18 = vld [vmem:[%s1510_s0 + $0x40] sm:$0xff]  }
   0x7   :  { %873 = vmatprep.mubr.msk.bf16.mxu0 %vm247_vm1, %v941_v6  ;;  %905 = vmatprep.mubr.msk.bf16.mxu1 %vm247_vm1, %v942_v7  ;;  %v954_v19 = vld [vmem:[%s1510_s0 + $0xc0] sm:$0xff]   ;;  %v955_v20 = vld [vmem:[%s1510_s0 + $0x48] sm:$0xff]   ;;  %v957_v22 = vld [vmem:[%s1510_s0 + $0x50] sm:$0xff]  }
   0x8   :  { %v956_v21 = vld [vmem:[%s1510_s0 + $0xc8] sm:$0xff]   ;;  %v958_v23 = vld [vmem:[%s1510_s0 + $0xd0] sm:$0xff]   ;;  %v959_v24 = vld [vmem:[%s1510_s0 + $0x58] sm:$0xff]  }
   0x9   :  { %v960_v25 = vld [vmem:[%s1510_s0 + $0xd8] sm:$0xff]   ;;  %v961_v26 = vld [vmem:[%s1510_s0 + $0x60] sm:$0xff]   ;;  %v963_v28 = vld [vmem:[%s1510_s0 + $0x68] sm:$0xff]  }
   0xa   :  { %v962_v27 = vld [vmem:[%s1510_s0 + $0xe0] sm:$0xff]   ;;  %v964_v29 = vld [vmem:[%s1510_s0 + $0xe8] sm:$0xff]   ;;  %v965_v30 = vld [vmem:[%s1510_s0 + $0x70] sm:$0xff]  }
   0xb   :  { %v966_v31 = vld [vmem:[%s1510_s0 + $0xf0] sm:$0xff]   ;;  %v967_v32 = vld [vmem:[%s1510_s0 + $0x78] sm:$0xff]   ;;  %v1251_v34 = vld [vmem:[%s1511_s2] ss:$0 sm:$0xff] }
   0xc   :  { %v968_v33 = vld [vmem:[%s1510_s0 + $0xf8] sm:$0xff]  }
   0xe   :  { %874 = vmatmul.mubr.msk.bf16.gmra.mrb[4].mxu0 %vm247_vm1, %v943_v8  ;;  %906 = vmatmul.mubr.msk.bf16.gmra.mrb[4].mxu1 %vm247_vm1, %v944_v9 }
   0xf   :  { %877 = vmatprep.mubr.msk.bf16.mxu0 %vm247_vm1, %v945_v10  ;;  %909 = vmatprep.mubr.msk.bf16.mxu1 %vm247_vm1, %v946_v11 }
  0x16   :  { %878 = vmatmul.mubr.msk.bf16.gmra.mrb[8].mxu0 %vm247_vm1, %v947_v12  ;;  %910 = vmatmul.mubr.msk.bf16.gmra.mrb[8].mxu1 %vm247_vm1, %v948_v13 }
  0x17   :  { %881 = vmatprep.mubr.msk.bf16.mxu0 %vm247_vm1, %v949_v14  ;;  %913 = vmatprep.mubr.msk.bf16.mxu1 %vm247_vm1, %v950_v15 }
  0x1e   :  { %882 = vmatmul.mubr.msk.bf16.gmra.mrb[12].mxu0 %vm247_vm1, %v951_v16  ;;  %914 = vmatmul.mubr.msk.bf16.gmra.mrb[12].mxu1 %vm247_vm1, %v952_v17 }
  0x1f   :  { %885 = vmatprep.mubr.msk.bf16.mxu0 %vm247_vm1, %v953_v18  ;;  %917 = vmatprep.mubr.msk.bf16.mxu1 %vm247_vm1, %v954_v19 }
  0x26   :  { %886 = vmatmul.mubr.msk.bf16.gmra.mrb[16].mxu0 %vm247_vm1, %v955_v20  ;;  %918 = vmatmul.mubr.msk.bf16.gmra.mrb[16].mxu1 %vm247_vm1, %v956_v21 }
  0x27   :  { %889 = vmatprep.mubr.msk.bf16.mxu0 %vm247_vm1, %v957_v22  ;;  %921 = vmatprep.mubr.msk.bf16.mxu1 %vm247_vm1, %v958_v23 }
  0x2e   :  { %890 = vmatmul.mubr.msk.bf16.gmra.mrb[20].mxu0 %vm247_vm1, %v959_v24  ;;  %922 = vmatmul.mubr.msk.bf16.gmra.mrb[20].mxu1 %vm247_vm1, %v960_v25 }
  0x2f   :  { %893 = vmatprep.mubr.msk.bf16.mxu0 %vm247_vm1, %v961_v26  ;;  %925 = vmatprep.mubr.msk.bf16.mxu1 %vm247_vm1, %v962_v27 }
  0x36   :  { %894 = vmatmul.mubr.msk.bf16.gmra.mrb[24].mxu0 %vm247_vm1, %v963_v28  ;;  %926 = vmatmul.mubr.msk.bf16.gmra.mrb[24].mxu1 %vm247_vm1, %v964_v29 }
  0x37   :  { %897 = vmatprep.mubr.msk.bf16.mxu0 %vm247_vm1, %v965_v30  ;;  %929 = vmatprep.mubr.msk.bf16.mxu1 %vm247_vm1, %v966_v31 }
  0x3e   :  { %898 = vmatmul.mubr.msk.bf16.gmra.mrb[28].mxu0 %vm247_vm1, %v967_v32  ;;  %930 = vmatmul.mubr.msk.bf16.gmra.mrb[28].mxu1 %vm247_vm1, %v968_v33 }
  0xd9   :  { %v871_v35 = vpop.f32.mrb[0].mxu0  ;;  %v903_v37 = vpop.f32.mrb[0].mxu1 }
  0xda   :  { %v391_v36 = vadd.f32 %v871_v35, %v1251_v34  ;;  %v382_v38 = vpop.f32.mrb[1].mxu0  ;;  %v519_v39 = vadd.f32 %v903_v37, %v1251_v34  ;;  %v510_v41 = vpop.f32.mrb[1].mxu1 }
  0xdb   :  { %v383_v40 = vadd.f32 %v1251_v34, %v382_v38  ;;  %v872_v42 = vpop.f32.mrb[2].mxu0  ;;  %v511_v43 = vadd.f32 %v1251_v34, %v510_v41  ;;  %v904_v45 = vpop.f32.mrb[2].mxu1 }
  0xdc   :  { %969 = vtanh.f32 %v391_v36  ;;  %v394_v44 = vadd.f32 %v872_v42, %v1251_v34  ;;  %v385_v46 = vpop.f32.mrb[3].mxu0  ;;  %v522_v47 = vadd.f32 %v904_v45, %v1251_v34  ;;  %v513_v48 = vpop.f32.mrb[3].mxu1 }
  0xdd   :  { %971 = vtanh.f32 %v519_v39  ;;  %v386_v49 = vadd.f32 %v1251_v34, %v385_v46  ;;  %v514_v50 = vadd.f32 %v1251_v34, %v513_v48 }
  0xde   :  { %973 = vtanh.f32 %v383_v40 }
  0xdf   :  { %975 = vtanh.f32 %v511_v43 }
  0xe0   :  { %977 = vtanh.f32 %v394_v44 }
  0xe1   :  { %979 = vtanh.f32 %v522_v47  ;;  %v875_v51 = vpop.f32.mrb[4].mxu0  ;;  %v907_v53 = vpop.f32.mrb[4].mxu1 }
  0xe2   :  { %981 = vtanh.f32 %v386_v49  ;;  %v407_v52 = vadd.f32 %v875_v51, %v1251_v34  ;;  %v398_v54 = vpop.f32.mrb[5].mxu0  ;;  %v535_v55 = vadd.f32 %v907_v53, %v1251_v34  ;;  %v526_v57 = vpop.f32.mrb[5].mxu1 }
  0xe3   :  { %983 = vtanh.f32 %v514_v50  ;;  %v399_v56 = vadd.f32 %v1251_v34, %v398_v54  ;;  %v876_v58 = vpop.f32.mrb[6].mxu0  ;;  %v527_v59 = vadd.f32 %v1251_v34, %v526_v57  ;;  %v908_v61 = vpop.f32.mrb[6].mxu1 }
  0xe4   :  { %985 = vtanh.f32 %v407_v52  ;;  %v410_v60 = vadd.f32 %v876_v58, %v1251_v34  ;;  %v401_v62 = vpop.f32.mrb[7].mxu0  ;;  %v538_v63 = vadd.f32 %v908_v61, %v1251_v34  ;;  %v529_v0 = vpop.f32.mrb[7].mxu1 }
  0xe5   :  { %987 = vtanh.f32 %v535_v55  ;;  %v402_v2 = vadd.f32 %v1251_v34, %v401_v62  ;;  %v530_v4 = vadd.f32 %v1251_v34, %v529_v0 }
  0xe6   :  { %v970_v1 = vpop.eup %969  ;;  %989 = vtanh.f32 %v399_v56 }
  0xe7   :  { %v972_v3 = vpop.eup %971  ;;  %703 = vst [vmem:[%s1512_s3 + $0x10] sm:$0xff] %v970_v1  ;;  %991 = vtanh.f32 %v527_v59 }
  0xe8   :  { %v974_v5 = vpop.eup %973  ;;  %735 = vst [vmem:[%s1512_s3 + $0x110] sm:$0xff] %v972_v3  ;;  %993 = vtanh.f32 %v410_v60 }
  0xe9   :  { %v976_v6 = vpop.eup %975  ;;  %701 = vst [vmem:[%s1512_s3] sm:$0xff] %v974_v5  ;;  %995 = vtanh.f32 %v538_v63  ;;  %v879_v7 = vpop.f32.mrb[8].mxu0 }
  0xea   :  { %v978_v8 = vpop.eup %977  ;;  %733 = vst [vmem:[%s1512_s3 + $0x100] sm:$0xff] %v976_v6  ;;  %997 = vtanh.f32 %v402_v2  ;;  %v423_v9 = vadd.f32 %v879_v7, %v1251_v34  ;;  %v911_v10 = vpop.f32.mrb[8].mxu1 }
  0xeb   :  { %v414_v11 = vpop.f32.mrb[9].mxu0  ;;  %v980_v12 = vpop.eup %979  ;;  %704 = vst [vmem:[%s1512_s3 + $0x18] sm:$0xff] %v978_v8  ;;  %999 = vtanh.f32 %v530_v4  ;;  %v551_v13 = vadd.f32 %v911_v10, %v1251_v34 }
  0xec   :  { %v415_v14 = vadd.f32 %v1251_v34, %v414_v11  ;;  %v542_v15 = vpop.f32.mrb[9].mxu1  ;;  %v880_v16 = vpop.f32.mrb[10].mxu0  ;;  %736 = vst [vmem:[%s1512_s3 + $0x118] sm:$0xff] %v980_v12  ;;  %1001 = vtanh.f32 %v423_v9 }
  0xed   :  { %v982_v17 = vpop.eup %981  ;;  %v543_v18 = vadd.f32 %v1251_v34, %v542_v15  ;;  %v426_v19 = vadd.f32 %v880_v16, %v1251_v34  ;;  %v912_v20 = vpop.f32.mrb[10].mxu1  ;;  %1003 = vtanh.f32 %v551_v13 }
  0xee   :  { %v417_v21 = vpop.f32.mrb[11].mxu0  ;;  %v984_v22 = vpop.eup %983  ;;  %702 = vst [vmem:[%s1512_s3 + $0x8] sm:$0xff] %v982_v17  ;;  %v554_v23 = vadd.f32 %v912_v20, %v1251_v34  ;;  %1005 = vtanh.f32 %v415_v14 }
  0xef   :  { %v545_v24 = vpop.f32.mrb[11].mxu1  ;;  %v986_v25 = vpop.eup %985  ;;  %734 = vst [vmem:[%s1512_s3 + $0x108] sm:$0xff] %v984_v22  ;;  %v418_v26 = vadd.f32 %v1251_v34, %v417_v21  ;;  %1007 = vtanh.f32 %v543_v18 }
  0xf0   :  { %v988_v27 = vpop.eup %987  ;;  %707 = vst [vmem:[%s1512_s3 + $0x30] sm:$0xff] %v986_v25  ;;  %v546_v28 = vadd.f32 %v1251_v34, %v545_v24  ;;  %1009 = vtanh.f32 %v426_v19 }
  0xf1   :  { %v990_v29 = vpop.eup %989  ;;  %739 = vst [vmem:[%s1512_s3 + $0x130] sm:$0xff] %v988_v27  ;;  %1011 = vtanh.f32 %v554_v23  ;;  %v883_v31 = vpop.f32.mrb[12].mxu0 }
  0xf2   :  { %v992_v30 = vpop.eup %991  ;;  %705 = vst [vmem:[%s1512_s3 + $0x20] sm:$0xff] %v990_v29  ;;  %1013 = vtanh.f32 %v418_v26  ;;  %v439_v33 = vadd.f32 %v883_v31, %v1251_v34  ;;  %v915_v35 = vpop.f32.mrb[12].mxu1 }
  0xf3   :  { %v994_v32 = vpop.eup %993  ;;  %737 = vst [vmem:[%s1512_s3 + $0x120] sm:$0xff] %v992_v30  ;;  %v430_v36 = vpop.f32.mrb[13].mxu0  ;;  %1015 = vtanh.f32 %v546_v28  ;;  %v567_v38 = vadd.f32 %v915_v35, %v1251_v34 }
  0xf4   :  { %v996_v37 = vpop.eup %995  ;;  %708 = vst [vmem:[%s1512_s3 + $0x38] sm:$0xff] %v994_v32  ;;  %v431_v39 = vadd.f32 %v1251_v34, %v430_v36  ;;  %v558_v40 = vpop.f32.mrb[13].mxu1  ;;  %1017 = vtanh.f32 %v439_v33 }
  0xf5   :  { %v884_v41 = vpop.f32.mrb[14].mxu0  ;;  %v998_v42 = vpop.eup %997  ;;  %740 = vst [vmem:[%s1512_s3 + $0x138] sm:$0xff] %v996_v37  ;;  %v559_v43 = vadd.f32 %v1251_v34, %v558_v40  ;;  %1019 = vtanh.f32 %v567_v38 }
  0xf6   :  { %v442_v44 = vadd.f32 %v884_v41, %v1251_v34  ;;  %v916_v45 = vpop.f32.mrb[14].mxu1  ;;  %v433_v46 = vpop.f32.mrb[15].mxu0  ;;  %706 = vst [vmem:[%s1512_s3 + $0x28] sm:$0xff] %v998_v42  ;;  %1021 = vtanh.f32 %v431_v39 }
  0xf7   :  { %v1000_v47 = vpop.eup %999  ;;  %v570_v48 = vadd.f32 %v916_v45, %v1251_v34  ;;  %v561_v49 = vpop.f32.mrb[15].mxu1  ;;  %v434_v51 = vadd.f32 %v1251_v34, %v433_v46  ;;  %1023 = vtanh.f32 %v559_v43 }
  0xf8   :  { %v1002_v50 = vpop.eup %1001  ;;  %738 = vst [vmem:[%s1512_s3 + $0x128] sm:$0xff] %v1000_v47  ;;  %v562_v53 = vadd.f32 %v1251_v34, %v561_v49  ;;  %1025 = vtanh.f32 %v442_v44 }
  0xf9   :  { %v1004_v52 = vpop.eup %1003  ;;  %711 = vst [vmem:[%s1512_s3 + $0x50] sm:$0xff] %v1002_v50  ;;  %1027 = vtanh.f32 %v570_v48  ;;  %v887_v56 = vpop.f32.mrb[16].mxu0 }
  0xfa   :  { %v1006_v54 = vpop.eup %1005  ;;  %743 = vst [vmem:[%s1512_s3 + $0x150] sm:$0xff] %v1004_v52  ;;  %1029 = vtanh.f32 %v434_v51  ;;  %v455_v58 = vadd.f32 %v887_v56, %v1251_v34  ;;  %v919_v59 = vpop.f32.mrb[16].mxu1 }
  0xfb   :  { %v1008_v55 = vpop.eup %1007  ;;  %709 = vst [vmem:[%s1512_s3 + $0x40] sm:$0xff] %v1006_v54  ;;  %v446_v60 = vpop.f32.mrb[17].mxu0  ;;  %1031 = vtanh.f32 %v562_v53  ;;  %v583_v62 = vadd.f32 %v919_v59, %v1251_v34 }
  0xfc   :  { %v1010_v57 = vpop.eup %1009  ;;  %741 = vst [vmem:[%s1512_s3 + $0x140] sm:$0xff] %v1008_v55  ;;  %v447_v63 = vadd.f32 %v1251_v34, %v446_v60  ;;  %v574_v0 = vpop.f32.mrb[17].mxu1  ;;  %1033 = vtanh.f32 %v455_v58 }
  0xfd   :  { %v1012_v61 = vpop.eup %1011  ;;  %712 = vst [vmem:[%s1512_s3 + $0x58] sm:$0xff] %v1010_v57  ;;  %v888_v1 = vpop.f32.mrb[18].mxu0  ;;  %v575_v3 = vadd.f32 %v1251_v34, %v574_v0  ;;  %1035 = vtanh.f32 %v583_v62 }
  0xfe   :  { %v1014_v2 = vpop.eup %1013  ;;  %744 = vst [vmem:[%s1512_s3 + $0x158] sm:$0xff] %v1012_v61  ;;  %v458_v4 = vadd.f32 %v888_v1, %v1251_v34  ;;  %v920_v5 = vpop.f32.mrb[18].mxu1  ;;  %1037 = vtanh.f32 %v447_v63 }
  0xff   :  { %v449_v6 = vpop.f32.mrb[19].mxu0  ;;  %v1016_v7 = vpop.eup %1015  ;;  %710 = vst [vmem:[%s1512_s3 + $0x48] sm:$0xff] %v1014_v2  ;;  %v586_v8 = vadd.f32 %v920_v5, %v1251_v34  ;;  %1039 = vtanh.f32 %v575_v3 }
 0x100   :  { %v577_v9 = vpop.f32.mrb[19].mxu1  ;;  %v1018_v10 = vpop.eup %1017  ;;  %742 = vst [vmem:[%s1512_s3 + $0x148] sm:$0xff] %v1016_v7  ;;  %v450_v11 = vadd.f32 %v1251_v34, %v449_v6  ;;  %1041 = vtanh.f32 %v458_v4 }
 0x101   :  { %v1020_v12 = vpop.eup %1019  ;;  %715 = vst [vmem:[%s1512_s3 + $0x70] sm:$0xff] %v1018_v10  ;;  %v578_v13 = vadd.f32 %v1251_v34, %v577_v9  ;;  %1043 = vtanh.f32 %v586_v8  ;;  %v891_v16 = vpop.f32.mrb[20].mxu0 }
 0x102   :  { %v1022_v14 = vpop.eup %1021  ;;  %747 = vst [vmem:[%s1512_s3 + $0x170] sm:$0xff] %v1020_v12  ;;  %1045 = vtanh.f32 %v450_v11  ;;  %v471_v18 = vadd.f32 %v891_v16, %v1251_v34  ;;  %v923_v19 = vpop.f32.mrb[20].mxu1 }
 0x103   :  { %v1024_v15 = vpop.eup %1023  ;;  %713 = vst [vmem:[%s1512_s3 + $0x60] sm:$0xff] %v1022_v14  ;;  %v462_v20 = vpop.f32.mrb[21].mxu0  ;;  %1047 = vtanh.f32 %v578_v13  ;;  %v599_v22 = vadd.f32 %v923_v19, %v1251_v34 }
 0x104   :  { %v1026_v17 = vpop.eup %1025  ;;  %745 = vst [vmem:[%s1512_s3 + $0x160] sm:$0xff] %v1024_v15  ;;  %v463_v23 = vadd.f32 %v1251_v34, %v462_v20  ;;  %v590_v24 = vpop.f32.mrb[21].mxu1  ;;  %1049 = vtanh.f32 %v471_v18 }
 0x105   :  { %v1028_v21 = vpop.eup %1027  ;;  %716 = vst [vmem:[%s1512_s3 + $0x78] sm:$0xff] %v1026_v17  ;;  %v892_v25 = vpop.f32.mrb[22].mxu0  ;;  %v591_v27 = vadd.f32 %v1251_v34, %v590_v24  ;;  %1051 = vtanh.f32 %v599_v22 }
 0x106   :  { %v1030_v26 = vpop.eup %1029  ;;  %748 = vst [vmem:[%s1512_s3 + $0x178] sm:$0xff] %v1028_v21  ;;  %v474_v28 = vadd.f32 %v892_v25, %v1251_v34  ;;  %v924_v29 = vpop.f32.mrb[22].mxu1  ;;  %1053 = vtanh.f32 %v463_v23 }
 0x107   :  { %v465_v30 = vpop.f32.mrb[23].mxu0  ;;  %v1032_v31 = vpop.eup %1031  ;;  %714 = vst [vmem:[%s1512_s3 + $0x68] sm:$0xff] %v1030_v26  ;;  %v602_v32 = vadd.f32 %v924_v29, %v1251_v34  ;;  %1055 = vtanh.f32 %v591_v27 }
 0x108   :  { %v593_v33 = vpop.f32.mrb[23].mxu1  ;;  %v1034_v35 = vpop.eup %1033  ;;  %746 = vst [vmem:[%s1512_s3 + $0x168] sm:$0xff] %v1032_v31  ;;  %v466_v36 = vadd.f32 %v1251_v34, %v465_v30  ;;  %1057 = vtanh.f32 %v474_v28 }
 0x109   :  { %v1036_v37 = vpop.eup %1035  ;;  %719 = vst [vmem:[%s1512_s3 + $0x90] sm:$0xff] %v1034_v35  ;;  %v594_v38 = vadd.f32 %v1251_v34, %v593_v33  ;;  %1059 = vtanh.f32 %v602_v32  ;;  %v895_v41 = vpop.f32.mrb[24].mxu0 }
 0x10a   :  { %v1038_v39 = vpop.eup %1037  ;;  %751 = vst [vmem:[%s1512_s3 + $0x190] sm:$0xff] %v1036_v37  ;;  %1061 = vtanh.f32 %v466_v36  ;;  %v487_v43 = vadd.f32 %v895_v41, %v1251_v34  ;;  %v927_v44 = vpop.f32.mrb[24].mxu1 }
 0x10b   :  { %v1040_v40 = vpop.eup %1039  ;;  %717 = vst [vmem:[%s1512_s3 + $0x80] sm:$0xff] %v1038_v39  ;;  %v478_v45 = vpop.f32.mrb[25].mxu0  ;;  %1063 = vtanh.f32 %v594_v38  ;;  %v615_v47 = vadd.f32 %v927_v44, %v1251_v34 }
 0x10c   :  { %v1042_v42 = vpop.eup %1041  ;;  %749 = vst [vmem:[%s1512_s3 + $0x180] sm:$0xff] %v1040_v40  ;;  %v479_v48 = vadd.f32 %v1251_v34, %v478_v45  ;;  %v606_v49 = vpop.f32.mrb[25].mxu1  ;;  %1065 = vtanh.f32 %v487_v43 }
 0x10d   :  { %v1044_v46 = vpop.eup %1043  ;;  %720 = vst [vmem:[%s1512_s3 + $0x98] sm:$0xff] %v1042_v42  ;;  %v896_v50 = vpop.f32.mrb[26].mxu0  ;;  %v607_v52 = vadd.f32 %v1251_v34, %v606_v49  ;;  %1067 = vtanh.f32 %v615_v47 }
 0x10e   :  { %v1046_v51 = vpop.eup %1045  ;;  %752 = vst [vmem:[%s1512_s3 + $0x198] sm:$0xff] %v1044_v46  ;;  %v490_v53 = vadd.f32 %v896_v50, %v1251_v34  ;;  %v928_v54 = vpop.f32.mrb[26].mxu1  ;;  %1069 = vtanh.f32 %v479_v48 }
 0x10f   :  { %v481_v55 = vpop.f32.mrb[27].mxu0  ;;  %v1048_v56 = vpop.eup %1047  ;;  %718 = vst [vmem:[%s1512_s3 + $0x88] sm:$0xff] %v1046_v51  ;;  %v618_v57 = vadd.f32 %v928_v54, %v1251_v34  ;;  %1071 = vtanh.f32 %v607_v52 }
 0x110   :  { %v609_v58 = vpop.f32.mrb[27].mxu1  ;;  %v1050_v59 = vpop.eup %1049  ;;  %750 = vst [vmem:[%s1512_s3 + $0x188] sm:$0xff] %v1048_v56  ;;  %v482_v60 = vadd.f32 %v1251_v34, %v481_v55  ;;  %1073 = vtanh.f32 %v490_v53 }
 0x111   :  { %v1052_v61 = vpop.eup %1051  ;;  %723 = vst [vmem:[%s1512_s3 + $0xb0] sm:$0xff] %v1050_v59  ;;  %v610_v62 = vadd.f32 %v1251_v34, %v609_v58  ;;  %1075 = vtanh.f32 %v618_v57  ;;  %v899_v1 = vpop.f32.mrb[28].mxu0 }
 0x112   :  { %v1054_v63 = vpop.eup %1053  ;;  %755 = vst [vmem:[%s1512_s3 + $0x1b0] sm:$0xff] %v1052_v61  ;;  %1077 = vtanh.f32 %v482_v60  ;;  %v503_v3 = vadd.f32 %v899_v1, %v1251_v34  ;;  %v931_v4 = vpop.f32.mrb[28].mxu1 }
 0x113   :  { %v1056_v0 = vpop.eup %1055  ;;  %721 = vst [vmem:[%s1512_s3 + $0xa0] sm:$0xff] %v1054_v63  ;;  %v494_v5 = vpop.f32.mrb[29].mxu0  ;;  %1079 = vtanh.f32 %v610_v62  ;;  %v631_v7 = vadd.f32 %v931_v4, %v1251_v34 }
 0x114   :  { %v1058_v2 = vpop.eup %1057  ;;  %753 = vst [vmem:[%s1512_s3 + $0x1a0] sm:$0xff] %v1056_v0  ;;  %v495_v8 = vadd.f32 %v1251_v34, %v494_v5  ;;  %v622_v9 = vpop.f32.mrb[29].mxu1  ;;  %1081 = vtanh.f32 %v503_v3 }
 0x115   :  { %v1060_v6 = vpop.eup %1059  ;;  %724 = vst [vmem:[%s1512_s3 + $0xb8] sm:$0xff] %v1058_v2  ;;  %v900_v10 = vpop.f32.mrb[30].mxu0  ;;  %v623_v12 = vadd.f32 %v1251_v34, %v622_v9  ;;  %1083 = vtanh.f32 %v631_v7 }
 0x116   :  { %v1062_v11 = vpop.eup %1061  ;;  %756 = vst [vmem:[%s1512_s3 + $0x1b8] sm:$0xff] %v1060_v6  ;;  %v506_v13 = vadd.f32 %v900_v10, %v1251_v34  ;;  %v932_v14 = vpop.f32.mrb[30].mxu1  ;;  %1085 = vtanh.f32 %v495_v8 }
 0x117   :  { %v497_v15 = vpop.f32.mrb[31].mxu0  ;;  %v1064_v16 = vpop.eup %1063  ;;  %722 = vst [vmem:[%s1512_s3 + $0xa8] sm:$0xff] %v1062_v11  ;;  %v634_v17 = vadd.f32 %v932_v14, %v1251_v34  ;;  %1087 = vtanh.f32 %v623_v12 }
 0x118   :  { %v625_v18 = vpop.f32.mrb[31].mxu1  ;;  %v1066_v19 = vpop.eup %1065  ;;  %754 = vst [vmem:[%s1512_s3 + $0x1a8] sm:$0xff] %v1064_v16  ;;  %v498_v20 = vadd.f32 %v1251_v34, %v497_v15  ;;  %1089 = vtanh.f32 %v506_v13 }
 0x119   :  { %v1068_v21 = vpop.eup %1067  ;;  %727 = vst [vmem:[%s1512_s3 + $0xd0] sm:$0xff] %v1066_v19  ;;  %v626_v22 = vadd.f32 %v1251_v34, %v625_v18  ;;  %1091 = vtanh.f32 %v634_v17 }
 0x11a   :  { %v1070_v23 = vpop.eup %1069  ;;  %759 = vst [vmem:[%s1512_s3 + $0x1d0] sm:$0xff] %v1068_v21  ;;  %1093 = vtanh.f32 %v498_v20 }
 0x11b   :  { %v1072_v24 = vpop.eup %1071  ;;  %725 = vst [vmem:[%s1512_s3 + $0xc0] sm:$0xff] %v1070_v23  ;;  %1095 = vtanh.f32 %v626_v22 }
 0x11c   :  { %v1074_v25 = vpop.eup %1073  ;;  %757 = vst [vmem:[%s1512_s3 + $0x1c0] sm:$0xff] %v1072_v24 }
 0x11d   :  { %v1076_v26 = vpop.eup %1075  ;;  %728 = vst [vmem:[%s1512_s3 + $0xd8] sm:$0xff] %v1074_v25 }
 0x11e   :  { %v1078_v34 = vpop.eup %1077  ;;  %760 = vst [vmem:[%s1512_s3 + $0x1d8] sm:$0xff] %v1076_v26 }
 0x11f   :  { %v1080_v27 = vpop.eup %1079  ;;  %726 = vst [vmem:[%s1512_s3 + $0xc8] sm:$0xff] %v1078_v34 }
 0x120   :  { %v1082_v28 = vpop.eup %1081  ;;  %758 = vst [vmem:[%s1512_s3 + $0x1c8] sm:$0xff] %v1080_v27 }
 0x121   :  { %v1084_v29 = vpop.eup %1083  ;;  %731 = vst [vmem:[%s1512_s3 + $0xf0] sm:$0xff] %v1082_v28 }
 0x122   :  { %v1086_v30 = vpop.eup %1085  ;;  %763 = vst [vmem:[%s1512_s3 + $0x1f0] sm:$0xff] %v1084_v29 }
 0x123   :  { %v1088_v31 = vpop.eup %1087  ;;  %729 = vst [vmem:[%s1512_s3 + $0xe0] sm:$0xff] %v1086_v30 }
 0x124   :  { %v1090_v32 = vpop.eup %1089  ;;  %761 = vst [vmem:[%s1512_s3 + $0x1e0] sm:$0xff] %v1088_v31 }
 0x125   :  { %v1092_v33 = vpop.eup %1091  ;;  %732 = vst [vmem:[%s1512_s3 + $0xf8] sm:$0xff] %v1090_v32 }
 0x126   :  { %v1094_v35 = vpop.eup %1093  ;;  %764 = vst [vmem:[%s1512_s3 + $0x1f8] sm:$0xff] %v1092_v33 }
 0x127   :  { %v1096_v36 = vpop.eup %1095  ;;  %730 = vst [vmem:[%s1512_s3 + $0xe8] sm:$0xff] %v1094_v35 }
 0x128   :  { %762 = vst [vmem:[%s1512_s3 + $0x1e8] sm:$0xff] %v1096_v36 }

</bundles_post_ra>
